<compile_context>
chip_gen: v6e
topology: v6e:2x2x1
jax: 0.10.0
libtpu: 0.0.40
codegen_flags: <defaults>
</compile_context>

<pallas_src>
import functools

import jax
import jax.numpy as jnp
from jax.experimental import pallas as pl
from jax.experimental.pallas import tpu as pltpu


_C = 128       # channel width of the 3x3 convs (lane tile)
_PADL = 16     # left halo offset: bf16 packed sublane tile is 16 -> aligned stores
_PADR = 16     # right margin (keeps buffer width a multiple of 16)


# --------------------------- fused per-branch kernel ---------------------------
def _stage1_branch_kernel(x_ref, w3_ref, b3_ref, w4_ref, b4_ref, w5_ref, b5_ref,
                          o_ref, abuf_a, abuf_b, *, H, W, Wp):
    # x_ref : (1, H, W, 128) bf16        one image (already bf16)
    # w3_ref: (1, 9, 384, 128) bf16      row = conv*3 + ky, col = kx*128 + cin
    # b3_ref: (1, 3, 1, 128) f32
    # w4_ref: (1, 128, 512) bf16         b4_ref: (1, 1, 512) f32
    # w5_ref: (1, 512, 128) bf16 (lane-padded Cout)   b5_ref: (1, 1, 128) f32
    # o_ref : (1, H, Wp, 128) f32        lane-padded branch output
    # abuf_a/abuf_b: (H+2, Wp+32, 128) bf16 ping-pong zero-halo activation buffers
    C = _C
    PL = _PADL
    WB = Wp + _PADL + _PADR
    HWW = H * Wp

    # ---- per-step halo zeroing (cheap strips only; scratch persists across
    # grid steps and is per-core under megacore, so never gate on program_id) --
    row_zero = jnp.zeros((1, WB, C), jnp.bfloat16)
    col_zero = jnp.zeros((H, 1, C), jnp.bfloat16)
    for buf in (abuf_a, abuf_b):
        buf[0:1, :, :] = row_zero                           # top halo row
        buf[H + 1:H + 2, :, :] = row_zero                   # bottom halo row
        buf[1:H + 1, PL - 1:PL, :] = col_zero               # left halo column
        buf[1:H + 1, PL + Wp:PL + Wp + 1, :] = col_zero     # right halo column
    if Wp > W:
        # columns [W, Wp) of the conv1 input must be zero (x fills only [0, W))
        abuf_a[1:H + 1, PL + W:PL + Wp, :] = jnp.zeros((H, Wp - W, C), jnp.bfloat16)

    # ---- drop the (already bf16) input into the aligned interior ----
    abuf_a[1:H + 1, PL:PL + W, :] = x_ref[0]

    def conv3x3(src, conv_idx):
        # Width-only im2col built as a *value*: three kx-shifted slabs loaded
        # once each (kx=1 is a tile-aligned load) and lane-concatenated -> no
        # im scratch store.  Each ky tap is one K=384 MXU dot; bias + 3 dots +
        # ReLU are a single fused expression (no accumulator RMW passes).
        slabs = []
        for kx in range(3):
            s = src[:, PL - 1 + kx:PL - 1 + kx + Wp, :]      # (H+2, Wp, C) bf16
            slabs.append(s.reshape((H + 2) * Wp, C))
        im = jnp.concatenate(slabs, axis=-1)                 # ((H+2)*Wp, 3C)
        acc = b3_ref[0, conv_idx]                            # (1, C) f32
        for ky in range(3):
            patch = im[ky * Wp:(ky + H) * Wp, :]             # (HWW, 3C) bf16
            acc = acc + jnp.dot(patch, w3_ref[0, 3 * conv_idx + ky],
                                preferred_element_type=jnp.float32)
        return jnp.maximum(acc, 0.0).astype(jnp.bfloat16)    # (HWW, C)

    def store_act(dst, val):
        dst[1:H + 1, PL:PL + Wp, :] = val.reshape(H, Wp, C)  # aligned store
        if Wp > W:
            # keep padded columns zero so they cannot leak into real columns
            dst[1:H + 1, PL + W:PL + Wp, :] = jnp.zeros((H, Wp - W, C), jnp.bfloat16)

    store_act(abuf_b, conv3x3(abuf_a, 0))      # conv1: a -> b
    store_act(abuf_a, conv3x3(abuf_b, 1))      # conv2: b -> a
    x3 = conv3x3(abuf_a, 2)                    # conv3: a -> value (HWW, 128) bf16

    # ---- conv4 (1x1, 128->512, ReLU) fused with conv5 (1x1, 512->Cout) ----
    # 256-wide Cout chunks fill the 256-wide MXUs on v6e/v7x; conv5 accumulates
    # per chunk, so the (HWW, 512) activation never touches a scratch buffer.
    y = None
    for j in range(2):
        lo, hi = j * 256, (j + 1) * 256
        a = jnp.dot(x3, w4_ref[0, :, lo:hi], preferred_element_type=jnp.float32)
        a = jnp.maximum(a + b4_ref[0, :, lo:hi], 0.0).astype(jnp.bfloat16)
        d = jnp.dot(a, w5_ref[0, lo:hi, :], preferred_element_type=jnp.float32)
        y = d if y is None else y + d
    y = y + b5_ref[0]
    o_ref[...] = y.reshape(1, H, Wp, C).astype(o_ref.dtype)


# ------------------------------- parameter packing -------------------------------
def _pack_branch(p, cout_pad=_C):
    # 3x3 weights HWIO (3,3,128,128) per conv -> (9, 384, 128):
    # row = conv*3 + ky, contraction index = kx*128 + cin (matches im2col lanes).
    w3 = jnp.stack([p["c1"][0], p["c2"][0], p["c3"][0]])          # (3,3,3,128,128)
    w3 = w3.reshape(9, 3 * _C, _C)
    b3 = jnp.stack([p["c1"][1], p["c2"][1], p["c3"][1]]).reshape(3, 1, _C)
    w4 = p["c4"][0]                                               # (128, 512)
    b4 = p["c4"][1].reshape(1, 512)
    w5_raw, b5_raw = p["c5"]                                      # (512, Cout), (Cout,)
    cout = w5_raw.shape[1]
    w5 = jnp.zeros((512, cout_pad), w5_raw.dtype).at[:, :cout].set(w5_raw)
    b5 = jnp.zeros((1, cout_pad), b5_raw.dtype).at[0, :cout].set(b5_raw)
    return w3, b3, w4, b4, w5, b5


def _vmem_limit_bytes(H, W, Wp):
    C = _C
    WB = Wp + _PADL + _PADR
    HWW = H * Wp
    scratch = 2 * (H + 2) * WB * C * 2                            # 2 bf16 halo buffers
    blocks = 2 * (H * W * C * 2 + H * Wp * C * 4)                 # 2x-buffered x + out
    weights = 2 * ((9 * 3 * C * C + C * 512 + 512 * C) * 2
                   + (3 * C + 512 + C) * 4)                       # 2x-buffered weights
    # headroom for compiler-managed value spills (im value, f32 accs, conv4 chunks)
    values = ((H + 2) * Wp * 3 * C * 2
              + HWW * (C * 4 + 256 * 4 + 256 * 2 + 2 * C * 2))
    limit = scratch + blocks + weights + values + (8 << 20)
    return int(min(max(limit, 32 << 20), 56 << 20))               # <= v7x physical


# --------------------------------- public forward ---------------------------------
def stage1_forward(params, x_nchw):
    N, Cin, H, W = x_nchw.shape
    assert Cin == _C, "Stage_1 expects 128 input channels"
    Wp = ((W + 15) // 16) * 16          # compute width: multiple of bf16 sublane tile

    # NCHW -> NHWC, bf16 MXU inputs (halves x DMA; kernel already accumulates in f32)
    x = jnp.transpose(x_nchw, (0, 2, 3, 1)).astype(jnp.bfloat16)

    pk1 = _pack_branch(params["L1"])
    pk2 = _pack_branch(params["L2"])
    w3 = jnp.stack([pk1[0], pk2[0]]).astype(jnp.bfloat16)         # (2, 9, 384, 128)
    b3 = jnp.stack([pk1[1], pk2[1]])                              # (2, 3, 1, 128)
    w4 = jnp.stack([pk1[2], pk2[2]]).astype(jnp.bfloat16)         # (2, 128, 512)
    b4 = jnp.stack([pk1[3], pk2[3]])                              # (2, 1, 512)
    w5 = jnp.stack([pk1[4], pk2[4]]).astype(jnp.bfloat16)         # (2, 512, 128)
    b5 = jnp.stack([pk1[5], pk2[5]])                              # (2, 1, 128)

    kernel = functools.partial(_stage1_branch_kernel, H=H, W=W, Wp=Wp)
    out = pl.pallas_call(
        kernel,
        out_shape=jax.ShapeDtypeStruct((2 * N, H, Wp, _C), jnp.float32),
        grid_spec=pltpu.PrefetchScalarGridSpec(
            num_scalar_prefetch=0,
            grid=(2, N),                                          # (branch, image)
            in_specs=[
                pl.BlockSpec((1, H, W, _C), lambda br, n: (n, 0, 0, 0)),
                pl.BlockSpec((1, 9, 3 * _C, _C), lambda br, n: (br, 0, 0, 0)),
                pl.BlockSpec((1, 3, 1, _C), lambda br, n: (br, 0, 0, 0)),
                pl.BlockSpec((1, _C, 512), lambda br, n: (br, 0, 0)),
                pl.BlockSpec((1, 1, 512), lambda br, n: (br, 0, 0)),
                pl.BlockSpec((1, 512, _C), lambda br, n: (br, 0, 0)),
                pl.BlockSpec((1, 1, _C), lambda br, n: (br, 0, 0)),
            ],
            out_specs=pl.BlockSpec((1, H, Wp, _C),
                                   lambda br, n: (br * N + n, 0, 0, 0)),
            scratch_shapes=[
                pltpu.VMEM((H + 2, Wp + _PADL + _PADR, _C), jnp.bfloat16),  # ping
                pltpu.VMEM((H + 2, Wp + _PADL + _PADR, _C), jnp.bfloat16),  # pong
            ]),
        compiler_params=pltpu.CompilerParams(
            dimension_semantics=("parallel", "arbitrary"),        # branch split on v7x
            vmem_limit_bytes=_vmem_limit_bytes(H, W, Wp)),
    )(x, w3, b3, w4, b4, w5, b5)

    cout1 = params["L1"]["c5"][0].shape[1]
    cout2 = params["L2"]["c5"][0].shape[1]
    # Single deferred width/lane slice + NHWC->NCHW transpose per branch.
    h1 = jnp.transpose(out[:N, :, :W, :cout1], (0, 3, 1, 2))
    h2 = jnp.transpose(out[N:, :, :W, :cout2], (0, 3, 1, 2))
    return h1, h2


# ------------------------------ parameter init (PyTorch-like) ------------------------------
def make_conv_params(key, k, cin, cout):
    # PyTorch default Conv2d init: U(-1/sqrt(fan_in), 1/sqrt(fan_in))
    kw, kb = jax.random.split(key)
    bound = 1.0 / float(jnp.sqrt(cin * k * k))
    if k == 1:
        w = jax.random.uniform(kw, (cin, cout), jnp.float32, -bound, bound)
    else:
        w = jax.random.uniform(kw, (k, k, cin, cout), jnp.float32, -bound, bound)
    b = jax.random.uniform(kb, (cout,), jnp.float32, -bound, bound)
    return w, b


def init_stage1_params(key):
    keys = jax.random.split(key, 10)
    return {
        "L1": {
            "c1": make_conv_params(keys[0], 3, 128, 128),
            "c2": make_conv_params(keys[1], 3, 128, 128),
            "c3": make_conv_params(keys[2], 3, 128, 128),
            "c4": make_conv_params(keys[3], 1, 128, 512),
            "c5": make_conv_params(keys[4], 1, 512, 38),
        },
        "L2": {
            "c1": make_conv_params(keys[5], 3, 128, 128),
            "c2": make_conv_params(keys[6], 3, 128, 128),
            "c3": make_conv_params(keys[7], 3, 128, 128),
            "c4": make_conv_params(keys[8], 1, 128, 512),
            "c5": make_conv_params(keys[9], 1, 512, 19),
        },
    }


# ---------------------------- plain-JAX references ----------------------------
def _ref_conv(x, w, b, *, pad, relu, bf16_inputs):
    if w.ndim == 2:  # 1x1 conv stored as (Cin, Cout)
        w = w.reshape(1, 1, *w.shape)
    if bf16_inputs:
        x = x.astype(jnp.bfloat16)
        w = w.astype(jnp.bfloat16)
    y = jax.lax.conv_general_dilated(
        x, w, (1, 1), ((pad, pad), (pad, pad)),
        dimension_numbers=("NHWC", "HWIO", "NHWC"),
        preferred_element_type=jnp.float32)
    y = y + b
    return jnp.maximum(y, 0.0) if relu else y


def stage1_ref(params, x_nchw, bf16_inputs=False):
    x = jnp.transpose(x_nchw, (0, 2, 3, 1))

    def branch(p):
        h = _ref_conv(x, *p["c1"], pad=1, relu=True, bf16_inputs=bf16_inputs)
        h = _ref_conv(h, *p["c2"], pad=1, relu=True, bf16_inputs=bf16_inputs)
        h = _ref_conv(h, *p["c3"], pad=1, relu=True, bf16_inputs=bf16_inputs)
        h = _ref_conv(h, *p["c4"], pad=0, relu=True, bf16_inputs=bf16_inputs)
        h = _ref_conv(h, *p["c5"], pad=0, relu=False, bf16_inputs=bf16_inputs)
        return jnp.transpose(h, (0, 3, 1, 2))

    return branch(params["L1"]), branch(params["L2"])


if __name__ == "__main__":
    key = jax.random.PRNGKey(0)
    kp, kx = jax.random.split(key)
    params = init_stage1_params(kp)

    # Small shapes consistent with the module: batch=2, C=128 (fixed by the
    # first conv layers), spatial 16x16.
    x = jax.random.normal(kx, (2, 128, 16, 16), jnp.float32)

    h1, h2 = jax.jit(stage1_forward)(params, x)
    jax.block_until_ready((h1, h2))

    assert h1.shape == (2, 38, 16, 16) and h1.dtype == jnp.float32
    assert h2.shape == (2, 19, 16, 16) and h2.dtype == jnp.float32

    # Apples-to-apples reference: same bf16 MXU inputs, f32 accumulation.
    r1, r2 = jax.jit(functools.partial(stage1_ref, bf16_inputs=True))(params, x)
    jax.block_until_ready((r1, r2))
    assert jnp.allclose(h1, r1, rtol=2e-3, atol=2e-3), float(jnp.max(jnp.abs(h1 - r1)))
    assert jnp.allclose(h2, r2, rtol=2e-3, atol=2e-3), float(jnp.max(jnp.abs(h2 - r2)))

    # Sanity check against the full-f32 reference (loose tolerance accounts for
    # the bf16 rounding of MXU inputs).
    f1, f2 = jax.jit(stage1_ref)(params, x)
    jax.block_until_ready((f1, f2))
    assert jnp.allclose(h1, f1, rtol=5e-2, atol=5e-2), float(jnp.max(jnp.abs(h1 - f1)))
    assert jnp.allclose(h2, f2, rtol=5e-2, atol=5e-2), float(jnp.max(jnp.abs(h2 - f2)))

    print("KERNEL_OK")
</pallas_src>

<mosaic_0001>
module attributes {stable_mosaic.version = 11 : i64} {
  func.func @_stage1_branch_kernel(%arg0: i32, %arg1: i32, %arg2: memref<1x16x16x128xbf16, #tpu.memory_space<vmem>>, %arg3: memref<1x9x384x128xbf16, #tpu.memory_space<vmem>>, %arg4: memref<1x3x1x128xf32, #tpu.memory_space<vmem>>, %arg5: memref<1x128x512xbf16, #tpu.memory_space<vmem>>, %arg6: memref<1x1x512xf32, #tpu.memory_space<vmem>>, %arg7: memref<1x512x128xbf16, #tpu.memory_space<vmem>>, %arg8: memref<1x1x128xf32, #tpu.memory_space<vmem>>, %arg9: memref<1x16x16x128xf32, #tpu.memory_space<vmem>>, %arg10: memref<18x48x128xbf16, #tpu.memory_space<vmem>>, %arg11: memref<18x48x128xbf16, #tpu.memory_space<vmem>>) attributes {dimension_semantics = [#tpu.dimension_semantics<parallel>, #tpu.dimension_semantics<arbitrary>], iteration_bounds = array<i64: 2, 2>, scalar_prefetch = 0 : i64, scratch_operands = 2 : i64, tpu.core_type = #tpu.core_type<tc>, window_params = [{transform_indices = @transform_0, window_bounds = array<i64: 1, 16, 16, 128>}, {transform_indices = @transform_1, window_bounds = array<i64: 1, 9, 384, 128>}, {transform_indices = @transform_2, window_bounds = array<i64: 1, 3, 1, 128>}, {transform_indices = @transform_3, window_bounds = array<i64: 1, 128, 512>}, {transform_indices = @transform_4, window_bounds = array<i64: 1, 1, 512>}, {transform_indices = @transform_5, window_bounds = array<i64: 1, 512, 128>}, {transform_indices = @transform_6, window_bounds = array<i64: 1, 1, 128>}, {transform_indices = @transform_7, window_bounds = array<i64: 1, 16, 16, 128>}]} {
    %cst = arith.constant 0.000000e+00 : bf16
    %0 = vector.broadcast %cst : bf16 to vector<1x48x128xbf16>
    %cst_0 = arith.constant 0.000000e+00 : bf16
    %1 = vector.broadcast %cst_0 : bf16 to vector<16x1x128xbf16>
    %c0 = arith.constant 0 : index
    %c0_1 = arith.constant 0 : index
    %c0_2 = arith.constant 0 : index
    %2 = vector.load %arg10[%c0, %c0_1, %c0_2] : memref<18x48x128xbf16, #tpu.memory_space<vmem>>, vector<1x48x128xbf16>
    tpu.vector_store %arg10[%c0, %c0_1, %c0_2], %0 {strides = array<i32>} : memref<18x48x128xbf16, #tpu.memory_space<vmem>>, vector<1x48x128xbf16>,
    %c17 = arith.constant 17 : index
    %c0_3 = arith.constant 0 : index
    %c0_4 = arith.constant 0 : index
    %3 = vector.load %arg10[%c17, %c0_3, %c0_4] : memref<18x48x128xbf16, #tpu.memory_space<vmem>>, vector<1x48x128xbf16>
    tpu.vector_store %arg10[%c17, %c0_3, %c0_4], %0 {strides = array<i32>} : memref<18x48x128xbf16, #tpu.memory_space<vmem>>, vector<1x48x128xbf16>,
    %c1 = arith.constant 1 : index
    %c15 = arith.constant 15 : index
    %c0_5 = arith.constant 0 : index
    %4 = vector.load %arg10[%c1, %c15, %c0_5] : memref<18x48x128xbf16, #tpu.memory_space<vmem>>, vector<16x1x128xbf16>
    tpu.vector_store %arg10[%c1, %c15, %c0_5], %1 {strides = array<i32>} : memref<18x48x128xbf16, #tpu.memory_space<vmem>>, vector<16x1x128xbf16>,
    %c1_6 = arith.constant 1 : index
    %c32 = arith.constant 32 : index
    %c0_7 = arith.constant 0 : index
    %5 = vector.load %arg10[%c1_6, %c32, %c0_7] : memref<18x48x128xbf16, #tpu.memory_space<vmem>>, vector<16x1x128xbf16>
    tpu.vector_store %arg10[%c1_6, %c32, %c0_7], %1 {strides = array<i32>} : memref<18x48x128xbf16, #tpu.memory_space<vmem>>, vector<16x1x128xbf16>,
    %c0_8 = arith.constant 0 : index
    %c0_9 = arith.constant 0 : index
    %c0_10 = arith.constant 0 : index
    %6 = vector.load %arg11[%c0_8, %c0_9, %c0_10] : memref<18x48x128xbf16, #tpu.memory_space<vmem>>, vector<1x48x128xbf16>
    tpu.vector_store %arg11[%c0_8, %c0_9, %c0_10], %0 {strides = array<i32>} : memref<18x48x128xbf16, #tpu.memory_space<vmem>>, vector<1x48x128xbf16>,
    %c17_11 = arith.constant 17 : index
    %c0_12 = arith.constant 0 : index
    %c0_13 = arith.constant 0 : index
    %7 = vector.load %arg11[%c17_11, %c0_12, %c0_13] : memref<18x48x128xbf16, #tpu.memory_space<vmem>>, vector<1x48x128xbf16>
    tpu.vector_store %arg11[%c17_11, %c0_12, %c0_13], %0 {strides = array<i32>} : memref<18x48x128xbf16, #tpu.memory_space<vmem>>, vector<1x48x128xbf16>,
    %c1_14 = arith.constant 1 : index
    %c15_15 = arith.constant 15 : index
    %c0_16 = arith.constant 0 : index
    %8 = vector.load %arg11[%c1_14, %c15_15, %c0_16] : memref<18x48x128xbf16, #tpu.memory_space<vmem>>, vector<16x1x128xbf16>
    tpu.vector_store %arg11[%c1_14, %c15_15, %c0_16], %1 {strides = array<i32>} : memref<18x48x128xbf16, #tpu.memory_space<vmem>>, vector<16x1x128xbf16>,
    %c1_17 = arith.constant 1 : index
    %c32_18 = arith.constant 32 : index
    %c0_19 = arith.constant 0 : index
    %9 = vector.load %arg11[%c1_17, %c32_18, %c0_19] : memref<18x48x128xbf16, #tpu.memory_space<vmem>>, vector<16x1x128xbf16>
    tpu.vector_store %arg11[%c1_17, %c32_18, %c0_19], %1 {strides = array<i32>} : memref<18x48x128xbf16, #tpu.memory_space<vmem>>, vector<16x1x128xbf16>,
    %c0_20 = arith.constant 0 : index
    %c0_21 = arith.constant 0 : index
    %c0_22 = arith.constant 0 : index
    %c0_23 = arith.constant 0 : index
    %10 = vector.load %arg2[%c0_20, %c0_21, %c0_22, %c0_23] : memref<1x16x16x128xbf16, #tpu.memory_space<vmem>>, vector<1x16x16x128xbf16>
    %11 = vector.shape_cast %10 : vector<1x16x16x128xbf16> to vector<16x16x128xbf16>
    %c1_24 = arith.constant 1 : index
    %c16 = arith.constant 16 : index
    %c0_25 = arith.constant 0 : index
    %12 = vector.load %arg10[%c1_24, %c16, %c0_25] : memref<18x48x128xbf16, #tpu.memory_space<vmem>>, vector<16x16x128xbf16>
    tpu.vector_store %arg10[%c1_24, %c16, %c0_25], %11 {strides = array<i32>} : memref<18x48x128xbf16, #tpu.memory_space<vmem>>, vector<16x16x128xbf16>,
    %c0_26 = arith.constant 0 : index
    %c15_27 = arith.constant 15 : index
    %c0_28 = arith.constant 0 : index
    %13 = vector.load %arg10[%c0_26, %c15_27, %c0_28] : memref<18x48x128xbf16, #tpu.memory_space<vmem>>, vector<18x16x128xbf16>
    %14 = vector.shape_cast %13 : vector<18x16x128xbf16> to vector<288x128xbf16>
    %c0_29 = arith.constant 0 : index
    %c16_30 = arith.constant 16 : index
    %c0_31 = arith.constant 0 : index
    %15 = vector.load %arg10[%c0_29, %c16_30, %c0_31] : memref<18x48x128xbf16, #tpu.memory_space<vmem>>, vector<18x16x128xbf16>
    %16 = vector.shape_cast %15 : vector<18x16x128xbf16> to vector<288x128xbf16>
    %c0_32 = arith.constant 0 : index
    %c17_33 = arith.constant 17 : index
    %c0_34 = arith.constant 0 : index
    %17 = vector.load %arg10[%c0_32, %c17_33, %c0_34] : memref<18x48x128xbf16, #tpu.memory_space<vmem>>, vector<18x16x128xbf16>
    %18 = vector.shape_cast %17 : vector<18x16x128xbf16> to vector<288x128xbf16>
    %19 = tpu.concatenate %14, %16, %18 in 1 : vector<288x128xbf16>, vector<288x128xbf16>, vector<288x128xbf16> -> vector<288x384xbf16>
    %c0_35 = arith.constant 0 : index
    %c0_36 = arith.constant 0 : index
    %c0_37 = arith.constant 0 : index
    %c0_38 = arith.constant 0 : index
    %20 = vector.load %arg4[%c0_35, %c0_36, %c0_37, %c0_38] : memref<1x3x1x128xf32, #tpu.memory_space<vmem>>, vector<1x1x1x128xf32>
    %21 = vector.shape_cast %20 : vector<1x1x1x128xf32> to vector<1x128xf32>
    %22 = vector.extract_strided_slice %19 {offsets = [0, 0], sizes = [256, 384], strides = [1, 1]} : vector<288x384xbf16> to vector<256x384xbf16>
    %c0_39 = arith.constant 0 : index
    %c0_40 = arith.constant 0 : index
    %c0_41 = arith.constant 0 : index
    %c0_42 = arith.constant 0 : index
    %23 = vector.load %arg3[%c0_39, %c0_40, %c0_41, %c0_42] : memref<1x9x384x128xbf16, #tpu.memory_space<vmem>>, vector<1x1x384x128xbf16>
    %24 = vector.shape_cast %23 : vector<1x1x384x128xbf16> to vector<384x128xbf16>
    %cst_43 = arith.constant dense<0.000000e+00> : vector<256x128xf32>
    %25 = tpu.matmul %22, %24, %cst_43 {dimension_numbers = #tpu.dot_dimension_numbers<[1], [0], [0], [1], [0, 0, 1, 1], [], []>} : vector<256x384xbf16>, vector<384x128xbf16>, vector<256x128xf32> -> vector<256x128xf32>
    %26 = vector.broadcast %21 : vector<1x128xf32> to vector<256x128xf32>
    %27 = arith.addf %26, %25 : vector<256x128xf32>
    %28 = vector.extract_strided_slice %19 {offsets = [16, 0], sizes = [256, 384], strides = [1, 1]} : vector<288x384xbf16> to vector<256x384xbf16>
    %c0_44 = arith.constant 0 : index
    %c1_45 = arith.constant 1 : index
    %c0_46 = arith.constant 0 : index
    %c0_47 = arith.constant 0 : index
    %29 = vector.load %arg3[%c0_44, %c1_45, %c0_46, %c0_47] : memref<1x9x384x128xbf16, #tpu.memory_space<vmem>>, vector<1x1x384x128xbf16>
    %30 = vector.shape_cast %29 : vector<1x1x384x128xbf16> to vector<384x128xbf16>
    %cst_48 = arith.constant dense<0.000000e+00> : vector<256x128xf32>
    %31 = tpu.matmul %28, %30, %cst_48 {dimension_numbers = #tpu.dot_dimension_numbers<[1], [0], [0], [1], [0, 0, 1, 1], [], []>} : vector<256x384xbf16>, vector<384x128xbf16>, vector<256x128xf32> -> vector<256x128xf32>
    %32 = arith.addf %27, %31 : vector<256x128xf32>
    %33 = vector.extract_strided_slice %19 {offsets = [32, 0], sizes = [256, 384], strides = [1, 1]} : vector<288x384xbf16> to vector<256x384xbf16>
    %c0_49 = arith.constant 0 : index
    %c2 = arith.constant 2 : index
    %c0_50 = arith.constant 0 : index
    %c0_51 = arith.constant 0 : index
    %34 = vector.load %arg3[%c0_49, %c2, %c0_50, %c0_51] : memref<1x9x384x128xbf16, #tpu.memory_space<vmem>>, vector<1x1x384x128xbf16>
    %35 = vector.shape_cast %34 : vector<1x1x384x128xbf16> to vector<384x128xbf16>
    %cst_52 = arith.constant dense<0.000000e+00> : vector<256x128xf32>
    %36 = tpu.matmul %33, %35, %cst_52 {dimension_numbers = #tpu.dot_dimension_numbers<[1], [0], [0], [1], [0, 0, 1, 1], [], []>} : vector<256x384xbf16>, vector<384x128xbf16>, vector<256x128xf32> -> vector<256x128xf32>
    %37 = arith.addf %32, %36 : vector<256x128xf32>
    %cst_53 = arith.constant 0.000000e+00 : f32
    %38 = vector.broadcast %cst_53 : f32 to vector<256x128xf32>
    %39 = arith.maximumf %37, %38 : vector<256x128xf32>
    %40 = arith.truncf %39 : vector<256x128xf32> to vector<256x128xbf16>
    %41 = vector.shape_cast %40 : vector<256x128xbf16> to vector<16x16x128xbf16>
    %c1_54 = arith.constant 1 : index
    %c16_55 = arith.constant 16 : index
    %c0_56 = arith.constant 0 : index
    %42 = vector.load %arg11[%c1_54, %c16_55, %c0_56] : memref<18x48x128xbf16, #tpu.memory_space<vmem>>, vector<16x16x128xbf16>
    tpu.vector_store %arg11[%c1_54, %c16_55, %c0_56], %41 {strides = array<i32>} : memref<18x48x128xbf16, #tpu.memory_space<vmem>>, vector<16x16x128xbf16>,
    %c0_57 = arith.constant 0 : index
    %c15_58 = arith.constant 15 : index
    %c0_59 = arith.constant 0 : index
    %43 = vector.load %arg11[%c0_57, %c15_58, %c0_59] : memref<18x48x128xbf16, #tpu.memory_space<vmem>>, vector<18x16x128xbf16>
    %44 = vector.shape_cast %43 : vector<18x16x128xbf16> to vector<288x128xbf16>
    %c0_60 = arith.constant 0 : index
    %c16_61 = arith.constant 16 : index
    %c0_62 = arith.constant 0 : index
    %45 = vector.load %arg11[%c0_60, %c16_61, %c0_62] : memref<18x48x128xbf16, #tpu.memory_space<vmem>>, vector<18x16x128xbf16>
    %46 = vector.shape_cast %45 : vector<18x16x128xbf16> to vector<288x128xbf16>
    %c0_63 = arith.constant 0 : index
    %c17_64 = arith.constant 17 : index
    %c0_65 = arith.constant 0 : index
    %47 = vector.load %arg11[%c0_63, %c17_64, %c0_65] : memref<18x48x128xbf16, #tpu.memory_space<vmem>>, vector<18x16x128xbf16>
    %48 = vector.shape_cast %47 : vector<18x16x128xbf16> to vector<288x128xbf16>
    %49 = tpu.concatenate %44, %46, %48 in 1 : vector<288x128xbf16>, vector<288x128xbf16>, vector<288x128xbf16> -> vector<288x384xbf16>
    %c0_66 = arith.constant 0 : index
    %c1_67 = arith.constant 1 : index
    %c0_68 = arith.constant 0 : index
    %c0_69 = arith.constant 0 : index
    %50 = vector.load %arg4[%c0_66, %c1_67, %c0_68, %c0_69] : memref<1x3x1x128xf32, #tpu.memory_space<vmem>>, vector<1x1x1x128xf32>
    %51 = vector.shape_cast %50 : vector<1x1x1x128xf32> to vector<1x128xf32>
    %52 = vector.extract_strided_slice %49 {offsets = [0, 0], sizes = [256, 384], strides = [1, 1]} : vector<288x384xbf16> to vector<256x384xbf16>
    %c0_70 = arith.constant 0 : index
    %c3 = arith.constant 3 : index
    %c0_71 = arith.constant 0 : index
    %c0_72 = arith.constant 0 : index
    %53 = vector.load %arg3[%c0_70, %c3, %c0_71, %c0_72] : memref<1x9x384x128xbf16, #tpu.memory_space<vmem>>, vector<1x1x384x128xbf16>
    %54 = vector.shape_cast %53 : vector<1x1x384x128xbf16> to vector<384x128xbf16>
    %cst_73 = arith.constant dense<0.000000e+00> : vector<256x128xf32>
    %55 = tpu.matmul %52, %54, %cst_73 {dimension_numbers = #tpu.dot_dimension_numbers<[1], [0], [0], [1], [0, 0, 1, 1], [], []>} : vector<256x384xbf16>, vector<384x128xbf16>, vector<256x128xf32> -> vector<256x128xf32>
    %56 = vector.broadcast %51 : vector<1x128xf32> to vector<256x128xf32>
    %57 = arith.addf %56, %55 : vector<256x128xf32>
    %58 = vector.extract_strided_slice %49 {offsets = [16, 0], sizes = [256, 384], strides = [1, 1]} : vector<288x384xbf16> to vector<256x384xbf16>
    %c0_74 = arith.constant 0 : index
    %c4 = arith.constant 4 : index
    %c0_75 = arith.constant 0 : index
    %c0_76 = arith.constant 0 : index
    %59 = vector.load %arg3[%c0_74, %c4, %c0_75, %c0_76] : memref<1x9x384x128xbf16, #tpu.memory_space<vmem>>, vector<1x1x384x128xbf16>
    %60 = vector.shape_cast %59 : vector<1x1x384x128xbf16> to vector<384x128xbf16>
    %cst_77 = arith.constant dense<0.000000e+00> : vector<256x128xf32>
    %61 = tpu.matmul %58, %60, %cst_77 {dimension_numbers = #tpu.dot_dimension_numbers<[1], [0], [0], [1], [0, 0, 1, 1], [], []>} : vector<256x384xbf16>, vector<384x128xbf16>, vector<256x128xf32> -> vector<256x128xf32>
    %62 = arith.addf %57, %61 : vector<256x128xf32>
    %63 = vector.extract_strided_slice %49 {offsets = [32, 0], sizes = [256, 384], strides = [1, 1]} : vector<288x384xbf16> to vector<256x384xbf16>
    %c0_78 = arith.constant 0 : index
    %c5 = arith.constant 5 : index
    %c0_79 = arith.constant 0 : index
    %c0_80 = arith.constant 0 : index
    %64 = vector.load %arg3[%c0_78, %c5, %c0_79, %c0_80] : memref<1x9x384x128xbf16, #tpu.memory_space<vmem>>, vector<1x1x384x128xbf16>
    %65 = vector.shape_cast %64 : vector<1x1x384x128xbf16> to vector<384x128xbf16>
    %cst_81 = arith.constant dense<0.000000e+00> : vector<256x128xf32>
    %66 = tpu.matmul %63, %65, %cst_81 {dimension_numbers = #tpu.dot_dimension_numbers<[1], [0], [0], [1], [0, 0, 1, 1], [], []>} : vector<256x384xbf16>, vector<384x128xbf16>, vector<256x128xf32> -> vector<256x128xf32>
    %67 = arith.addf %62, %66 : vector<256x128xf32>
    %cst_82 = arith.constant 0.000000e+00 : f32
    %68 = vector.broadcast %cst_82 : f32 to vector<256x128xf32>
    %69 = arith.maximumf %67, %68 : vector<256x128xf32>
    %70 = arith.truncf %69 : vector<256x128xf32> to vector<256x128xbf16>
    %71 = vector.shape_cast %70 : vector<256x128xbf16> to vector<16x16x128xbf16>
    %c1_83 = arith.constant 1 : index
    %c16_84 = arith.constant 16 : index
    %c0_85 = arith.constant 0 : index
    %72 = vector.load %arg10[%c1_83, %c16_84, %c0_85] : memref<18x48x128xbf16, #tpu.memory_space<vmem>>, vector<16x16x128xbf16>
    tpu.vector_store %arg10[%c1_83, %c16_84, %c0_85], %71 {strides = array<i32>} : memref<18x48x128xbf16, #tpu.memory_space<vmem>>, vector<16x16x128xbf16>,
    %c0_86 = arith.constant 0 : index
    %c15_87 = arith.constant 15 : index
    %c0_88 = arith.constant 0 : index
    %73 = vector.load %arg10[%c0_86, %c15_87, %c0_88] : memref<18x48x128xbf16, #tpu.memory_space<vmem>>, vector<18x16x128xbf16>
    %74 = vector.shape_cast %73 : vector<18x16x128xbf16> to vector<288x128xbf16>
    %c0_89 = arith.constant 0 : index
    %c16_90 = arith.constant 16 : index
    %c0_91 = arith.constant 0 : index
    %75 = vector.load %arg10[%c0_89, %c16_90, %c0_91] : memref<18x48x128xbf16, #tpu.memory_space<vmem>>, vector<18x16x128xbf16>
    %76 = vector.shape_cast %75 : vector<18x16x128xbf16> to vector<288x128xbf16>
    %c0_92 = arith.constant 0 : index
    %c17_93 = arith.constant 17 : index
    %c0_94 = arith.constant 0 : index
    %77 = vector.load %arg10[%c0_92, %c17_93, %c0_94] : memref<18x48x128xbf16, #tpu.memory_space<vmem>>, vector<18x16x128xbf16>
    %78 = vector.shape_cast %77 : vector<18x16x128xbf16> to vector<288x128xbf16>
    %79 = tpu.concatenate %74, %76, %78 in 1 : vector<288x128xbf16>, vector<288x128xbf16>, vector<288x128xbf16> -> vector<288x384xbf16>
    %c0_95 = arith.constant 0 : index
    %c2_96 = arith.constant 2 : index
    %c0_97 = arith.constant 0 : index
    %c0_98 = arith.constant 0 : index
    %80 = vector.load %arg4[%c0_95, %c2_96, %c0_97, %c0_98] : memref<1x3x1x128xf32, #tpu.memory_space<vmem>>, vector<1x1x1x128xf32>
    %81 = vector.shape_cast %80 : vector<1x1x1x128xf32> to vector<1x128xf32>
    %82 = vector.extract_strided_slice %79 {offsets = [0, 0], sizes = [256, 384], strides = [1, 1]} : vector<288x384xbf16> to vector<256x384xbf16>
    %c0_99 = arith.constant 0 : index
    %c6 = arith.constant 6 : index
    %c0_100 = arith.constant 0 : index
    %c0_101 = arith.constant 0 : index
    %83 = vector.load %arg3[%c0_99, %c6, %c0_100, %c0_101] : memref<1x9x384x128xbf16, #tpu.memory_space<vmem>>, vector<1x1x384x128xbf16>
    %84 = vector.shape_cast %83 : vector<1x1x384x128xbf16> to vector<384x128xbf16>
    %cst_102 = arith.constant dense<0.000000e+00> : vector<256x128xf32>
    %85 = tpu.matmul %82, %84, %cst_102 {dimension_numbers = #tpu.dot_dimension_numbers<[1], [0], [0], [1], [0, 0, 1, 1], [], []>} : vector<256x384xbf16>, vector<384x128xbf16>, vector<256x128xf32> -> vector<256x128xf32>
    %86 = vector.broadcast %81 : vector<1x128xf32> to vector<256x128xf32>
    %87 = arith.addf %86, %85 : vector<256x128xf32>
    %88 = vector.extract_strided_slice %79 {offsets = [16, 0], sizes = [256, 384], strides = [1, 1]} : vector<288x384xbf16> to vector<256x384xbf16>
    %c0_103 = arith.constant 0 : index
    %c7 = arith.constant 7 : index
    %c0_104 = arith.constant 0 : index
    %c0_105 = arith.constant 0 : index
    %89 = vector.load %arg3[%c0_103, %c7, %c0_104, %c0_105] : memref<1x9x384x128xbf16, #tpu.memory_space<vmem>>, vector<1x1x384x128xbf16>
    %90 = vector.shape_cast %89 : vector<1x1x384x128xbf16> to vector<384x128xbf16>
    %cst_106 = arith.constant dense<0.000000e+00> : vector<256x128xf32>
    %91 = tpu.matmul %88, %90, %cst_106 {dimension_numbers = #tpu.dot_dimension_numbers<[1], [0], [0], [1], [0, 0, 1, 1], [], []>} : vector<256x384xbf16>, vector<384x128xbf16>, vector<256x128xf32> -> vector<256x128xf32>
    %92 = arith.addf %87, %91 : vector<256x128xf32>
    %93 = vector.extract_strided_slice %79 {offsets = [32, 0], sizes = [256, 384], strides = [1, 1]} : vector<288x384xbf16> to vector<256x384xbf16>
    %c0_107 = arith.constant 0 : index
    %c8 = arith.constant 8 : index
    %c0_108 = arith.constant 0 : index
    %c0_109 = arith.constant 0 : index
    %94 = vector.load %arg3[%c0_107, %c8, %c0_108, %c0_109] : memref<1x9x384x128xbf16, #tpu.memory_space<vmem>>, vector<1x1x384x128xbf16>
    %95 = vector.shape_cast %94 : vector<1x1x384x128xbf16> to vector<384x128xbf16>
    %cst_110 = arith.constant dense<0.000000e+00> : vector<256x128xf32>
    %96 = tpu.matmul %93, %95, %cst_110 {dimension_numbers = #tpu.dot_dimension_numbers<[1], [0], [0], [1], [0, 0, 1, 1], [], []>} : vector<256x384xbf16>, vector<384x128xbf16>, vector<256x128xf32> -> vector<256x128xf32>
    %97 = arith.addf %92, %96 : vector<256x128xf32>
    %cst_111 = arith.constant 0.000000e+00 : f32
    %98 = vector.broadcast %cst_111 : f32 to vector<256x128xf32>
    %99 = arith.maximumf %97, %98 : vector<256x128xf32>
    %100 = arith.truncf %99 : vector<256x128xf32> to vector<256x128xbf16>
    %c0_112 = arith.constant 0 : index
    %c0_113 = arith.constant 0 : index
    %c0_114 = arith.constant 0 : index
    %101 = vector.load %arg5[%c0_112, %c0_113, %c0_114] : memref<1x128x512xbf16, #tpu.memory_space<vmem>>, vector<1x128x256xbf16>
    %102 = vector.shape_cast %101 : vector<1x128x256xbf16> to vector<128x256xbf16>
    %cst_115 = arith.constant dense<0.000000e+00> : vector<256x256xf32>
    %103 = tpu.matmul %100, %102, %cst_115 {dimension_numbers = #tpu.dot_dimension_numbers<[1], [0], [0], [1], [0, 0, 1, 1], [], []>} : vector<256x128xbf16>, vector<128x256xbf16>, vector<256x256xf32> -> vector<256x256xf32>
    %c0_116 = arith.constant 0 : index
    %c0_117 = arith.constant 0 : index
    %c0_118 = arith.constant 0 : index
    %104 = vector.load %arg6[%c0_116, %c0_117, %c0_118] : memref<1x1x512xf32, #tpu.memory_space<vmem>>, vector<1x1x256xf32>
    %105 = vector.shape_cast %104 : vector<1x1x256xf32> to vector<1x256xf32>
    %106 = vector.broadcast %105 : vector<1x256xf32> to vector<256x256xf32>
    %107 = arith.addf %103, %106 : vector<256x256xf32>
    %cst_119 = arith.constant 0.000000e+00 : f32
    %108 = vector.broadcast %cst_119 : f32 to vector<256x256xf32>
    %109 = arith.maximumf %107, %108 : vector<256x256xf32>
    %110 = arith.truncf %109 : vector<256x256xf32> to vector<256x256xbf16>
    %c0_120 = arith.constant 0 : index
    %c0_121 = arith.constant 0 : index
    %c0_122 = arith.constant 0 : index
    %111 = vector.load %arg7[%c0_120, %c0_121, %c0_122] : memref<1x512x128xbf16, #tpu.memory_space<vmem>>, vector<1x256x128xbf16>
    %112 = vector.shape_cast %111 : vector<1x256x128xbf16> to vector<256x128xbf16>
    %cst_123 = arith.constant dense<0.000000e+00> : vector<256x128xf32>
    %113 = tpu.matmul %110, %112, %cst_123 {dimension_numbers = #tpu.dot_dimension_numbers<[1], [0], [0], [1], [0, 0, 1, 1], [], []>} : vector<256x256xbf16>, vector<256x128xbf16>, vector<256x128xf32> -> vector<256x128xf32>
    %c0_124 = arith.constant 0 : index
    %c0_125 = arith.constant 0 : index
    %c256 = arith.constant 256 : index
    %114 = vector.load %arg5[%c0_124, %c0_125, %c256] : memref<1x128x512xbf16, #tpu.memory_space<vmem>>, vector<1x128x256xbf16>
    %115 = vector.shape_cast %114 : vector<1x128x256xbf16> to vector<128x256xbf16>
    %cst_126 = arith.constant dense<0.000000e+00> : vector<256x256xf32>
    %116 = tpu.matmul %100, %115, %cst_126 {dimension_numbers = #tpu.dot_dimension_numbers<[1], [0], [0], [1], [0, 0, 1, 1], [], []>} : vector<256x128xbf16>, vector<128x256xbf16>, vector<256x256xf32> -> vector<256x256xf32>
    %c0_127 = arith.constant 0 : index
    %c0_128 = arith.constant 0 : index
    %c256_129 = arith.constant 256 : index
    %117 = vector.load %arg6[%c0_127, %c0_128, %c256_129] : memref<1x1x512xf32, #tpu.memory_space<vmem>>, vector<1x1x256xf32>
    %118 = vector.shape_cast %117 : vector<1x1x256xf32> to vector<1x256xf32>
    %119 = vector.broadcast %118 : vector<1x256xf32> to vector<256x256xf32>
    %120 = arith.addf %116, %119 : vector<256x256xf32>
    %cst_130 = arith.constant 0.000000e+00 : f32
    %121 = vector.broadcast %cst_130 : f32 to vector<256x256xf32>
    %122 = arith.maximumf %120, %121 : vector<256x256xf32>
    %123 = arith.truncf %122 : vector<256x256xf32> to vector<256x256xbf16>
    %c0_131 = arith.constant 0 : index
    %c256_132 = arith.constant 256 : index
    %c0_133 = arith.constant 0 : index
    %124 = vector.load %arg7[%c0_131, %c256_132, %c0_133] : memref<1x512x128xbf16, #tpu.memory_space<vmem>>, vector<1x256x128xbf16>
    %125 = vector.shape_cast %124 : vector<1x256x128xbf16> to vector<256x128xbf16>
    %cst_134 = arith.constant dense<0.000000e+00> : vector<256x128xf32>
    %126 = tpu.matmul %123, %125, %cst_134 {dimension_numbers = #tpu.dot_dimension_numbers<[1], [0], [0], [1], [0, 0, 1, 1], [], []>} : vector<256x256xbf16>, vector<256x128xbf16>, vector<256x128xf32> -> vector<256x128xf32>
    %127 = arith.addf %113, %126 : vector<256x128xf32>
    %c0_135 = arith.constant 0 : index
    %c0_136 = arith.constant 0 : index
    %c0_137 = arith.constant 0 : index
    %128 = vector.load %arg8[%c0_135, %c0_136, %c0_137] : memref<1x1x128xf32, #tpu.memory_space<vmem>>, vector<1x1x128xf32>
    %129 = vector.shape_cast %128 : vector<1x1x128xf32> to vector<1x128xf32>
    %130 = vector.broadcast %129 : vector<1x128xf32> to vector<256x128xf32>
    %131 = arith.addf %127, %130 : vector<256x128xf32>
    %132 = vector.shape_cast %131 : vector<256x128xf32> to vector<1x16x16x128xf32>
    %c0_138 = arith.constant 0 : index
    %c0_139 = arith.constant 0 : index
    %c0_140 = arith.constant 0 : index
    %c0_141 = arith.constant 0 : index
    %133 = vector.load %arg9[%c0_138, %c0_139, %c0_140, %c0_141] : memref<1x16x16x128xf32, #tpu.memory_space<vmem>>, vector<1x16x16x128xf32>
    tpu.vector_store %arg9[%c0_138, %c0_139, %c0_140, %c0_141], %132 {strides = array<i32>} : memref<1x16x16x128xf32, #tpu.memory_space<vmem>>, vector<1x16x16x128xf32>,
    return
  }
  func.func @transform_0(%arg0: i32, %arg1: i32) -> (i32, i32, i32, i32) {
    %c0_i32 = arith.constant 0 : i32
    %c0_i32_0 = arith.constant 0 : i32
    %c0_i32_1 = arith.constant 0 : i32
    %c0_i32_2 = arith.constant 0 : i32
    return %arg1, %c0_i32, %c0_i32_0, %c0_i32_1 : i32, i32, i32, i32
  }
  func.func @transform_1(%arg0: i32, %arg1: i32) -> (i32, i32, i32, i32) {
    %c0_i32 = arith.constant 0 : i32
    %c0_i32_0 = arith.constant 0 : i32
    %c0_i32_1 = arith.constant 0 : i32
    %c0_i32_2 = arith.constant 0 : i32
    return %arg0, %c0_i32, %c0_i32_0, %c0_i32_1 : i32, i32, i32, i32
  }
  func.func @transform_2(%arg0: i32, %arg1: i32) -> (i32, i32, i32, i32) {
    %c0_i32 = arith.constant 0 : i32
    %c0_i32_0 = arith.constant 0 : i32
    %c0_i32_1 = arith.constant 0 : i32
    %c0_i32_2 = arith.constant 0 : i32
    return %arg0, %c0_i32, %c0_i32_0, %c0_i32_1 : i32, i32, i32, i32
  }
  func.func @transform_3(%arg0: i32, %arg1: i32) -> (i32, i32, i32) {
    %c0_i32 = arith.constant 0 : i32
    %c0_i32_0 = arith.constant 0 : i32
    %c0_i32_1 = arith.constant 0 : i32
    return %arg0, %c0_i32, %c0_i32_0 : i32, i32, i32
  }
  func.func @transform_4(%arg0: i32, %arg1: i32) -> (i32, i32, i32) {
    %c0_i32 = arith.constant 0 : i32
    %c0_i32_0 = arith.constant 0 : i32
    %c0_i32_1 = arith.constant 0 : i32
    return %arg0, %c0_i32, %c0_i32_0 : i32, i32, i32
  }
  func.func @transform_5(%arg0: i32, %arg1: i32) -> (i32, i32, i32) {
    %c0_i32 = arith.constant 0 : i32
    %c0_i32_0 = arith.constant 0 : i32
    %c0_i32_1 = arith.constant 0 : i32
    return %arg0, %c0_i32, %c0_i32_0 : i32, i32, i32
  }
  func.func @transform_6(%arg0: i32, %arg1: i32) -> (i32, i32, i32) {
    %c0_i32 = arith.constant 0 : i32
    %c0_i32_0 = arith.constant 0 : i32
    %c0_i32_1 = arith.constant 0 : i32
    return %arg0, %c0_i32, %c0_i32_0 : i32, i32, i32
  }
  func.func @transform_7(%arg0: i32, %arg1: i32) -> (i32, i32, i32, i32) {
    %c2_i32 = arith.constant 2 : i32
    %0 = arith.muli %arg0, %c2_i32 : i32
    %1 = arith.addi %0, %arg1 : i32
    %c0_i32 = arith.constant 0 : i32
    %c0_i32_0 = arith.constant 0 : i32
    %c0_i32_1 = arith.constant 0 : i32
    %c0_i32_2 = arith.constant 0 : i32
    return %1, %c0_i32, %c0_i32_0, %c0_i32_1 : i32, i32, i32, i32
  }
}

</mosaic_0001>

<bundles_post_ra>
// kernel: stage1_forward.1
= control target key start
LH: loop header
LB: loop body
LE: loop exit
PB: predicated region body
PF: predicated region fallthrough
CT: control target
= control target key end

     0   :  { %s14183_s24 = smov 0   ;;  %s14185_s25 = smov 0   ;;  %s18677_s0 = inlined_call_operand.vmem [shape: bf16[2,16,16,128], index: 0, kind: input, shape index: {}]   ;;  %s18678_s1 = inlined_call_operand.vmem [shape: bf16[2,9,384,128], index: 1, kind: input, shape index: {}]   ;;  %s18679_s2 = inlined_call_operand.vmem [shape: f32[2,3,1,128], index: 2, kind: input, shape index: {}]   ;;  %s18680_s3 = inlined_call_operand.vmem [shape: bf16[2,128,512], index: 3, kind: input, shape index: {}]   ;;  %s18681_s4 = inlined_call_operand.vmem [shape: f32[2,1,512], index: 4, kind: input, shape index: {}]   ;;  %s18682_s5 = inlined_call_operand.vmem [shape: bf16[2,512,128], index: 5, kind: input, shape index: {}]   ;;  %s18683_s6 = inlined_call_operand.vmem [shape: f32[2,1,128], index: 6, kind: input, shape index: {}]   ;;  %s18684_s7 = inlined_call_operand.vmem [shape: f32[4,16,16,128], index: 7, kind: output, shape index: {}]  }
   0x1   :  { %s14187_s26 = smov 0   ;;  %s14189_s27 = smov 0  }
   0x2   :  { %s14191_s28 = smov 0  }
   0x3 LB: > { %s26_s29 = sadd.s32 1, %s14132_s26  ;;  %s29_s30 = sadd.s32 1, %s14136_s27  ;;  %s14140_s28 = sphi %s14191_s28, %s17_s28   ;;  %s14136_s27 = sphi %s14189_s27, %s19220_s27   ;;  %s14132_s26 = sphi %s14187_s26, %s19219_s26   ;;  %s14128_s25 = sphi %s14185_s25, %s19218_s25   ;;  %s14124_s24 = sphi %s14183_s24, %s19217_s24  }
   0x4   : > { %p27_p0 = scmp.ge.s32.totalorder %s26_s29, 2  ;;  %p10589_p1 = scmp.ge.s32.totalorder %s14140_s28, 1 }
   0x5   : > { %p309_p2 = scmp.lt.s32.totalorder %s14140_s28, 5 }
   0x6   : > { %s19222_s29 = smov (%p27_p0, %s26_s29), 0  ;;  %s19224_s30 = smov (!%p27_p0, %s29_s30), %s14136_s27 }
   0x7   : > { %p310_p3 = pnand %p10589_p1, %p309_p2  ;;  %p31_p4 = scmp.ge.s32.totalorder %s19224_s30, 2 }
   0x9   : > { %s19226_s30 = smov (%p31_p4, %s19224_s30), 0  ;;  %313 = sbr.rel (%p310_p3) target bundleno = 1984 (0x7c0), region = 48 }
   0xe   : > { %p374_p5 = scmp.lt.s32.totalorder %s14128_s25, 1  ;;  %vm424_vm0 = vcmask 1043459   ;;  %v18685_v0 = vmov 0   ;;  %vm425_vm1 = vsmask.f32 7950  ;;  %p369_p6 = scmp.lt.s32.totalorder %s14124_s24, 1 }
   0xf   : > { %412 = vst [vmem:[#allocation2 + $0x8] sm:$0xf] %v18685_v0  ;;  %413 = vst [vmem:[#allocation2 + $0xc] sm:$0xf] %v18685_v0  ;;  %v460_v1 = vld [vmem:[#allocation2 + $0x124] sm:$0x8] }
  0x10   : > { %411 = vst [vmem:[#allocation2 + $0x4] sm:$0xf] %v18685_v0  ;;  %414 = vst [vmem:[#allocation2 + $0x10] sm:$0xf] %v18685_v0  ;;  %s14237_s8 = scalar_select %p374_p5, %s14128_s25, 1  ;;  %v18841_v46 = vmov 0 }
  0x11   : > { %418 = vst [vmem:[#allocation2 + $0x19c] sm:$0xf] %v18685_v0  ;;  %419 = vst [vmem:[#allocation2 + $0x1a0] sm:$0xf] %v18685_v0  ;;  %v427_v2 = vld [vmem:[#allocation2 + $0x1c] sm:$0x8] }
  0x12   : > { %420 = vst [vmem:[#allocation2 + $0x1a4] sm:$0xf] %v18685_v0  ;;  %421 = vst [vmem:[#allocation2 + $0x1a8] sm:$0xf] %v18685_v0  ;;  %v463_v3 = vld [vmem:[#allocation2 + $0x13c] sm:$0x8] }
  0x13   : > { %527 = vst [vmem:[#allocation3 + $0x4] sm:$0xf] %v18685_v0  ;;  %528 = vst [vmem:[#allocation3 + $0x8] sm:$0xf] %v18685_v0  ;;  %v430_v5 = vld [vmem:[#allocation2 + $0x34] sm:$0x8] }
  0x14   : > { %529 = vst [vmem:[#allocation3 + $0xc] sm:$0xf] %v18685_v0  ;;  %530 = vst [vmem:[#allocation3 + $0x10] sm:$0xf] %v18685_v0  ;;  %v466_v6 = vld [vmem:[#allocation2 + $0x154] sm:$0x8] }
  0x15   : > { %534 = vst [vmem:[#allocation3 + $0x19c] sm:$0xf] %v18685_v0  ;;  %535 = vst [vmem:[#allocation3 + $0x1a0] sm:$0xf] %v18685_v0  ;;  %s13709_s9 = smul.u32 1728, %s14237_s8  ;;  %vm475_vm9 = vcmask 1040384  }
  0x16   : > { %536 = vst [vmem:[#allocation3 + $0x1a4] sm:$0xf] %v18685_v0  ;;  %537 = vst [vmem:[#allocation3 + $0x1a8] sm:$0xf] %v18685_v0  ;;  %v433_v12 = vld [vmem:[#allocation2 + $0x4c] sm:$0x8] }
  0x17   : > { %vm14240_vm2 = vmand %vm424_vm0, %vm425_vm1  ;;  %v469_v13 = vld [vmem:[#allocation2 + $0x16c] sm:$0x8]  ;;  %s14258_s12 = scalar_lea.vmem %s18678_s1, %s13709_s9  ;;  %vm476_vm3 = vsmask.f32 256  ;;  %vm754_vm4 = vsmask.f32 4368 }
  0x18   : > { %v461_v7 = vsel %vm14240_vm2, 0, %v460_v1  ;;  %v428_v8 = vsel %vm14240_vm2, 0, %v427_v2  ;;  %v464_v9 = vsel %vm14240_vm2, 0, %v463_v3  ;;  %v431_v10 = vsel %vm14240_vm2, 0, %v430_v5  ;;  %v13752_v16 = vld [vmem:[%s14258_s12 + $0x78] sm:$0xff]   ;;  %v13754_v18 = vld [vmem:[%s14258_s12 + $0x70] sm:$0xff]   ;;  %vm14289_vm7 = vmor %vm476_vm3, %vm754_vm4 }
  0x19   : > { %462 = vst [vmem:[#allocation2 + $0x124] sm:$0x8] %v461_v7  ;;  %429 = vst [vmem:[#allocation2 + $0x1c] sm:$0x8] %v428_v8  ;;  %v467_v11 = vsel %vm14240_vm2, 0, %v466_v6  ;;  %v434_v14 = vsel %vm14240_vm2, 0, %v433_v12  ;;  %11813 = vmatprep.subr.bf16.mxu0 %v13752_v16  ;;  %13693 = vmatprep.subr.bf16.mxu1 %v13752_v16 }
  0x1a   : > { %465 = vst [vmem:[#allocation2 + $0x13c] sm:$0x8] %v464_v9  ;;  %432 = vst [vmem:[#allocation2 + $0x34] sm:$0x8] %v431_v10  ;;  %v470_v15 = vsel %vm14240_vm2, 0, %v469_v13  ;;  %v13753_v17 = vld [vmem:[%s14258_s12 + $0x38] sm:$0xff]  }
  0x1b   : > { %468 = vst [vmem:[#allocation2 + $0x154] sm:$0x8] %v467_v11  ;;  %435 = vst [vmem:[#allocation2 + $0x4c] sm:$0x8] %v434_v14  ;;  %11814 = vmatpush3.bf16.msra.mxu0 %v13753_v17  ;;  %13701 = vmatpush3.bf16.msra.mxu1 %v13753_v17  ;;  %v13755_v19 = vld [vmem:[%s14258_s12 + $0x30] sm:$0xff]   ;;  %v13756_v20 = vld [vmem:[%s14258_s12 + $0x68] sm:$0xff]  }
  0x1c   : > { %471 = vst [vmem:[#allocation2 + $0x16c] sm:$0x8] %v470_v15  ;;  %11815 = vmatprep.subr.bf16.mxu0 %v13754_v18  ;;  %13694 = vmatprep.subr.bf16.mxu1 %v13754_v18  ;;  %s370_s13 = scalar_select %p369_p6, %s14124_s24, 1  ;;  %v13757_v21 = vld [vmem:[%s14258_s12 + $0x28] sm:$0xff]   ;;  %v13758_v22 = vld [vmem:[%s14258_s12 + $0x60] sm:$0xff]   ;;  %v13760_v24 = vld [vmem:[%s14258_s12 + $0x58] sm:$0xff]  }
  0x1d   : > { %v13759_v23 = vld [vmem:[%s14258_s12 + $0x20] sm:$0xff]   ;;  %v13761_v25 = vld [vmem:[%s14258_s12 + $0x18] sm:$0xff]   ;;  %v13762_v26 = vld [vmem:[%s14258_s12 + $0x50] sm:$0xff]   ;;  %vm1170_vm5 = vsmask.f32 3328  ;;  %v18842_v46 = vsel %vm14289_vm7, 4294967295, %v18841_v46 }
  0x1e   : > { %s11553_s14 = sshll.u32 %s370_s13, 7  ;;  %vm1171_vm6 = vsmask.f32 7440  ;;  %v701_v27 = vld [vmem:[#allocation2 + $0x8] sm:$0xf]  ;;  %v13763_v30 = vld [vmem:[%s14258_s12 + $0x10] sm:$0xff]   ;;  %vm14526_vm10 = vmand %vm475_vm9, %vm476_vm3 }
  0x1f   : > { %11816 = vmatpush3.bf16.msra.mxu0 %v13755_v19  ;;  %13702 = vmatpush3.bf16.msra.mxu1 %v13755_v19  ;;  %s14278_s17 = scalar_lea.vmem %s18677_s0, %s11553_s14  ;;  %v702_v28 = vld [vmem:[#allocation2 + $0xc] sm:$0xf]  ;;  %v762_v31 = vshrl.u32 %v701_v27, 16  ;;  %v765_v32 = vshll.u32 %v701_v27, 16  ;;  %v700_v35 = vld [vmem:[#allocation2 + $0x4] sm:$0x8]  ;;  %vm14324_vm8 = vmor %vm1170_vm5, %vm1171_vm6 }
  0x20   : > { %11817 = vmatprep.subr.bf16.mxu0 %v13756_v20  ;;  %13695 = vmatprep.subr.bf16.mxu1 %v13756_v20  ;;  %v658_v29 = vld [vmem:[%s14278_s17 + $0x58] sm:$0xff]   ;;  %v771_v33 = vshrl.u32 %v702_v28, 16  ;;  %v774_v34 = vshll.u32 %v702_v28, 16  ;;  %v13764_v36 = vld [vmem:[%s14258_s12 + $0x48] sm:$0xff]   ;;  %v10637_v37 = vcombine.low %v701_v27, %v702_v28  ;;  %v757_v38 = vshrl.u32 %v700_v35, 16  ;;  %18843 = vst [vmem:[#allocation4_spill] sm:$0xff] %v18842_v46 }
  0x21   : > { %690 = vst [vmem:[#allocation2 + $0x128] sm:$0xff] %v658_v29   ;;  %v736_v39 = vld [vmem:[#allocation2 + $0x124] sm:$0x8]  ;;  %v764_v40 = vrot.slane %v762_v31, 7  ;;  %v1173_v42 = vrot.slane %v762_v31, 4  ;;  %v1174_v43 = vrot.slane %v765_v32, 5 }
  0x22   : > { %v773_v41 = vrot.slane %v771_v33, 7  ;;  %v14285_v44 = vrot.slane %v774_v34, 5  ;;  %v1179_v45 = vrot.slane %v771_v33, 4  ;;  %v10601_v47 = vrot.slane %v757_v38, 11  ;;  %v13765_v49 = vld [vmem:[%s14258_s12 + $0x8] sm:$0xff]   ;;  %1902 = vmatprep.mubr.bf16.mxu0 %v10637_v37  ;;  %v636_v53 = vld [vmem:[%s14278_s17] sm:$0xff]  }
  0x23   : > { %11818 = vmatpush3.bf16.msra.mxu0 %v13757_v21  ;;  %13703 = vmatpush3.bf16.msra.mxu1 %v13757_v21  ;;  %v1021_v48 = vshrl.u32 %v736_v39, 16  ;;  %v767_v50 = vor.u32 %v765_v32, %v764_v40  ;;  %v769_v51 = vrot.slane %v764_v40, 4  ;;  %v1175_v54 = vor.u32 %v1174_v43, %v1173_v42  ;;  %668 = vst [vmem:[#allocation2 + $0x20] sm:$0xff] %v636_v53   ;;  %v660_v56 = vld [vmem:[%s14278_s17 + $0x60] sm:$0xff]   ;;  %v703_v57 = vld [vmem:[#allocation2 + $0x1c] sm:$0x8] }
  0x24   : > { %11819 = vmatprep.subr.bf16.mxu0 %v13758_v22  ;;  %13696 = vmatprep.subr.bf16.mxu1 %v13758_v22  ;;  %v776_v52 = vor.u32 %v774_v34, %v773_v41  ;;  %v1180_v55 = vor.u32 %v1179_v45, %v14285_v44  ;;  %v739_v58 = vld [vmem:[#allocation2 + $0x13c] sm:$0x8]  ;;  %v13766_v59 = vld [vmem:[%s14258_s12 + $0x40] sm:$0xff]   ;;  %692 = vst [vmem:[#allocation2 + $0x140] sm:$0xff] %v660_v56   ;;  %v779_v60 = vshrl.u32 %v703_v57, 16  ;;  %v18845_v15 = vmov 0 }
  0x25   : > { %v768_v63 = vsel %vm14289_vm7, %v10601_v47, %v767_v50  ;;  %v10613_v2 = vrot.slane %v1021_v48, 11  ;;  %v1043_v3 = vshrl.u32 %v739_v58, 16  ;;  %v13767_v5 = vld [vmem:[%s14258_s12] sm:$0xff]   ;;  %v14314_v10 = vrot.slane %v1175_v54, 4  ;;  %v13770_v13 = vld [vmem:[%s14258_s12 + $0xb8] sm:$0xff]   ;;  %v638_v18 = vld [vmem:[%s14278_s17 + $0x8] sm:$0xff]  }
  0x26   : > { %v777_v1 = vsel %vm14289_vm7, %v769_v51, %v776_v52  ;;  %v14316_v11 = vrot.slane %v1180_v55, 4  ;;  %v14320_v14 = vrot.slane %v779_v60, 11  ;;  %v18846_v15 = vsel %vm14324_vm8, 4294967295, %v18845_v15  ;;  %v662_v19 = vld [vmem:[%s14278_s17 + $0x68] sm:$0xff]   ;;  %v14334_v20 = vld [vmem:[#allocation2 + $0x34] sm:$0x8] }
  0x27   : > { %11820 = vmatpush3.bf16.msra.mxu0 %v13759_v23  ;;  %13704 = vmatpush3.bf16.msra.mxu1 %v13759_v23  ;;  %18847 = vst [vmem:[#allocation6_spill] sm:$0xff] %v18846_v15  ;;  %v10619_v21 = vcombine.low %v768_v63, %v777_v1  ;;  %v14336_v22 = vrot.slane %v1043_v3, 11  ;;  %670 = vst [vmem:[#allocation2 + $0x38] sm:$0xff] %v638_v18   ;;  %v801_v23 = vshrl.u32 %v14334_v20, 16  ;;  %v13771_v42 = vld [vmem:[%s14258_s12 + $0xb0] sm:$0xff]   ;;  %v13774_v1 = vld [vmem:[%s14258_s12 + $0xa8] sm:$0xff]  }
  0x28   : > { %11821 = vmatprep.subr.bf16.mxu0 %v13760_v24  ;;  %13697 = vmatprep.subr.bf16.mxu1 %v13760_v24  ;;  %v14298_v61 = vld [vmem:[#allocation2 + $0x128] sm:$0xf]  ;;  %v14300_v62 = vld [vmem:[#allocation2 + $0x12c] sm:$0xf]  ;;  %694 = vst [vmem:[#allocation2 + $0x158] sm:$0xff] %v662_v19   ;;  %v640_v48 = vld [vmem:[%s14278_s17 + $0x10] sm:$0xff]  }
  0x29   : > { %v18700_v6 = vshrl.u32 %v14298_v61, 16  ;;  %v18696_v7 = vshrl.u32 %v14300_v62, 16  ;;  %v14311_v8 = vcombine.low %v14298_v61, %v14300_v62  ;;  %v18698_v9 = vshll.u32 %v14298_v61, 16  ;;  %v14339_v24 = vld [vmem:[#allocation2 + $0x154] sm:$0x8]  ;;  %672 = vst [vmem:[#allocation2 + $0x50] sm:$0xff] %v640_v48  }
  0x2a   : > { %v18697_v12 = vshll.u32 %v14300_v62, 16  ;;  %v704_v28 = vld [vmem:[#allocation2 + $0x20] sm:$0xf]  ;;  %v705_v29 = vld [vmem:[#allocation2 + $0x24] sm:$0xf]  ;;  %v664_v53 = vld [vmem:[%s14278_s17 + $0x70] sm:$0xff]  }
  0x2b   : > { %11822 = vmatpush3.bf16.msra.mxu0 %v13761_v25  ;;  %13705 = vmatpush3.bf16.msra.mxu1 %v13761_v25  ;;  %18844 = vst [vmem:[#allocation5_spill] sm:$0xff] %v14311_v8  ;;  %v1028_v16 = vrot.slane %v18700_v6, 7  ;;  %v1037_v17 = vrot.slane %v18696_v7, 7  ;;  %v784_v31 = vshrl.u32 %v704_v28, 16  ;;  %v793_v32 = vshrl.u32 %v705_v29, 16  ;;  %696 = vst [vmem:[#allocation2 + $0x170] sm:$0xff] %v664_v53  }
  0x2c   : > { %11823 = vmatprep.subr.bf16.mxu0 %v13762_v26  ;;  %13698 = vmatprep.subr.bf16.mxu1 %v13762_v26  ;;  %v14347_v33 = vcombine.low %v704_v28, %v705_v29  ;;  %v14349_v34 = vld [vmem:[#allocation2 + $0x140] sm:$0xf]  ;;  %v14351_v35 = vld [vmem:[#allocation2 + $0x144] sm:$0xf]  ;;  %v787_v50 = vshll.u32 %v704_v28, 16  ;;  %v796_v52 = vshll.u32 %v705_v29, 16 }
  0x2d   : > { %1998 = vmatprep.mubr.bf16.mxu1 %v14311_v8  ;;  %v1031_v25 = vor.u32 %v18698_v9, %v1028_v16  ;;  %v1033_v26 = vrot.slane %v1028_v16, 4  ;;  %v1040_v27 = vor.u32 %v18697_v12, %v1037_v17  ;;  %v18695_v39 = vshrl.u32 %v14349_v34, 16  ;;  %v13782_v12 = vld [vmem:[%s14258_s12 + $0x88] sm:$0xff]   ;;  %v436_v9 = vld [vmem:[#allocation2 + $0x64] sm:$0x8]  ;;  %s13710_s18 = smul.u32 3, %s14237_s8 }
  0x2e   : > { %v18691_v40 = vshrl.u32 %v14351_v35, 16  ;;  %v1187_v43 = vrot.slane %v784_v31, 4  ;;  %v1193_v45 = vrot.slane %v793_v32, 4  ;;  %v14368_v47 = vcombine.low %v14349_v34, %v14351_v35  ;;  %v14390_v17 = vld [vmem:[#allocation2 + $0x3c] sm:$0xf]  ;;  %s11554_s22 = sshll.u32 %s14237_s8, 8 }
  0x2f   : > { %11824 = vmatpush3.bf16.msra.mxu0 %v13763_v30  ;;  %13706 = vmatpush3.bf16.msra.mxu1 %v13763_v30  ;;  %v1065_v30 = vshrl.u32 %v14339_v24, 16  ;;  %v1032_v37 = vsel %vm14289_vm7, %v10613_v2, %v1031_v25  ;;  %v1041_v38 = vsel %vm14289_vm7, %v1033_v26, %v1040_v27  ;;  %v795_v51 = vrot.slane %v793_v32, 7  ;;  %v14381_v2 = vld [vmem:[#allocation2 + $0x38] sm:$0xf]  ;;  %v14400_v27 = vld [vmem:[#allocation2 + $0x15c] sm:$0xf]  ;;  %s15375_s21 = scalar_lea.vmem %s18679_s2, %s13710_s18  ;;  %s17794_s10 = scalar_lea.vmem %s18680_s3, %s11554_s22 }
  0x30   : > { %11825 = vmatprep.subr.bf16.mxu0 %v13764_v36  ;;  %13699 = vmatprep.subr.bf16.mxu1 %v13764_v36  ;;  %v1178_v36 = vsel %vm14324_vm8, %v14314_v10, %v14285_v44  ;;  %v14363_v41 = vcombine.low %v1032_v37, %v1041_v38  ;;  %18849 = vst [vmem:[#allocation8_spill] sm:$0xff] %v14368_v47  ;;  %v1050_v54 = vrot.slane %v18695_v39, 7  ;;  %v18693_v55 = vshll.u32 %v14349_v34, 16  ;;  %v14392_v18 = vld [vmem:[#allocation2 + $0x158] sm:$0xf]  ;;  %s17810_s13 = scalar_lea.vmem %s18682_s5, %s11554_s22  ;;  %s10595_s14 = sshll.u32 %s14237_s8, 2 }
  0x31   : > { %v1059_v56 = vrot.slane %v18691_v40, 7  ;;  %v18692_v57 = vshll.u32 %v14351_v35, 16  ;;  %v798_v60 = vor.u32 %v796_v52, %v795_v51  ;;  %v1188_v63 = vrot.slane %v787_v50, 5  ;;  %v14429_v51 = vld [vmem:[#allocation2 + $0x50] sm:$0xf]  ;;  %s10598_s18 = sshll.u32 %s14128_s25, 1  ;;  %s399_s22 = scalar_lea.vmem %s18683_s6, %s14237_s8 }
  0x32   : > { %18848 = vst [vmem:[#allocation7_spill] sm:$0xff] %v14363_v41  ;;  %v14384_v3 = vrot.slane %v796_v52, 5  ;;  %v1055_v16 = vrot.slane %v1050_v54, 4  ;;  %v806_v26 = vshrl.u32 %v14381_v2, 16  ;;  %v815_v38 = vshrl.u32 %v14390_v17, 16  ;;  %s401_s19 = sadd.s32 %s14124_s24, %s10598_s18 }
  0x33   : > { %11826 = vmatpush3.bf16.msra.mxu0 %v13765_v49  ;;  %13707 = vmatpush3.bf16.msra.mxu1 %v13765_v49  ;;  %v786_v49 = vrot.slane %v784_v31, 7  ;;  %v1189_v25 = vor.u32 %v1188_v63, %v1187_v43  ;;  %v14417_v43 = vcombine.low %v14381_v2, %v14390_v17  ;;  %v10603_v52 = vrot.slane %v801_v23, 11  ;;  %v13778_v63 = vld [vmem:[%s14258_s12 + $0x98] sm:$0xff]   ;;  %v478_v6 = vld [vmem:[#allocation2 + $0x28] sm:$0x1]  ;;  %p402_p7 = scmp.lt.s32.totalorder %s401_s19, 3 }
  0x34   : > { %11827 = vmatprep.subr.bf16.mxu0 %v13766_v59  ;;  %13700 = vmatprep.subr.bf16.mxu1 %v13766_v59  ;;  %v1194_v28 = vor.u32 %v1193_v45, %v14384_v3  ;;  %v642_v45 = vld [vmem:[%s14278_s17 + $0x18] sm:$0xff]   ;;  %v808_v53 = vrot.slane %v806_v26, 7  ;;  %v10615_v20 = vrot.slane %v1065_v30, 11  ;;  %v18689_v24 = vshll.u32 %v14400_v27, 16  ;;  %v14457_v30 = vld [vmem:[#allocation2 + $0x174] sm:$0xf] }
  0x35   : > { %v789_v58 = vor.u32 %v787_v50, %v786_v49  ;;  %v791_v59 = vrot.slane %v786_v49, 4  ;;  %v14410_v32 = vrot.slane %v1189_v25, 4  ;;  %v13775_v49 = vld [vmem:[%s14258_s12 + $0xa0] sm:$0xff]   ;;  %v18687_v50 = vshrl.u32 %v14400_v27, 16  ;;  %674 = vst [vmem:[#allocation2 + $0x68] sm:$0xff] %v642_v45   ;;  %s19228_s19 = smov (!%p402_p7, %s401_s19), 3 }
  0x36   : > { %v14420_v48 = vrot.slane %v1194_v28, 4  ;;  %v745_v45 = vld [vmem:[#allocation2 + $0x16c] sm:$0x8]  ;;  %v18706_v7 = vshll.u32 %v14457_v30, 16  ;;  %v1201_v44 = vrot.slane %v806_v26, 4  ;;  %s11556_s23 = sshll.u32 %s19228_s19, 8 }
  0x37   : > { %11828 = vmatpush3.bf16.msra.mxu0 %v13767_v5  ;;  %13708 = vmatpush3.bf16.msra.mxu1 %v13767_v5  ;;  %v1053_v5 = vor.u32 %v18693_v55, %v1050_v54  ;;  %v790_v19 = vsel %vm14289_vm7, %v14320_v14, %v789_v58  ;;  %v809_v54 = vshll.u32 %v14381_v2, 16  ;;  %v14438_v58 = vld [vmem:[#allocation2 + $0x54] sm:$0xf]  ;;  %v1087_v40 = vshrl.u32 %v745_v45, 16  ;;  %v1152_v55 = vld [vmem:[#allocation2 + $0x10] sm:$0x1]  ;;  %s18596_s9 = scalar_lea.vmem %s18684_s7, %s11556_s23 }
  0x38   : > { %13261 = vmatprep.subr.bf16.mxu1 %v13770_v13  ;;  %v555_v15 = vld [vmem:[#allocation3 + $0x94] sm:$0x8] }
  0x39   : > { %v1054_v31 = vsel %vm14289_vm7, %v14336_v22, %v1053_v5  ;;  %v18690_v22 = vshrl.u32 %v14392_v18, 16  ;;  %v14449_v5 = vld [vmem:[#allocation2 + $0x170] sm:$0xf]  ;;  %v1202_v10 = vrot.slane %v809_v54, 5 }
  0x3a   : > { %1903 = vmatmul.mubr.bf16.vlgmr.msra.gmra.mxu0 %v10619_v21  ;;  %1999 = vmatmul.mubr.bf16.vlgmr.msra.gmra.mxu1 %v14363_v41  ;;  %v799_v21 = vsel %vm14289_vm7, %v791_v59, %v798_v60  ;;  %v818_v59 = vshll.u32 %v14390_v17, 16  ;;  %v18688_v60 = vshll.u32 %v14392_v18, 16 }
  0x3b   : > { %13262 = vmatpush3.bf16.msra.mxu1 %v13770_v13  ;;  %1910 = vmatprep.mubr.bf16.mxu0 %v14347_v33  ;;  %v1062_v13 = vor.u32 %v18692_v57, %v1059_v56  ;;  %v14403_v29 = vcombine.low %v790_v19, %v799_v21  ;;  %v817_v56 = vrot.slane %v815_v38, 7  ;;  %v1072_v23 = vrot.slane %v18690_v22, 7  ;;  %v644_v21 = vld [vmem:[%s14278_s17 + $0x20] sm:$0xff]  }
  0x3c   : > { %13263 = vmatprep.subr.bf16.mxu1 %v13771_v42  ;;  %2006 = vmatprep.mubr.bf16.mxu1 %v14368_v47  ;;  %v1081_v19 = vrot.slane %v18687_v50, 7  ;;  %676 = vst [vmem:[#allocation2 + $0x80] sm:$0xff] %v644_v21   ;;  %v18701_v50 = vshrl.u32 %v14438_v58, 16  ;;  %v18694_v21 = vshrl.u32 %v14449_v5, 16  ;;  %v14488_v22 = vcombine.low %v14449_v5, %v14457_v30 }
  0x3d   : > { %v1063_v14 = vsel %vm14289_vm7, %v1055_v16, %v1062_v13  ;;  %v811_v16 = vor.u32 %v809_v54, %v808_v53  ;;  %v813_v13 = vrot.slane %v808_v53, 4  ;;  %v1075_v25 = vor.u32 %v18688_v60, %v1072_v23  ;;  %v652_v54 = vld [vmem:[%s14278_s17 + $0x40] sm:$0xff]  }
  0x3e   : > { %v14412_v37 = vcombine.low %v1054_v31, %v1063_v14  ;;  %v1077_v28 = vrot.slane %v1072_v23, 4  ;;  %v18705_v31 = vshrl.u32 %v14429_v51, 16  ;;  %v709_v14 = vld [vmem:[#allocation2 + $0x4c] sm:$0x8]  ;;  %v1084_v0 = vor.u32 %v18689_v24, %v1081_v19  ;;  %v13779_v24 = vld [vmem:[%s14258_s12 + $0x90] sm:$0xff]   ;;  %18852 = vst [vmem:[#allocation11_spill] sm:$0xff] %v14488_v22 }
  0x3f   : > { %13264 = vmatpush3.bf16.msra.mxu1 %v13771_v42  ;;  %v14427_v42 = vcombine.low %v14392_v18, %v14400_v27  ;;  %v812_v53 = vsel %vm14289_vm7, %v10603_v52, %v811_v16  ;;  %v1076_v60 = vsel %vm14289_vm7, %v10615_v20, %v1075_v25  ;;  %v18699_v52 = vshrl.u32 %v14457_v30, 16  ;;  %684 = vst [vmem:[#allocation2 + $0xe0] sm:$0xff] %v652_v54  }
  0x40   : > { %18850 = vst [vmem:[#allocation9_spill] sm:$0xff] %v14412_v37  ;;  %13265 = vmatprep.subr.bf16.mxu1 %v13774_v1  ;;  %v1085_v19 = vsel %vm14289_vm7, %v1077_v28, %v1084_v0  ;;  %v830_v20 = vrot.slane %v18705_v31, 7  ;;  %v18704_v25 = vshll.u32 %v14429_v51, 16  ;;  %v646_v0 = vld [vmem:[%s14278_s17 + $0x28] sm:$0xff]   ;;  %v437_v31 = vsel %vm14240_vm2, 0, %v436_v9  ;;  %v648_v9 = vld [vmem:[%s14278_s17 + $0x30] sm:$0xff]  }
  0x41   : > { %18851 = vst [vmem:[#allocation10_spill] sm:$0xff] %v14427_v42  ;;  %678 = vst [vmem:[#allocation2 + $0x98] sm:$0xff] %v646_v0   ;;  %v1103_v45 = vrot.slane %v18699_v52, 7 }
  0x42   : > { %1911 = vmatmul.mubr.bf16.gmra.mxu0 %v14403_v29  ;;  %2007 = vmatmul.mubr.bf16.gmra.mxu1 %v14412_v37  ;;  %v835_v57 = vrot.slane %v830_v20, 4  ;;  %438 = vst [vmem:[#allocation2 + $0x64] sm:$0x8] %v437_v31  ;;  %v481_v31 = vld [vmem:[#allocation2 + $0x40] sm:$0x1]  ;;  %680 = vst [vmem:[#allocation2 + $0xb0] sm:$0xff] %v648_v9  }
  0x43   : > { %13266 = vmatpush3.bf16.msra.mxu1 %v13774_v1  ;;  %1918 = vmatprep.mubr.bf16.mxu0 %v14417_v43  ;;  %v820_v1 = vor.u32 %v818_v59, %v817_v56  ;;  %v14473_v56 = vcombine.low %v14429_v51, %v14438_v58  ;;  %v484_v9 = vld [vmem:[#allocation2 + $0x58] sm:$0x1]  ;;  %v13807_v37 = vld [vmem:[%s14258_s12 + $0x108] sm:$0xff]  }
  0x44   : > { %13267 = vmatprep.subr.bf16.mxu1 %v13775_v49  ;;  %2014 = vmatprep.mubr.bf16.mxu1 %v14427_v42 }
  0x45   : > { %v821_v23 = vsel %vm14289_vm7, %v813_v13, %v820_v1  ;;  %v823_v13 = vshrl.u32 %v709_v14, 16  ;;  %v14490_v1 = vcombine.low %v1076_v60, %v1085_v19  ;;  %v1094_v60 = vrot.slane %v18694_v21, 7  ;;  %v14503_v14 = vld [vmem:[#allocation2 + $0x6c] sm:$0xf] }
  0x46   : > { %v14481_v16 = vcombine.low %v812_v53, %v821_v23  ;;  %v14497_v53 = vld [vmem:[#allocation2 + $0x68] sm:$0xf]  ;;  %v18703_v23 = vshll.u32 %v14438_v58, 16  ;;  %v833_v19 = vor.u32 %v18704_v25, %v830_v20  ;;  %v10616_v21 = vrot.slane %v1087_v40, 11 }
  0x47   : > { %13268 = vmatpush3.bf16.msra.mxu1 %v13775_v49  ;;  %18853 = vst [vmem:[#allocation12_spill] sm:$0xff] %v14490_v1  ;;  %v839_v49 = vrot.slane %v18701_v50, 7  ;;  %v10604_v28 = vrot.slane %v823_v13, 11  ;;  %v18702_v13 = vshll.u32 %v14449_v5, 16  ;;  %v1099_v39 = vrot.slane %v1094_v60, 4 }
  0x48   : > { %13269 = vmatprep.subr.bf16.mxu1 %v13778_v63  ;;  %v18707_v52 = vshrl.u32 %v14497_v53, 16 }
  0x49   : > { %v842_v0 = vor.u32 %v18703_v23, %v839_v49  ;;  %v834_v20 = vsel %vm14289_vm7, %v10604_v28, %v833_v19  ;;  %v18708_v49 = vshrl.u32 %v14503_v14, 16  ;;  %v1106_v28 = vor.u32 %v18706_v7, %v1103_v45  ;;  %v14547_v45 = vld [vmem:[#allocation2 + $0x80] sm:$0xf]  ;;  %v712_v17 = vld [vmem:[#allocation2 + $0x64] sm:$0x8] }
  0x4a   : > { %1919 = vmatmul.mubr.bf16.gmra.mxu0 %v14481_v16  ;;  %2015 = vmatmul.mubr.bf16.gmra.mxu1 %v14490_v1  ;;  %v1183_v19 = vshll.u32 %v1152_v55, 16  ;;  %v13783_v7 = vld [vmem:[%s14258_s12 + $0x80] sm:$0xff]  }
  0x4b   : > { %13270 = vmatpush3.bf16.msra.mxu1 %v13778_v63  ;;  %1926 = vmatprep.mubr.bf16.mxu0 %v14473_v56  ;;  %v1097_v63 = vor.u32 %v18702_v13, %v1094_v60  ;;  %v843_v50 = vsel %vm14289_vm7, %v835_v57, %v842_v0  ;;  %v14536_v60 = vcombine.low %v14497_v53, %v14503_v14  ;;  %v13793_v13 = vld [vmem:[%s14258_s12 + $0x178] sm:$0xff]   ;;  %v852_v57 = vrot.slane %v18707_v52, 7 }
  0x4c   : > { %13271 = vmatprep.subr.bf16.mxu1 %v13779_v24  ;;  %2022 = vmatprep.mubr.bf16.mxu1 %v14488_v22  ;;  %v14539_v23 = vcombine.low %v834_v20, %v843_v50  ;;  %v1107_v0 = vsel %vm14289_vm7, %v1099_v39, %v1106_v28  ;;  %v1185_v55 = vrot.slane %v1183_v19, 5  ;;  %v18713_v50 = vshll.u32 %v14497_v53, 16 }
  0x4d   : > { %v1098_v25 = vsel %vm14289_vm7, %v10616_v21, %v1097_v63  ;;  %v861_v20 = vrot.slane %v18708_v49, 7  ;;  %v14554_v21 = vld [vmem:[#allocation2 + $0x84] sm:$0xf]  ;;  %13309 = vmatprep.subr.bf16.mxu0 %v13793_v13  ;;  %v857_v52 = vrot.slane %v852_v57, 4  ;;  %v479_v39 = vsel %vm14526_vm10, 0, %v478_v6  ;;  %v650_v49 = vld [vmem:[%s14278_s17 + $0x38] sm:$0xff]  }
  0x4e   : > { %v14557_v63 = vcombine.low %v1098_v25, %v1107_v0  ;;  %13310 = vmatpush3.bf16.msra.mxu0 %v13793_v13  ;;  %v1186_v28 = vsel %vm14324_vm8, %v14316_v11, %v1185_v55  ;;  %v14568_v25 = vor.u32 %v18713_v50, %v852_v57  ;;  %480 = vst [vmem:[#allocation2 + $0x28] sm:$0x1] %v479_v39  ;;  %v18710_v6 = vshrl.u32 %v14547_v45, 16  ;;  %v439_v0 = vld [vmem:[#allocation2 + $0x7c] sm:$0x8] }
  0x4f   : > { %13272 = vmatpush3.bf16.msra.mxu1 %v13779_v24  ;;  %v18711_v24 = vshll.u32 %v14503_v14, 16  ;;  %v10655_v11 = vcombine.low %v1178_v36, %v1186_v28  ;;  %v13785_v57 = vld [vmem:[%s14258_s12 + $0x138] sm:$0xff]   ;;  %v18709_v55 = vshrl.u32 %v14554_v21, 16  ;;  %v14588_v39 = vcombine.low %v14547_v45, %v14554_v21  ;;  %682 = vst [vmem:[#allocation2 + $0xc8] sm:$0xff] %v650_v49  }
  0x50   : > { %18856 = vst [vmem:[#allocation13_spill] sm:$0xff] %v14557_v63  ;;  %13273 = vmatprep.subr.bf16.mxu1 %v13782_v12  ;;  %v482_v19 = vsel %vm14526_vm10, 0, %v481_v31  ;;  %v14600_v36 = vrot.slane %v818_v59, 5  ;;  %v440_v26 = vsel %vm14240_vm2, 0, %v439_v0  ;;  %v874_v2 = vrot.slane %v18710_v6, 7 }
  0x51   : > { %v864_v13 = vor.u32 %v18711_v24, %v861_v20  ;;  %483 = vst [vmem:[#allocation2 + $0x40] sm:$0x1] %v482_v19  ;;  %v1207_v20 = vrot.slane %v815_v38, 4  ;;  %v1203_v31 = vor.u32 %v1202_v10, %v1201_v44  ;;  %441 = vst [vmem:[#allocation2 + $0x7c] sm:$0x8] %v440_v26  ;;  %v18712_v59 = vshll.u32 %v14547_v45, 16 }
  0x52   : > { %1927 = vmatmul.mubr.bf16.gmra.mxu0 %v14539_v23  ;;  %2023 = vmatmul.mubr.bf16.gmra.mxu1 %v14557_v63  ;;  %v883_v49 = vrot.slane %v18709_v55, 7  ;;  %v14615_v28 = vld [vmem:[#allocation2 + $0x98] sm:$0xf]  ;;  %v879_v19 = vrot.slane %v874_v2, 4  ;;  %v485_v0 = vsel %vm14526_vm10, 0, %v484_v9  ;;  %v845_v10 = vshrl.u32 %v712_v17, 16 }
  0x53   : > { %13274 = vmatpush3.bf16.msra.mxu1 %v13782_v12  ;;  %1934 = vmatprep.mubr.bf16.mxu0 %v14536_v60  ;;  %v865_v12 = vsel %vm14289_vm7, %v857_v52, %v864_v13  ;;  %v18714_v52 = vshll.u32 %v14554_v21, 16  ;;  %v1208_v38 = vor.u32 %v1207_v20, %v14600_v36  ;;  %v487_v44 = vld [vmem:[#allocation2 + $0x70] sm:$0x1]  ;;  %v1204_v26 = vrot.slane %v1203_v31, 4  ;;  %486 = vst [vmem:[#allocation2 + $0x58] sm:$0x1] %v485_v0 }
  0x54   : > { %13275 = vmatprep.subr.bf16.mxu1 %v13783_v7  ;;  %13277 = vmatprep.mubr.bf16.mxu1 %v10655_v11  ;;  %v18857_v11 = vshrl.u32 %v14429_v51, 16  ;;  %v14624_v55 = vor.u32 %v18712_v59, %v874_v2  ;;  %v14628_v20 = vld [vmem:[#allocation2 + $0x9c] sm:$0xf]  ;;  %v18860_v2 = vshrl.u32 %v14438_v58, 16  ;;  %v10605_v59 = vrot.slane %v845_v10, 11 }
  0x55   : > { %v886_v54 = vor.u32 %v18714_v52, %v883_v49  ;;  %v1153_v6 = vld [vmem:[#allocation2 + $0x28] sm:$0x1]  ;;  %v1209_v9 = vrot.slane %v1208_v38, 4  ;;  %v1206_v49 = vsel %vm14324_vm8, %v1204_v26, %v14600_v36  ;;  %v13786_v10 = vld [vmem:[%s14258_s12 + $0xf8] sm:$0xff]   ;;  %v14652_v36 = vcombine.low %v14615_v28, %v14628_v20  ;;  %v13788_v52 = vld [vmem:[%s14258_s12 + $0x130] sm:$0xff]  }
  0x56   : > { %v1215_v13 = vrot.slane %v18857_v11, 4  ;;  %v18858_v11 = vshll.u32 %v14429_v51, 16  ;;  %v1221_v17 = vrot.slane %v18860_v2, 4  ;;  %v1197_v50 = vshll.u32 %v1153_v6, 16 }
  0x57   : > { %13276 = vmatpush3.bf16.msra.mxu1 %v13783_v7  ;;  %v18859_v7 = vshll.u32 %v14438_v58, 16  ;;  %v856_v58 = vsel %vm14289_vm7, %v10605_v59, %v14568_v25 }
  0x58   : > { %11949 = vmatprep.subr.bf16.mxu1 %v13785_v57  ;;  %v1216_v24 = vrot.slane %v18858_v11, 5  ;;  %v887_v57 = vsel %vm14289_vm7, %v879_v19, %v886_v54  ;;  %v1199_v6 = vrot.slane %v1197_v50, 5  ;;  %v442_v19 = vld [vmem:[#allocation2 + $0x94] sm:$0x8]  ;;  %v715_v54 = vld [vmem:[#allocation2 + $0x7c] sm:$0x8] }
  0x59   : > { %v14634_v31 = vrot.slane %v18859_v7, 5  ;;  %v1154_v7 = vld [vmem:[#allocation2 + $0x40] sm:$0x1]  ;;  %v13800_v50 = vld [vmem:[%s14258_s12 + $0x170] sm:$0xff]   ;;  %v867_v59 = vshrl.u32 %v715_v54, 16  ;;  %v18861_v11 = vshrl.u32 %v14497_v53, 16 }
  0x5a   : > { %v1217_v38 = vor.u32 %v1216_v24, %v1215_v13  ;;  %v488_v24 = vsel %vm14526_vm10, 0, %v487_v44  ;;  %v14656_v13 = vcombine.low %v856_v58, %v865_v12  ;;  %v1211_v26 = vshll.u32 %v1154_v7, 16  ;;  %v654_v12 = vld [vmem:[%s14278_s17 + $0x48] sm:$0xff]   ;;  %13311 = vmatprep.subr.bf16.mxu0 %v13800_v50  ;;  %v656_v54 = vld [vmem:[%s14278_s17 + $0x50] sm:$0xff]  }
  0x5b   : > { %v1222_v51 = vor.u32 %v1221_v17, %v14634_v31  ;;  %489 = vst [vmem:[#allocation2 + $0x70] sm:$0x1] %v488_v24  ;;  %v1200_v25 = vsel %vm14324_vm8, %v14420_v48, %v1199_v6  ;;  %v1229_v0 = vrot.slane %v18861_v11, 4  ;;  %v18862_v44 = vshll.u32 %v14497_v53, 16  ;;  %v1155_v48 = vld [vmem:[#allocation2 + $0x58] sm:$0x1]  ;;  %13312 = vmatpush3.bf16.msra.mxu0 %v13800_v50 }
  0x5c   : > { %v1218_v2 = vrot.slane %v1217_v38, 4  ;;  %1935 = vmatmul.mubr.bf16.gmra.mxu0 %v14656_v13  ;;  %v18863_v38 = vsel %vm14324_vm8, %v14410_v32, %v14384_v3  ;;  %v1213_v58 = vrot.slane %v1211_v26, 5  ;;  %v18864_v53 = vshll.u32 %v14503_v14, 16  ;;  %686 = vst [vmem:[#allocation2 + $0xf8] sm:$0xff] %v654_v12   ;;  %688 = vst [vmem:[#allocation2 + $0x110] sm:$0xff] %v656_v54  }
  0x5d   : > { %v1223_v17 = vrot.slane %v1222_v51, 4  ;;  %v1230_v63 = vrot.slane %v18862_v44, 5  ;;  %v14674_v51 = vcombine.low %v18863_v38, %v1200_v25  ;;  %1942 = vmatprep.mubr.bf16.mxu0 %v14588_v39  ;;  %v10606_v7 = vrot.slane %v867_v59, 11 }
  0x5e   : > { %v1220_v11 = vsel %vm14324_vm8, %v1218_v2, %v14634_v31  ;;  %v14681_v6 = vrot.slane %v18864_v53, 5  ;;  %v1225_v24 = vshll.u32 %v1155_v48, 16  ;;  %v18865_v32 = vshrl.u32 %v14503_v14, 16  ;;  %v14707_v48 = vld [vmem:[#allocation2 + $0xb0] sm:$0xf]  ;;  %v13803_v53 = vld [vmem:[%s14258_s12 + $0x168] sm:$0xff]  }
  0x5f   : > { %v1231_v3 = vor.u32 %v1230_v63, %v1229_v0  ;;  %13278 = vmatmul.mubr.bf16.vlgmr.msra.gmra.mxu1 %v14674_v51  ;;  %v1214_v31 = vsel %vm14324_vm8, %v1209_v9, %v1213_v58  ;;  %v443_v2 = vsel %vm14240_vm2, 0, %v442_v19  ;;  %v18866_v25 = vshrl.u32 %v14615_v28, 16  ;;  %v13789_v9 = vld [vmem:[%s14258_s12 + $0xf0] sm:$0xff]   ;;  %v490_v19 = vld [vmem:[#allocation2 + $0x88] sm:$0x1]  ;;  %13313 = vmatprep.subr.bf16.mxu0 %v13803_v53 }
  0x60   : > { %v1235_v26 = vrot.slane %v18865_v32, 4  ;;  %v897_v59 = vshll.u32 %v14615_v28, 16  ;;  %11950 = vmatpush3.bf16.msra.mxu1 %v13786_v10  ;;  %v14695_v14 = vcombine.low %v1206_v49, %v1214_v31  ;;  %v878_v63 = vsel %vm14289_vm7, %v10606_v7, %v14624_v55  ;;  %444 = vst [vmem:[#allocation2 + $0x94] sm:$0x8] %v443_v2  ;;  %v13791_v49 = vld [vmem:[%s14258_s12 + $0x128] sm:$0xff]   ;;  %13314 = vmatpush3.bf16.msra.mxu0 %v13803_v53 }
  0x61   : > { %v896_v44 = vrot.slane %v18866_v25, 7  ;;  %v1227_v0 = vrot.slane %v1225_v24, 5  ;;  %v1232_v50 = vrot.slane %v1231_v3, 4  ;;  %v14701_v12 = vcombine.low %v878_v63, %v887_v57  ;;  %11951 = vmatprep.subr.bf16.mxu1 %v13788_v52  ;;  %v13792_v32 = vld [vmem:[%s14258_s12 + $0xe8] sm:$0xff]   ;;  %v493_v25 = vld [vmem:[#allocation2 + $0xa0] sm:$0x1] }
  0x62   : > { %v1236_v38 = vor.u32 %v1235_v26, %v14681_v6  ;;  %13281 = vmatprep.mubr.bf16.mxu1 %v14695_v14  ;;  %v1156_v7 = vld [vmem:[#allocation2 + $0x70] sm:$0x1]  ;;  %v18867_v57 = vshrl.u32 %v14628_v20, 16  ;;  %v906_v3 = vshll.u32 %v14628_v20, 16  ;;  %v14720_v26 = vld [vmem:[#allocation2 + $0xb4] sm:$0xf] }
  0x63   : > { %v14704_v58 = vor.u32 %v897_v59, %v896_v44  ;;  %v901_v10 = vrot.slane %v896_v44, 4  ;;  %v1228_v55 = vsel %vm14324_vm8, %v1223_v17, %v1227_v0  ;;  %v1234_v52 = vsel %vm14324_vm8, %v1232_v50, %v14681_v6  ;;  %v13795_v44 = vld [vmem:[%s14258_s12 + $0x120] sm:$0xff]  }
  0x64   : > { %v905_v24 = vrot.slane %v18867_v57, 7  ;;  %v14722_v54 = vcombine.low %v1220_v11, %v1228_v55  ;;  %v1237_v31 = vrot.slane %v1236_v38, 4  ;;  %v1239_v2 = vshll.u32 %v1156_v7, 16  ;;  %11952 = vmatpush3.bf16.msra.mxu1 %v13789_v9  ;;  %v445_v55 = vld [vmem:[#allocation2 + $0xac] sm:$0x8]  ;;  %1943 = vmatmul.mubr.bf16.gmra.mxu0 %v14701_v12 }
  0x65   : > { %v491_v17 = vsel %vm14526_vm10, 0, %v490_v19  ;;  %v18868_v63 = vshrl.u32 %v14547_v45, 16  ;;  %v18869_v50 = vshll.u32 %v14547_v45, 16  ;;  %v18870_v11 = vshll.u32 %v14554_v21, 16  ;;  %v13805_v19 = vld [vmem:[%s14258_s12 + $0x160] sm:$0xff]   ;;  %11953 = vmatprep.subr.bf16.mxu1 %v13791_v49  ;;  %1950 = vmatprep.mubr.bf16.mxu0 %v14652_v36 }
  0x66   : > { %v908_v6 = vor.u32 %v906_v3, %v905_v24  ;;  %492 = vst [vmem:[#allocation2 + $0x88] sm:$0x1] %v491_v17  ;;  %v1241_v7 = vrot.slane %v1239_v2, 5  ;;  %v18871_v9 = vshrl.u32 %v14554_v21, 16  ;;  %v14746_v53 = vcombine.low %v14707_v48, %v14720_v26  ;;  %v13796_v21 = vld [vmem:[%s14258_s12 + $0xe0] sm:$0xff]   ;;  %13315 = vmatprep.subr.bf16.mxu0 %v13805_v19 }
  0x67   : > { %v1243_v0 = vrot.slane %v18868_v63, 4  ;;  %v1244_v57 = vrot.slane %v18869_v50, 5  ;;  %v14733_v38 = vrot.slane %v18870_v11, 5  ;;  %v494_v2 = vsel %vm14526_vm10, 0, %v493_v25  ;;  %13282 = vmatmul.mubr.bf16.gmra.mxu1 %v14722_v54  ;;  %v718_v11 = vld [vmem:[#allocation2 + $0x94] sm:$0x8]  ;;  %13316 = vmatpush3.bf16.msra.mxu0 %v13805_v19 }
  0x68   : > { %v1249_v24 = vrot.slane %v18871_v9, 4  ;;  %v909_v63 = vsel %vm14289_vm7, %v901_v10, %v908_v6  ;;  %18872 = vst [vmem:[#allocation14_spill] sm:$0xff] %v14746_v53  ;;  %v1242_v49 = vsel %vm14324_vm8, %v1237_v31, %v1241_v7  ;;  %495 = vst [vmem:[#allocation2 + $0xa0] sm:$0x1] %v494_v2  ;;  %v18873_v10 = vshrl.u32 %v14615_v28, 16  ;;  %11954 = vmatpush3.bf16.msra.mxu1 %v13792_v32  ;;  %v13808_v31 = vld [vmem:[%s14258_s12 + $0x158] sm:$0xff]  }
  0x69   : > { %v1245_v50 = vor.u32 %v1244_v57, %v1243_v0  ;;  %v1258_v0 = vrot.slane %v897_v59, 5  ;;  %v14757_v57 = vcombine.low %v1234_v52, %v1242_v49  ;;  %v889_v25 = vshrl.u32 %v718_v11, 16  ;;  %11955 = vmatprep.subr.bf16.mxu1 %v13795_v44  ;;  %v13798_v59 = vld [vmem:[%s14258_s12 + $0x118] sm:$0xff]   ;;  %13317 = vmatprep.subr.bf16.mxu0 %v13808_v31  ;;  %v13810_v44 = vld [vmem:[%s14258_s12 + $0x150] sm:$0xff]  }
  0x6a   : > { %v1250_v9 = vor.u32 %v1249_v24, %v14733_v38  ;;  %v1257_v6 = vrot.slane %v18873_v10, 4  ;;  %v14761_v17 = vrot.slane %v906_v3, 5  ;;  %v18874_v24 = vshrl.u32 %v14628_v20, 16 }
  0x6b   : > { %v14759_v45 = vrot.slane %v1245_v50, 4  ;;  %v446_v28 = vsel %vm14240_vm2, 0, %v445_v55  ;;  %13285 = vmatprep.mubr.bf16.mxu1 %v14757_v57  ;;  %v10607_v52 = vrot.slane %v889_v25, 11  ;;  %v18875_v32 = vshrl.u32 %v14707_v48, 16  ;;  %v496_v50 = vld [vmem:[#allocation2 + $0xb8] sm:$0x1]  ;;  %13318 = vmatpush3.bf16.msra.mxu0 %v13808_v31 }
  0x6c   : > { %v1251_v7 = vrot.slane %v1250_v9, 4  ;;  %v1259_v22 = vor.u32 %v1258_v0, %v1257_v6  ;;  %v1263_v2 = vrot.slane %v18874_v24, 4  ;;  %447 = vst [vmem:[#allocation2 + $0xac] sm:$0x8] %v446_v28  ;;  %v919_v20 = vshll.u32 %v14707_v48, 16  ;;  %11956 = vmatpush3.bf16.msra.mxu1 %v13796_v21  ;;  %v13802_v28 = vld [vmem:[%s14258_s12 + $0x110] sm:$0xff]   ;;  %13319 = vmatprep.subr.bf16.mxu0 %v13810_v44 }
  0x6d   : > { %v1248_v3 = vsel %vm14324_vm8, %v14759_v45, %v14733_v38  ;;  %v918_v19 = vrot.slane %v18875_v32, 7  ;;  %v1157_v55 = vld [vmem:[#allocation2 + $0x88] sm:$0x1]  ;;  %v18876_v9 = vshrl.u32 %v14720_v26, 16  ;;  %v928_v38 = vshll.u32 %v14720_v26, 16  ;;  %11957 = vmatprep.subr.bf16.mxu1 %v13798_v59 }
  0x6e   : > { %v14778_v49 = vrot.slane %v1259_v22, 4  ;;  %v1264_v11 = vor.u32 %v1263_v2, %v14761_v17  ;;  %v900_v45 = vsel %vm14289_vm7, %v10607_v52, %v14704_v58  ;;  %v1253_v6 = vshll.u32 %v1157_v55, 16  ;;  %v14789_v24 = vld [vmem:[#allocation2 + $0xc8] sm:$0xf]  ;;  %v13799_v22 = vld [vmem:[%s14258_s12 + $0xd8] sm:$0xff]  }
  0x6f   : > { %v927_v10 = vrot.slane %v18876_v9, 7  ;;  %v14787_v0 = vor.u32 %v919_v20, %v918_v19  ;;  %v923_v25 = vrot.slane %v918_v19, 4  ;;  %v14793_v2 = vcombine.low %v900_v45, %v909_v63  ;;  %v14799_v52 = vld [vmem:[#allocation2 + $0xcc] sm:$0xf]  ;;  %v499_v55 = vld [vmem:[#allocation2 + $0xd0] sm:$0x1]  ;;  %13320 = vmatpush3.bf16.msra.mxu0 %v13810_v44 }
  0x70   : > { %v1262_v32 = vsel %vm14324_vm8, %v14778_v49, %v14761_v17  ;;  %v1265_v9 = vrot.slane %v1264_v11, 4  ;;  %v13813_v21 = vld [vmem:[%s14258_s12 + $0x148] sm:$0xff]   ;;  %v1255_v19 = vrot.slane %v1253_v6, 5  ;;  %v1158_v1 = vld [vmem:[#allocation2 + $0xa0] sm:$0x1]  ;;  %v497_v63 = vsel %vm14526_vm10, 0, %v496_v50  ;;  %11958 = vmatpush3.bf16.msra.mxu1 %v13799_v22 }
  0x71   : > { %v930_v58 = vor.u32 %v928_v38, %v927_v10  ;;  %v18877_v31 = vshrl.u32 %v14707_v48, 16  ;;  %v1272_v42 = vrot.slane %v919_v20, 5  ;;  %1951 = vmatmul.mubr.bf16.gmra.mxu0 %v14793_v2  ;;  %v1267_v17 = vshll.u32 %v1158_v1, 16  ;;  %498 = vst [vmem:[#allocation2 + $0xb8] sm:$0x1] %v497_v63  ;;  %v13804_v6 = vld [vmem:[%s14258_s12 + $0xd0] sm:$0xff]   ;;  %11959 = vmatprep.subr.bf16.mxu1 %v13802_v28 }
  0x72   : > { %v14809_v11 = vrot.slane %v928_v38, 5  ;;  %v18878_v59 = vshrl.u32 %v14720_v26, 16  ;;  %v1256_v50 = vsel %vm14324_vm8, %v1251_v7, %v1255_v19  ;;  %1958 = vmatprep.mubr.bf16.mxu0 %v14746_v53  ;;  %v938_v20 = vshrl.u32 %v14789_v24, 16  ;;  %v502_v7 = vld [vmem:[#allocation2 + $0xe8] sm:$0x1]  ;;  %13321 = vmatprep.subr.bf16.mxu0 %v13813_v21 }
  0x73   : > { %v1271_v45 = vrot.slane %v18877_v31, 4  ;;  %v931_v49 = vsel %vm14289_vm7, %v923_v25, %v930_v58  ;;  %v941_v1 = vshll.u32 %v14789_v24, 16  ;;  %v448_v25 = vld [vmem:[#allocation2 + $0xc4] sm:$0x8]  ;;  %v14820_v38 = vcombine.low %v1248_v3, %v1256_v50  ;;  %v721_v58 = vld [vmem:[#allocation2 + $0xac] sm:$0x8]  ;;  %13322 = vmatpush3.bf16.msra.mxu0 %v13813_v21 }
  0x74   : > { %v1277_v10 = vrot.slane %v18878_v59, 4  ;;  %v1269_v26 = vrot.slane %v1267_v17, 5  ;;  %v947_v31 = vshrl.u32 %v14799_v52, 16  ;;  %v500_v3 = vsel %vm14526_vm10, 0, %v499_v55  ;;  %v13809_v22 = vld [vmem:[%s14258_s12 + $0xc8] sm:$0xff]   ;;  %v13815_v17 = vld [vmem:[%s14258_s12 + $0x140] sm:$0xff]   ;;  %11960 = vmatpush3.bf16.msra.mxu1 %v13804_v6 }
  0x75   : > { %v1273_v48 = vor.u32 %v1272_v42, %v1271_v45  ;;  %v911_v42 = vshrl.u32 %v721_v58, 16  ;;  %v14828_v45 = vcombine.low %v14789_v24, %v14799_v52  ;;  %13286 = vmatmul.mubr.bf16.gmra.mxu1 %v14820_v38  ;;  %501 = vst [vmem:[#allocation2 + $0xd0] sm:$0x1] %v500_v3  ;;  %v950_v44 = vshll.u32 %v14799_v52, 16  ;;  %v14838_v50 = vld [vmem:[#allocation2 + $0xe0] sm:$0xf]  ;;  %11961 = vmatprep.subr.bf16.mxu1 %v13807_v37 }
  0x76   : > { %v1278_v63 = vor.u32 %v1277_v10, %v14809_v11  ;;  %v1270_v28 = vsel %vm14324_vm8, %v1265_v9, %v1269_v26  ;;  %v1285_v10 = vrot.slane %v938_v20, 4  ;;  %v13812_v24 = vld [vmem:[%s14258_s12 + $0x100] sm:$0xff]   ;;  %v1286_v47 = vrot.slane %v941_v1, 5  ;;  %13323 = vmatprep.subr.bf16.mxu0 %v13815_v17 }
  0x77   : > { %v14824_v19 = vrot.slane %v1273_v48, 4  ;;  %18879 = vst [vmem:[#allocation15_spill] sm:$0xff] %v14828_v45  ;;  %v14841_v48 = vcombine.low %v1262_v32, %v1270_v28  ;;  %v10608_v58 = vrot.slane %v911_v42, 11  ;;  %v14847_v41 = vrot.slane %v950_v44, 5  ;;  %v13814_v3 = vld [vmem:[%s14258_s12 + $0xc0] sm:$0xff]   ;;  %13324 = vmatpush3.bf16.msra.mxu0 %v13815_v17 }
  0x78   : > { %v1279_v59 = vrot.slane %v1278_v63, 4  ;;  %v1291_v9 = vrot.slane %v947_v31, 4  ;;  %v449_v52 = vsel %vm14240_vm2, 0, %v448_v25  ;;  %v940_v26 = vrot.slane %v938_v20, 7  ;;  %11962 = vmatpush3.bf16.msra.mxu1 %v13809_v22 }
  0x79   : > { %v1276_v55 = vsel %vm14324_vm8, %v14824_v19, %v14809_v11  ;;  %13289 = vmatprep.mubr.bf16.mxu1 %v14841_v48  ;;  %v922_v32 = vsel %vm14289_vm7, %v10608_v58, %v14787_v0  ;;  %v1159_v11 = vld [vmem:[#allocation2 + $0xb8] sm:$0x1]  ;;  %v1287_v63 = vor.u32 %v1286_v47, %v1285_v10  ;;  %450 = vst [vmem:[#allocation2 + $0xc4] sm:$0x8] %v449_v52  ;;  %v949_v6 = vrot.slane %v947_v31, 7 }
  0x7a   : > { %v503_v42 = vsel %vm14526_vm10, 0, %v502_v7  ;;  %v14857_v19 = vld [vmem:[#allocation2 + $0xe4] sm:$0xf]  ;;  %v14859_v37 = vcombine.low %v922_v32, %v931_v49  ;;  %v1281_v21 = vshll.u32 %v1159_v11, 16  ;;  %v1292_v20 = vor.u32 %v1291_v9, %v14847_v41  ;;  %v505_v0 = vld [vmem:[#allocation2 + $0x100] sm:$0x1]  ;;  %11963 = vmatprep.subr.bf16.mxu1 %v13812_v24 }
  0x7b   : > { %v14862_v25 = vor.u32 %v941_v1, %v940_v26  ;;  %504 = vst [vmem:[#allocation2 + $0xe8] sm:$0x1] %v503_v42  ;;  %v14866_v47 = vld [vmem:[%s14258_s12 + $0x238] sm:$0xff]   ;;  %v1288_v31 = vrot.slane %v1287_v63, 4  ;;  %v945_v28 = vrot.slane %v940_v26, 4  ;;  %v952_v10 = vor.u32 %v950_v44, %v949_v6 }
  0x7c   : > { %18880 = vst [vmem:[#allocation16_spill] sm:$0xff] %v14859_v37  ;;  %v960_v7 = vshrl.u32 %v14838_v50, 16  ;;  %v14869_v58 = vld [vmem:[#allocation2 + $0xf8] sm:$0xf]  ;;  %1959 = vmatmul.mubr.bf16.gmra.mxu0 %v14859_v37  ;;  %v1283_v52 = vrot.slane %v1281_v21, 5  ;;  %v1293_v9 = vrot.slane %v1292_v20, 4  ;;  %11964 = vmatpush3.bf16.msra.mxu1 %v13814_v3 }
  0x7d   : > { %v13818_v49 = vld [vmem:[%s14258_s12 + $0x1f8] sm:$0xff]   ;;  %v18733_v1 = vshll.u32 %v14838_v50, 16  ;;  %v969_v32 = vshrl.u32 %v14857_v19, 16  ;;  %1966 = vmatprep.mubr.bf16.mxu0 %v14828_v45  ;;  %v1160_v44 = vld [vmem:[#allocation2 + $0xd0] sm:$0x1]  ;;  %v1290_v26 = vsel %vm14324_vm8, %v1288_v31, %v14847_v41  ;;  %v953_v22 = vsel %vm14289_vm7, %v945_v28, %v952_v10  ;;  %13357 = vmatprep.subr.bf16.mxu1 %v14866_v47 }
  0x7e   : > { %v14875_v11 = vld [vmem:[#allocation2 + $0xfc] sm:$0xf]  ;;  %v972_v63 = vshll.u32 %v14857_v19, 16  ;;  %v1299_v6 = vrot.slane %v960_v7, 4  ;;  %v1284_v42 = vsel %vm14324_vm8, %v1279_v59, %v1283_v52  ;;  %v1295_v21 = vshll.u32 %v1160_v44, 16  ;;  %12085 = vmatprep.subr.bf16.mxu0 %v13818_v49 }
  0x7f   : > { %v1300_v24 = vrot.slane %v18733_v1, 5  ;;  %v1305_v20 = vrot.slane %v969_v32, 4  ;;  %v14888_v8 = vcombine.low %v1276_v55, %v1284_v42  ;;  %v14892_v41 = vcombine.low %v14838_v50, %v14857_v19  ;;  %v451_v49 = vld [vmem:[#allocation2 + $0xdc] sm:$0x8] }
  0x80   : > { %v1303_v45 = vrot.slane %v972_v63, 5  ;;  %v506_v31 = vsel %vm14526_vm10, 0, %v505_v0  ;;  %v1297_v17 = vrot.slane %v1295_v21, 5  ;;  %v724_v28 = vld [vmem:[#allocation2 + $0xc4] sm:$0x8]  ;;  %v18739_v10 = vshrl.u32 %v14869_v58, 16 }
  0x81   : > { %18881 = vst [vmem:[#allocation17_spill] sm:$0xff] %v14892_v41  ;;  %v1301_v59 = vor.u32 %v1300_v24, %v1299_v6  ;;  %507 = vst [vmem:[#allocation2 + $0x100] sm:$0x1] %v506_v31  ;;  %13290 = vmatmul.mubr.bf16.gmra.mxu1 %v14888_v8  ;;  %v933_v55 = vshrl.u32 %v724_v28, 16  ;;  %v18738_v0 = vshll.u32 %v14875_v11, 16  ;;  %v18882_v28 = vshll.u32 %v14869_v58, 16 }
  0x82   : > { %v1161_v19 = vld [vmem:[#allocation2 + $0xe8] sm:$0x1]  ;;  %v1306_v44 = vor.u32 %v1305_v20, %v1303_v45  ;;  %v1298_v3 = vsel %vm14324_vm8, %v1293_v9, %v1297_v17  ;;  %v1313_v24 = vrot.slane %v18739_v10, 4  ;;  %v18883_v9 = vshrl.u32 %v14875_v11, 16 }
  0x83   : > { %v1302_v6 = vrot.slane %v1301_v59, 4  ;;  %v1309_v21 = vshll.u32 %v1161_v19, 16  ;;  %v14906_v31 = vcombine.low %v1290_v26, %v1298_v3  ;;  %v10609_v1 = vrot.slane %v933_v55, 11  ;;  %v508_v59 = vld [vmem:[#allocation2 + $0x118] sm:$0x1] }
  0x84   : > { %v1307_v52 = vrot.slane %v1306_v44, 4  ;;  %v1314_v37 = vrot.slane %v18882_v28, 5  ;;  %v1317_v53 = vrot.slane %v18738_v0, 5  ;;  %v1319_v17 = vrot.slane %v18883_v9, 4  ;;  %v14924_v3 = vld [vmem:[#allocation2 + $0x114] sm:$0xf] }
  0x85   : > { %v1304_v20 = vsel %vm14324_vm8, %v1302_v6, %v1303_v45  ;;  %v1311_v42 = vrot.slane %v1309_v21, 5  ;;  %13293 = vmatprep.mubr.bf16.mxu1 %v14906_v31  ;;  %v944_v26 = vsel %vm14289_vm7, %v10609_v1, %v14862_v25  ;;  %v452_v19 = vsel %vm14240_vm2, 0, %v451_v49  ;;  %v14922_v45 = vld [vmem:[#allocation2 + $0x110] sm:$0xf] }
  0x86   : > { %v1315_v55 = vor.u32 %v1314_v37, %v1313_v24  ;;  %v962_v44 = vrot.slane %v960_v7, 7  ;;  %v14926_v6 = vcombine.low %v944_v26, %v953_v22  ;;  %v1320_v28 = vor.u32 %v1319_v17, %v1317_v53  ;;  %453 = vst [vmem:[#allocation2 + $0xdc] sm:$0x8] %v452_v19  ;;  %v511_v0 = vld [vmem:[#allocation2 + $0x130] sm:$0x1] }
  0x87   : > { %v1312_v21 = vsel %vm14324_vm8, %v1307_v52, %v1311_v42  ;;  %v971_v9 = vrot.slane %v969_v32, 7  ;;  %v18884_v1 = vshll.u32 %v14838_v50, 16  ;;  %v509_v52 = vsel %vm14526_vm10, 0, %v508_v59  ;;  %v454_v17 = vld [vmem:[#allocation2 + $0xf4] sm:$0x8] }
  0x88   : > { %v14930_v10 = vcombine.low %v1304_v20, %v1312_v21  ;;  %v1162_v37 = vld [vmem:[#allocation2 + $0x100] sm:$0x1]  ;;  %v1316_v25 = vrot.slane %v1315_v55, 4  ;;  %v967_v49 = vrot.slane %v962_v44, 4  ;;  %1967 = vmatmul.mubr.bf16.gmra.mxu0 %v14926_v6  ;;  %v1321_v24 = vrot.slane %v1320_v28, 4 }
  0x89   : > { %v965_v7 = vor.u32 %v18884_v1, %v962_v44  ;;  %v1323_v22 = vshll.u32 %v1162_v37, 16  ;;  %v974_v26 = vor.u32 %v972_v63, %v971_v9  ;;  %1974 = vmatprep.mubr.bf16.mxu0 %v14892_v41  ;;  %510 = vst [vmem:[#allocation2 + $0x118] sm:$0x1] %v509_v52  ;;  %v18742_v50 = vshrl.u32 %v14922_v45, 16  ;;  %v514_v9 = vld [vmem:[#allocation2 + $0x148] sm:$0x1] }
  0x8a   : > { %13294 = vmatmul.mubr.bf16.gmra.mxu1 %v14930_v10  ;;  %v1318_v32 = vsel %vm14324_vm8, %v1316_v25, %v1317_v53  ;;  %v18740_v42 = vshll.u32 %v14922_v45, 16  ;;  %v18741_v20 = vshrl.u32 %v14924_v3, 16  ;;  %v18745_v59 = vshll.u32 %v14924_v3, 16 }
  0x8b   : > { %v1325_v55 = vrot.slane %v1323_v22, 5  ;;  %v975_v63 = vsel %vm14289_vm7, %v967_v49, %v974_v26  ;;  %v14949_v19 = vcombine.low %v14869_v58, %v14875_v11  ;;  %v1327_v53 = vrot.slane %v18742_v50, 4 }
  0x8c   : > { %v1328_v44 = vrot.slane %v18740_v42, 5  ;;  %v1333_v21 = vrot.slane %v18741_v20, 4  ;;  %v512_v28 = vsel %vm14526_vm10, 0, %v511_v0  ;;  %v1331_v25 = vrot.slane %v18745_v59, 5 }
  0x8d   : > { %v1326_v37 = vsel %vm14324_vm8, %v1321_v24, %v1325_v55  ;;  %513 = vst [vmem:[#allocation2 + $0x130] sm:$0x1] %v512_v28  ;;  %v18885_v1 = vshrl.u32 %v14298_v61, 16  ;;  %v18886_v22 = vshll.u32 %v14298_v61, 16  ;;  %v727_v42 = vld [vmem:[#allocation2 + $0xdc] sm:$0x8] }
  0x8e   : > { %v14967_v52 = vcombine.low %v1318_v32, %v1326_v37  ;;  %v1329_v20 = vor.u32 %v1328_v44, %v1327_v53  ;;  %v18887_v0 = vshll.u32 %v14300_v62, 16  ;;  %v18888_v24 = vshrl.u32 %v14300_v62, 16 }
  0x8f   : > { %v1341_v49 = vrot.slane %v18885_v1, 4  ;;  %v1342_v26 = vrot.slane %v18886_v22, 5  ;;  %v955_v41 = vshrl.u32 %v727_v42, 16  ;;  %v1334_v59 = vor.u32 %v1333_v21, %v1331_v25 }
  0x90   : > { %v14971_v50 = vrot.slane %v18887_v0, 5  ;;  %v1347_v55 = vrot.slane %v18888_v24, 4  ;;  %v455_v1 = vsel %vm14240_vm2, 0, %v454_v17  ;;  %13297 = vmatprep.mubr.bf16.mxu1 %v14967_v52  ;;  %v1330_v61 = vrot.slane %v1329_v20, 4  ;;  %v1163_v0 = vld [vmem:[#allocation2 + $0x118] sm:$0x1] }
  0x91   : > { %v1343_v28 = vor.u32 %v1342_v26, %v1341_v49  ;;  %456 = vst [vmem:[#allocation2 + $0xf4] sm:$0x8] %v455_v1  ;;  %v18889_v53 = vshrl.u32 %v14869_v58, 16  ;;  %v18890_v37 = vshrl.u32 %v14875_v11, 16  ;;  %v10610_v62 = vrot.slane %v955_v41, 11 }
  0x92   : > { %v1348_v32 = vor.u32 %v1347_v55, %v14971_v50  ;;  %v1335_v42 = vrot.slane %v1334_v59, 4  ;;  %v515_v49 = vsel %vm14526_vm10, 0, %v514_v9  ;;  %v517_v17 = vld [vmem:[#allocation2 + $0x160] sm:$0x1]  ;;  %v1332_v20 = vsel %vm14324_vm8, %v1330_v61, %v1331_v25 }
  0x93   : > { %v984_v44 = vrot.slane %v18889_v53, 7  ;;  %v993_v22 = vrot.slane %v18890_v37, 7  ;;  %v1344_v21 = vrot.slane %v1343_v28, 4  ;;  %v1337_v26 = vshll.u32 %v1163_v0, 16  ;;  %516 = vst [vmem:[#allocation2 + $0x148] sm:$0x1] %v515_v49 }
  0x94   : > { %v1349_v24 = vrot.slane %v1348_v32, 4  ;;  %v18891_v55 = vshll.u32 %v14869_v58, 16  ;;  %v966_v41 = vsel %vm14289_vm7, %v10610_v62, %v965_v7  ;;  %v18892_v9 = vshll.u32 %v14875_v11, 16  ;;  %v1164_v61 = vld [vmem:[#allocation2 + $0x130] sm:$0x1] }
  0x95   : > { %v1346_v59 = vsel %vm14324_vm8, %v1344_v21, %v14971_v50  ;;  %v989_v28 = vrot.slane %v984_v44, 4  ;;  %v14996_v37 = vcombine.low %v966_v41, %v975_v63  ;;  %v1339_v25 = vrot.slane %v1337_v26, 5 }
  0x96   : > { %v987_v1 = vor.u32 %v18891_v55, %v984_v44  ;;  %v996_v53 = vor.u32 %v18892_v9, %v993_v22  ;;  %v18893_v58 = vshrl.u32 %v14349_v34, 16  ;;  %v18894_v0 = vshll.u32 %v14349_v34, 16  ;;  %v457_v55 = vld [vmem:[#allocation2 + $0x10c] sm:$0x8]  ;;  %v666_v22 = vld [vmem:[%s14278_s17 + $0x78] sm:$0xff]   ;;  %s391_s17 = scalar_lea.vmem %s18681_s4, %s10595_s14 }
  0x97   : > { %v1351_v7 = vshll.u32 %v1164_v61, 16  ;;  %v18895_v50 = vshll.u32 %v14351_v35, 16  ;;  %v18896_v11 = vshrl.u32 %v14351_v35, 16  ;;  %1975 = vmatmul.mubr.bf16.gmra.mxu0 %v14996_v37  ;;  %v1340_v21 = vsel %vm14324_vm8, %v1335_v42, %v1339_v25  ;;  %698 = vst [vmem:[#allocation2 + $0x188] sm:$0xff] %v666_v22   ;;  %v520_v25 = vld [vmem:[#allocation2 + $0x178] sm:$0x1] }
  0x98   : > { %v1355_v32 = vrot.slane %v18893_v58, 4  ;;  %v1356_v49 = vrot.slane %v18894_v0, 5  ;;  %v997_v62 = vsel %vm14289_vm7, %v989_v28, %v996_v53  ;;  %v15014_v34 = vcombine.low %v14922_v45, %v14924_v3  ;;  %1982 = vmatprep.mubr.bf16.mxu0 %v14949_v19  ;;  %v730_v9 = vld [vmem:[#allocation2 + $0xf4] sm:$0x8] }
  0x99   : > { %v1359_v44 = vrot.slane %v18895_v50, 5  ;;  %v1361_v63 = vrot.slane %v18896_v11, 4  ;;  %v518_v41 = vsel %vm14526_vm10, 0, %v517_v17  ;;  %v15018_v28 = vcombine.low %v1332_v20, %v1340_v21 }
  0x9a   : > { %v1357_v26 = vor.u32 %v1356_v49, %v1355_v32  ;;  %v1353_v35 = vrot.slane %v1351_v7, 5  ;;  %519 = vst [vmem:[#allocation2 + $0x160] sm:$0x1] %v518_v41  ;;  %v18897_v61 = vshrl.u32 %v14392_v18, 16  ;;  %v977_v58 = vshrl.u32 %v730_v9, 16 }
  0x9b   : > { %v1362_v53 = vor.u32 %v1361_v63, %v1359_v44  ;;  %v18898_v0 = vshll.u32 %v14392_v18, 16  ;;  %v18899_v17 = vshll.u32 %v14400_v27, 16  ;;  %13298 = vmatmul.mubr.bf16.gmra.mxu1 %v15018_v28  ;;  %v1165_v7 = vld [vmem:[#allocation2 + $0x148] sm:$0x1]  ;;  %v18900_v63 = vshrl.u32 %v14400_v27, 16 }
  0x9c   : > { %v1369_v42 = vrot.slane %v18897_v61, 4  ;;  %v1358_v32 = vrot.slane %v1357_v26, 4  ;;  %v1354_v20 = vsel %vm14324_vm8, %v1349_v24, %v1353_v35  ;;  %v458_v21 = vsel %vm14240_vm2, 0, %v457_v55 }
  0x9d   : > { %v1370_v49 = vrot.slane %v18898_v0, 5  ;;  %v1373_v50 = vrot.slane %v18899_v17, 5  ;;  %v1363_v11 = vrot.slane %v1362_v53, 4  ;;  %v1375_v22 = vrot.slane %v18900_v63, 4  ;;  %459 = vst [vmem:[#allocation2 + $0x10c] sm:$0x8] %v458_v21 }
  0x9e   : > { %v15034_v26 = vcombine.low %v1346_v59, %v1354_v20  ;;  %v10611_v18 = vrot.slane %v977_v58, 11  ;;  %v1360_v41 = vsel %vm14324_vm8, %v1358_v32, %v1359_v44  ;;  %v1365_v9 = vshll.u32 %v1165_v7, 16 }
  0x9f   : > { %v1371_v61 = vor.u32 %v1370_v49, %v1369_v42  ;;  %v1376_v0 = vor.u32 %v1375_v22, %v1373_v50  ;;  %v18901_v24 = vshrl.u32 %v14922_v45, 16  ;;  %v18902_v53 = vshrl.u32 %v14924_v3, 16 }
  0xa0   : > { %13301 = vmatprep.mubr.bf16.mxu1 %v15034_v26  ;;  %v988_v59 = vsel %vm14289_vm7, %v10611_v18, %v987_v1  ;;  %v1367_v55 = vrot.slane %v1365_v9, 5  ;;  %v521_v58 = vsel %vm14526_vm10, 0, %v520_v25  ;;  %v18903_v44 = vshrl.u32 %v14449_v5, 16 }
  0xa1   : > { %v1006_v35 = vrot.slane %v18901_v24, 7  ;;  %v1015_v27 = vrot.slane %v18902_v53, 7  ;;  %v15049_v42 = vcombine.low %v988_v59, %v997_v62  ;;  %v1372_v49 = vrot.slane %v1371_v61, 4  ;;  %522 = vst [vmem:[#allocation2 + $0x178] sm:$0x1] %v521_v58 }
  0xa2   : > { %v1383_v32 = vrot.slane %v18903_v44, 4  ;;  %v1368_v17 = vsel %vm14324_vm8, %v1363_v11, %v1367_v55  ;;  %v1166_v20 = vld [vmem:[#allocation2 + $0x160] sm:$0x1]  ;;  %v1377_v7 = vrot.slane %v1376_v0, 4  ;;  %v18904_v63 = vshll.u32 %v14449_v5, 16 }
  0xa3   : > { %1983 = vmatmul.mubr.bf16.gmra.mxu0 %v15049_v42  ;;  %v15056_v1 = vcombine.low %v1360_v41, %v1368_v17  ;;  %v1379_v25 = vshll.u32 %v1166_v20, 16  ;;  %v18905_v21 = vshll.u32 %v14457_v30, 16  ;;  %v1011_v62 = vrot.slane %v1006_v35, 4 }
  0xa4   : > { %v1384_v22 = vrot.slane %v18904_v63, 5  ;;  %1990 = vmatprep.mubr.bf16.mxu0 %v15014_v34  ;;  %v18906_v9 = vshll.u32 %v14924_v3, 16  ;;  %v18907_v0 = vshrl.u32 %v14457_v30, 16  ;;  %v1374_v5 = vsel %vm14324_vm8, %v1372_v49, %v1373_v50  ;;  %v733_v53 = vld [vmem:[#allocation2 + $0x10c] sm:$0x8] }
  0xa5   : > { %v1387_v18 = vrot.slane %v18905_v21, 5  ;;  %13302 = vmatmul.mubr.bf16.gmra.mxu1 %v15056_v1  ;;  %v1381_v41 = vrot.slane %v1379_v25, 5  ;;  %v999_v59 = vshrl.u32 %v733_v53, 16  ;;  %v18908_v55 = vshll.u32 %v14922_v45, 16  ;;  %v523_v50 = vld [vmem:[#allocation2 + $0x190] sm:$0x1] }
  0xa6   : > { %v1018_v61 = vor.u32 %v18906_v9, %v1015_v27  ;;  %v1385_v11 = vor.u32 %v1384_v22, %v1383_v32  ;;  %v1389_v24 = vrot.slane %v18907_v0, 4  ;;  %v524_v22 = vsel %vm14526_vm10, 0, %v523_v50  ;;  %v15078_v45 = vld [vmem:[#allocation2 + $0x188] sm:$0xf]  ;;  %v13822_v50 = vld [vmem:[%s14258_s12 + $0x1b0] sm:$0xff]  }
  0xa7   : > { %v1009_v58 = vor.u32 %v18908_v55, %v1006_v35  ;;  %v1382_v3 = vsel %vm14324_vm8, %v1377_v7, %v1381_v41  ;;  %v10612_v30 = vrot.slane %v999_v59, 11  ;;  %v15080_v35 = vld [vmem:[#allocation2 + $0x18c] sm:$0xf]  ;;  %525 = vst [vmem:[#allocation2 + $0x190] sm:$0x1] %v524_v22  ;;  %v1114_v25 = vshrl.u32 %v15078_v45, 16 }
  0xa8   : > { %v1386_v44 = vrot.slane %v1385_v11, 4  ;;  %v1390_v17 = vor.u32 %v1389_v24, %v1387_v18  ;;  %v15072_v27 = vcombine.low %v1374_v5, %v1382_v3  ;;  %v1019_v32 = vsel %vm14289_vm7, %v1011_v62, %v1018_v61  ;;  %v1167_v20 = vld [vmem:[#allocation2 + $0x178] sm:$0x1]  ;;  %v13823_v22 = vld [vmem:[%s14258_s12 + $0x1e8] sm:$0xff]  }
  0xa9   : > { %v1393_v49 = vshll.u32 %v1167_v20, 16  ;;  %v1010_v7 = vsel %vm14289_vm7, %v10612_v30, %v1009_v58  ;;  %v1117_v21 = vshll.u32 %v15078_v45, 16  ;;  %v1123_v11 = vshrl.u32 %v15080_v35, 16  ;;  %v13820_v58 = vld [vmem:[%s14258_s12 + $0x1b8] sm:$0xff]  }
  0xaa   : > { %v1391_v63 = vrot.slane %v1390_v17, 4  ;;  %13305 = vmatprep.mubr.bf16.mxu1 %v15072_v27  ;;  %v15087_v62 = vcombine.low %v1010_v7, %v1019_v32  ;;  %v1388_v9 = vsel %vm14324_vm8, %v1386_v44, %v1387_v18  ;;  %v1397_v24 = vrot.slane %v1114_v25, 4  ;;  %v472_v17 = vld [vmem:[#allocation2 + $0x184] sm:$0x8]  ;;  %v13821_v32 = vld [vmem:[%s14258_s12 + $0x1f0] sm:$0xff]  }
  0xab   : > { %v1395_v61 = vrot.slane %v1393_v49, 5  ;;  %v1398_v5 = vrot.slane %v1117_v21, 5  ;;  %v1126_v18 = vshll.u32 %v15080_v35, 16  ;;  %v1116_v53 = vrot.slane %v1114_v25, 7 }
  0xac   : > { %1991 = vmatmul.mubr.bf16.gmra.mxu0 %v15087_v62  ;;  %v1125_v55 = vrot.slane %v1123_v11, 7 }
  0xad   : > { %v1396_v0 = vsel %vm14324_vm8, %v1391_v63, %v1395_v61  ;;  %13325 = vmatprep.mubr.bf16.mxu0 %v14674_v51  ;;  %v1399_v44 = vor.u32 %v1398_v5, %v1397_v24  ;;  %v1119_v3 = vor.u32 %v1117_v21, %v1116_v53  ;;  %v1121_v30 = vrot.slane %v1116_v53, 4  ;;  %v13817_v63 = vld [vmem:[%s14258_s12 + $0x230] sm:$0xff]   ;;  %v13828_v5 = vld [vmem:[%s14258_s12 + $0x220] sm:$0xff]  }
  0xae   : > { %v15095_v41 = vcombine.low %v1388_v9, %v1396_v0  ;;  %v1168_v59 = vld [vmem:[#allocation2 + $0x190] sm:$0x1]  ;;  %v473_v51 = vsel %vm14240_vm2, 0, %v472_v17  ;;  %v1128_v20 = vor.u32 %v1126_v18, %v1125_v55  ;;  %v15107_v49 = vrot.slane %v1126_v18, 5  ;;  %v13819_v9 = vld [vmem:[%s14258_s12 + $0x228] sm:$0xff]   ;;  %v13825_v0 = vld [vmem:[%s14258_s12 + $0x1e0] sm:$0xff]  }
  0xaf   : > { %474 = vst [vmem:[#allocation2 + $0x184] sm:$0x8] %v473_v51  ;;  %v15114_v25 = vrot.slane %v1399_v44, 4  ;;  %v1407_v21 = vshll.u32 %v1168_v59, 16  ;;  %v13826_v53 = vld [vmem:[%s14258_s12 + $0x1a0] sm:$0xff]   ;;  %v13829_v17 = vld [vmem:[%s14258_s12 + $0x198] sm:$0xff]  }
  0xb0   : > { %13306 = vmatmul.mubr.bf16.gmra.mxu1 %v15095_v41  ;;  %v1129_v7 = vsel %vm14289_vm7, %v1121_v30, %v1128_v20  ;;  %v13837_v51 = vld [vmem:[%s14258_s12 + $0x210] sm:$0xff]  }
  0xb1   : > { %2455 = vmatprep.mubr.bf16.mxu1 %v14347_v33  ;;  %v1403_v33 = vrot.slane %v1123_v11, 4  ;;  %v13824_v11 = vld [vmem:[%s14258_s12 + $0x1a8] sm:$0xff]   ;;  %v1409_v59 = vrot.slane %v1407_v21, 5  ;;  %v13831_v20 = vld [vmem:[%s14258_s12 + $0x190] sm:$0xff]  }
  0xb2   : > { %v18909_v21 = vld [vmem:[#allocation14_spill] sm:$0xff] }
  0xb3   : > { %v1404_v61 = vor.u32 %v1403_v33, %v15107_v49  ;;  %v13834_v33 = vld [vmem:[%s14258_s12 + $0x1c0] sm:$0xff]  }
  0xb4   : > { %13326 = vmatmul.mubr.bf16.vlgmr.msra.gmra.mxu0 %v14695_v14 }
  0xb5   : > { %13329 = vmatprep.mubr.bf16.mxu0 %v14722_v54  ;;  %12086 = vmatpush3.bf16.msra.mxu0 %v13820_v58  ;;  %v15124_v18 = vrot.slane %v1404_v61, 4  ;;  %v13836_v58 = vld [vmem:[%s14258_s12 + $0x218] sm:$0xff]  }
  0xb6   : > { %12087 = vmatprep.subr.bf16.mxu0 %v13821_v32  ;;  %v748_v24 = vld [vmem:[#allocation2 + $0x184] sm:$0x8]  ;;  %v13830_v32 = vld [vmem:[%s14258_s12 + $0x1d0] sm:$0xff]  }
  0xb7   : > { %v1410_v61 = vsel %vm14324_vm8, %v15124_v18, %v1409_v59 }
  0xb8   : > { %2456 = vmatmul.mubr.bf16.vlgmr.msra.gmra.mxu1 %v14403_v29  ;;  %v1109_v29 = vshrl.u32 %v748_v24, 16 }
  0xb9   : > { %13358 = vmatpush3.bf16.msra.mxu1 %v14866_v47  ;;  %2463 = vmatprep.mubr.bf16.mxu1 %v14417_v43  ;;  %v13827_v47 = vld [vmem:[%s14258_s12 + $0x1d8] sm:$0xff]  }
  0xba   : > { %13359 = vmatprep.subr.bf16.mxu1 %v13817_v63  ;;  %12088 = vmatpush3.bf16.msra.mxu0 %v13822_v50  ;;  %v10617_v55 = vrot.slane %v1109_v29, 11  ;;  %v13833_v50 = vld [vmem:[%s14258_s12 + $0x188] sm:$0xff]  }
  0xbb   : > { %12089 = vmatprep.subr.bf16.mxu0 %v13823_v22  ;;  %v13839_v22 = vld [vmem:[%s14258_s12 + $0x200] sm:$0xff]  }
  0xbc   : > { %13330 = vmatmul.mubr.bf16.gmra.mxu0 %v14757_v57  ;;  %v1120_v44 = vsel %vm14289_vm7, %v10617_v55, %v1119_v3  ;;  %v13832_v3 = vld [vmem:[%s14258_s12 + $0x1c8] sm:$0xff]  }
  0xbd   : > { %13360 = vmatpush3.bf16.msra.mxu1 %v13817_v63  ;;  %13333 = vmatprep.mubr.bf16.mxu0 %v14820_v38  ;;  %v15136_v30 = vcombine.low %v1120_v44, %v1129_v7  ;;  %v13838_v63 = vld [vmem:[%s14258_s12 + $0x208] sm:$0xff]   ;;  %v13835_v7 = vld [vmem:[%s14258_s12 + $0x180] sm:$0xff]  }
  0xbe   : > { %13361 = vmatprep.subr.bf16.mxu1 %v13819_v9  ;;  %12090 = vmatpush3.bf16.msra.mxu0 %v13824_v11  ;;  %v18910_v11 = vld [vmem:[#allocation16_spill] sm:$0xff]  ;;  %v18914_v55 = vld [vmem:[#allocation5_spill] sm:$0xff] }
  0xbf   : > { %12091 = vmatprep.subr.bf16.mxu0 %v13825_v0  ;;  %v18911_v0 = vld [vmem:[#allocation15_spill] sm:$0xff] }
  0xc0   : > { %2464 = vmatmul.mubr.bf16.gmra.mxu1 %v14481_v16 }
  0xc1   : > { %2471 = vmatprep.mubr.bf16.mxu1 %v14473_v56  ;;  %13362 = vmatpush3.bf16.msra.mxu1 %v13819_v9  ;;  %v1402_v9 = vsel %vm14324_vm8, %v15114_v25, %v15107_v49 }
  0xc2   : > { %13363 = vmatprep.subr.bf16.mxu1 %v13828_v5  ;;  %12092 = vmatpush3.bf16.msra.mxu0 %v13826_v53  ;;  %v15174_v24 = vcombine.low %v1402_v9, %v1410_v61 }
  0xc3   : > { %12093 = vmatprep.subr.bf16.mxu0 %v13827_v47 }
  0xc4   : > { %13334 = vmatmul.mubr.bf16.gmra.mxu0 %v14841_v48 }
  0xc5   : > { %13364 = vmatpush3.bf16.msra.mxu1 %v13828_v5  ;;  %13337 = vmatprep.mubr.bf16.mxu0 %v14888_v8  ;;  %v18912_v5 = vld [vmem:[#allocation17_spill] sm:$0xff] }
  0xc6   : > { %13365 = vmatprep.subr.bf16.mxu1 %v13836_v58  ;;  %12094 = vmatpush3.bf16.msra.mxu0 %v13829_v17 }
  0xc7   : > { %12095 = vmatprep.subr.bf16.mxu0 %v13830_v32 }
  0xc8   : > { %2472 = vmatmul.mubr.bf16.gmra.mxu1 %v14539_v23 }
  0xc9   : > { %2479 = vmatprep.mubr.bf16.mxu1 %v14536_v60  ;;  %13366 = vmatpush3.bf16.msra.mxu1 %v13836_v58 }
  0xca   : > { %13367 = vmatprep.subr.bf16.mxu1 %v13837_v51  ;;  %12096 = vmatpush3.bf16.msra.mxu0 %v13831_v20 }
  0xcb   : > { %12097 = vmatprep.subr.bf16.mxu0 %v13832_v3 }
  0xcc   : > { %13338 = vmatmul.mubr.bf16.gmra.mxu0 %v14906_v31 }
  0xcd   : > { %13368 = vmatpush3.bf16.msra.mxu1 %v13837_v51  ;;  %13341 = vmatprep.mubr.bf16.mxu0 %v14930_v10 }
  0xce   : > { %13369 = vmatprep.subr.bf16.mxu1 %v13838_v63  ;;  %12098 = vmatpush3.bf16.msra.mxu0 %v13833_v50  ;;  %v18915_v50 = vld [vmem:[#allocation7_spill] sm:$0xff] }
  0xcf   : > { %12099 = vmatprep.subr.bf16.mxu0 %v13834_v33 }
  0xd0   : > { %2480 = vmatmul.mubr.bf16.gmra.mxu1 %v14656_v13 }
  0xd1   : > { %2487 = vmatprep.mubr.bf16.mxu1 %v14588_v39  ;;  %13370 = vmatpush3.bf16.msra.mxu1 %v13838_v63 }
  0xd2   : > { %13371 = vmatprep.subr.bf16.mxu1 %v13839_v22  ;;  %12100 = vmatpush3.bf16.msra.mxu0 %v13835_v7  ;;  %v18916_v7 = vld [vmem:[#allocation8_spill] sm:$0xff] }
  0xd4   : > { %13342 = vmatmul.mubr.bf16.gmra.mxu0 %v14967_v52 }
  0xd5   : > { %13372 = vmatpush3.bf16.msra.mxu1 %v13839_v22  ;;  %13345 = vmatprep.mubr.bf16.mxu0 %v15018_v28 }
  0xd8   : > { %2488 = vmatmul.mubr.bf16.gmra.mxu1 %v14701_v12 }
  0xd9   : > { %2495 = vmatprep.mubr.bf16.mxu1 %v14652_v36 }
  0xdc   : > { %13346 = vmatmul.mubr.bf16.gmra.mxu0 %v15034_v26 }
  0xdd   : > { %13349 = vmatprep.mubr.bf16.mxu0 %v15056_v1 }
  0xe0   : > { %2496 = vmatmul.mubr.bf16.gmra.mxu1 %v14793_v2 }
  0xe1   : > { %2503 = vmatprep.mubr.bf16.mxu1 %v18909_v21 }
  0xe4   : > { %13350 = vmatmul.mubr.bf16.gmra.mxu0 %v15072_v27 }
  0xe5   : > { %13353 = vmatprep.mubr.bf16.mxu0 %v15095_v41 }
  0xe8   : > { %2504 = vmatmul.mubr.bf16.gmra.mxu1 %v18910_v11 }
  0xe9   : > { %2511 = vmatprep.mubr.bf16.mxu1 %v18911_v0 }
  0xec   : > { %13354 = vmatmul.mubr.bf16.gmra.mxu0 %v15174_v24 }
  0xed   : > { %3002 = vmatprep.mubr.bf16.mxu0 %v14417_v43 }
  0xf0   : > { %2512 = vmatmul.mubr.bf16.gmra.mxu1 %v14926_v6 }
  0xf1   : > { %2519 = vmatprep.mubr.bf16.mxu1 %v18912_v5 }
  0xf4   : > { %3003 = vmatmul.mubr.bf16.vlgmr.msra.gmra.mxu0 %v14481_v16 }
  0xf5   : > { %3010 = vmatprep.mubr.bf16.mxu0 %v14473_v56 }
  0xf8   : > { %2520 = vmatmul.mubr.bf16.gmra.mxu1 %v14996_v37 }
  0xf9   : > { %2527 = vmatprep.mubr.bf16.mxu1 %v14949_v19 }
  0xfa   : > { %v11829_v43 = vpop.f32.mrf.mxu0  ;;  %v11901_v49 = vpop.f32.mrf.mxu1 }
  0xfc   : > { %3011 = vmatmul.mubr.bf16.gmra.mxu0 %v14539_v23  ;;  %v11830_v25 = vpop.f32.mrf.mxu0  ;;  %v11902_v18 = vpop.f32.mrf.mxu1 }
  0xfd   : > { %3018 = vmatprep.mubr.bf16.mxu0 %v14536_v60  ;;  %v15188_v29 = vadd.f32 %v11830_v25, %v11829_v43  ;;  %v15190_v16 = vadd.f32 %v11902_v18, %v11901_v49 }
  0xfe   : > { %v11832_v56 = vpop.f32.mrf.mxu0  ;;  %v11904_v53 = vpop.f32.mrf.mxu1 }
 0x100   : > { %2528 = vmatmul.mubr.bf16.gmra.mxu1 %v15049_v42  ;;  %v11833_v23 = vpop.f32.mrf.mxu0  ;;  %v11905_v60 = vpop.f32.mrf.mxu1 }
 0x101   : > { %2535 = vmatprep.mubr.bf16.mxu1 %v15014_v34  ;;  %v15195_v47 = vadd.f32 %v11833_v23, %v11832_v56  ;;  %v15197_v59 = vadd.f32 %v11905_v60, %v11904_v53  ;;  %v18917_v23 = vld [vmem:[#allocation9_spill] sm:$0xff] }
 0x102   : > { %v11835_v58 = vpop.f32.mrf.mxu0  ;;  %v11907_v44 = vpop.f32.mrf.mxu1 }
 0x103   : > { %18913 = vst [vmem:[#allocation14_spill] sm:$0xff] %v15197_v59 }
 0x104   : > { %3019 = vmatmul.mubr.bf16.gmra.mxu0 %v14656_v13  ;;  %v11836_v17 = vpop.f32.mrf.mxu0  ;;  %v11908_v32 = vpop.f32.mrf.mxu1 }
 0x105   : > { %3026 = vmatprep.mubr.bf16.mxu0 %v14588_v39  ;;  %v11837_v51 = vadd.f32 %v11836_v17, %v11835_v58  ;;  %v15200_v13 = vadd.f32 %v11908_v32, %v11907_v44  ;;  %v18919_v44 = vld [vmem:[#allocation10_spill] sm:$0xff] }
 0x106   : > { %v11838_v39 = vpop.f32.mrf.mxu0  ;;  %v11910_v20 = vpop.f32.mrf.mxu1 }
 0x108   : > { %2536 = vmatmul.mubr.bf16.gmra.mxu1 %v15087_v62  ;;  %v11839_v3 = vpop.f32.mrf.mxu0  ;;  %v11911_v63 = vpop.f32.mrf.mxu1 }
 0x109   : > { %2543 = vmatprep.mubr.bf16.mxu1 %v18914_v55  ;;  %v11840_v33 = vadd.f32 %v11839_v3, %v11838_v39  ;;  %v15205_v22 = vadd.f32 %v11911_v63, %v11910_v20 }
 0x10a   : > { %v11841_v9 = vpop.f32.mrf.mxu0  ;;  %v11913_v61 = vpop.f32.mrf.mxu1 }
 0x10c   : > { %3027 = vmatmul.mubr.bf16.gmra.mxu0 %v14701_v12  ;;  %v11842_v43 = vpop.f32.mrf.mxu0  ;;  %v11914_v49 = vpop.f32.mrf.mxu1 }
 0x10d   : > { %3034 = vmatprep.mubr.bf16.mxu0 %v14652_v36  ;;  %v11843_v25 = vadd.f32 %v11842_v43, %v11841_v9  ;;  %v15208_v18 = vadd.f32 %v11914_v49, %v11913_v61  ;;  %v18920_v43 = vld [vmem:[#allocation12_spill] sm:$0xff] }
 0x10e   : > { %v11844_v12 = vpop.f32.mrf.mxu0  ;;  %v11916_v36 = vpop.f32.mrf.mxu1 }
 0x110   : > { %2544 = vmatmul.mubr.bf16.gmra.mxu1 %v18915_v50  ;;  %v11845_v56 = vpop.f32.mrf.mxu0  ;;  %v11917_v53 = vpop.f32.mrf.mxu1 }
 0x111   : > { %2551 = vmatprep.mubr.bf16.mxu1 %v18916_v7  ;;  %v11846_v60 = vadd.f32 %v11845_v56, %v11844_v12  ;;  %v15213_v58 = vadd.f32 %v11917_v53, %v11916_v36  ;;  %v18921_v36 = vld [vmem:[#allocation11_spill] sm:$0xff]  ;;  %v15227_v56 = vcombine.low %v15078_v45, %v15080_v35 }
 0x112   : > { %v11847_v17 = vpop.f32.mrf.mxu0  ;;  %v11919_v32 = vpop.f32.mrf.mxu1 }
 0x113   : > { %18918 = vst [vmem:[#allocation16_spill] sm:$0xff] %v15213_v58 }
 0x114   : > { %3035 = vmatmul.mubr.bf16.gmra.mxu0 %v14793_v2  ;;  %v11848_v39 = vpop.f32.mrf.mxu0  ;;  %v11920_v20 = vpop.f32.mrf.mxu1 }
 0x115   : > { %3042 = vmatprep.mubr.bf16.mxu0 %v18909_v21  ;;  %v11849_v3 = vadd.f32 %v11848_v39, %v11847_v17  ;;  %v15216_v63 = vadd.f32 %v11920_v20, %v11919_v32  ;;  %v18922_v17 = vld [vmem:[#allocation13_spill] sm:$0xff] }
 0x116   : > { %v11850_v2 = vpop.f32.mrf.mxu0  ;;  %v11922_v21 = vpop.f32.mrf.mxu1 }
 0x118   : > { %2552 = vmatmul.mubr.bf16.gmra.mxu1 %v18917_v23  ;;  %v11851_v9 = vpop.f32.mrf.mxu0  ;;  %v11923_v61 = vpop.f32.mrf.mxu1 }
 0x119   : > { %2559 = vmatprep.mubr.bf16.mxu1 %v18919_v44  ;;  %v11852_v49 = vadd.f32 %v11851_v9, %v11850_v2  ;;  %v15221_v12 = vadd.f32 %v11923_v61, %v11922_v21 }
 0x11c   : > { %3043 = vmatmul.mubr.bf16.gmra.mxu0 %v18910_v11  ;;  %v11853_v11 = vpop.f32.mrf.mxu0 }
 0x11d   : > { %3050 = vmatprep.mubr.bf16.mxu0 %v18911_v0 }
 0x11e   : > { %v11854_v0 = vpop.f32.mrf.mxu0 }
 0x11f   : > { %v13279_v53 = vpop.f32.mrf.mxu1  ;;  %v11855_v39 = vadd.f32 %v11854_v0, %v11853_v11 }
 0x120   : > { %2560 = vmatmul.mubr.bf16.gmra.mxu1 %v18920_v43  ;;  %v15231_v32 = vadd.f32 %v13279_v53, %v11837_v51  ;;  %v11856_v2 = vpop.f32.mrf.mxu0 }
 0x121   : > { %2567 = vmatprep.mubr.bf16.mxu1 %v18921_v36  ;;  %v2065_v20 = vpop.f32.mrf.mxu1 }
 0x122   : > { %v11857_v45 = vpop.f32.mrf.mxu0 }
 0x123   : > { %v13280_v21 = vpop.f32.mrf.mxu1  ;;  %v11858_v9 = vadd.f32 %v11857_v45, %v11856_v2 }
 0x124   : > { %3051 = vmatmul.mubr.bf16.gmra.mxu0 %v14926_v6  ;;  %v15235_v6 = vadd.f32 %v15188_v29, %v2065_v20  ;;  %v15237_v35 = vadd.f32 %v13280_v21, %v11840_v33  ;;  %v11859_v61 = vpop.f32.mrf.mxu0 }
 0x125   : > { %3058 = vmatprep.mubr.bf16.mxu0 %v18912_v5  ;;  %v2068_v5 = vpop.f32.mrf.mxu1 }
 0x126   : > { %v15242_v51 = vadd.f32 %v15195_v47, %v2068_v5  ;;  %v11860_v53 = vpop.f32.mrf.mxu0 }
 0x127   : > { %v13283_v11 = vpop.f32.mrf.mxu1  ;;  %v11861_v0 = vadd.f32 %v11860_v53, %v11859_v61 }
 0x128   : > { %2568 = vmatmul.mubr.bf16.gmra.mxu1 %v18922_v17  ;;  %v15245_v29 = vadd.f32 %v13283_v11, %v11849_v3  ;;  %v11862_v20 = vpop.f32.mrf.mxu0 }
 0x129   : > { %2575 = vmatprep.mubr.bf16.mxu1 %v15227_v56  ;;  %v2081_v33 = vpop.f32.mrf.mxu1 }
 0x12a   : > { %v15248_v2 = vadd.f32 %v11843_v25, %v2081_v33  ;;  %v11863_v21 = vpop.f32.mrf.mxu0 }
 0x12c   : > { %3059 = vmatmul.mubr.bf16.gmra.mxu0 %v14996_v37  ;;  %v13284_v37 = vpop.f32.mrf.mxu1 }
 0x12d   : > { %3066 = vmatprep.mubr.bf16.mxu0 %v14949_v19  ;;  %v15250_v45 = vadd.f32 %v13284_v37, %v11852_v49  ;;  %v11864_v19 = vadd.f32 %v11863_v21, %v11862_v20 }
 0x12e   : > { %v2084_v47 = vpop.f32.mrf.mxu1 }
 0x12f   : > { %v15254_v5 = vadd.f32 %v11846_v60, %v2084_v47 }
 0x130   : > { %2576 = vmatmul.mubr.bf16.gmra.mxu1 %v15136_v30 }
 0x131   : > { %13373 = vmatprep.mubr.bf16.mxu1 %v14695_v14  ;;  %v11865_v3 = vpop.f32.mrf.mxu0 }
 0x133   : > { %v11866_v14 = vpop.f32.mrf.mxu0 }
 0x134   : > { %3067 = vmatmul.mubr.bf16.gmra.mxu0 %v15049_v42  ;;  %v11867_v25 = vadd.f32 %v11866_v14, %v11865_v3 }
 0x135   : > { %3074 = vmatprep.mubr.bf16.mxu0 %v15014_v34  ;;  %v13287_v61 = vpop.f32.mrf.mxu1  ;;  %v11868_v11 = vpop.f32.mrf.mxu0 }
 0x136   : > { %v15258_v53 = vadd.f32 %v13287_v61, %v11861_v0  ;;  %v13842_v61 = vld [vmem:[%s14258_s12 + $0x2f8] sm:$0xff]  }
 0x137   : > { %v2097_v49 = vpop.f32.mrf.mxu1  ;;  %v11869_v42 = vpop.f32.mrf.mxu0  ;;  %13405 = vmatprep.subr.bf16.mxu0 %v13842_v61 }
 0x138   : > { %13374 = vmatmul.mubr.bf16.vlgmr.msra.gmra.mxu1 %v14722_v54  ;;  %v15262_v34 = vadd.f32 %v11855_v39, %v2097_v49  ;;  %v11870_v60 = vadd.f32 %v11869_v42, %v11868_v11  ;;  %13406 = vmatpush3.bf16.msra.mxu0 %v13842_v61  ;;  %v13843_v42 = vld [vmem:[%s14258_s12 + $0x2b8] sm:$0xff]  }
 0x139   : > { %13377 = vmatprep.mubr.bf16.mxu1 %v14757_v57  ;;  %v13288_v33 = vpop.f32.mrf.mxu1  ;;  %12221 = vmatprep.subr.bf16.mxu1 %v13843_v42 }
 0x13a   : > { %v15265_v54 = vadd.f32 %v13288_v33, %v11864_v19  ;;  %v13844_v33 = vld [vmem:[%s14258_s12 + $0x278] sm:$0xff]  }
 0x13b   : > { %v2100_v57 = vpop.f32.mrf.mxu1  ;;  %12222 = vmatpush3.bf16.msra.mxu1 %v13844_v33 }
 0x13c   : > { %3075 = vmatmul.mubr.bf16.gmra.mxu0 %v15087_v62  ;;  %v11871_v20 = vpop.f32.mrf.mxu0  ;;  %v15268_v0 = vadd.f32 %v11858_v9, %v2100_v57 }
 0x13d   : > { %3082 = vmatprep.mubr.bf16.mxu0 %v18914_v55 }
 0x13e   : > { %v11872_v37 = vpop.f32.mrf.mxu0 }
 0x13f   : > { %v11873_v62 = vadd.f32 %v11872_v37, %v11871_v20  ;;  %v15292_v20 = vld [vmem:[#allocation2 + $0x1a0] sm:$0xf] }
 0x140   : > { %13378 = vmatmul.mubr.bf16.gmra.mxu1 %v14820_v38  ;;  %v11874_v21 = vpop.f32.mrf.mxu0 }
 0x141   : > { %13381 = vmatprep.mubr.bf16.mxu1 %v14841_v48  ;;  %v13291_v55 = vpop.f32.mrf.mxu1 }
 0x142   : > { %v15272_v39 = vadd.f32 %v13291_v55, %v11873_v62  ;;  %v11875_v38 = vpop.f32.mrf.mxu0  ;;  %v1136_v62 = vshrl.u32 %v15292_v20, 16 }
 0x143   : > { %v2113_v19 = vpop.f32.mrf.mxu1  ;;  %v11876_v48 = vadd.f32 %v11875_v38, %v11874_v21  ;;  %v1139_v21 = vshll.u32 %v15292_v20, 16 }
 0x144   : > { %3083 = vmatmul.mubr.bf16.gmra.mxu0 %v18915_v50  ;;  %v15276_v9 = vadd.f32 %v11867_v25, %v2113_v19  ;;  %v13846_v19 = vld [vmem:[%s14258_s12 + $0x270] sm:$0xff]  }
 0x145   : > { %3090 = vmatprep.mubr.bf16.mxu0 %v18916_v7  ;;  %v13292_v47 = vpop.f32.mrf.mxu1 }
 0x146   : > { %v15278_v3 = vadd.f32 %v13292_v47, %v11876_v48  ;;  %v751_v47 = vld [vmem:[#allocation2 + $0x19c] sm:$0x8] }
 0x147   : > { %v2116_v50 = vpop.f32.mrf.mxu1  ;;  %v1131_v33 = vshrl.u32 %v751_v47, 16  ;;  %v13848_v47 = vld [vmem:[%s14258_s12 + $0x2a8] sm:$0xff]  }
 0x148   : > { %13382 = vmatmul.mubr.bf16.gmra.mxu1 %v14888_v8  ;;  %v15281_v7 = vadd.f32 %v11870_v60, %v2116_v50  ;;  %v11877_v14 = vpop.f32.mrf.mxu0 }
 0x149   : > { %13385 = vmatprep.mubr.bf16.mxu1 %v14906_v31  ;;  %v10618_v59 = vrot.slane %v1131_v33, 11 }
 0x14a   : > { %v13295_v8 = vpop.f32.mrf.mxu1  ;;  %v11878_v11 = vpop.f32.mrf.mxu0 }
 0x14b   : > { %v11879_v31 = vadd.f32 %v11878_v11, %v11877_v14  ;;  %v1411_v14 = vrot.slane %v1136_v62, 4  ;;  %v1138_v11 = vrot.slane %v1136_v62, 7 }
 0x14c   : > { %3091 = vmatmul.mubr.bf16.gmra.mxu0 %v18917_v23  ;;  %v2129_v25 = vpop.f32.mrf.mxu1  ;;  %v11880_v49 = vpop.f32.mrf.mxu0 }
 0x14d   : > { %3098 = vmatprep.mubr.bf16.mxu0 %v18919_v44  ;;  %v15289_v23 = vadd.f32 %v11879_v31, %v2129_v25  ;;  %v13847_v25 = vld [vmem:[%s14258_s12 + $0x2f0] sm:$0xff]   ;;  %v1143_v58 = vrot.slane %v1138_v11, 4 }
 0x14e   : > { %v13296_v60 = vpop.f32.mrf.mxu1  ;;  %v11881_v57 = vpop.f32.mrf.mxu0  ;;  %13407 = vmatprep.subr.bf16.mxu0 %v13847_v25 }
 0x14f   : > { %v11882_v44 = vadd.f32 %v11881_v57, %v11880_v49  ;;  %v1169_v57 = vld [vmem:[#allocation2 + $0x1a8] sm:$0x1]  ;;  %13408 = vmatpush3.bf16.msra.mxu0 %v13847_v25 }
 0x150   : > { %13386 = vmatmul.mubr.bf16.gmra.mxu1 %v14930_v10  ;;  %v2132_v10 = vpop.f32.mrf.mxu1 }
 0x151   : > { %13389 = vmatprep.mubr.bf16.mxu1 %v14967_v52  ;;  %v15294_v37 = vadd.f32 %v11882_v44, %v2132_v10  ;;  %v753_v52 = vld [vmem:[#allocation2 + $0x1a4] sm:$0xf] }
 0x152   : > { %v1145_v55 = vshrl.u32 %v753_v52, 16  ;;  %v1148_v38 = vshll.u32 %v753_v52, 16 }
 0x154   : > { %3099 = vmatmul.mubr.bf16.gmra.mxu0 %v18920_v43  ;;  %v13845_v43 = vld [vmem:[%s14258_s12 + $0x2b0] sm:$0xff]   ;;  %v1415_v31 = vrot.slane %v1148_v38, 5  ;;  %v1147_v42 = vrot.slane %v1145_v55, 7 }
 0x155   : > { %3106 = vmatprep.mubr.bf16.mxu0 %v18921_v36  ;;  %12223 = vmatprep.subr.bf16.mxu1 %v13845_v43  ;;  %v1412_v36 = vrot.slane %v1139_v21, 5 }
 0x156   : > { %12224 = vmatpush3.bf16.msra.mxu1 %v13846_v19 }
 0x157   : > { %v11883_v48 = vpop.f32.mrf.mxu0  ;;  %v1413_v43 = vor.u32 %v1412_v36, %v1411_v14  ;;  %12225 = vmatprep.subr.bf16.mxu1 %v13848_v47  ;;  %v13853_v47 = vld [vmem:[%s14258_s12 + $0x298] sm:$0xff]  }
 0x158   : > { %13390 = vmatmul.mubr.bf16.gmra.mxu1 %v15018_v28 }
 0x159   : > { %13393 = vmatprep.mubr.bf16.mxu1 %v15034_v26  ;;  %v11884_v50 = vpop.f32.mrf.mxu0  ;;  %v1417_v26 = vrot.slane %v1145_v55, 4 }
 0x15a   : > { %v11885_v28 = vadd.f32 %v11884_v50, %v11883_v48  ;;  %v1421_v48 = vshll.u32 %v1169_v57, 16  ;;  %v13849_v50 = vld [vmem:[%s14258_s12 + $0x268] sm:$0xff]  }
 0x15b   : > { %v15303_v61 = vpop.f32.mrf.mxu1  ;;  %v11886_v49 = vpop.f32.mrf.mxu0  ;;  %v1418_v55 = vor.u32 %v1417_v26, %v1415_v31  ;;  %12226 = vmatpush3.bf16.msra.mxu1 %v13849_v50  ;;  %v13854_v50 = vld [vmem:[%s14258_s12 + $0x258] sm:$0xff]  }
 0x15c   : > { %3107 = vmatmul.mubr.bf16.gmra.mxu0 %v18922_v17  ;;  %v15308_v44 = vadd.f32 %v13295_v8, %v11885_v28  ;;  %v1150_v8 = vor.u32 %v1148_v38, %v1147_v42  ;;  %v10654_v28 = vcombine.low %v15292_v20, %v753_v52  ;;  %v1423_v25 = vrot.slane %v1421_v48, 5 }
 0x15d   : > { %3114 = vmatprep.mubr.bf16.mxu0 %v15227_v56  ;;  %v2145_v10 = vpop.f32.mrf.mxu1  ;;  %v11887_v17 = vpop.f32.mrf.mxu0  ;;  %v1141_v56 = vor.u32 %v1139_v21, %v1138_v11  ;;  %v1414_v21 = vrot.slane %v1413_v43, 4  ;;  %v1419_v26 = vrot.slane %v1418_v55, 4 }
 0x15e   : > { %18923 = vst [vmem:[#allocation15_spill] sm:$0xff] %v15308_v44  ;;  %v11888_v19 = vadd.f32 %v11887_v17, %v11886_v49  ;;  %v1151_v52 = vsel %vm14289_vm7, %v1143_v58, %v1150_v8  ;;  %v13850_v17 = vld [vmem:[%s14258_s12 + $0x2a0] sm:$0xff]  }
 0x15f   : > { %v15311_v62 = vpop.f32.mrf.mxu1  ;;  %v1416_v58 = vsel %vm14324_vm8, %v1414_v21, %v1415_v31  ;;  %v1424_v57 = vsel %vm14324_vm8, %v1419_v26, %v1423_v25  ;;  %12227 = vmatprep.subr.bf16.mxu1 %v13850_v17 }
 0x160   : > { %13394 = vmatmul.mubr.bf16.gmra.mxu1 %v15056_v1  ;;  %v15317_v44 = vadd.f32 %v13296_v60, %v11888_v19  ;;  %v1142_v60 = vsel %vm14289_vm7, %v10618_v59, %v1141_v56  ;;  %v10672_v43 = vcombine.low %v1416_v58, %v1424_v57  ;;  %v13852_v19 = vld [vmem:[%s14258_s12 + $0x2e8] sm:$0xff]  }
 0x161   : > { %13397 = vmatprep.mubr.bf16.mxu1 %v15072_v27  ;;  %v15319_v1 = vpop.f32.mrf.mxu1  ;;  %v10636_v59 = vcombine.low %v1142_v60, %v1151_v52  ;;  %13409 = vmatprep.subr.bf16.mxu0 %v13852_v19 }
 0x162   : > { %13410 = vmatpush3.bf16.msra.mxu0 %v13852_v19 }
 0x163   : > { %v11889_v14 = vpop.f32.mrf.mxu0 }
 0x164   : > { %3115 = vmatmul.mubr.bf16.gmra.mxu0 %v15136_v30 }
 0x165   : > { %v13303_v36 = vpop.f32.mrf.mxu1  ;;  %v11890_v27 = vpop.f32.mrf.mxu0  ;;  %3122 = vmatprep.mubr.bf16.mxu0 %v10654_v28 }
 0x166   : > { %v15323_v11 = vadd.f32 %v13303_v36, %v15200_v13  ;;  %v11891_v20 = vadd.f32 %v11890_v27, %v11889_v14 }
 0x167   : > { %v2161_v38 = vpop.f32.mrf.mxu1  ;;  %v15329_v49 = vpop.f32.mrf.mxu0 }
 0x168   : > { %13398 = vmatmul.mubr.bf16.gmra.mxu1 %v15095_v41  ;;  %v15332_v30 = vadd.f32 %v11891_v20, %v2145_v10  ;;  %v15335_v13 = vadd.f32 %v15190_v16, %v2161_v38  ;;  %v13851_v41 = vld [vmem:[%s14258_s12 + $0x260] sm:$0xff]  }
 0x169   : > { %v13304_v42 = vpop.f32.mrf.mxu1  ;;  %v15337_v33 = vpop.f32.mrf.mxu0  ;;  %13401 = vmatprep.mubr.bf16.mxu1 %v15174_v24  ;;  %12228 = vmatpush3.bf16.msra.mxu1 %v13851_v41  ;;  %v13856_v41 = vld [vmem:[%s14258_s12 + $0x250] sm:$0xff]  }
 0x16a   : > { %v15347_v10 = vadd.f32 %v13304_v42, %v15205_v22  ;;  %12229 = vmatprep.subr.bf16.mxu1 %v13853_v47  ;;  %v15380_v42 = vld [vmem:[%s15375_s21] ss:$0 sm:$0xff]  ;;  %v15394_v47 = vld [vmem:[#allocation3 + $0x8] sm:$0xf] }
 0x16b   : > { %v15349_v16 = vpop.f32.mrf.mxu1  ;;  %v2198_v58 = vadd.f32 %v15380_v42, %v15235_v6  ;;  %v2199_v6 = vadd.f32 %v15380_v42, %v15242_v51  ;;  %v2206_v46 = vadd.f32 %v15380_v42, %v15262_v34  ;;  %v2207_v34 = vadd.f32 %v15380_v42, %v15268_v0 }
 0x16c   : > { %v11895_v24 = vpop.f32.mrf.mxu0  ;;  %3123 = vmatmul.mubr.bf16.gmra.mxu0 %v10636_v59  ;;  %v13855_v59 = vld [vmem:[%s14258_s12 + $0x290] sm:$0xff]  }
 0x16d   : > { %12230 = vmatpush3.bf16.msra.mxu1 %v13854_v50  ;;  %v15396_v50 = vld [vmem:[#allocation3 + $0xc] sm:$0xf] }
 0x16e   : > { %v11896_v56 = vpop.f32.mrf.mxu0  ;;  %12231 = vmatprep.subr.bf16.mxu1 %v13855_v59 }
 0x16f   : > { %v11897_v55 = vadd.f32 %v11896_v56, %v11895_v24 }
 0x170   : > { %v13307_v31 = vpop.f32.mrf.mxu1  ;;  %13402 = vmatmul.mubr.bf16.gmra.mxu1 %v10672_v43  ;;  %v11898_v48 = vpop.f32.mrf.mxu0 }
 0x171   : > { %v15353_v22 = vadd.f32 %v13307_v31, %v15216_v63  ;;  %v15358_v8 = vadd.f32 %v15303_v61, %v11897_v55  ;;  %12232 = vmatpush3.bf16.msra.mxu1 %v13856_v41  ;;  %v13857_v31 = vld [vmem:[%s14258_s12 + $0x2e0] sm:$0xff]   ;;  %v18749_v41 = vshll.u32 %v15394_v47, 16 }
 0x172   : > { %v2177_v28 = vpop.f32.mrf.mxu1  ;;  %v11899_v36 = vpop.f32.mrf.mxu0  ;;  %13411 = vmatprep.subr.bf16.mxu0 %v13857_v31 }
 0x173   : > { %v15361_v14 = vadd.f32 %v15208_v18, %v2177_v28  ;;  %v11900_v21 = vadd.f32 %v11899_v36, %v11898_v48  ;;  %v13858_v48 = vld [vmem:[%s14258_s12 + $0x288] sm:$0xff]   ;;  %13412 = vmatpush3.bf16.msra.mxu0 %v13857_v31  ;;  %v2200_v31 = vadd.f32 %v15380_v42, %v15231_v32  ;;  %v10910_v32 = vcombine.low %v15394_v47, %v15396_v50 }
 0x174   : > { %v13308_v27 = vpop.f32.mrf.mxu1  ;;  %v13327_v26 = vpop.f32.mrf.mxu0  ;;  %12233 = vmatprep.subr.bf16.mxu1 %v13858_v48 }
 0x175   : > { %v15365_v63 = vadd.f32 %v13308_v27, %v15221_v12  ;;  %v15368_v25 = vadd.f32 %v15311_v62, %v11900_v21  ;;  %v13859_v27 = vld [vmem:[%s14258_s12 + $0x248] sm:$0xff]   ;;  %v18747_v21 = vshrl.u32 %v15394_v47, 16  ;;  %4715 = vmatprep.mubr.bf16.mxu1 %v10910_v32  ;;  %v2202_v32 = vadd.f32 %v15380_v42, %v15248_v2 }
 0x176   : > { %v15370_v61 = vpop.f32.mrf.mxu1  ;;  %v2618_v20 = vpop.f32.mrf.mxu0  ;;  %12234 = vmatpush3.bf16.msra.mxu1 %v13859_v27 }
 0x178   : > { %v11965_v18 = vpop.f32.mrf.mxu1  ;;  %v15377_v60 = vpop.f32.mrf.mxu0 }
 0x17a   : > { %v11966_v52 = vpop.f32.mrf.mxu1  ;;  %v2621_v38 = vpop.f32.mrf.mxu0 }
 0x17b   : > { %v11967_v12 = vadd.f32 %v11966_v52, %v11965_v18  ;;  %v3516_v52 = vld [vmem:[#allocation3 + $0x4] sm:$0x8] }
 0x17c   : > { %v11968_v62 = vpop.f32.mrf.mxu1  ;;  %v15385_v17 = vpop.f32.mrf.mxu0  ;;  %v3571_v51 = vshrl.u32 %v3516_v52, 16 }
 0x17d   : > { %v2619_v57 = vadd.f32 %v11967_v12, %v2618_v20  ;;  %v18746_v20 = vshrl.u32 %v15396_v50, 16 }
 0x17e   : > { %v11969_v43 = vpop.f32.mrf.mxu1  ;;  %v15390_v56 = vpop.f32.mrf.mxu0 }
 0x17f   : > { %v15388_v24 = vadd.f32 %v2619_v57, %v2198_v58  ;;  %v11970_v19 = vadd.f32 %v11969_v43, %v11968_v62  ;;  %v13860_v57 = vld [vmem:[%s14258_s12 + $0x280] sm:$0xff]   ;;  %v3587_v43 = vrot.slane %v18746_v20, 7 }
 0x180   : > { %v11971_v55 = vpop.f32.mrf.mxu1  ;;  %v15400_v36 = vpop.f32.mrf.mxu0  ;;  %12235 = vmatprep.subr.bf16.mxu1 %v13860_v57  ;;  %v2201_v57 = vadd.f32 %v15380_v42, %v15237_v35 }
 0x181   : > { %18924 = vst [vmem:[#allocation17_spill] sm:$0xff] %v15388_v24  ;;  %v2622_v28 = vadd.f32 %v11970_v19, %v2621_v38  ;;  %v3578_v38 = vrot.slane %v18747_v21, 7  ;;  %v18748_v19 = vshll.u32 %v15396_v50, 16 }
 0x182   : > { %v11972_v18 = vpop.f32.mrf.mxu1  ;;  %v2637_v59 = vpop.f32.mrf.mxu0 }
 0x183   : > { %v15405_v12 = vadd.f32 %v2622_v28, %v2199_v6  ;;  %v11973_v62 = vadd.f32 %v11972_v18, %v11971_v55  ;;  %v13861_v6 = vld [vmem:[%s14258_s12 + $0x240] sm:$0xff]   ;;  %v10874_v28 = vrot.slane %v3571_v51, 11  ;;  %v3583_v27 = vrot.slane %v3578_v38, 4 }
 0x184   : > { %v11974_v58 = vpop.f32.mrf.mxu1  ;;  %v15416_v55 = vpop.f32.mrf.mxu0  ;;  %v3581_v52 = vor.u32 %v18749_v41, %v3578_v38  ;;  %v3590_v20 = vor.u32 %v18748_v19, %v3587_v43  ;;  %12236 = vmatpush3.bf16.msra.mxu1 %v13861_v6  ;;  %v13863_v38 = vld [vmem:[%s14258_s12 + $0x2d8] sm:$0xff]   ;;  %v2205_v19 = vadd.f32 %v15380_v42, %v15250_v45 }
 0x185   : > { %18925 = vst [vmem:[#allocation5_spill] sm:$0xff] %v15405_v12  ;;  %v2627_v48 = vadd.f32 %v13327_v26, %v11973_v62  ;;  %13413 = vmatprep.subr.bf16.mxu0 %v13863_v38 }
 0x186   : > { %v11975_v18 = vpop.f32.mrf.mxu1  ;;  %v15423_v12 = vpop.f32.mrf.mxu0  ;;  %v3582_v62 = vsel %vm14289_vm7, %v10874_v28, %v3581_v52  ;;  %v3591_v51 = vsel %vm14289_vm7, %v3583_v27, %v3590_v20  ;;  %13414 = vmatpush3.bf16.msra.mxu0 %v13863_v38 }
 0x187   : > { %v11976_v21 = vadd.f32 %v11975_v18, %v11974_v58  ;;  %v15425_v24 = vadd.f32 %v2627_v48, %v2200_v31  ;;  %v10892_v31 = vcombine.low %v3582_v62, %v3591_v51  ;;  %v588_v48 = vld [vmem:[#allocation3 + $0x28] sm:$0x1]  ;;  %v540_v18 = vld [vmem:[#allocation3 + $0x1c] sm:$0x8] }
 0x188   : > { %v11977_v26 = vpop.f32.mrf.mxu1  ;;  %v15437_v43 = vpop.f32.mrf.mxu0  ;;  %v589_v28 = vsel %vm14526_vm10, 0, %v588_v48  ;;  %v541_v35 = vsel %vm14240_vm2, 0, %v540_v18  ;;  %v2203_v48 = vadd.f32 %v15380_v42, %v15254_v5 }
 0x189   : > { %v2630_v58 = vadd.f32 %v15377_v60, %v11976_v21  ;;  %4716 = vmatmul.mubr.bf16.vlgmr.msra.gmra.mxu1 %v10892_v31  ;;  %590 = vst [vmem:[#allocation3 + $0x28] sm:$0x1] %v589_v28  ;;  %v13864_v21 = vld [vmem:[%s14258_s12 + $0x2d0] sm:$0xff]   ;;  %542 = vst [vmem:[#allocation3 + $0x1c] sm:$0x8] %v541_v35  ;;  %v13867_v35 = vld [vmem:[%s14258_s12 + $0x2c8] sm:$0xff]  }
 0x18a   : > { %v11978_v6 = vpop.f32.mrf.mxu1  ;;  %v15441_v20 = vpop.f32.mrf.mxu0  ;;  %13415 = vmatprep.subr.bf16.mxu0 %v13864_v21 }
 0x18b   : > { %v11979_v52 = vadd.f32 %v11978_v6, %v11977_v26  ;;  %v15443_v27 = vadd.f32 %v2630_v58, %v2201_v57  ;;  %13416 = vmatpush3.bf16.msra.mxu0 %v13864_v21  ;;  %v2204_v21 = vadd.f32 %v15380_v42, %v15245_v29  ;;  %v13865_v29 = vld [vmem:[%s14258_s12 + $0x3b8] sm:$0xff]  }
 0x18c   : > { %v11980_v60 = vpop.f32.mrf.mxu1  ;;  %v15451_v26 = vpop.f32.mrf.mxu0  ;;  %13417 = vmatprep.subr.bf16.mxu0 %v13867_v35  ;;  %13453 = vmatprep.subr.bf16.mxu1 %v13865_v29 }
 0x18d   : > { %v2635_v62 = vadd.f32 %v11979_v52, %v15390_v56  ;;  %13454 = vmatpush3.bf16.msra.mxu1 %v13865_v29 }
 0x18e   : > { %v11981_v51 = vpop.f32.mrf.mxu1  ;;  %v15453_v58 = vpop.f32.mrf.mxu0 }
 0x18f   : > { %v11982_v57 = vadd.f32 %v11981_v51, %v11980_v60  ;;  %v15455_v38 = vadd.f32 %v2635_v62, %v2202_v32  ;;  %v543_v32 = vld [vmem:[#allocation3 + $0x34] sm:$0x8]  ;;  %13418 = vmatpush3.bf16.msra.mxu0 %v13867_v35 }
 0x190   : > { %v11983_v31 = vpop.f32.mrf.mxu1  ;;  %v15459_v28 = vpop.f32.mrf.mxu0  ;;  %v544_v51 = vsel %vm14240_vm2, 0, %v543_v32 }
 0x191   : > { %18926 = vst [vmem:[#allocation7_spill] sm:$0xff] %v15455_v38  ;;  %v2638_v6 = vadd.f32 %v11982_v57, %v2637_v59  ;;  %v591_v59 = vld [vmem:[#allocation3 + $0x40] sm:$0x1]  ;;  %545 = vst [vmem:[#allocation3 + $0x34] sm:$0x8] %v544_v51 }
 0x192   : > { %v11984_v2 = vpop.f32.mrf.mxu1  ;;  %v15461_v18 = vpop.f32.mrf.mxu0 }
 0x193   : > { %v11985_v56 = vadd.f32 %v11984_v2, %v11983_v31  ;;  %v15463_v52 = vadd.f32 %v2638_v6, %v2203_v48  ;;  %v592_v31 = vsel %vm14526_vm10, 0, %v591_v59 }
 0x194   : > { %v11986_v60 = vpop.f32.mrf.mxu1  ;;  %v15469_v5 = vpop.f32.mrf.mxu0  ;;  %593 = vst [vmem:[#allocation3 + $0x40] sm:$0x1] %v592_v31 }
 0x195   : > { %18927 = vst [vmem:[#allocation8_spill] sm:$0xff] %v15463_v52  ;;  %v2643_v62 = vadd.f32 %v15385_v17, %v11985_v56  ;;  %v13868_v17 = vld [vmem:[%s14258_s12 + $0x2c0] sm:$0xff]  }
 0x196   : > { %v11987_v57 = vpop.f32.mrf.mxu1  ;;  %v15475_v6 = vpop.f32.mrf.mxu0  ;;  %13419 = vmatprep.subr.bf16.mxu0 %v13868_v17 }
 0x197   : > { %v11988_v48 = vadd.f32 %v11987_v57, %v11986_v60  ;;  %v15477_v2 = vadd.f32 %v2643_v62, %v2204_v21  ;;  %13420 = vmatpush3.bf16.msra.mxu0 %v13868_v17  ;;  %v18930_v62 = vshrl.u32 %v15394_v47, 16  ;;  %v18931_v57 = vshll.u32 %v15394_v47, 16 }
 0x198   : > { %v11989_v56 = vpop.f32.mrf.mxu1  ;;  %v15484_v41 = vpop.f32.mrf.mxu0 }
 0x199   : > { %18928 = vst [vmem:[#allocation9_spill] sm:$0xff] %v15477_v2  ;;  %v2646_v32 = vadd.f32 %v15400_v36, %v11988_v48  ;;  %v3984_v51 = vrot.slane %v18930_v62, 4  ;;  %v3985_v45 = vrot.slane %v18931_v57, 5  ;;  %v18932_v36 = vshrl.u32 %v15396_v50, 16  ;;  %v3966_v57 = vld [vmem:[#allocation3 + $0x10] sm:$0x1] }
 0x19a   : > { %v11990_v35 = vpop.f32.mrf.mxu1  ;;  %v15486_v59 = vpop.f32.mrf.mxu0  ;;  %v3994_v2 = vshll.u32 %v3966_v57, 16 }
 0x19b   : > { %v11991_v60 = vadd.f32 %v11990_v35, %v11989_v56  ;;  %v15488_v21 = vadd.f32 %v2646_v32, %v2205_v19  ;;  %v3990_v48 = vrot.slane %v18932_v36, 4  ;;  %v18933_v19 = vshll.u32 %v15396_v50, 16 }
 0x19c   : > { %v11992_v31 = vpop.f32.mrf.mxu1  ;;  %v15499_v17 = vpop.f32.mrf.mxu0  ;;  %v3986_v52 = vor.u32 %v3985_v45, %v3984_v51 }
 0x19d   : > { %18929 = vst [vmem:[#allocation10_spill] sm:$0xff] %v15488_v21  ;;  %v2651_v29 = vadd.f32 %v11991_v60, %v15423_v12  ;;  %v3988_v32 = vrot.slane %v18933_v19, 5  ;;  %v597_v21 = vld [vmem:[#allocation3 + $0x70] sm:$0x1]  ;;  %v594_v19 = vld [vmem:[#allocation3 + $0x58] sm:$0x1] }
 0x19e   : > { %v11993_v56 = vpop.f32.mrf.mxu1  ;;  %v15503_v62 = vpop.f32.mrf.mxu0  ;;  %v3987_v50 = vrot.slane %v3986_v52, 4  ;;  %v595_v51 = vsel %vm14526_vm10, 0, %v594_v19 }
 0x19f   : > { %v11994_v35 = vadd.f32 %v11993_v56, %v11992_v31  ;;  %v15505_v47 = vadd.f32 %v2651_v29, %v2206_v46  ;;  %v3991_v38 = vor.u32 %v3990_v48, %v3988_v32  ;;  %v598_v31 = vsel %vm14526_vm10, 0, %v597_v21  ;;  %596 = vst [vmem:[#allocation3 + $0x58] sm:$0x1] %v595_v51 }
 0x1a0   : > { %v11995_v36 = vpop.f32.mrf.mxu1  ;;  %v15510_v60 = vpop.f32.mrf.mxu0  ;;  %v3996_v56 = vrot.slane %v3994_v2, 5  ;;  %599 = vst [vmem:[#allocation3 + $0x70] sm:$0x1] %v598_v31  ;;  %v2208_v2 = vadd.f32 %v15380_v42, %v15258_v53  ;;  %v13870_v31 = vld [vmem:[%s14258_s12 + $0x3b0] sm:$0xff]   ;;  %v2209_v53 = vadd.f32 %v15380_v42, %v15265_v54  ;;  %v2210_v54 = vadd.f32 %v15380_v42, %v15276_v9 }
 0x1a1   : > { %18934 = vst [vmem:[#allocation12_spill] sm:$0xff] %v15505_v47  ;;  %v2654_v12 = vadd.f32 %v11994_v35, %v15441_v20  ;;  %v3992_v29 = vrot.slane %v3991_v38, 4  ;;  %v3989_v20 = vsel %vm14324_vm8, %v3987_v50, %v3988_v32  ;;  %v546_v38 = vld [vmem:[#allocation3 + $0x4c] sm:$0x8]  ;;  %13455 = vmatprep.subr.bf16.mxu1 %v13870_v31 }
 0x1a2   : > { %v11996_v46 = vpop.f32.mrf.mxu1  ;;  %v15516_v48 = vpop.f32.mrf.mxu0  ;;  %13456 = vmatpush3.bf16.msra.mxu1 %v13870_v31  ;;  %v2211_v31 = vadd.f32 %v15380_v42, %v15281_v7 }
 0x1a3   : > { %v11997_v45 = vadd.f32 %v11996_v46, %v11995_v36  ;;  %v15518_v0 = vadd.f32 %v2654_v12, %v2207_v34  ;;  %v3997_v21 = vsel %vm14324_vm8, %v3992_v29, %v3996_v56  ;;  %v547_v34 = vsel %vm14240_vm2, 0, %v546_v38  ;;  %v549_v56 = vld [vmem:[#allocation3 + $0x64] sm:$0x8] }
 0x1a4   : > { %v11998_v52 = vpop.f32.mrf.mxu1  ;;  %v15527_v57 = vpop.f32.mrf.mxu0  ;;  %v10928_v36 = vcombine.low %v3989_v20, %v3997_v21  ;;  %548 = vst [vmem:[#allocation3 + $0x4c] sm:$0x8] %v547_v34 }
 0x1a5   : > { %18935 = vst [vmem:[#allocation11_spill] sm:$0xff] %v15518_v0  ;;  %v2659_v35 = vadd.f32 %v15416_v55, %v11997_v45  ;;  %v550_v45 = vsel %vm14240_vm2, 0, %v549_v56 }
 0x1a6   : > { %v11999_v12 = vpop.f32.mrf.mxu1  ;;  %v15531_v50 = vpop.f32.mrf.mxu0  ;;  %13421 = vmatprep.mubr.bf16.mxu0 %v10928_v36  ;;  %551 = vst [vmem:[#allocation3 + $0x64] sm:$0x8] %v550_v45 }
 0x1a7   : > { %v12000_v32 = vadd.f32 %v11999_v12, %v11998_v52  ;;  %v15533_v19 = vadd.f32 %v2659_v35, %v2208_v2 }
 0x1a8   : > { %v12001_v46 = vpop.f32.mrf.mxu1  ;;  %v15539_v29 = vpop.f32.mrf.mxu0 }
 0x1a9   : > { %18936 = vst [vmem:[#allocation13_spill] sm:$0xff] %v15533_v19  ;;  %v2662_v55 = vadd.f32 %v15437_v43, %v12000_v32 }
 0x1aa   : > { %v12002_v51 = vpop.f32.mrf.mxu1  ;;  %v15543_v52 = vpop.f32.mrf.mxu0 }
 0x1ab   : > { %v12003_v20 = vadd.f32 %v12002_v51, %v12001_v46  ;;  %v15545_v21 = vadd.f32 %v2662_v55, %v2209_v53  ;;  %v603_v51 = vld [vmem:[#allocation3 + $0xa0] sm:$0x1] }
 0x1ac   : > { %v12004_v38 = vpop.f32.mrf.mxu1  ;;  %v15550_v2 = vpop.f32.mrf.mxu0 }
 0x1ad   : > { %18937 = vst [vmem:[#allocation18_spill] sm:$0xff] %v15545_v21  ;;  %v2667_v43 = vadd.f32 %v12003_v20, %v15453_v58  ;;  %v604_v20 = vsel %vm14526_vm10, 0, %v603_v51  ;;  %v3525_v21 = vld [vmem:[#allocation3 + $0x4c] sm:$0x8] }
 0x1ae   : > { %v12005_v35 = vpop.f32.mrf.mxu1  ;;  %v15552_v34 = vpop.f32.mrf.mxu0  ;;  %605 = vst [vmem:[#allocation3 + $0xa0] sm:$0x1] %v604_v20 }
 0x1af   : > { %v12006_v36 = vadd.f32 %v12005_v35, %v12004_v38  ;;  %v15554_v12 = vadd.f32 %v2667_v43, %v2210_v54  ;;  %v2212_v38 = vadd.f32 %v15380_v42, %v15272_v39  ;;  %v2213_v39 = vadd.f32 %v15380_v42, %v15278_v3 }
 0x1b0   : > { %v12007_v32 = vpop.f32.mrf.mxu1  ;;  %v15559_v53 = vpop.f32.mrf.mxu0 }
 0x1b1   : > { %18938 = vst [vmem:[#allocation19_spill] sm:$0xff] %v15554_v12  ;;  %v2670_v46 = vadd.f32 %v12006_v36, %v15461_v18  ;;  %v600_v18 = vld [vmem:[#allocation3 + $0x88] sm:$0x1] }
 0x1b2   : > { %v12008_v55 = vpop.f32.mrf.mxu1  ;;  %v15561_v56 = vpop.f32.mrf.mxu0  ;;  %v601_v35 = vsel %vm14526_vm10, 0, %v600_v18  ;;  %v552_v18 = vld [vmem:[#allocation3 + $0x7c] sm:$0x8] }
 0x1b3   : > { %v12009_v9 = vadd.f32 %v12008_v55, %v12007_v32  ;;  %v15563_v58 = vadd.f32 %v2670_v46, %v2211_v31  ;;  %602 = vst [vmem:[#allocation3 + $0x88] sm:$0x1] %v601_v35  ;;  %v553_v3 = vsel %vm14240_vm2, 0, %v552_v18 }
 0x1b4   : > { %v12010_v45 = vpop.f32.mrf.mxu1  ;;  %v15570_v54 = vpop.f32.mrf.mxu0  ;;  %554 = vst [vmem:[#allocation3 + $0x7c] sm:$0x8] %v553_v3  ;;  %v13873_v3 = vld [vmem:[%s14258_s12 + $0x3a8] sm:$0xff]  }
 0x1b5   : > { %18939 = vst [vmem:[#allocation20_spill] sm:$0xff] %v15563_v58  ;;  %v2675_v7 = vadd.f32 %v15451_v26, %v12009_v9  ;;  %13457 = vmatprep.subr.bf16.mxu1 %v13873_v3 }
 0x1b6   : > { %v12011_v43 = vpop.f32.mrf.mxu1  ;;  %v15574_v32 = vpop.f32.mrf.mxu0  ;;  %13458 = vmatpush3.bf16.msra.mxu1 %v13873_v3 }
 0x1b7   : > { %v12012_v36 = vadd.f32 %v12011_v43, %v12010_v45  ;;  %v15576_v31 = vadd.f32 %v2675_v7, %v2212_v38  ;;  %v2214_v38 = vadd.f32 %v15380_v42, %v15289_v23 }
 0x1b8   : > { %v12013_v46 = vpop.f32.mrf.mxu1  ;;  %v15581_v55 = vpop.f32.mrf.mxu0 }
 0x1b9   : > { %18940 = vst [vmem:[#allocation21_spill] sm:$0xff] %v15576_v31  ;;  %v2678_v26 = vadd.f32 %v15459_v28, %v12012_v36 }
 0x1ba   : > { %v12014_v9 = vpop.f32.mrf.mxu1  ;;  %v15583_v20 = vpop.f32.mrf.mxu0 }
 0x1bb   : > { %v12015_v51 = vadd.f32 %v12014_v9, %v12013_v46  ;;  %v15585_v58 = vadd.f32 %v2678_v26, %v2213_v39  ;;  %v2215_v26 = vadd.f32 %v15380_v42, %v15294_v37 }
 0x1bc   : > { %v12016_v45 = vpop.f32.mrf.mxu1  ;;  %v15590_v43 = vpop.f32.mrf.mxu0 }
 0x1bd   : > { %18941 = vst [vmem:[#allocation22_spill] sm:$0xff] %v15585_v58  ;;  %v2683_v7 = vadd.f32 %v12015_v51, %v15475_v6 }
 0x1be   : > { %v12017_v28 = vpop.f32.mrf.mxu1  ;;  %v15594_v36 = vpop.f32.mrf.mxu0 }
 0x1bf   : > { %v12018_v35 = vadd.f32 %v12017_v28, %v12016_v45  ;;  %v15596_v46 = vadd.f32 %v2683_v7, %v2214_v38  ;;  %v609_v28 = vld [vmem:[#allocation3 + $0xd0] sm:$0x1]  ;;  %v18944_v38 = vld [vmem:[#allocation15_spill] sm:$0xff] }
 0x1c0   : > { %v12019_v39 = vpop.f32.mrf.mxu1  ;;  %v15601_v6 = vpop.f32.mrf.mxu0  ;;  %v2216_v7 = vadd.f32 %v15380_v42, %v18944_v38 }
 0x1c1   : > { %18942 = vst [vmem:[#allocation23_spill] sm:$0xff] %v15596_v46  ;;  %v2686_v23 = vadd.f32 %v12018_v35, %v15486_v59  ;;  %v606_v59 = vld [vmem:[#allocation3 + $0xb8] sm:$0x1]  ;;  %v610_v35 = vsel %vm14526_vm10, 0, %v609_v28  ;;  %v2217_v28 = vadd.f32 %v15380_v42, %v15317_v44 }
 0x1c2   : > { %v12020_v9 = vpop.f32.mrf.mxu1  ;;  %v15603_v58 = vpop.f32.mrf.mxu0  ;;  %611 = vst [vmem:[#allocation3 + $0xd0] sm:$0x1] %v610_v35 }
 0x1c3   : > { %v12021_v51 = vadd.f32 %v12020_v9, %v12019_v39  ;;  %v15605_v18 = vadd.f32 %v2686_v23, %v2215_v26  ;;  %v556_v39 = vsel %vm14240_vm2, 0, %v555_v15  ;;  %v607_v23 = vsel %vm14526_vm10, 0, %v606_v59 }
 0x1c4   : > { %v12022_v45 = vpop.f32.mrf.mxu1  ;;  %v15611_v37 = vpop.f32.mrf.mxu0  ;;  %557 = vst [vmem:[#allocation3 + $0x94] sm:$0x8] %v556_v39  ;;  %608 = vst [vmem:[#allocation3 + $0xb8] sm:$0x1] %v607_v23  ;;  %v11894_v15 = vadd.f32 %v15337_v33, %v15329_v49 }
 0x1c5   : > { %18943 = vst [vmem:[#allocation24_spill] sm:$0xff] %v15605_v18  ;;  %v2691_v46 = vadd.f32 %v15469_v5, %v12021_v51 }
 0x1c6   : > { %v12023_v26 = vpop.f32.mrf.mxu1  ;;  %v15619_v38 = vpop.f32.mrf.mxu0 }
 0x1c7   : > { %v12024_v9 = vadd.f32 %v12023_v26, %v12022_v45  ;;  %v15621_v5 = vadd.f32 %v2691_v46, %v2216_v7  ;;  %v2218_v7 = vadd.f32 %v15380_v42, %v15332_v30  ;;  %v2149_v26 = vadd.f32 %v11894_v15, %v15319_v1  ;;  %v612_v30 = vld [vmem:[#allocation3 + $0xe8] sm:$0x1] }
 0x1c8   : > { %v12025_v51 = vpop.f32.mrf.mxu1  ;;  %v15628_v18 = vpop.f32.mrf.mxu0  ;;  %v613_v1 = vsel %vm14526_vm10, 0, %v612_v30 }
 0x1c9   : > { %18945 = vst [vmem:[#allocation15_spill] sm:$0xff] %v15621_v5  ;;  %v2694_v3 = vadd.f32 %v15484_v41, %v12024_v9  ;;  %614 = vst [vmem:[#allocation3 + $0xe8] sm:$0x1] %v613_v1 }
 0x1ca   : > { %v12026_v59 = vpop.f32.mrf.mxu1  ;;  %v15630_v39 = vpop.f32.mrf.mxu0 }
 0x1cb   : > { %v12027_v35 = vadd.f32 %v12026_v59, %v12025_v51  ;;  %v15632_v45 = vadd.f32 %v2694_v3, %v2217_v28  ;;  %v2219_v28 = vadd.f32 %v15380_v42, %v2149_v26 }
 0x1cc   : > { %v12028_v46 = vpop.f32.mrf.mxu1  ;;  %v15638_v23 = vpop.f32.mrf.mxu0 }
 0x1cd   : > { %18946 = vst [vmem:[#allocation25_spill] sm:$0xff] %v15632_v45  ;;  %v2699_v44 = vadd.f32 %v12027_v35, %v15503_v62 }
 0x1ce   : > { %v12029_v49 = vpop.f32.mrf.mxu1  ;;  %v15640_v41 = vpop.f32.mrf.mxu0 }
 0x1cf   : > { %v12030_v33 = vadd.f32 %v12029_v49, %v12028_v46  ;;  %v15642_v9 = vadd.f32 %v2699_v44, %v2218_v7  ;;  %v558_v46 = vld [vmem:[#allocation3 + $0xac] sm:$0x8] }
 0x1d0   : > { %v12031_v51 = vpop.f32.mrf.mxu1  ;;  %v15646_v59 = vpop.f32.mrf.mxu0  ;;  %v559_v26 = vsel %vm14240_vm2, 0, %v558_v46 }
 0x1d1   : > { %18947 = vst [vmem:[#allocation26_spill] sm:$0xff] %v15642_v9  ;;  %v2702_v3 = vadd.f32 %v12030_v33, %v15516_v48  ;;  %v2220_v48 = vadd.f32 %v15380_v42, %v15358_v8  ;;  %560 = vst [vmem:[#allocation3 + $0xac] sm:$0x8] %v559_v26  ;;  %v615_v33 = vld [vmem:[#allocation3 + $0x100] sm:$0x1]  ;;  %v13876_v26 = vld [vmem:[%s14258_s12 + $0x378] sm:$0xff]  }
 0x1d2   : > { %v12032_v45 = vpop.f32.mrf.mxu1  ;;  %v15650_v15 = vpop.f32.mrf.mxu0  ;;  %v616_v1 = vsel %vm14526_vm10, 0, %v615_v33  ;;  %12357 = vmatprep.subr.bf16.mxu0 %v13876_v26  ;;  %v618_v9 = vld [vmem:[#allocation3 + $0x118] sm:$0x1] }
 0x1d3   : > { %v12033_v62 = vadd.f32 %v12032_v45, %v12031_v51  ;;  %v15652_v35 = vadd.f32 %v2702_v3, %v2219_v28  ;;  %v561_v51 = vld [vmem:[#allocation3 + $0xc4] sm:$0x8]  ;;  %617 = vst [vmem:[#allocation3 + $0x100] sm:$0x1] %v616_v1  ;;  %v2222_v1 = vadd.f32 %v15380_v42, %v15335_v13 }
 0x1d4   : > { %v12034_v7 = vpop.f32.mrf.mxu1  ;;  %v15659_v49 = vpop.f32.mrf.mxu0  ;;  %v562_v8 = vsel %vm14240_vm2, 0, %v561_v51  ;;  %v13880_v51 = vld [vmem:[%s14258_s12 + $0x3a0] sm:$0xff]  }
 0x1d5   : > { %18948 = vst [vmem:[#allocation27_spill] sm:$0xff] %v15652_v35  ;;  %v2707_v44 = vadd.f32 %v15499_v17, %v12033_v62  ;;  %563 = vst [vmem:[#allocation3 + $0xc4] sm:$0x8] %v562_v8  ;;  %v2221_v62 = vadd.f32 %v15380_v42, %v15368_v25  ;;  %v18951_v25 = vld [vmem:[#allocation14_spill] sm:$0xff]  ;;  %13459 = vmatprep.subr.bf16.mxu1 %v13880_v51 }
 0x1d6   : > { %v12035_v45 = vpop.f32.mrf.mxu1  ;;  %v15661_v3 = vpop.f32.mrf.mxu0  ;;  %v2165_v8 = vadd.f32 %v18951_v25, %v15349_v16  ;;  %13460 = vmatpush3.bf16.msra.mxu1 %v13880_v51  ;;  %v621_v25 = vld [vmem:[#allocation3 + $0x130] sm:$0x1]  ;;  %v567_v51 = vld [vmem:[#allocation3 + $0xf4] sm:$0x8] }
 0x1d7   : > { %v12036_v28 = vadd.f32 %v12035_v45, %v12034_v7  ;;  %v15663_v30 = vadd.f32 %v2707_v44, %v2220_v48 }
 0x1d8   : > { %v12037_v17 = vpop.f32.mrf.mxu1  ;;  %v15672_v7 = vpop.f32.mrf.mxu0 }
 0x1d9   : > { %18949 = vst [vmem:[#allocation28_spill] sm:$0xff] %v15663_v30  ;;  %v2710_v46 = vadd.f32 %v15510_v60, %v12036_v28 }
 0x1da   : > { %v12038_v48 = vpop.f32.mrf.mxu1  ;;  %v15675_v45 = vpop.f32.mrf.mxu0 }
 0x1db   : > { %v12039_v44 = vadd.f32 %v12038_v48, %v12037_v17  ;;  %v15677_v35 = vadd.f32 %v2710_v46, %v2221_v62  ;;  %v619_v17 = vsel %vm14526_vm10, 0, %v618_v9 }
 0x1dc   : > { %v12040_v33 = vpop.f32.mrf.mxu1  ;;  %v15685_v28 = vpop.f32.mrf.mxu0  ;;  %620 = vst [vmem:[#allocation3 + $0x118] sm:$0x1] %v619_v17  ;;  %v568_v17 = vsel %vm14240_vm2, 0, %v567_v51 }
 0x1dd   : > { %18950 = vst [vmem:[#allocation29_spill] sm:$0xff] %v15677_v35  ;;  %v2715_v60 = vadd.f32 %v12039_v44, %v15531_v50  ;;  %v2223_v35 = vadd.f32 %v15380_v42, %v2165_v8  ;;  %v2224_v8 = vadd.f32 %v15380_v42, %v15323_v11  ;;  %569 = vst [vmem:[#allocation3 + $0xf4] sm:$0x8] %v568_v17 }
 0x1de   : > { %v12041_v48 = vpop.f32.mrf.mxu1  ;;  %v15689_v46 = vpop.f32.mrf.mxu0 }
 0x1df   : > { %v12042_v62 = vadd.f32 %v12041_v48, %v12040_v33  ;;  %v15691_v26 = vadd.f32 %v2715_v60, %v2222_v1  ;;  %v622_v33 = vsel %vm14526_vm10, 0, %v621_v25 }
 0x1e0   : > { %v12043_v13 = vpop.f32.mrf.mxu1  ;;  %v15695_v50 = vpop.f32.mrf.mxu0  ;;  %623 = vst [vmem:[#allocation3 + $0x130] sm:$0x1] %v622_v33 }
 0x1e1   : > { %18952 = vst [vmem:[#allocation14_spill] sm:$0xff] %v15691_v26  ;;  %v2718_v16 = vadd.f32 %v12042_v62, %v15543_v52  ;;  %v624_v62 = vld [vmem:[#allocation3 + $0x148] sm:$0x1]  ;;  %v3968_v26 = vld [vmem:[#allocation3 + $0x40] sm:$0x1] }
 0x1e2   : > { %v12044_v44 = vpop.f32.mrf.mxu1  ;;  %v15697_v9 = vpop.f32.mrf.mxu0  ;;  %v625_v25 = vsel %vm14526_vm10, 0, %v624_v62  ;;  %v3522_v62 = vld [vmem:[#allocation3 + $0x34] sm:$0x8] }
 0x1e3   : > { %v12045_v30 = vadd.f32 %v12044_v44, %v12043_v13  ;;  %v15699_v5 = vadd.f32 %v2718_v16, %v2223_v35  ;;  %v564_v35 = vld [vmem:[#allocation3 + $0xdc] sm:$0x8]  ;;  %626 = vst [vmem:[#allocation3 + $0x148] sm:$0x1] %v625_v25  ;;  %v3969_v25 = vld [vmem:[#allocation3 + $0x58] sm:$0x1] }
 0x1e4   : > { %v12046_v1 = vpop.f32.mrf.mxu1  ;;  %v15706_v60 = vpop.f32.mrf.mxu0  ;;  %v565_v11 = vsel %vm14240_vm2, 0, %v564_v35  ;;  %v3615_v0 = vshrl.u32 %v3522_v62, 16 }
 0x1e5   : > { %18953 = vst [vmem:[#allocation30_spill] sm:$0xff] %v15699_v5  ;;  %v2723_v52 = vadd.f32 %v15527_v57, %v12045_v30  ;;  %566 = vst [vmem:[#allocation3 + $0xdc] sm:$0x8] %v565_v11  ;;  %v2225_v30 = vadd.f32 %v15380_v42, %v15347_v10  ;;  %v627_v11 = vld [vmem:[#allocation3 + $0x160] sm:$0x1]  ;;  %v2226_v10 = vadd.f32 %v15380_v42, %v15361_v14 }
 0x1e6   : > { %v12047_v48 = vpop.f32.mrf.mxu1  ;;  %v15710_v16 = vpop.f32.mrf.mxu0  ;;  %v628_v12 = vsel %vm14526_vm10, 0, %v627_v11 }
 0x1e7   : > { %v12048_v13 = vadd.f32 %v12047_v48, %v12046_v1  ;;  %v15712_v44 = vadd.f32 %v2723_v52, %v2224_v8  ;;  %v3967_v52 = vld [vmem:[#allocation3 + $0x28] sm:$0x1]  ;;  %v3519_v48 = vld [vmem:[#allocation3 + $0x1c] sm:$0x8]  ;;  %629 = vst [vmem:[#allocation3 + $0x160] sm:$0x1] %v628_v12 }
 0x1e8   : > { %v12049_v57 = vpop.f32.mrf.mxu1  ;;  %v15721_v51 = vpop.f32.mrf.mxu0  ;;  %v3593_v31 = vshrl.u32 %v3519_v48, 16 }
 0x1e9   : > { %18954 = vst [vmem:[#allocation31_spill] sm:$0xff] %v15712_v44  ;;  %v2726_v33 = vadd.f32 %v15539_v29, %v12048_v13  ;;  %v18957_v29 = vld [vmem:[#allocation16_spill] sm:$0xff] }
 0x1ea   : > { %v12050_v1 = vpop.f32.mrf.mxu1  ;;  %v15723_v8 = vpop.f32.mrf.mxu0  ;;  %v2181_v13 = vadd.f32 %v18957_v29, %v15370_v61 }
 0x1eb   : > { %v12051_v17 = vadd.f32 %v12050_v1, %v12049_v57  ;;  %18955 = vst [vmem:[#allocation32_spill] sm:$0xff] %v15723_v8  ;;  %v15725_v5 = vadd.f32 %v2726_v33, %v2225_v30  ;;  %v3970_v1 = vld [vmem:[#allocation3 + $0x70] sm:$0x1]  ;;  %v573_v30 = vld [vmem:[#allocation3 + $0x124] sm:$0x8]  ;;  %v13891_v8 = vld [vmem:[%s14258_s12 + $0x398] sm:$0xff]  }
 0x1ec   : > { %v12052_v35 = vpop.f32.mrf.mxu1  ;;  %v15732_v57 = vpop.f32.mrf.mxu0  ;;  %v574_v14 = vsel %vm14240_vm2, 0, %v573_v30  ;;  %v4050_v19 = vshll.u32 %v3970_v1, 16  ;;  %v2227_v48 = vadd.f32 %v15380_v42, %v2181_v13  ;;  %v3637_v30 = vshrl.u32 %v3525_v21, 16  ;;  %v3972_v1 = vld [vmem:[#allocation3 + $0xa0] sm:$0x1]  ;;  %13461 = vmatprep.subr.bf16.mxu1 %v13891_v8 }
 0x1ed   : > { %18956 = vst [vmem:[#allocation33_spill] sm:$0xff] %v15725_v5  ;;  %v2731_v44 = vadd.f32 %v12051_v17, %v15552_v34  ;;  %18958 = vst [vmem:[#allocation16_spill] sm:$0xff] %v15732_v57  ;;  %v4008_v5 = vshll.u32 %v3967_v52, 16  ;;  %v4022_v34 = vshll.u32 %v3968_v26, 16  ;;  %v4036_v17 = vshll.u32 %v3969_v25, 16  ;;  %13462 = vmatpush3.bf16.msra.mxu1 %v13891_v8 }
 0x1ee   : > { %v12053_v33 = vpop.f32.mrf.mxu1  ;;  %v15738_v29 = vpop.f32.mrf.mxu0  ;;  %575 = vst [vmem:[#allocation3 + $0x124] sm:$0x8] %v574_v14  ;;  %v3528_v57 = vld [vmem:[#allocation3 + $0x64] sm:$0x8]  ;;  %v630_v52 = vld [vmem:[#allocation3 + $0x178] sm:$0x1] }
 0x1ef   : > { %v12054_v61 = vadd.f32 %v12053_v33, %v12052_v35  ;;  %v15740_v47 = vadd.f32 %v2731_v44, %v2226_v10  ;;  %v631_v35 = vsel %vm14526_vm10, 0, %v630_v52  ;;  %v570_v26 = vld [vmem:[#allocation3 + $0x10c] sm:$0x8]  ;;  %v2228_v44 = vadd.f32 %v15380_v42, %v15353_v22  ;;  %v3971_v14 = vld [vmem:[#allocation3 + $0x88] sm:$0x1] }
 0x1f0   : > { %v12055_v11 = vpop.f32.mrf.mxu1  ;;  %v15745_v62 = vpop.f32.mrf.mxu0  ;;  %v15751_v10 = vrot.slane %v3593_v31, 11  ;;  %632 = vst [vmem:[#allocation3 + $0x178] sm:$0x1] %v631_v35  ;;  %v571_v13 = vsel %vm14240_vm2, 0, %v570_v26  ;;  %v15757_v21 = vrot.slane %v4008_v5, 5  ;;  %v15761_v31 = vrot.slane %v4022_v34, 5 }
 0x1f1   : > { %18959 = vst [vmem:[#allocation34_spill] sm:$0xff] %v15740_v47  ;;  %v2734_v12 = vadd.f32 %v12054_v61, %v15561_v56  ;;  %v3659_v61 = vshrl.u32 %v3528_v57, 16  ;;  %572 = vst [vmem:[#allocation3 + $0x10c] sm:$0x8] %v571_v13  ;;  %v15763_v47 = vrot.slane %v3615_v0, 11  ;;  %v15765_v35 = vrot.slane %v4036_v17, 5 }
 0x1f2   : > { %v12056_v25 = vpop.f32.mrf.mxu1  ;;  %18960 = vst [vmem:[#allocation35_spill] sm:$0xff] %v15751_v10  ;;  %v15755_v33 = vpop.f32.mrf.mxu0  ;;  %v15767_v10 = vrot.slane %v4050_v19, 5  ;;  %v12109_v5 = vadd.f32 %v15594_v36, %v15590_v43  ;;  %v4078_v8 = vshll.u32 %v3972_v1, 16  ;;  %v579_v34 = vld [vmem:[#allocation3 + $0x154] sm:$0x8]  ;;  %v2229_v0 = vadd.f32 %v15380_v42, %v15365_v63 }
 0x1f3   : > { %v12057_v56 = vadd.f32 %v12056_v25, %v12055_v11  ;;  %v15759_v52 = vadd.f32 %v2734_v12, %v2227_v48  ;;  %v3531_v11 = vld [vmem:[#allocation3 + $0x7c] sm:$0x8]  ;;  %v15774_v48 = vrot.slane %v3637_v30, 11  ;;  %v3974_v12 = vld [vmem:[#allocation3 + $0xd0] sm:$0x1]  ;;  %v4064_v25 = vshll.u32 %v3971_v14, 16 }
 0x1f4   : > { %v12058_v22 = vpop.f32.mrf.mxu1  ;;  %18962 = vst [vmem:[#allocation37_spill] sm:$0xff] %v15767_v10  ;;  %v15772_v57 = vpop.f32.mrf.mxu0  ;;  %v3973_v19 = vld [vmem:[#allocation3 + $0xb8] sm:$0x1]  ;;  %v3534_v13 = vld [vmem:[#allocation3 + $0x94] sm:$0x8]  ;;  %v15784_v30 = vrot.slane %v3659_v61, 11  ;;  %v12103_v63 = vadd.f32 %v15574_v32, %v15570_v54  ;;  %v12106_v42 = vadd.f32 %v15583_v20, %v15581_v55  ;;  %v12112_v54 = vadd.f32 %v15603_v58, %v15601_v6 }
 0x1f5   : > { %18961 = vst [vmem:[#allocation36_spill] sm:$0xff] %v15759_v52  ;;  %v2739_v26 = vadd.f32 %v15550_v2, %v12057_v56  ;;  %18963 = vst [vmem:[#allocation38_spill] sm:$0xff] %v15774_v48  ;;  %v580_v52 = vsel %vm14240_vm2, 0, %v579_v34  ;;  %v3681_v1 = vshrl.u32 %v3531_v11, 16  ;;  %v576_v56 = vld [vmem:[#allocation3 + $0x13c] sm:$0x8]  ;;  %v12115_v32 = vadd.f32 %v15619_v38, %v15611_v37 }
 0x1f6   : > { %v12059_v17 = vpop.f32.mrf.mxu1  ;;  %v15782_v36 = vpop.f32.mrf.mxu0  ;;  %581 = vst [vmem:[#allocation3 + $0x154] sm:$0x8] %v580_v52  ;;  %v4106_v10 = vshll.u32 %v3974_v12, 16  ;;  %v3975_v48 = vld [vmem:[#allocation3 + $0xe8] sm:$0x1]  ;;  %v4092_v11 = vshll.u32 %v3973_v19, 16  ;;  %v15811_v58 = vadd.f32 %v15630_v39, %v15628_v18  ;;  %v12121_v6 = vadd.f32 %v15640_v41, %v15638_v23 }
 0x1f7   : > { %v15780_v43 = vadd.f32 %v2739_v26, %v2228_v44  ;;  %v12060_v2 = vadd.f32 %v12059_v17, %v12058_v22  ;;  %v577_v44 = vsel %vm14240_vm2, 0, %v576_v56  ;;  %v3703_v34 = vshrl.u32 %v3534_v13, 16  ;;  %v3537_v52 = vld [vmem:[#allocation3 + $0xac] sm:$0x8] }
 0x1f8   : > { %v13375_v14 = vpop.f32.mrf.mxu1  ;;  %v15793_v61 = vpop.f32.mrf.mxu0  ;;  %578 = vst [vmem:[#allocation3 + $0x13c] sm:$0x8] %v577_v44  ;;  %v15799_v20 = vrot.slane %v4064_v25, 5  ;;  %v15801_v12 = vrot.slane %v4078_v8, 5  ;;  %v15807_v19 = vrot.slane %v3681_v1, 11  ;;  %v4120_v13 = vshll.u32 %v3975_v48, 16 }
 0x1f9   : > { %v2742_v22 = vadd.f32 %v15559_v53, %v12060_v2  ;;  %v3174_v26 = vadd.f32 %v13375_v14, %v12109_v5  ;;  %v3976_v2 = vld [vmem:[#allocation3 + $0x100] sm:$0x1]  ;;  %v15815_v38 = vrot.slane %v4106_v10, 5  ;;  %v3725_v8 = vshrl.u32 %v3537_v52, 16  ;;  %v3977_v10 = vld [vmem:[#allocation3 + $0x118] sm:$0x1] }
 0x1fa   : > { %v3165_v55 = vpop.f32.mrf.mxu1  ;;  %v15805_v5 = vpop.f32.mrf.mxu0  ;;  %v15820_v1 = vrot.slane %v4092_v11, 5  ;;  %v15822_v48 = vrot.slane %v3703_v34, 11  ;;  %v12124_v18 = vadd.f32 %v15650_v15, %v15646_v59  ;;  %v15828_v39 = vadd.f32 %v15661_v3, %v15659_v49  ;;  %v18964_v14 = vld [vmem:[#allocation17_spill] sm:$0xff]  ;;  %v3978_v59 = vld [vmem:[#allocation3 + $0x130] sm:$0x1]  ;;  %v13898_v15 = vld [vmem:[%s14258_s12 + $0x390] sm:$0xff]  }
 0x1fb   : > { %v15803_v17 = vadd.f32 %v2742_v22, %v2229_v0  ;;  %v3166_v53 = vadd.f32 %v12103_v63, %v3165_v55  ;;  %v3294_v0 = vadd.f32 %v3174_v26, %v15425_v24  ;;  %v3540_v63 = vld [vmem:[#allocation3 + $0xc4] sm:$0x8]  ;;  %v15832_v23 = vadd.f32 %v15675_v45, %v15672_v7  ;;  %v582_v49 = vld [vmem:[#allocation3 + $0x16c] sm:$0x8]  ;;  %13463 = vmatprep.subr.bf16.mxu1 %v13898_v15 }
 0x1fc   : > { %v13376_v37 = vpop.f32.mrf.mxu1  ;;  %v15818_v56 = vpop.f32.mrf.mxu0  ;;  %v4134_v41 = vshll.u32 %v3976_v2, 16  ;;  %v15838_v34 = vrot.slane %v4120_v13, 5  ;;  %v12133_v3 = vadd.f32 %v15689_v46, %v15685_v28  ;;  %v15843_v45 = vrot.slane %v3725_v8, 11  ;;  %13464 = vmatpush3.bf16.msra.mxu1 %v13898_v15 }
 0x1fd   : > { %v3177_v25 = vadd.f32 %v13376_v37, %v12112_v54  ;;  %v3292_v44 = vadd.f32 %v3166_v53, %v18964_v14  ;;  %v3747_v52 = vshrl.u32 %v3540_v63, 16  ;;  %v583_v54 = vsel %vm14240_vm2, 0, %v582_v49  ;;  %v3979_v37 = vld [vmem:[#allocation3 + $0x148] sm:$0x1]  ;;  %v3980_v49 = vld [vmem:[#allocation3 + $0x160] sm:$0x1] }
 0x1fe   : > { %v3168_v24 = vpop.f32.mrf.mxu1  ;;  %v15836_v11 = vpop.f32.mrf.mxu0  ;;  %18965 = vst [vmem:[#allocation17_spill] sm:$0xff] %v15843_v45  ;;  %v3326_v55 = vmax.f32 %v3294_v0, 0.0  ;;  %584 = vst [vmem:[#allocation3 + $0x16c] sm:$0x8] %v583_v54  ;;  %v15850_v28 = vrot.slane %v4134_v41, 5  ;;  %v4148_v46 = vshll.u32 %v3977_v10, 16  ;;  %v12136_v54 = vadd.f32 %v15697_v9, %v15695_v50 }
 0x1ff   : > { %v3295_v22 = vadd.f32 %v3177_v25, %v15443_v27  ;;  %v3169_v26 = vadd.f32 %v12106_v42, %v3168_v24  ;;  %v18966_v42 = vld [vmem:[#allocation5_spill] sm:$0xff]  ;;  %v585_v25 = vld [vmem:[#allocation3 + $0x184] sm:$0x8]  ;;  %v4162_v8 = vshll.u32 %v3978_v59, 16  ;;  %v3324_v0 = vmax.f32 %v3292_v44, 0.0  ;;  %v18971_v9 = vld [vmem:[#allocation32_spill] sm:$0xff] }
 0x200   : > { %v13379_v7 = vpop.f32.mrf.mxu1  ;;  %v15848_v13 = vpop.f32.mrf.mxu0  ;;  %v586_v63 = vsel %vm14240_vm2, 0, %v585_v25  ;;  %v4176_v41 = vshll.u32 %v3979_v37, 16  ;;  %v15856_v45 = vrot.slane %v3747_v52, 11  ;;  %v15858_v10 = vld [vmem:[#allocation3 + $0xf4] sm:$0x8]  ;;  %v15864_v44 = vadd.f32 %v15710_v16, %v15706_v60  ;;  %v18969_v59 = vld [vmem:[#allocation9_spill] sm:$0xff] }
 0x201   : > { %v3327_v27 = vmax.f32 %v3295_v22, 0.0  ;;  %v3293_v53 = vadd.f32 %v3169_v26, %v18966_v42  ;;  %v3190_v2 = vadd.f32 %v13379_v7, %v12121_v6  ;;  %v633_v7 = vld [vmem:[#allocation3 + $0x190] sm:$0x1]  ;;  %587 = vst [vmem:[#allocation3 + $0x184] sm:$0x8] %v586_v63  ;;  %18968 = vst [vmem:[#allocation39_spill] sm:$0xff] %v15858_v10  ;;  %v15871_v52 = vadd.f32 %v18971_v9, %v15721_v51 }
 0x202   : > { %v3181_v24 = vpop.f32.mrf.mxu1  ;;  %v12159_v6 = vpop.f32.mrf.mxu0  ;;  %18967 = vst [vmem:[#allocation5_spill] sm:$0xff] %v15856_v45  ;;  %v634_v4 = vsel %vm14526_vm10, 0, %v633_v7  ;;  %v15867_v50 = vld [vmem:[#allocation3 + $0xdc] sm:$0x8]  ;;  %v15874_v25 = vrot.slane %v4148_v46, 5  ;;  %v4190_v60 = vshll.u32 %v3980_v49, 16  ;;  %v15887_v46 = vadd.f32 %v15755_v33, %v15745_v62 }
 0x203   : > { %v11629_v14 = vpack.c.bf16 %v3327_v27, %v3326_v55  ;;  %v3325_v22 = vmax.f32 %v3293_v53, 0.0  ;;  %v3182_v26 = vadd.f32 %v12115_v32, %v3181_v24  ;;  %v3298_v15 = vadd.f32 %v3190_v2, %v18969_v59  ;;  %18970 = vst [vmem:[#allocation9_spill] sm:$0xff] %v15867_v50  ;;  %635 = vst [vmem:[#allocation3 + $0x190] sm:$0x1] %v634_v4  ;;  %v18972_v53 = vld [vmem:[#allocation7_spill] sm:$0xff]  ;;  %v18973_v16 = vld [vmem:[#allocation10_spill] sm:$0xff] }
 0x204   : > { %v13380_v42 = vpop.f32.mrf.mxu1  ;;  %v12161_v27 = vpop.f32.mrf.mxu0  ;;  %v15878_v63 = vrot.slane %v4162_v8, 5  ;;  %v18975_v51 = vld [vmem:[#allocation16_spill] sm:$0xff]  ;;  %v15889_v49 = vrot.slane %v4176_v41, 5  ;;  %v18983_v10 = vld [vmem:[#allocation21_spill] sm:$0xff] }
 0x205   : > { %11782 = vst [vmem:[#allocation3 + $0x38] sm:$0xff] %v11629_v14   ;;  %v11624_v32 = vpack.c.bf16 %v3325_v22, %v3324_v0  ;;  %v3193_v55 = vadd.f32 %v13380_v42, %v12124_v18  ;;  %v3296_v40 = vadd.f32 %v3182_v26, %v18972_v53  ;;  %v15880_v0 = vld [vmem:[#allocation3 + $0x178] sm:$0x1]  ;;  %v12145_v22 = vadd.f32 %v15738_v29, %v18975_v51  ;;  %v18976_v8 = vld [vmem:[#allocation8_spill] sm:$0xff] }
 0x206   : > { %v3184_v37 = vpop.f32.mrf.mxu1  ;;  %v12162_v18 = vpop.f32.mrf.mxu0  ;;  %18974 = vst [vmem:[#allocation32_spill] sm:$0xff] %v15880_v0  ;;  %v15897_v53 = vrot.slane %v4190_v60, 5 }
 0x207   : > { %11781 = vst [vmem:[#allocation3 + $0x20] sm:$0xff] %v11624_v32   ;;  %v3299_v24 = vadd.f32 %v3193_v55, %v18973_v16  ;;  %v3185_v2 = vadd.f32 %v15811_v58, %v3184_v37  ;;  %v3330_v58 = vmax.f32 %v3298_v15, 0.0  ;;  %v15895_v55 = vadd.f32 %v15782_v36, %v15772_v57  ;;  %v18978_v37 = vld [vmem:[#allocation13_spill] sm:$0xff] }
 0x208   : > { %v13383_v26 = vpop.f32.mrf.mxu1  ;;  %v12164_v59 = vpop.f32.mrf.mxu0  ;;  %v3328_v29 = vmax.f32 %v3296_v40, 0.0  ;;  %18977 = vst [vmem:[#allocation7_spill] sm:$0xff] %v15897_v53  ;;  %v15908_v57 = vadd.f32 %v15836_v11, %v15818_v56  ;;  %v15911_v36 = vadd.f32 %v12159_v6, %v15848_v13  ;;  %v15913_v40 = vadd.f32 %v12162_v18, %v12161_v27 }
 0x209   : > { %v3331_v42 = vmax.f32 %v3299_v24, 0.0  ;;  %v3297_v4 = vadd.f32 %v3185_v2, %v18976_v8  ;;  %v3206_v32 = vadd.f32 %v13383_v26, %v12133_v3  ;;  %v15904_v3 = vadd.f32 %v15805_v5, %v15793_v61 }
 0x20a   : > { %v3197_v9 = vpop.f32.mrf.mxu1  ;;  %v12165_v24 = vpop.f32.mrf.mxu0 }
 0x20b   : > { %v11639_v33 = vpack.c.bf16 %v3331_v42, %v3330_v58  ;;  %v3329_v41 = vmax.f32 %v3297_v4, 0.0  ;;  %v3302_v16 = vadd.f32 %v3206_v32, %v18978_v37  ;;  %v3198_v15 = vadd.f32 %v15828_v39, %v3197_v9  ;;  %v18979_v58 = vld [vmem:[#allocation12_spill] sm:$0xff]  ;;  %v18980_v32 = vld [vmem:[#allocation18_spill] sm:$0xff] }
 0x20c   : > { %v13384_v60 = vpop.f32.mrf.mxu1  ;;  %v15915_v2 = vld [vmem:[#allocation3 + $0x38] sm:$0xf]  ;;  %v15917_v51 = vld [vmem:[#allocation3 + $0x3c] sm:$0xf]  ;;  %v12167_v42 = vpop.f32.mrf.mxu0  ;;  %v15920_v56 = vadd.f32 %v12165_v24, %v12164_v59 }
 0x20d   : > { %11784 = vst [vmem:[#allocation3 + $0x68] sm:$0xff] %v11639_v33   ;;  %v11634_v39 = vpack.c.bf16 %v3329_v41, %v3328_v29  ;;  %v3334_v26 = vmax.f32 %v3302_v16, 0.0  ;;  %v3300_v61 = vadd.f32 %v3198_v15, %v18979_v58  ;;  %v3209_v5 = vadd.f32 %v13384_v60, %v12136_v54  ;;  %v13901_v33 = vld [vmem:[%s14258_s12 + $0x388] sm:$0xff]   ;;  %v18982_v58 = vld [vmem:[#allocation11_spill] sm:$0xff] }
 0x20e   : > { %v3200_v11 = vpop.f32.mrf.mxu1  ;;  %v3520_v13 = vld [vmem:[#allocation3 + $0x20] sm:$0xf]  ;;  %v3521_v6 = vld [vmem:[#allocation3 + $0x24] sm:$0xf]  ;;  %v15926_v8 = vcombine.low %v15915_v2, %v15917_v51  ;;  %v12168_v59 = vpop.f32.mrf.mxu0  ;;  %13465 = vmatprep.subr.bf16.mxu1 %v13901_v33 }
 0x20f   : > { %11783 = vst [vmem:[#allocation3 + $0x50] sm:$0xff] %v11634_v39   ;;  %v3332_v4 = vmax.f32 %v3300_v61, 0.0  ;;  %v3303_v29 = vadd.f32 %v3209_v5, %v18980_v32  ;;  %v3201_v54 = vadd.f32 %v15832_v23, %v3200_v11  ;;  %v3598_v9 = vshrl.u32 %v3520_v13, 16  ;;  %13466 = vmatpush3.bf16.msra.mxu1 %v13901_v33 }
 0x210   : > { %v13387_v41 = vpop.f32.mrf.mxu1  ;;  %v3601_v37 = vshll.u32 %v3520_v13, 16  ;;  %v3607_v16 = vshrl.u32 %v3521_v6, 16  ;;  %v3610_v15 = vshll.u32 %v3521_v6, 16  ;;  %v15931_v24 = vcombine.low %v3520_v13, %v3521_v6  ;;  %v12170_v39 = vpop.f32.mrf.mxu0 }
 0x211   : > { %v3335_v60 = vmax.f32 %v3303_v29, 0.0  ;;  %v3301_v14 = vadd.f32 %v3201_v54, %v18982_v58  ;;  %v3222_v62 = vadd.f32 %v13387_v41, %v12145_v22  ;;  %v3600_v7 = vrot.slane %v3598_v9, 7 }
 0x212   : > { %18981 = vst [vmem:[#allocation10_spill] sm:$0xff] %v15931_v24  ;;  %v3609_v61 = vrot.slane %v3607_v16, 7  ;;  %v3998_v5 = vrot.slane %v3598_v9, 4  ;;  %v3999_v32 = vrot.slane %v3601_v37, 5  ;;  %v4002_v23 = vrot.slane %v3610_v15, 5  ;;  %4723 = vmatprep.mubr.bf16.mxu1 %v15931_v24  ;;  %v3213_v11 = vpop.f32.mrf.mxu1  ;;  %v12171_v29 = vpop.f32.mrf.mxu0 }
 0x213   : > { %v11649_v18 = vpack.c.bf16 %v3335_v60, %v3334_v26  ;;  %v3333_v27 = vmax.f32 %v3301_v14, 0.0  ;;  %v3306_v13 = vadd.f32 %v3222_v62, %v18983_v10  ;;  %v3603_v6 = vor.u32 %v3601_v37, %v3600_v7  ;;  %v18988_v60 = vld [vmem:[#allocation22_spill] sm:$0xff] }
 0x214   : > { %v3605_v0 = vrot.slane %v3600_v7, 4  ;;  %v3612_v54 = vor.u32 %v3610_v15, %v3609_v61  ;;  %v4000_v22 = vor.u32 %v3999_v32, %v3998_v5  ;;  %v4004_v41 = vrot.slane %v3607_v16, 4  ;;  %v13388_v58 = vpop.f32.mrf.mxu1  ;;  %v12173_v45 = vpop.f32.mrf.mxu0  ;;  %v18984_v7 = vld [vmem:[#allocation19_spill] sm:$0xff] }
 0x215   : > { %11786 = vst [vmem:[#allocation3 + $0x98] sm:$0xff] %v11649_v18   ;;  %v11644_v50 = vpack.c.bf16 %v3333_v27, %v3332_v4  ;;  %v3338_v9 = vmax.f32 %v3306_v13, 0.0  ;;  %v15936_v53 = vadd.f32 %v12168_v59, %v12167_v42  ;;  %v3214_v24 = vadd.f32 %v15864_v44, %v3213_v11  ;;  %v18985_v18 = vld [vmem:[#allocation35_spill] sm:$0xff]  ;;  %v14060_v27 = vld [vmem:[%s17794_s10 + $0x44] ss:$16 sps:$4 sm:$0xff]  }
 0x216   : > { %v4001_v33 = vrot.slane %v4000_v22, 4  ;;  %v4005_v26 = vor.u32 %v4004_v41, %v4002_v23  ;;  %v3225_v14 = vadd.f32 %v13388_v58, %v15887_v46  ;;  %v15940_v10 = vadd.f32 %v12171_v29, %v12170_v39  ;;  %v3216_v62 = vpop.f32.mrf.mxu1  ;;  %v12174_v4 = vpop.f32.mrf.mxu0  ;;  %v13877_v41 = vld [vmem:[%s14258_s12 + $0x338] sm:$0xff]  }
 0x217   : > { %11785 = vst [vmem:[#allocation3 + $0x80] sm:$0xff] %v11644_v50   ;;  %v3304_v37 = vadd.f32 %v3214_v24, %v18984_v7  ;;  %v3217_v16 = vadd.f32 %v15871_v52, %v3216_v62  ;;  %v3604_v42 = vsel %vm14289_vm7, %v18985_v18, %v3603_v6  ;;  %v3613_v44 = vsel %vm14289_vm7, %v3605_v0, %v3612_v54  ;;  %v18989_v52 = vld [vmem:[#allocation20_spill] sm:$0xff]  ;;  %v13878_v7 = vld [vmem:[%s14258_s12 + $0x370] sm:$0xff]  }
 0x218   : > { %v4003_v15 = vsel %vm14324_vm8, %v4001_v33, %v4002_v23  ;;  %v4006_v46 = vrot.slane %v4005_v26, 4  ;;  %v3307_v39 = vadd.f32 %v3225_v14, %v18988_v60  ;;  %v13391_v50 = vpop.f32.mrf.mxu1  ;;  %v15952_v61 = vcombine.low %v3604_v42, %v3613_v44  ;;  %v12176_v13 = vpop.f32.mrf.mxu0  ;;  %v18991_v33 = vld [vmem:[#allocation15_spill] sm:$0xff] }
 0x219   : > { %v3336_v24 = vmax.f32 %v3304_v37, 0.0  ;;  %v3305_v5 = vadd.f32 %v3217_v16, %v18989_v52  ;;  %v3238_v32 = vadd.f32 %v13391_v50, %v15908_v57  ;;  %v18990_v11 = vshrl.u32 %v15915_v2, 16 }
 0x21a   : > { %v4011_v23 = vsel %vm14324_vm8, %v4006_v46, %v15757_v21  ;;  %v3339_v6 = vmax.f32 %v3307_v39, 0.0  ;;  %4724 = vmatmul.mubr.bf16.gmra.mxu1 %v15952_v61  ;;  %v3629_v29 = vshrl.u32 %v15917_v51, 16  ;;  %v3632_v54 = vshll.u32 %v15917_v51, 16  ;;  %v3229_v22 = vpop.f32.mrf.mxu1  ;;  %v12177_v21 = vpop.f32.mrf.mxu0 }
 0x21b   : > { %v3622_v0 = vrot.slane %v18990_v11, 7  ;;  %v15965_v58 = vcombine.low %v4003_v15, %v4011_v23  ;;  %v3337_v57 = vmax.f32 %v3305_v5, 0.0  ;;  %v15968_v26 = vadd.f32 %v3238_v32, %v18991_v33  ;;  %4731 = vmatprep.mubr.bf16.mxu1 %v15926_v8 }
 0x21c   : > { %v18992_v14 = vshll.u32 %v15915_v2, 16  ;;  %v11659_v37 = vpack.c.bf16 %v3339_v6, %v3338_v9  ;;  %v3631_v18 = vrot.slane %v3629_v29, 7  ;;  %v18993_v51 = vmov %v18990_v11  ;;  %v13392_v44 = vpop.f32.mrf.mxu1  ;;  %v15980_v52 = vpop.f32.mrf.mxu0 }
 0x21d   : > { %v3627_v16 = vrot.slane %v3622_v0, 4  ;;  %v4012_v42 = vrot.slane %v18993_v51, 4  ;;  %v11654_v15 = vpack.c.bf16 %v3337_v57, %v3336_v24  ;;  %v3342_v46 = vmax.f32 %v15968_v26, 0.0  ;;  %13422 = vmatmul.mubr.bf16.vlgmr.msra.gmra.mxu0 %v15965_v58  ;;  %v3526_v57 = vld [vmem:[#allocation3 + $0x50] sm:$0xf]  ;;  %v13882_v26 = vld [vmem:[%s14258_s12 + $0x368] sm:$0xff]  }
 0x21e   : > { %v3625_v62 = vor.u32 %v18992_v14, %v3622_v0  ;;  %v18994_v60 = vmov %v18992_v14  ;;  %v4018_v50 = vrot.slane %v3629_v29, 4  ;;  %11788 = vst [vmem:[#allocation3 + $0xc8] sm:$0xff] %v11659_v37   ;;  %v3634_v9 = vor.u32 %v3632_v54, %v3631_v18  ;;  %v3232_v24 = vpop.f32.mrf.mxu1  ;;  %12358 = vmatpush3.bf16.msra.mxu0 %v13877_v41  ;;  %v13879_v0 = vld [vmem:[%s14258_s12 + $0x330] sm:$0xff]   ;;  %v12180_v33 = vpop.f32.mrf.mxu0  ;;  %v18996_v41 = vld [vmem:[#allocation25_spill] sm:$0xff]  ;;  %v3527_v18 = vld [vmem:[#allocation3 + $0x54] sm:$0xf] }
 0x21f   : > { %v4013_v39 = vrot.slane %v18994_v60, 5  ;;  %v15982_v5 = vadd.f32 %v12174_v4, %v12173_v45  ;;  %v3230_v32 = vadd.f32 %v15895_v55, %v3229_v22  ;;  %v4016_v11 = vrot.slane %v3632_v54, 5  ;;  %11787 = vst [vmem:[#allocation3 + $0xb0] sm:$0xff] %v11654_v15   ;;  %12359 = vmatprep.subr.bf16.mxu0 %v13878_v7  ;;  %v13904_v45 = vld [vmem:[%s14258_s12 + $0x380] sm:$0xff]   ;;  %v18995_v4 = vld [vmem:[#allocation23_spill] sm:$0xff] }
 0x220   : > { %v3241_v23 = vadd.f32 %v13392_v44, %v15911_v36  ;;  %v15987_v6 = vadd.f32 %v12177_v21, %v12176_v13  ;;  %v3233_v29 = vadd.f32 %v15904_v3, %v3232_v24  ;;  %v13395_v54 = vpop.f32.mrf.mxu1  ;;  %v3626_v22 = vsel %vm14289_vm7, %v15763_v47, %v3625_v62  ;;  %v18997_v21 = vld [vmem:[#allocation24_spill] sm:$0xff]  ;;  %v16001_v51 = vpop.f32.mrf.mxu0  ;;  %13467 = vmatprep.subr.bf16.mxu1 %v13904_v45 }
 0x221   : > { %v4014_v2 = vor.u32 %v4013_v39, %v4012_v42  ;;  %v3308_v14 = vadd.f32 %v3230_v32, %v18995_v4  ;;  %v4019_v55 = vor.u32 %v4018_v50, %v4016_v11  ;;  %v3635_v36 = vsel %vm14289_vm7, %v3627_v16, %v3634_v9  ;;  %v13883_v16 = vld [vmem:[%s14258_s12 + $0x328] sm:$0xff]   ;;  %13468 = vmatpush3.bf16.msra.mxu1 %v13904_v45  ;;  %v13884_v24 = vld [vmem:[%s14258_s12 + $0x360] sm:$0xff]  }
 0x222   : > { %v3311_v3 = vadd.f32 %v3241_v23, %v18996_v41  ;;  %v3309_v37 = vadd.f32 %v3233_v29, %v18997_v21  ;;  %v3254_v7 = vadd.f32 %v13395_v54, %v15936_v53  ;;  %v16003_v15 = vcombine.low %v3626_v22, %v3635_v36  ;;  %v3245_v62 = vpop.f32.mrf.mxu1  ;;  %12360 = vmatpush3.bf16.msra.mxu0 %v13879_v0  ;;  %v18998_v53 = vld [vmem:[#allocation28_spill] sm:$0xff]  ;;  %v12183_v32 = vpop.f32.mrf.mxu0 }
 0x223   : > { %v4015_v13 = vrot.slane %v4014_v2, 4  ;;  %v3340_v42 = vmax.f32 %v3308_v14, 0.0  ;;  %v4020_v44 = vrot.slane %v4019_v55, 4  ;;  %v3642_v47 = vshrl.u32 %v3526_v57, 16  ;;  %12361 = vmatprep.subr.bf16.mxu0 %v13882_v26  ;;  %v16021_v26 = vld [vmem:[#allocation3 + $0x68] sm:$0xf] }
 0x224   : > { %v3343_v39 = vmax.f32 %v3311_v3, 0.0  ;;  %v3341_v50 = vmax.f32 %v3309_v37, 0.0  ;;  %v16009_v9 = vadd.f32 %v3254_v7, %v18998_v53  ;;  %4732 = vmatmul.mubr.bf16.gmra.mxu1 %v16003_v15  ;;  %v3645_v23 = vshll.u32 %v3526_v57, 16  ;;  %v16029_v3 = vpop.f32.mrf.mxu0 }
 0x225   : > { %v4017_v60 = vsel %vm14324_vm8, %v4015_v13, %v4016_v11  ;;  %v4025_v2 = vsel %vm14324_vm8, %v4020_v44, %v15761_v31  ;;  %v16016_v0 = vrot.slane %v3642_v47, 7  ;;  %v3651_v29 = vshrl.u32 %v3527_v18, 16  ;;  %v13396_v11 = vpop.f32.mrf.mxu1  ;;  %v16027_v13 = vld [vmem:[#allocation3 + $0x6c] sm:$0xf] }
 0x226   : > { %v16018_v45 = vcombine.low %v4017_v60, %v4025_v2  ;;  %v11669_v4 = vpack.c.bf16 %v3343_v39, %v3342_v46  ;;  %v11664_v14 = vpack.c.bf16 %v3341_v50, %v3340_v42  ;;  %v3346_v55 = vmax.f32 %v16009_v9, 0.0  ;;  %12362 = vmatpush3.bf16.msra.mxu0 %v13883_v16  ;;  %v13885_v46 = vld [vmem:[%s14258_s12 + $0x320] sm:$0xff]   ;;  %v13887_v44 = vld [vmem:[%s14258_s12 + $0x358] sm:$0xff]  }
 0x227   : > { %v16024_v54 = vor.u32 %v3645_v23, %v16016_v0  ;;  %v3649_v31 = vrot.slane %v16016_v0, 4  ;;  %v3653_v22 = vrot.slane %v3651_v29, 7  ;;  %v3654_v36 = vshll.u32 %v3527_v18, 16  ;;  %v3248_v41 = vpop.f32.mrf.mxu1  ;;  %12363 = vmatprep.subr.bf16.mxu0 %v13884_v24  ;;  %v18999_v24 = vld [vmem:[#allocation26_spill] sm:$0xff]  ;;  %v16099_v0 = vld [vmem:[#allocation3 + $0x98] sm:$0xf] }
 0x228   : > { %13425 = vmatprep.mubr.bf16.mxu0 %v16018_v45  ;;  %11790 = vst [vmem:[#allocation3 + $0xf8] sm:$0xff] %v11669_v4   ;;  %11789 = vst [vmem:[#allocation3 + $0xe0] sm:$0xff] %v11664_v14   ;;  %v4026_v21 = vrot.slane %v3642_v47, 4  ;;  %v4027_v37 = vrot.slane %v3645_v23, 5  ;;  %v4032_v7 = vrot.slane %v3651_v29, 4  ;;  %v16033_v42 = vcombine.low %v3526_v57, %v3527_v18 }
 0x229   : > { %v3656_v60 = vor.u32 %v3654_v36, %v3653_v22  ;;  %v4030_v39 = vrot.slane %v3654_v36, 5  ;;  %v12181_v50 = vadd.f32 %v12180_v33, %v15980_v52  ;;  %v3246_v53 = vadd.f32 %v15913_v40, %v3245_v62  ;;  %v13399_v16 = vpop.f32.mrf.mxu1  ;;  %v12186_v33 = vpop.f32.mrf.mxu0  ;;  %v13888_v40 = vld [vmem:[%s14258_s12 + $0x318] sm:$0xff]  }
 0x22a   : > { %v4028_v2 = vor.u32 %v4027_v37, %v4026_v21  ;;  %4739 = vmatprep.mubr.bf16.mxu1 %v16033_v42  ;;  %v18761_v4 = vshrl.u32 %v16021_v26, 16  ;;  %v18758_v47 = vshll.u32 %v16021_v26, 16  ;;  %v18759_v57 = vshrl.u32 %v16027_v13, 16  ;;  %12364 = vmatpush3.bf16.msra.mxu0 %v13885_v46  ;;  %v13889_v37 = vld [vmem:[%s14258_s12 + $0x350] sm:$0xff]  }
 0x22b   : > { %v4033_v18 = vor.u32 %v4032_v7, %v4030_v39  ;;  %v3312_v23 = vadd.f32 %v3246_v53, %v18999_v24  ;;  %v18760_v29 = vshll.u32 %v16027_v13, 16  ;;  %v3257_v52 = vadd.f32 %v13396_v11, %v15940_v10  ;;  %v3261_v21 = vpop.f32.mrf.mxu1  ;;  %12365 = vmatprep.subr.bf16.mxu0 %v13887_v44  ;;  %v19000_v11 = vld [vmem:[#allocation29_spill] sm:$0xff] }
 0x22c   : > { %v4029_v62 = vrot.slane %v4028_v2, 4  ;;  %v4040_v14 = vrot.slane %v18761_v4, 4  ;;  %v4041_v22 = vrot.slane %v18758_v47, 5  ;;  %v4046_v36 = vrot.slane %v18759_v57, 4  ;;  %v16065_v4 = vpop.f32.mrf.mxu0 }
 0x22d   : > { %v3344_v7 = vmax.f32 %v3312_v23, 0.0  ;;  %v4034_v53 = vrot.slane %v4033_v18, 4  ;;  %v4044_v10 = vrot.slane %v18760_v29, 5  ;;  %v3315_v46 = vadd.f32 %v3257_v52, %v19000_v11  ;;  %v13890_v52 = vld [vmem:[%s14258_s12 + $0x310] sm:$0xff]  }
 0x22e   : > { %v4031_v2 = vsel %vm14324_vm8, %v4029_v62, %v4030_v39  ;;  %v4042_v24 = vor.u32 %v4041_v22, %v4040_v14  ;;  %v16059_v47 = vadd.f32 %v12183_v32, %v16001_v51  ;;  %v3249_v44 = vadd.f32 %v15920_v56, %v3248_v41  ;;  %12366 = vmatpush3.bf16.msra.mxu0 %v13888_v40  ;;  %v19002_v14 = vld [vmem:[#allocation27_spill] sm:$0xff]  ;;  %v19003_v32 = vld [vmem:[#allocation38_spill] sm:$0xff]  ;;  %v13400_v41 = vpop.f32.mrf.mxu1 }
 0x22f   : > { %v4039_v18 = vsel %vm14324_vm8, %v4034_v53, %v15765_v35  ;;  %v4047_v23 = vor.u32 %v4046_v36, %v4044_v10  ;;  %v3347_v57 = vmax.f32 %v3315_v46, 0.0  ;;  %v3270_v29 = vadd.f32 %v13399_v16, %v12181_v50  ;;  %12367 = vmatprep.subr.bf16.mxu0 %v13889_v37  ;;  %v13893_v35 = vld [vmem:[%s14258_s12 + $0x348] sm:$0xff]   ;;  %v13907_v22 = vld [vmem:[%s14258_s12 + $0x438] sm:$0xff]   ;;  %v16086_v11 = vld [vmem:[#allocation3 + $0x80] sm:$0xf] }
 0x230   : > { %v16068_v39 = vcombine.low %v4031_v2, %v4039_v18  ;;  %v4043_v62 = vrot.slane %v4042_v24, 4  ;;  %v3313_v51 = vadd.f32 %v3249_v44, %v19002_v14  ;;  %v3648_v56 = vsel %vm14289_vm7, %v19003_v32, %v16024_v54  ;;  %v19004_v16 = vld [vmem:[#allocation31_spill] sm:$0xff]  ;;  %12493 = vmatprep.subr.bf16.mxu1 %v13907_v22  ;;  %v16109_v2 = vld [vmem:[#allocation3 + $0x9c] sm:$0xf]  ;;  %v12189_v24 = vpop.f32.mrf.mxu0 }
 0x231   : > { %v4048_v36 = vrot.slane %v4047_v23, 4  ;;  %v11679_v50 = vpack.c.bf16 %v3347_v57, %v3346_v55  ;;  %v16080_v40 = vadd.f32 %v3270_v29, %v19004_v16  ;;  %v3657_v53 = vsel %vm14289_vm7, %v3649_v31, %v3656_v60  ;;  %v16097_v55 = vld [vmem:[#allocation3 + $0x84] sm:$0xf]  ;;  %v19005_v31 = vld [vmem:[#allocation37_spill] sm:$0xff] }
 0x232   : > { %19001 = vst [vmem:[#allocation16_spill] sm:$0xff] %v16068_v39  ;;  %13426 = vmatmul.mubr.bf16.gmra.mxu0 %v16068_v39  ;;  %v4045_v54 = vsel %vm14324_vm8, %v4043_v62, %v4044_v10  ;;  %v3345_v37 = vmax.f32 %v3313_v51, 0.0  ;;  %v16091_v46 = vcombine.low %v3648_v56, %v3657_v53  ;;  %v16095_v9 = vcombine.low %v16021_v26, %v16027_v13  ;;  %v13894_v44 = vld [vmem:[%s14258_s12 + $0x308] sm:$0xff]   ;;  %v3264_v51 = vpop.f32.mrf.mxu1 }
 0x233   : > { %v4053_v60 = vsel %vm14324_vm8, %v4048_v36, %v19005_v31  ;;  %11792 = vst [vmem:[#allocation3 + $0x128] sm:$0xff] %v11679_v50   ;;  %v16106_v29 = vadd.f32 %v12186_v33, %v16029_v3  ;;  %v3262_v10 = vadd.f32 %v15982_v5, %v3261_v21  ;;  %12368 = vmatpush3.bf16.msra.mxu0 %v13890_v52  ;;  %v18768_v62 = vshrl.u32 %v16086_v11, 16  ;;  %v13895_v3 = vld [vmem:[%s14258_s12 + $0x340] sm:$0xff]   ;;  %v19007_v5 = vld [vmem:[#allocation14_spill] sm:$0xff]  ;;  %v19009_v57 = vld [vmem:[#allocation33_spill] sm:$0xff] }
 0x234   : > { %v16112_v18 = vcombine.low %v4045_v54, %v4053_v60  ;;  %v11674_v23 = vpack.c.bf16 %v3345_v37, %v3344_v7  ;;  %4740 = vmatmul.mubr.bf16.gmra.mxu1 %v16091_v46  ;;  %v18763_v14 = vshll.u32 %v16086_v11, 16  ;;  %12369 = vmatprep.subr.bf16.mxu0 %v13893_v35  ;;  %v18766_v21 = vshrl.u32 %v16097_v55, 16  ;;  %v12191_v54 = vpop.f32.mrf.mxu0  ;;  %v13896_v37 = vld [vmem:[%s14258_s12 + $0x300] sm:$0xff]  }
 0x235   : > { %4747 = vmatprep.mubr.bf16.mxu1 %v16095_v9  ;;  %v3316_v33 = vadd.f32 %v3262_v10, %v19007_v5  ;;  %v18762_v52 = vshll.u32 %v16097_v55, 16  ;;  %v18764_v7 = vshrl.u32 %v16099_v0, 16  ;;  %v4054_v32 = vrot.slane %v18768_v62, 4  ;;  %v13403_v5 = vpop.f32.mrf.mxu1 }
 0x236   : > { %19006 = vst [vmem:[#allocation8_spill] sm:$0xff] %v16112_v18  ;;  %13429 = vmatprep.mubr.bf16.mxu0 %v16112_v18  ;;  %11791 = vst [vmem:[#allocation3 + $0x110] sm:$0xff] %v11674_v23   ;;  %v4055_v56 = vrot.slane %v18763_v14, 5  ;;  %v18765_v35 = vshll.u32 %v16099_v0, 16  ;;  %v18767_v22 = vshrl.u32 %v16109_v2, 16  ;;  %v4060_v16 = vrot.slane %v18766_v21, 4 }
 0x237   : > { %v3348_v36 = vmax.f32 %v3316_v33, 0.0  ;;  %v4058_v50 = vrot.slane %v18762_v52, 5  ;;  %v18773_v53 = vshll.u32 %v16109_v2, 16  ;;  %12370 = vmatpush3.bf16.msra.mxu0 %v13894_v44  ;;  %v4068_v60 = vrot.slane %v18764_v7, 4  ;;  %v16143_v33 = vld [vmem:[%s14258_s12 + $0x478] sm:$0xff]  }
 0x238   : > { %v4056_v31 = vor.u32 %v4055_v56, %v4054_v32  ;;  %v4069_v10 = vrot.slane %v18765_v35, 5  ;;  %v4074_v23 = vrot.slane %v18767_v22, 4  ;;  %12371 = vmatprep.subr.bf16.mxu0 %v13895_v3  ;;  %v3273_v44 = vadd.f32 %v13400_v41, %v16059_v47  ;;  %v19011_v41 = vld [vmem:[#allocation30_spill] sm:$0xff] }
 0x239   : > { %v4061_v52 = vor.u32 %v4060_v16, %v4058_v50  ;;  %v4072_v14 = vrot.slane %v18773_v53, 5  ;;  %v16149_v32 = vadd.f32 %v12189_v24, %v16065_v4  ;;  %v3265_v35 = vadd.f32 %v15987_v6, %v3264_v51  ;;  %v12192_v53 = vpop.f32.mrf.mxu0 }
 0x23a   : > { %v4057_v56 = vrot.slane %v4056_v31, 4  ;;  %v4070_v7 = vor.u32 %v4069_v10, %v4068_v60  ;;  %v19008_v21 = vshrl.u32 %v16021_v26, 16  ;;  %v3319_v18 = vadd.f32 %v3273_v44, %v19009_v57  ;;  %v3277_v31 = vpop.f32.mrf.mxu1  ;;  %v16175_v10 = vld [vmem:[#allocation3 + $0xb4] sm:$0xf] }
 0x23b   : > { %v4062_v62 = vrot.slane %v4061_v52, 4  ;;  %v4075_v3 = vor.u32 %v4074_v23, %v4072_v14  ;;  %v19010_v16 = vshrl.u32 %v16027_v13, 16  ;;  %12372 = vmatpush3.bf16.msra.mxu0 %v13896_v37  ;;  %v3317_v24 = vadd.f32 %v3265_v35, %v19011_v41  ;;  %v16173_v35 = vld [vmem:[#allocation3 + $0xb0] sm:$0xf]  ;;  %v12194_v44 = vpop.f32.mrf.mxu0 }
 0x23c   : > { %v3666_v22 = vrot.slane %v19008_v21, 7  ;;  %v4059_v4 = vsel %vm14324_vm8, %v4057_v56, %v4058_v50  ;;  %v4071_v47 = vrot.slane %v4070_v7, 4  ;;  %v19012_v6 = vshll.u32 %v16021_v26, 16  ;;  %13501 = vmatprep.subr.bf16.mxu0 %v16143_v33 }
 0x23d   : > { %v3675_v39 = vrot.slane %v19010_v16, 7  ;;  %v4067_v57 = vsel %vm14324_vm8, %v4062_v62, %v15799_v20  ;;  %v4076_v21 = vrot.slane %v4075_v3, 4  ;;  %v3351_v52 = vmax.f32 %v3319_v18, 0.0 }
 0x23e   : > { %v3669_v51 = vor.u32 %v19012_v6, %v3666_v22  ;;  %v3671_v60 = vrot.slane %v3666_v22, 4  ;;  %v16166_v37 = vcombine.low %v4059_v4, %v4067_v57  ;;  %v4073_v7 = vsel %vm14324_vm8, %v4071_v47, %v4072_v14 }
 0x23f   : > { %v3349_v50 = vmax.f32 %v3317_v24, 0.0  ;;  %v4081_v20 = vsel %vm14324_vm8, %v4076_v21, %v15801_v12  ;;  %v19013_v18 = vmax.f32 %v16080_v40, 0.0  ;;  %v19014_v22 = vshll.u32 %v16027_v13, 16  ;;  %v16192_v12 = vld [vmem:[#allocation3 + $0xc8] sm:$0xf]  ;;  %v13404_v40 = vpop.f32.mrf.mxu1  ;;  %v12195_v21 = vpop.f32.mrf.mxu0 }
 0x240   : > { %v3670_v26 = vsel %vm14289_vm7, %v15784_v30, %v3669_v51  ;;  %v16186_v14 = vcombine.low %v16086_v11, %v16097_v55  ;;  %13430 = vmatmul.mubr.bf16.gmra.mxu0 %v16166_v37  ;;  %v16189_v30 = vcombine.low %v4073_v7, %v4081_v20  ;;  %v12193_v3 = vadd.f32 %v12192_v53, %v12191_v54  ;;  %v16204_v24 = vld [vmem:[#allocation3 + $0xcc] sm:$0xf] }
 0x241   : > { %v11689_v62 = vpack.c.bf16 %v3351_v52, %v19013_v18  ;;  %v3678_v23 = vor.u32 %v19014_v22, %v3675_v39  ;;  %v11684_v56 = vpack.c.bf16 %v3349_v50, %v3348_v36  ;;  %v3278_v16 = vadd.f32 %v16106_v29, %v3277_v31  ;;  %v19015_v29 = vld [vmem:[#allocation34_spill] sm:$0xff]  ;;  %v3280_v50 = vpop.f32.mrf.mxu1 }
 0x242   : > { %v3730_v39 = vshrl.u32 %v16173_v35, 16  ;;  %v3733_v4 = vshll.u32 %v16173_v35, 16  ;;  %v3739_v47 = vshrl.u32 %v16175_v10, 16  ;;  %13433 = vmatprep.mubr.bf16.mxu0 %v16189_v30  ;;  %v3286_v53 = vadd.f32 %v13403_v5, %v12193_v3 }
 0x243   : > { %11794 = vst [vmem:[#allocation3 + $0x158] sm:$0xff] %v11689_v62   ;;  %v3679_v13 = vsel %vm14289_vm7, %v3671_v60, %v3678_v23  ;;  %11793 = vst [vmem:[#allocation3 + $0x140] sm:$0xff] %v11684_v56   ;;  %v3320_v54 = vadd.f32 %v3278_v16, %v19015_v29  ;;  %v3742_v41 = vshll.u32 %v16175_v10, 16  ;;  %v3752_v57 = vshrl.u32 %v16192_v12, 16 }
 0x244   : > { %v16200_v36 = vcombine.low %v3670_v26, %v3679_v13  ;;  %v4082_v6 = vrot.slane %v3730_v39, 4  ;;  %v4083_v51 = vrot.slane %v3733_v4, 5  ;;  %v4088_v31 = vrot.slane %v3739_v47, 4 }
 0x245   : > { %v3322_v5 = vadd.f32 %v3286_v53, %v15780_v43  ;;  %v3352_v52 = vmax.f32 %v3320_v54, 0.0  ;;  %v4086_v60 = vrot.slane %v3742_v41, 5  ;;  %v18774_v7 = vshll.u32 %v16192_v12, 16 }
 0x246   : > { %4748 = vmatmul.mubr.bf16.gmra.mxu1 %v16200_v36  ;;  %v4084_v26 = vor.u32 %v4083_v51, %v4082_v6  ;;  %v18776_v20 = vshrl.u32 %v16204_v24, 16  ;;  %v18775_v18 = vshll.u32 %v16204_v24, 16  ;;  %v4096_v62 = vrot.slane %v3752_v57, 4 }
 0x247   : > { %4755 = vmatprep.mubr.bf16.mxu1 %v16186_v14  ;;  %v3354_v22 = vmax.f32 %v3322_v5, 0.0  ;;  %v4089_v23 = vor.u32 %v4088_v31, %v4086_v60  ;;  %v4097_v43 = vrot.slane %v18774_v7, 5  ;;  %v12196_v56 = vadd.f32 %v12195_v21, %v12194_v44  ;;  %v19017_v44 = vld [vmem:[#allocation36_spill] sm:$0xff] }
 0x248   : > { %v4085_v3 = vrot.slane %v4084_v26, 4  ;;  %v4100_v16 = vrot.slane %v18775_v18, 5  ;;  %v4102_v13 = vrot.slane %v18776_v20, 4  ;;  %v3281_v53 = vadd.f32 %v16149_v32, %v3280_v50 }
 0x249   : > { %v4090_v29 = vrot.slane %v4089_v23, 4  ;;  %v4098_v54 = vor.u32 %v4097_v43, %v4096_v62  ;;  %v3289_v6 = vadd.f32 %v13404_v40, %v12196_v56  ;;  %v19016_v51 = vshrl.u32 %v16086_v11, 16  ;;  %v16243_v23 = vld [vmem:[#allocation3 + $0xe0] sm:$0xf] }
 0x24a   : > { %v4087_v31 = vsel %vm14324_vm8, %v4085_v3, %v4086_v60  ;;  %v4103_v7 = vor.u32 %v4102_v13, %v4100_v16  ;;  %v3321_v21 = vadd.f32 %v3281_v53, %v19017_v44  ;;  %v19018_v26 = vshrl.u32 %v16097_v55, 16 }
 0x24b   : > { %v3688_v5 = vrot.slane %v19016_v51, 7  ;;  %v4095_v20 = vsel %vm14324_vm8, %v4090_v29, %v15820_v1  ;;  %v4099_v32 = vrot.slane %v4098_v54, 4  ;;  %v3323_v50 = vadd.f32 %v3289_v6, %v15803_v17  ;;  %v16265_v6 = vld [vmem:[#allocation3 + $0xf8] sm:$0xf] }
 0x24c   : > { %v3697_v18 = vrot.slane %v19018_v26, 7  ;;  %v19019_v40 = vshll.u32 %v16086_v11, 16  ;;  %v16245_v43 = vcombine.low %v4087_v31, %v4095_v20  ;;  %v4104_v60 = vrot.slane %v4103_v7, 4  ;;  %v16254_v11 = vld [vmem:[#allocation3 + $0xe4] sm:$0xf] }
 0x24d   : > { %v3353_v56 = vmax.f32 %v3321_v21, 0.0  ;;  %v3693_v3 = vrot.slane %v3688_v5, 4  ;;  %v4101_v13 = vsel %vm14324_vm8, %v4099_v32, %v4100_v16  ;;  %v3355_v53 = vmax.f32 %v3323_v50, 0.0 }
 0x24e   : > { %v3691_v62 = vor.u32 %v19019_v40, %v3688_v5  ;;  %v19020_v17 = vshll.u32 %v16097_v55, 16  ;;  %13434 = vmatmul.mubr.bf16.gmra.mxu0 %v16245_v43  ;;  %v4109_v7 = vsel %vm14324_vm8, %v4104_v60, %v15815_v38  ;;  %v16262_v16 = vcombine.low %v16099_v0, %v16109_v2 }
 0x24f   : > { %v11694_v20 = vpack.c.bf16 %v3353_v56, %v3352_v52  ;;  %v18800_v54 = vshrl.u32 %v16243_v23, 16  ;;  %v16269_v55 = vcombine.low %v4101_v13, %v4109_v7  ;;  %v18782_v5 = vshll.u32 %v16243_v23, 16 }
 0x250   : > { %v3692_v1 = vsel %vm14289_vm7, %v15807_v19, %v3691_v62  ;;  %v3700_v29 = vor.u32 %v19020_v17, %v3697_v18  ;;  %v16267_v19 = vld [vmem:[#allocation3 + $0xfc] sm:$0xf]  ;;  %v11699_v18 = vpack.c.bf16 %v3355_v53, %v3354_v22  ;;  %v18798_v52 = vshrl.u32 %v16254_v11, 16  ;;  %v16301_v17 = vld [vmem:[#allocation3 + $0x110] sm:$0xf] }
 0x251   : > { %11795 = vst [vmem:[#allocation3 + $0x170] sm:$0xff] %v11694_v20   ;;  %v18780_v31 = vshll.u32 %v16254_v11, 16  ;;  %v4110_v44 = vrot.slane %v18800_v54, 4  ;;  %13437 = vmatprep.mubr.bf16.mxu0 %v16269_v55  ;;  %v4111_v22 = vrot.slane %v18782_v5, 5  ;;  %v18777_v21 = vshrl.u32 %v16265_v6, 16  ;;  %v19029_v54 = vld [vmem:[#allocation5_spill] sm:$0xff] }
 0x252   : > { %v3701_v51 = vsel %vm14289_vm7, %v3693_v3, %v3700_v29  ;;  %11796 = vst [vmem:[#allocation3 + $0x188] sm:$0xff] %v11699_v18   ;;  %v18778_v26 = vshll.u32 %v16265_v6, 16  ;;  %v18779_v32 = vshrl.u32 %v16267_v19, 16  ;;  %v4116_v40 = vrot.slane %v18798_v52, 4 }
 0x253   : > { %v16274_v38 = vcombine.low %v3692_v1, %v3701_v51  ;;  %v4114_v50 = vrot.slane %v18780_v31, 5  ;;  %v18781_v62 = vshll.u32 %v16267_v19, 16  ;;  %v19021_v60 = vshrl.u32 %v16099_v0, 16 }
 0x254   : > { %v4112_v3 = vor.u32 %v4111_v22, %v4110_v44  ;;  %v4124_v13 = vrot.slane %v18777_v21, 4  ;;  %v4125_v53 = vrot.slane %v18778_v26, 5  ;;  %v4130_v1 = vrot.slane %v18779_v32, 4  ;;  %v16313_v32 = vld [vmem:[#allocation3 + $0x114] sm:$0xf] }
 0x255   : > { %4756 = vmatmul.mubr.bf16.gmra.mxu1 %v16274_v38  ;;  %v3710_v56 = vrot.slane %v19021_v60, 7  ;;  %v4117_v29 = vor.u32 %v4116_v40, %v4114_v50  ;;  %v4128_v7 = vrot.slane %v18781_v62, 5  ;;  %v19022_v20 = vshll.u32 %v16099_v0, 16 }
 0x256   : > { %4763 = vmatprep.mubr.bf16.mxu1 %v16262_v16  ;;  %v4113_v44 = vrot.slane %v4112_v3, 4  ;;  %v4126_v22 = vor.u32 %v4125_v53, %v4124_v13  ;;  %v19023_v60 = vshrl.u32 %v16109_v2, 16  ;;  %v16311_v26 = vcombine.low %v16173_v35, %v16175_v10 }
 0x257   : > { %v3713_v18 = vor.u32 %v19022_v20, %v3710_v56  ;;  %v3715_v51 = vrot.slane %v3710_v56, 4  ;;  %v4118_v31 = vrot.slane %v4117_v29, 4  ;;  %v4131_v40 = vor.u32 %v4130_v1, %v4128_v7 }
 0x258   : > { %v3719_v21 = vrot.slane %v19023_v60, 7  ;;  %v18797_v0 = vshrl.u32 %v16301_v17, 16  ;;  %v4115_v56 = vsel %vm14324_vm8, %v4113_v44, %v4114_v50  ;;  %v4127_v3 = vrot.slane %v4126_v22, 4  ;;  %v16339_v44 = vld [vmem:[#allocation3 + $0x12c] sm:$0xf] }
 0x259   : > { %v3714_v62 = vsel %vm14289_vm7, %v15822_v48, %v3713_v18  ;;  %v19024_v13 = vshll.u32 %v16109_v2, 16  ;;  %v18785_v20 = vshll.u32 %v16301_v17, 16  ;;  %v4123_v29 = vsel %vm14324_vm8, %v4118_v31, %v15838_v34  ;;  %v16329_v18 = vld [vmem:[#allocation3 + $0x128] sm:$0xf] }
 0x25a   : > { %v4132_v1 = vrot.slane %v4131_v40, 4  ;;  %v18787_v60 = vshrl.u32 %v16313_v32, 16  ;;  %v18783_v48 = vshll.u32 %v16313_v32, 16  ;;  %v16331_v5 = vcombine.low %v4115_v56, %v4123_v29 }
 0x25b   : > { %v3722_v53 = vor.u32 %v19024_v13, %v3719_v21  ;;  %v4129_v50 = vsel %vm14324_vm8, %v4127_v3, %v4128_v7  ;;  %v4138_v21 = vrot.slane %v18797_v0, 4  ;;  %v4139_v22 = vrot.slane %v18785_v20, 5 }
 0x25c   : > { %v4137_v34 = vsel %vm14324_vm8, %v4132_v1, %v15850_v28  ;;  %v4142_v7 = vrot.slane %v18783_v48, 5  ;;  %13438 = vmatmul.mubr.bf16.gmra.mxu0 %v16331_v5  ;;  %v4144_v40 = vrot.slane %v18787_v60, 4  ;;  %v18784_v56 = vshrl.u32 %v16329_v18, 16  ;;  %v19025_v60 = vld [vmem:[#allocation17_spill] sm:$0xff] }
 0x25d   : > { %v3723_v2 = vsel %vm14289_vm7, %v3715_v51, %v3722_v53  ;;  %v16351_v51 = vcombine.low %v4129_v50, %v4137_v34  ;;  %v18786_v3 = vshll.u32 %v16329_v18, 16  ;;  %v4140_v28 = vor.u32 %v4139_v22, %v4138_v21 }
 0x25e   : > { %v16344_v31 = vcombine.low %v3714_v62, %v3723_v2  ;;  %v18796_v62 = vshrl.u32 %v16339_v44, 16  ;;  %v18788_v13 = vshll.u32 %v16339_v44, 16  ;;  %v3732_v53 = vrot.slane %v3730_v39, 7 }
 0x25f   : > { %13441 = vmatprep.mubr.bf16.mxu0 %v16351_v51  ;;  %v4145_v29 = vor.u32 %v4144_v40, %v4142_v7  ;;  %v4152_v1 = vrot.slane %v18784_v56, 4  ;;  %v4153_v50 = vrot.slane %v18786_v3, 5  ;;  %v3741_v2 = vrot.slane %v3739_v47, 7  ;;  %v16376_v40 = vld [vmem:[#allocation3 + $0x140] sm:$0xf] }
 0x260   : > { %4764 = vmatmul.mubr.bf16.gmra.mxu1 %v16344_v31  ;;  %v4141_v21 = vrot.slane %v4140_v28, 4  ;;  %v4156_v34 = vrot.slane %v18788_v13, 5  ;;  %v4158_v39 = vrot.slane %v18796_v62, 4  ;;  %v3735_v22 = vor.u32 %v3733_v4, %v3732_v53  ;;  %v16389_v4 = vld [vmem:[#allocation3 + $0x144] sm:$0xf] }
 0x261   : > { %4771 = vmatprep.mubr.bf16.mxu1 %v16311_v26  ;;  %v4146_v48 = vrot.slane %v4145_v29, 4  ;;  %v4154_v56 = vor.u32 %v4153_v50, %v4152_v1  ;;  %v3737_v20 = vrot.slane %v3732_v53, 4  ;;  %v3744_v3 = vor.u32 %v3742_v41, %v3741_v2  ;;  %v16397_v29 = vld [vmem:[#allocation3 + $0x158] sm:$0xf] }
 0x262   : > { %v4143_v47 = vsel %vm14324_vm8, %v4141_v21, %v4142_v7  ;;  %v4159_v28 = vor.u32 %v4158_v39, %v4156_v34  ;;  %v3736_v13 = vsel %vm14289_vm7, %v19025_v60, %v3735_v22  ;;  %v16387_v35 = vcombine.low %v16192_v12, %v16204_v24  ;;  %v16404_v21 = vld [vmem:[#allocation3 + $0x15c] sm:$0xf] }
 0x263   : > { %v4151_v53 = vsel %vm14324_vm8, %v4146_v48, %v15874_v25  ;;  %v4155_v10 = vrot.slane %v4154_v56, 4  ;;  %v3745_v41 = vsel %vm14289_vm7, %v3737_v20, %v3744_v3  ;;  %v18792_v7 = vshrl.u32 %v16376_v40, 16 }
 0x264   : > { %v16399_v1 = vcombine.low %v4143_v47, %v4151_v53  ;;  %v4160_v60 = vrot.slane %v4159_v28, 4  ;;  %v16401_v50 = vcombine.low %v3736_v13, %v3745_v41  ;;  %v18790_v2 = vshll.u32 %v16376_v40, 16 }
 0x265   : > { %v4157_v25 = vsel %vm14324_vm8, %v4155_v10, %v4156_v34  ;;  %v18791_v48 = vshrl.u32 %v16389_v4, 16  ;;  %v18789_v20 = vshll.u32 %v16389_v4, 16  ;;  %v4166_v56 = vrot.slane %v18792_v7, 4 }
 0x266   : > { %13442 = vmatmul.mubr.bf16.gmra.mxu0 %v16399_v1  ;;  %v4165_v3 = vsel %vm14324_vm8, %v4160_v60, %v15878_v63  ;;  %v4167_v13 = vrot.slane %v18790_v2, 5  ;;  %v18793_v34 = vshrl.u32 %v16397_v29, 16  ;;  %v18794_v39 = vshll.u32 %v16397_v29, 16 }
 0x267   : > { %v16421_v22 = vcombine.low %v4157_v25, %v4165_v3  ;;  %v4170_v47 = vrot.slane %v18789_v20, 5  ;;  %v4172_v28 = vrot.slane %v18791_v48, 4  ;;  %v18795_v63 = vshrl.u32 %v16404_v21, 16 }
 0x268   : > { %4772 = vmatmul.mubr.bf16.gmra.mxu1 %v16401_v50  ;;  %v4168_v53 = vor.u32 %v4167_v13, %v4166_v56  ;;  %v18799_v10 = vshll.u32 %v16404_v21, 16  ;;  %v4180_v41 = vrot.slane %v18793_v34, 4  ;;  %v4181_v60 = vrot.slane %v18794_v39, 5  ;;  %v16441_v13 = vld [vmem:[#allocation3 + $0x170] sm:$0xf] }
 0x269   : > { %4779 = vmatprep.mubr.bf16.mxu1 %v16387_v35  ;;  %13445 = vmatprep.mubr.bf16.mxu0 %v16421_v22  ;;  %v4173_v25 = vor.u32 %v4172_v28, %v4170_v47  ;;  %v4186_v3 = vrot.slane %v18795_v63, 4  ;;  %v3754_v20 = vrot.slane %v3752_v57, 7  ;;  %v19026_v2 = vshrl.u32 %v16204_v24, 16 }
 0x26a   : > { %v4169_v48 = vrot.slane %v4168_v53, 4  ;;  %v4182_v7 = vor.u32 %v4181_v60, %v4180_v41  ;;  %v4184_v34 = vrot.slane %v18799_v10, 5  ;;  %v16447_v39 = vcombine.low %v16243_v23, %v16254_v11  ;;  %v16455_v60 = vld [vmem:[#allocation3 + $0x174] sm:$0xf] }
 0x26b   : > { %v3763_v56 = vrot.slane %v19026_v2, 7  ;;  %v4174_v28 = vrot.slane %v4173_v25, 4  ;;  %v19027_v63 = vshll.u32 %v16192_v12, 16  ;;  %v3759_v0 = vrot.slane %v3754_v20, 4 }
 0x26c   : > { %v19028_v57 = vshll.u32 %v16204_v24, 16  ;;  %v4171_v2 = vsel %vm14324_vm8, %v4169_v48, %v4170_v47  ;;  %v4183_v53 = vrot.slane %v4182_v7, 4  ;;  %v4187_v41 = vor.u32 %v4186_v3, %v4184_v34 }
 0x26d   : > { %v3757_v62 = vor.u32 %v19027_v63, %v3754_v20  ;;  %v18802_v10 = vshrl.u32 %v16441_v13, 16  ;;  %v4179_v25 = vsel %vm14324_vm8, %v4174_v28, %v15889_v49  ;;  %v18801_v20 = vshll.u32 %v16441_v13, 16 }
 0x26e   : > { %v3766_v52 = vor.u32 %v19028_v57, %v3763_v56  ;;  %v16467_v48 = vcombine.low %v4171_v2, %v4179_v25  ;;  %v4185_v7 = vsel %vm14324_vm8, %v4183_v53, %v4184_v34  ;;  %v4188_v47 = vrot.slane %v4187_v41, 4  ;;  %v19032_v34 = vld [vmem:[#allocation9_spill] sm:$0xff] }
 0x26f   : > { %v3758_v12 = vsel %vm14289_vm7, %v19029_v54, %v3757_v62  ;;  %v18806_v3 = vshrl.u32 %v16455_v60, 16  ;;  %v18803_v49 = vshll.u32 %v16455_v60, 16  ;;  %v4194_v54 = vrot.slane %v18802_v10, 4 }
 0x270   : > { %v3767_v24 = vsel %vm14289_vm7, %v3759_v0, %v3766_v52  ;;  %19030 = vst [vmem:[#allocation13_spill] sm:$0xff] %v16467_v48  ;;  %v4195_v52 = vrot.slane %v18801_v20, 5  ;;  %13446 = vmatmul.mubr.bf16.gmra.mxu0 %v16467_v48  ;;  %v19031_v0 = vld [vmem:[#allocation7_spill] sm:$0xff]  ;;  %v19033_v56 = vshrl.u32 %v19032_v34, 16  ;;  %v19034_v57 = vshrl.u32 %v16243_v23, 16 }
 0x271   : > { %v16471_v63 = vcombine.low %v3758_v12, %v3767_v24  ;;  %v4193_v62 = vsel %vm14324_vm8, %v4188_v47, %v19031_v0  ;;  %v19035_v53 = vshrl.u32 %v16254_v11, 16  ;;  %v4198_v24 = vrot.slane %v18803_v49, 5  ;;  %v19036_v0 = vld [vmem:[#allocation32_spill] sm:$0xff] }
 0x272   : > { %v10883_v28 = vrot.slane %v19033_v56, 11  ;;  %v3776_v2 = vrot.slane %v19034_v57, 7  ;;  %v16490_v25 = vcombine.low %v4185_v7, %v4193_v62  ;;  %v4196_v12 = vor.u32 %v4195_v52, %v4194_v54 }
 0x273   : > { %4780 = vmatmul.mubr.bf16.gmra.mxu1 %v16471_v63  ;;  %v3785_v41 = vrot.slane %v19035_v53, 7  ;;  %v4200_v47 = vrot.slane %v18806_v3, 4  ;;  %v19037_v34 = vshll.u32 %v19036_v0, 16  ;;  %v19038_v20 = vshll.u32 %v16243_v23, 16 }
 0x274   : > { %4787 = vmatprep.mubr.bf16.mxu1 %v16447_v39  ;;  %v3781_v10 = vrot.slane %v3776_v2, 4  ;;  %v19039_v53 = vshll.u32 %v16254_v11, 16  ;;  %13449 = vmatprep.mubr.bf16.mxu0 %v16490_v25  ;;  %v4197_v62 = vrot.slane %v4196_v12, 4  ;;  %v19040_v52 = vshrl.u32 %v16265_v6, 16  ;;  %v19042_v12 = vld [vmem:[#allocation39_spill] sm:$0xff] }
 0x275   : > { %v4206_v56 = vrot.slane %v19037_v34, 5  ;;  %v3779_v57 = vor.u32 %v19038_v20, %v3776_v2  ;;  %v4201_v54 = vor.u32 %v4200_v47, %v4198_v24  ;;  %v19041_v48 = vshrl.u32 %v16267_v19, 16 }
 0x276   : > { %v3788_v7 = vor.u32 %v19039_v53, %v3785_v41  ;;  %v3798_v49 = vrot.slane %v19040_v52, 7  ;;  %v4199_v11 = vsel %vm14324_vm8, %v4197_v62, %v4198_v24  ;;  %v16518_v41 = vcombine.low %v16265_v6, %v16267_v19  ;;  %v19046_v52 = vld [vmem:[#allocation10_spill] sm:$0xff] }
 0x277   : > { %v3807_v3 = vrot.slane %v19041_v48, 7  ;;  %v3780_v0 = vsel %vm14289_vm7, %v10883_v28, %v3779_v57  ;;  %v4202_v20 = vrot.slane %v4201_v54, 4  ;;  %v19043_v47 = vshrl.u32 %v19042_v12, 16 }
 0x278   : > { %v3789_v23 = vsel %vm14289_vm7, %v3781_v10, %v3788_v7  ;;  %v19044_v28 = vshll.u32 %v16265_v6, 16  ;;  %v3803_v10 = vrot.slane %v3798_v49, 4  ;;  %v19045_v53 = vshll.u32 %v16267_v19, 16  ;;  %v3549_v7 = vld [vmem:[#allocation3 + $0x10c] sm:$0x8] }
 0x279   : > { %v16514_v2 = vcombine.low %v3780_v0, %v3789_v23  ;;  %v10884_v34 = vrot.slane %v19043_v47, 11  ;;  %v4207_v48 = vsel %vm14324_vm8, %v4202_v20, %v4206_v56  ;;  %v3813_v54 = vshrl.u32 %v3549_v7, 16 }
 0x27a   : > { %v3801_v57 = vor.u32 %v19044_v28, %v3798_v49  ;;  %v3810_v24 = vor.u32 %v19045_v53, %v3807_v3  ;;  %v16528_v62 = vcombine.low %v4199_v11, %v4207_v48  ;;  %v19047_v3 = vshrl.u32 %v16301_v17, 16  ;;  %v13911_v53 = vld [vmem:[%s14258_s12 + $0x470] sm:$0xff]  }
 0x27b   : > { %4788 = vmatmul.mubr.bf16.gmra.mxu1 %v16514_v2  ;;  %v19048_v56 = vshrl.u32 %v16313_v32, 16  ;;  %v10885_v11 = vrot.slane %v3813_v54, 11  ;;  %v16546_v20 = vcombine.low %v16301_v17, %v16313_v32  ;;  %v19051_v12 = vshll.u32 %v16301_v17, 16 }
 0x27c   : > { %4795 = vmatprep.mubr.bf16.mxu1 %v16518_v41  ;;  %13450 = vmatmul.mubr.bf16.gmra.mxu0 %v16528_v62  ;;  %v3802_v6 = vsel %vm14289_vm7, %v10884_v34, %v3801_v57  ;;  %v3811_v19 = vsel %vm14289_vm7, %v3803_v10, %v3810_v24  ;;  %v3820_v49 = vrot.slane %v19047_v3, 7  ;;  %v19052_v48 = vshll.u32 %v16313_v32, 16  ;;  %v3552_v57 = vld [vmem:[#allocation3 + $0x124] sm:$0x8]  ;;  %v12237_v10 = vpop.f32.mrf.mxu1 }
 0x27d   : > { %5268 = vmatprep.mubr.bf16.mxu0 %v19046_v52  ;;  %v3829_v0 = vrot.slane %v19048_v56, 7  ;;  %v16542_v23 = vcombine.low %v3802_v6, %v3811_v19  ;;  %19050 = vst [vmem:[#allocation18_spill] sm:$0xff] %v16546_v20  ;;  %v3835_v24 = vshrl.u32 %v3552_v57, 16  ;;  %v19053_v7 = vshrl.u32 %v16329_v18, 16 }
 0x27e   : > { %v3823_v47 = vor.u32 %v19051_v12, %v3820_v49  ;;  %v3825_v34 = vrot.slane %v3820_v49, 4  ;;  %v19054_v52 = vshrl.u32 %v16339_v44, 16  ;;  %v12238_v19 = vpop.f32.mrf.mxu1 }
 0x27f   : > { %19049 = vst [vmem:[#allocation12_spill] sm:$0xff] %v16542_v23  ;;  %v3832_v28 = vor.u32 %v19052_v48, %v3829_v0  ;;  %v3842_v54 = vrot.slane %v19053_v7, 7  ;;  %v16567_v3 = vadd.f32 %v12238_v19, %v12237_v10  ;;  %v10886_v56 = vrot.slane %v3835_v24, 11 }
 0x280   : > { %v3824_v17 = vsel %vm14289_vm7, %v10885_v11, %v3823_v47  ;;  %v3851_v6 = vrot.slane %v19054_v52, 7  ;;  %v16573_v0 = vcombine.low %v16329_v18, %v16339_v44  ;;  %v19057_v11 = vshll.u32 %v16329_v18, 16 }
 0x281   : > { %v3833_v32 = vsel %vm14289_vm7, %v3825_v34, %v3832_v28  ;;  %v3847_v47 = vrot.slane %v3842_v54, 4  ;;  %v19058_v34 = vshll.u32 %v16339_v44, 16  ;;  %v13921_v28 = vld [vmem:[%s14258_s12 + $0x460] sm:$0xff]   ;;  %v19059_v10 = vshrl.u32 %v16376_v40, 16 }
 0x282   : > { %v16569_v49 = vcombine.low %v3824_v17, %v3833_v32  ;;  %19056 = vst [vmem:[#allocation21_spill] sm:$0xff] %v16573_v0  ;;  %v3845_v12 = vor.u32 %v19057_v11, %v3842_v54  ;;  %v19060_v24 = vshrl.u32 %v16389_v4, 16  ;;  %v13926_v32 = vld [vmem:[%s14258_s12 + $0x458] sm:$0xff]   ;;  %v16597_v52 = vcombine.low %v16376_v40, %v16389_v4 }
 0x283   : > { %4796 = vmatmul.mubr.bf16.gmra.mxu1 %v16542_v23  ;;  %v3854_v48 = vor.u32 %v19058_v34, %v3851_v6  ;;  %v19063_v6 = vshll.u32 %v16376_v40, 16  ;;  %v19064_v11 = vshll.u32 %v16389_v4, 16 }
 0x284   : > { %4803 = vmatprep.mubr.bf16.mxu1 %v16546_v20  ;;  %5269 = vmatmul.mubr.bf16.vlgmr.msra.gmra.mxu0 %v15952_v61  ;;  %v13916_v61 = vld [vmem:[%s14258_s12 + $0x468] sm:$0xff]   ;;  %19055 = vst [vmem:[#allocation11_spill] sm:$0xff] %v16569_v49  ;;  %v3846_v18 = vsel %vm14289_vm7, %v10886_v56, %v3845_v12  ;;  %v3873_v17 = vrot.slane %v19060_v24, 7  ;;  %19062 = vst [vmem:[#allocation35_spill] sm:$0xff] %v16597_v52  ;;  %v19069_v24 = vshll.u32 %v16397_v29, 16 }
 0x285   : > { %5276 = vmatprep.mubr.bf16.mxu0 %v15926_v8  ;;  %13502 = vmatpush3.bf16.msra.mxu0 %v16143_v33  ;;  %v3555_v33 = vld [vmem:[#allocation3 + $0x13c] sm:$0x8]  ;;  %v3855_v44 = vsel %vm14289_vm7, %v3847_v47, %v3854_v48  ;;  %v3558_v47 = vld [vmem:[#allocation3 + $0x154] sm:$0x8]  ;;  %v19065_v48 = vshrl.u32 %v16397_v29, 16 }
 0x286   : > { %13503 = vmatprep.subr.bf16.mxu0 %v13911_v53  ;;  %v3857_v57 = vshrl.u32 %v3555_v33, 16  ;;  %v16593_v7 = vcombine.low %v3846_v18, %v3855_v44  ;;  %v3876_v12 = vor.u32 %v19064_v11, %v3873_v17  ;;  %v3879_v34 = vshrl.u32 %v3558_v47, 16  ;;  %v13929_v18 = vld [vmem:[%s14258_s12 + $0x448] sm:$0xff]  }
 0x287   : > { %v3886_v33 = vrot.slane %v19065_v48, 7  ;;  %v16644_v48 = vcombine.low %v16441_v13, %v16455_v60 }
 0x288   : > { %19061 = vst [vmem:[#allocation19_spill] sm:$0xff] %v16593_v7  ;;  %v10887_v54 = vrot.slane %v3857_v57, 11 }
 0x289   : > { %13504 = vmatpush3.bf16.msra.mxu0 %v13911_v53  ;;  %v3864_v53 = vrot.slane %v19059_v10, 7  ;;  %v10888_v10 = vrot.slane %v3879_v34, 11  ;;  %v3889_v17 = vor.u32 %v19069_v24, %v3886_v33 }
 0x28a   : > { %13505 = vmatprep.subr.bf16.mxu0 %v13916_v61 }
 0x28b   : > { %4804 = vmatmul.mubr.bf16.gmra.mxu1 %v16569_v49  ;;  %v3867_v19 = vor.u32 %v19063_v6, %v3864_v53  ;;  %v3869_v56 = vrot.slane %v3864_v53, 4  ;;  %v16621_v53 = vcombine.low %v16397_v29, %v16404_v21  ;;  %v19070_v6 = vshll.u32 %v16404_v21, 16 }
 0x28c   : > { %4811 = vmatprep.mubr.bf16.mxu1 %v16573_v0  ;;  %5277 = vmatmul.mubr.bf16.gmra.mxu0 %v16003_v15  ;;  %v3890_v29 = vsel %vm14289_vm7, %v10888_v10, %v3889_v17  ;;  %v19074_v10 = vshll.u32 %v16455_v60, 16 }
 0x28d   : > { %5284 = vmatprep.mubr.bf16.mxu0 %v16033_v42  ;;  %13506 = vmatpush3.bf16.msra.mxu0 %v13916_v61  ;;  %v13928_v61 = vld [vmem:[%s14258_s12 + $0x450] sm:$0xff]   ;;  %v3868_v40 = vsel %vm14289_vm7, %v10887_v54, %v3867_v19  ;;  %v3877_v4 = vsel %vm14289_vm7, %v3869_v56, %v3876_v12  ;;  %19068 = vst [vmem:[#allocation6_spill] sm:$0xff] %v16621_v53  ;;  %v3891_v54 = vrot.slane %v3886_v33, 4  ;;  %v3561_v56 = vld [vmem:[#allocation3 + $0x16c] sm:$0x8]  ;;  %v19071_v12 = vshrl.u32 %v16441_v13, 16 }
 0x28e   : > { %13507 = vmatprep.subr.bf16.mxu0 %v13921_v28  ;;  %v16617_v44 = vcombine.low %v3868_v40, %v3877_v4  ;;  %v3901_v11 = vshrl.u32 %v3561_v56, 16  ;;  %v19073_v33 = vshll.u32 %v16441_v13, 16  ;;  %v13913_v56 = vld [vmem:[%s14258_s12 + $0x3e8] sm:$0xff]  }
 0x28f   : > { %v3908_v47 = vrot.slane %v19071_v12, 7  ;;  %v13918_v12 = vld [vmem:[%s14258_s12 + $0x3d8] sm:$0xff]  }
 0x290   : > { %19067 = vst [vmem:[#allocation4_spill] sm:$0xff] %v16617_v44  ;;  %v10889_v4 = vrot.slane %v3901_v11, 11  ;;  %v19076_v11 = vld [vmem:[#allocation8_spill] sm:$0xff] }
 0x291   : > { %13508 = vmatpush3.bf16.msra.mxu0 %v13921_v28  ;;  %v19066_v28 = vshrl.u32 %v16404_v21, 16 }
 0x292   : > { %13509 = vmatprep.subr.bf16.mxu0 %v13926_v32 }
 0x293   : > { %4812 = vmatmul.mubr.bf16.gmra.mxu1 %v16593_v7  ;;  %v3895_v57 = vrot.slane %v19066_v28, 7  ;;  %v3911_v28 = vor.u32 %v19073_v33, %v3908_v47  ;;  %v13924_v33 = vld [vmem:[%s14258_s12 + $0x400] sm:$0xff]  }
 0x294   : > { %4819 = vmatprep.mubr.bf16.mxu1 %v16597_v52  ;;  %5285 = vmatmul.mubr.bf16.gmra.mxu0 %v16091_v46 }
 0x295   : > { %5292 = vmatprep.mubr.bf16.mxu0 %v16095_v9  ;;  %13510 = vmatpush3.bf16.msra.mxu0 %v13926_v32  ;;  %v3898_v19 = vor.u32 %v19070_v6, %v3895_v57  ;;  %v13930_v32 = vld [vmem:[%s14258_s12 + $0x440] sm:$0xff]   ;;  %v3913_v57 = vrot.slane %v3908_v47, 4  ;;  %v3912_v13 = vsel %vm14289_vm7, %v10889_v4, %v3911_v28  ;;  %v13919_v47 = vld [vmem:[%s14258_s12 + $0x410] sm:$0xff]   ;;  %v13923_v4 = vld [vmem:[%s14258_s12 + $0x3c8] sm:$0xff]  }
 0x296   : > { %13511 = vmatprep.subr.bf16.mxu0 %v13928_v61  ;;  %v19075_v6 = vld [vmem:[#allocation16_spill] sm:$0xff] }
 0x297   : > { %v3899_v21 = vsel %vm14289_vm7, %v3891_v54, %v3898_v19  ;;  %v13909_v54 = vld [vmem:[%s14258_s12 + $0x430] sm:$0xff]   ;;  %v13925_v28 = vld [vmem:[%s14258_s12 + $0x3c0] sm:$0xff]  }
 0x298   : > { %v16640_v40 = vcombine.low %v3890_v29, %v3899_v21  ;;  %v13910_v19 = vld [vmem:[%s14258_s12 + $0x3f0] sm:$0xff]   ;;  %v13915_v29 = vld [vmem:[%s14258_s12 + $0x3e0] sm:$0xff]   ;;  %v13917_v21 = vld [vmem:[%s14258_s12 + $0x418] sm:$0xff]  }
 0x299   : > { %13512 = vmatpush3.bf16.msra.mxu0 %v13928_v61  ;;  %v19072_v61 = vshrl.u32 %v16455_v60, 16  ;;  %v13908_v60 = vld [vmem:[%s14258_s12 + $0x3f8] sm:$0xff]  }
 0x29a   : > { %13513 = vmatprep.subr.bf16.mxu0 %v13929_v18 }
 0x29b   : > { %4820 = vmatmul.mubr.bf16.gmra.mxu1 %v16617_v44  ;;  %v3917_v34 = vrot.slane %v19072_v61, 7  ;;  %v13920_v61 = vld [vmem:[%s14258_s12 + $0x3d0] sm:$0xff]  }
 0x29c   : > { %4827 = vmatprep.mubr.bf16.mxu1 %v16621_v53  ;;  %5293 = vmatmul.mubr.bf16.gmra.mxu0 %v16200_v36 }
 0x29d   : > { %5300 = vmatprep.mubr.bf16.mxu0 %v16186_v14  ;;  %13514 = vmatpush3.bf16.msra.mxu0 %v13929_v18  ;;  %v3920_v24 = vor.u32 %v19074_v10, %v3917_v34  ;;  %v13922_v34 = vld [vmem:[%s14258_s12 + $0x408] sm:$0xff]   ;;  %v16698_v10 = vld [vmem:[#allocation3 + $0x18c] sm:$0xf] }
 0x29e   : > { %13515 = vmatprep.subr.bf16.mxu0 %v13930_v32 }
 0x29f   : > { %v3921_v18 = vsel %vm14289_vm7, %v3913_v57, %v3920_v24  ;;  %v16696_v57 = vld [vmem:[#allocation3 + $0x188] sm:$0xf] }
 0x2a0   : > { %v16658_v17 = vcombine.low %v3912_v13, %v3921_v18  ;;  %v3928_v24 = vshrl.u32 %v16696_v57, 16  ;;  %v3931_v13 = vshll.u32 %v16696_v57, 16  ;;  %v3937_v18 = vshrl.u32 %v16698_v10, 16 }
 0x2a1   : > { %13516 = vmatpush3.bf16.msra.mxu0 %v13930_v32  ;;  %v13914_v32 = vld [vmem:[%s14258_s12 + $0x420] sm:$0xff]  }
 0x2a3   : > { %4828 = vmatmul.mubr.bf16.gmra.mxu1 %v16640_v40 }
 0x2a4   : > { %4835 = vmatprep.mubr.bf16.mxu1 %v16644_v48  ;;  %5301 = vmatmul.mubr.bf16.gmra.mxu0 %v16274_v38 }
 0x2a5   : > { %5308 = vmatprep.mubr.bf16.mxu0 %v16262_v16 }
 0x2ab   : > { %4836 = vmatmul.mubr.bf16.gmra.mxu1 %v16658_v17 }
 0x2ac   : > { %13469 = vmatprep.mubr.bf16.mxu1 %v15965_v58  ;;  %5309 = vmatmul.mubr.bf16.gmra.mxu0 %v16344_v31  ;;  %v13912_v58 = vld [vmem:[%s14258_s12 + $0x428] sm:$0xff]  }
 0x2ad   : > { %5316 = vmatprep.mubr.bf16.mxu0 %v16311_v26 }
 0x2b3   : > { %13470 = vmatmul.mubr.bf16.vlgmr.msra.gmra.mxu1 %v16018_v45 }
 0x2b4   : > { %13473 = vmatprep.mubr.bf16.mxu1 %v19075_v6  ;;  %12494 = vmatpush3.bf16.msra.mxu1 %v13908_v60  ;;  %v3940_v60 = vshll.u32 %v16698_v10, 16 }
 0x2b5   : > { %5317 = vmatmul.mubr.bf16.gmra.mxu0 %v16401_v50  ;;  %12495 = vmatprep.subr.bf16.mxu1 %v13909_v54  ;;  %v4208_v54 = vrot.slane %v3928_v24, 4 }
 0x2b6   : > { %5324 = vmatprep.mubr.bf16.mxu0 %v16387_v35 }
 0x2b8   : > { %12496 = vmatpush3.bf16.msra.mxu1 %v13910_v19  ;;  %v4209_v19 = vrot.slane %v3931_v13, 5 }
 0x2b9   : > { %12497 = vmatprep.subr.bf16.mxu1 %v13912_v58  ;;  %v4212_v58 = vrot.slane %v3940_v60, 5 }
 0x2bb   : > { %13474 = vmatmul.mubr.bf16.gmra.mxu1 %v19076_v11 }
 0x2bc   : > { %13477 = vmatprep.mubr.bf16.mxu1 %v16166_v37  ;;  %12498 = vmatpush3.bf16.msra.mxu1 %v13913_v56  ;;  %v4214_v56 = vrot.slane %v3937_v18, 4 }
 0x2bd   : > { %5325 = vmatmul.mubr.bf16.gmra.mxu0 %v16471_v63  ;;  %12499 = vmatprep.subr.bf16.mxu1 %v13914_v32  ;;  %v3982_v32 = vld [vmem:[#allocation3 + $0x190] sm:$0x1] }
 0x2be   : > { %5332 = vmatprep.mubr.bf16.mxu0 %v16447_v39 }
 0x2c0   : > { %12500 = vmatpush3.bf16.msra.mxu1 %v13915_v29  ;;  %v12240_v29 = vpop.f32.mrf.mxu1 }
 0x2c1   : > { %12501 = vmatprep.subr.bf16.mxu1 %v13917_v21  ;;  %v19077_v21 = vld [vmem:[#allocation13_spill] sm:$0xff] }
 0x2c3   : > { %13478 = vmatmul.mubr.bf16.gmra.mxu1 %v16189_v30 }
 0x2c4   : > { %13481 = vmatprep.mubr.bf16.mxu1 %v16245_v43  ;;  %12502 = vmatpush3.bf16.msra.mxu1 %v13918_v12  ;;  %v4210_v12 = vor.u32 %v4209_v19, %v4208_v54 }
 0x2c5   : > { %5333 = vmatmul.mubr.bf16.gmra.mxu0 %v16514_v2  ;;  %12503 = vmatprep.subr.bf16.mxu1 %v13919_v47  ;;  %v4215_v47 = vor.u32 %v4214_v56, %v4212_v58 }
 0x2c6   : > { %5340 = vmatprep.mubr.bf16.mxu0 %v16518_v41 }
 0x2c8   : > { %12504 = vmatpush3.bf16.msra.mxu1 %v13920_v61  ;;  %v4218_v61 = vshll.u32 %v3982_v32, 16 }
 0x2c9   : > { %12505 = vmatprep.subr.bf16.mxu1 %v13922_v34  ;;  %v12241_v34 = vpop.f32.mrf.mxu1 }
 0x2cb   : > { %13482 = vmatmul.mubr.bf16.gmra.mxu1 %v16269_v55 }
 0x2cc   : > { %13485 = vmatprep.mubr.bf16.mxu1 %v16331_v5  ;;  %12506 = vmatpush3.bf16.msra.mxu1 %v13923_v4 }
 0x2cd   : > { %5341 = vmatmul.mubr.bf16.gmra.mxu0 %v16542_v23  ;;  %12507 = vmatprep.subr.bf16.mxu1 %v13924_v33  ;;  %v4211_v33 = vrot.slane %v4210_v12, 4 }
 0x2ce   : > { %5348 = vmatprep.mubr.bf16.mxu0 %v16546_v20 }
 0x2cf   : > { %v4213_v54 = vsel %vm14324_vm8, %v4211_v33, %v4212_v58 }
 0x2d0   : > { %12508 = vmatpush3.bf16.msra.mxu1 %v13925_v28  ;;  %v4216_v28 = vrot.slane %v4215_v47, 4 }
 0x2d3   : > { %13486 = vmatmul.mubr.bf16.gmra.mxu1 %v16351_v51 }
 0x2d4   : > { %13489 = vmatprep.mubr.bf16.mxu1 %v16399_v1 }
 0x2d5   : > { %5349 = vmatmul.mubr.bf16.gmra.mxu0 %v16569_v49 }
 0x2d6   : > { %5356 = vmatprep.mubr.bf16.mxu0 %v16573_v0  ;;  %v4220_v0 = vrot.slane %v4218_v61, 5 }
 0x2d8   : > { %v4221_v19 = vsel %vm14324_vm8, %v4216_v28, %v4220_v0 }
 0x2da   : > { %v12243_v4 = vpop.f32.mrf.mxu1 }
 0x2db   : > { %13490 = vmatmul.mubr.bf16.gmra.mxu1 %v16421_v22 }
 0x2dc   : > { %13493 = vmatprep.mubr.bf16.mxu1 %v19077_v21  ;;  %v12244_v49 = vpop.f32.mrf.mxu1 }
 0x2dd   : > { %5357 = vmatmul.mubr.bf16.gmra.mxu0 %v16593_v7  ;;  %v12245_v20 = vadd.f32 %v12244_v49, %v12243_v4  ;;  %v13423_v23 = vpop.f32.mrf.mxu0  ;;  %v16724_v4 = vcombine.low %v4213_v54, %v4221_v19  ;;  %v16736_v19 = vcombine.low %v16696_v57, %v16698_v10 }
 0x2de   : > { %5364 = vmatprep.mubr.bf16.mxu0 %v16597_v52  ;;  %v12246_v7 = vpop.f32.mrf.mxu1 }
 0x2df   : > { %v16719_v56 = vadd.f32 %v13423_v23, %v12245_v20  ;;  %v4878_v32 = vpop.f32.mrf.mxu0  ;;  %v3564_v23 = vld [vmem:[#allocation3 + $0x184] sm:$0x8] }
 0x2e0   : > { %v16722_v12 = vadd.f32 %v16567_v3, %v4878_v32  ;;  %v12247_v47 = vpop.f32.mrf.mxu1 }
 0x2e1   : > { %v12248_v49 = vadd.f32 %v12247_v47, %v12246_v7  ;;  %v13424_v61 = vpop.f32.mrf.mxu0  ;;  %v3923_v7 = vshrl.u32 %v3564_v23, 16 }
 0x2e3   : > { %13494 = vmatmul.mubr.bf16.gmra.mxu1 %v16490_v25  ;;  %v16726_v52 = vadd.f32 %v13424_v61, %v12248_v49 }
 0x2e4   : > { %13497 = vmatprep.mubr.bf16.mxu1 %v16528_v62  ;;  %v12249_v58 = vpop.f32.mrf.mxu1 }
 0x2e5   : > { %5365 = vmatmul.mubr.bf16.gmra.mxu0 %v16617_v44  ;;  %v12242_v44 = vadd.f32 %v12241_v34, %v12240_v29  ;;  %v3930_v29 = vrot.slane %v3928_v24, 7  ;;  %v3939_v34 = vrot.slane %v3937_v18, 7 }
 0x2e6   : > { %5372 = vmatprep.mubr.bf16.mxu0 %v16621_v53  ;;  %v4881_v53 = vpop.f32.mrf.mxu0  ;;  %v12250_v20 = vpop.f32.mrf.mxu1 }
 0x2e7   : > { %v16729_v33 = vadd.f32 %v12242_v44, %v4881_v53  ;;  %v12251_v3 = vadd.f32 %v12250_v20, %v12249_v58  ;;  %v3933_v44 = vor.u32 %v3931_v13, %v3930_v29  ;;  %v3935_v53 = vrot.slane %v3930_v29, 4 }
 0x2e8   : > { %v12252_v0 = vpop.f32.mrf.mxu1  ;;  %v3942_v32 = vor.u32 %v3940_v60, %v3939_v34 }
 0x2ea   : > { %v12253_v28 = vpop.f32.mrf.mxu1  ;;  %v3943_v18 = vsel %vm14289_vm7, %v3935_v53, %v3942_v32 }
 0x2eb   : > { %13498 = vmatmul.mubr.bf16.gmra.mxu1 %v16724_v4  ;;  %v12254_v54 = vadd.f32 %v12253_v28, %v12252_v0 }
 0x2ec   : > { %5815 = vmatprep.mubr.bf16.mxu1 %v15926_v8  ;;  %v10890_v8 = vrot.slane %v3923_v7, 11 }
 0x2ed   : > { %5373 = vmatmul.mubr.bf16.gmra.mxu0 %v16640_v40 }
 0x2ee   : > { %5380 = vmatprep.mubr.bf16.mxu0 %v16644_v48  ;;  %v3934_v24 = vsel %vm14289_vm7, %v10890_v8, %v3933_v44  ;;  %v13932_v44 = vld [vmem:[%s14258_s12 + $0x538] sm:$0xff]  }
 0x2ef   : > { %13549 = vmatprep.subr.bf16.mxu1 %v13932_v44 }
 0x2f2   : > { %v13427_v57 = vpop.f32.mrf.mxu0 }
 0x2f3   : > { %5816 = vmatmul.mubr.bf16.vlgmr.msra.gmra.mxu1 %v16003_v15  ;;  %v16746_v15 = vcombine.low %v3934_v24, %v3943_v18 }
 0x2f4   : > { %5823 = vmatprep.mubr.bf16.mxu1 %v16033_v42  ;;  %v4894_v10 = vpop.f32.mrf.mxu0  ;;  %v12255_v47 = vpop.f32.mrf.mxu1  ;;  %13550 = vmatpush3.bf16.msra.mxu1 %v13932_v44 }
 0x2f5   : > { %5381 = vmatmul.mubr.bf16.gmra.mxu0 %v16658_v17  ;;  %v16749_v42 = vadd.f32 %v12251_v3, %v4894_v10 }
 0x2f6   : > { %5388 = vmatprep.mubr.bf16.mxu0 %v16736_v19  ;;  %v13428_v13 = vpop.f32.mrf.mxu0  ;;  %v12256_v60 = vpop.f32.mrf.mxu1 }
 0x2f7   : > { %v12257_v49 = vadd.f32 %v12256_v60, %v12255_v47 }
 0x2f8   : > { %v4897_v61 = vpop.f32.mrf.mxu0  ;;  %v12258_v58 = vpop.f32.mrf.mxu1 }
 0x2f9   : > { %v16754_v23 = vadd.f32 %v12254_v54, %v4897_v61  ;;  %v16756_v20 = vadd.f32 %v13427_v57, %v12257_v49 }
 0x2fa   : > { %v12259_v0 = vpop.f32.mrf.mxu1 }
 0x2fb   : > { %5824 = vmatmul.mubr.bf16.gmra.mxu1 %v16091_v46  ;;  %v12260_v7 = vadd.f32 %v12259_v0, %v12258_v58 }
 0x2fc   : > { %5831 = vmatprep.mubr.bf16.mxu1 %v16095_v9 }
 0x2fd   : > { %5389 = vmatmul.mubr.bf16.gmra.mxu0 %v16746_v15  ;;  %v16759_v46 = vadd.f32 %v13428_v13, %v12260_v7  ;;  %v16796_v13 = vld [vmem:[#allocation3 + $0x1a4] sm:$0xf] }
 0x2fe   : > { %13517 = vmatprep.mubr.bf16.mxu0 %v16018_v45  ;;  %v3959_v0 = vshrl.u32 %v16796_v13, 16  ;;  %v18815_v7 = vshll.u32 %v16796_v13, 16 }
 0x300   : > { %v13431_v9 = vpop.f32.mrf.mxu0 }
 0x302   : > { %v4910_v45 = vpop.f32.mrf.mxu0 }
 0x303   : > { %5832 = vmatmul.mubr.bf16.gmra.mxu1 %v16200_v36 }
 0x304   : > { %5839 = vmatprep.mubr.bf16.mxu1 %v16186_v14  ;;  %v13432_v29 = vpop.f32.mrf.mxu0 }
 0x305   : > { %13518 = vmatmul.mubr.bf16.vlgmr.msra.gmra.mxu0 %v19075_v6 }
 0x306   : > { %13521 = vmatprep.mubr.bf16.mxu0 %v19076_v11  ;;  %v12261_v3 = vpop.f32.mrf.mxu1  ;;  %v4913_v28 = vpop.f32.mrf.mxu0 }
 0x308   : > { %v12262_v34 = vpop.f32.mrf.mxu1 }
 0x309   : > { %v12263_v36 = vadd.f32 %v12262_v34, %v12261_v3 }
 0x30a   : > { %v12264_v14 = vpop.f32.mrf.mxu1 }
 0x30b   : > { %5840 = vmatmul.mubr.bf16.gmra.mxu1 %v16274_v38  ;;  %v16768_v6 = vadd.f32 %v12263_v36, %v4910_v45  ;;  %v4226_v36 = vrot.slane %v18815_v7, 5 }
 0x30c   : > { %5847 = vmatprep.mubr.bf16.mxu1 %v16262_v16  ;;  %v12265_v11 = vpop.f32.mrf.mxu1 }
 0x30d   : > { %13522 = vmatmul.mubr.bf16.gmra.mxu0 %v16166_v37  ;;  %v12266_v54 = vadd.f32 %v12265_v11, %v12264_v14  ;;  %v4228_v14 = vrot.slane %v3959_v0, 4 }
 0x30e   : > { %13525 = vmatprep.mubr.bf16.mxu0 %v16189_v30  ;;  %v16771_v8 = vpop.f32.mrf.mxu0 }
 0x30f   : > { %v16773_v38 = vadd.f32 %v12266_v54, %v4913_v28  ;;  %v3983_v54 = vld [vmem:[#allocation3 + $0x1a8] sm:$0x1] }
 0x310   : > { %v4926_v37 = vpop.f32.mrf.mxu0 }
 0x312   : > { %v16778_v16 = vpop.f32.mrf.mxu0 }
 0x313   : > { %5848 = vmatmul.mubr.bf16.gmra.mxu1 %v16344_v31 }
 0x314   : > { %5855 = vmatprep.mubr.bf16.mxu1 %v16311_v26  ;;  %v4929_v24 = vpop.f32.mrf.mxu0 }
 0x315   : > { %13526 = vmatmul.mubr.bf16.gmra.mxu0 %v16245_v43  ;;  %v12267_v30 = vpop.f32.mrf.mxu1 }
 0x316   : > { %13529 = vmatprep.mubr.bf16.mxu0 %v16269_v55 }
 0x317   : > { %v12268_v53 = vpop.f32.mrf.mxu1 }
 0x318   : > { %v12269_v32 = vadd.f32 %v12268_v53, %v12267_v30 }
 0x319   : > { %v12270_v31 = vpop.f32.mrf.mxu1 }
 0x31a   : > { %v16783_v18 = vadd.f32 %v13431_v9, %v12269_v32 }
 0x31b   : > { %5856 = vmatmul.mubr.bf16.gmra.mxu1 %v16401_v50  ;;  %v12271_v43 = vpop.f32.mrf.mxu1  ;;  %v16793_v50 = vld [vmem:[#allocation3 + $0x1a0] sm:$0xf] }
 0x31c   : > { %5863 = vmatprep.mubr.bf16.mxu1 %v16387_v35  ;;  %v12272_v55 = vadd.f32 %v12271_v43, %v12270_v31  ;;  %v16787_v26 = vpop.f32.mrf.mxu0  ;;  %v3950_v49 = vshrl.u32 %v16793_v50, 16  ;;  %v4229_v31 = vor.u32 %v4228_v14, %v4226_v36 }
 0x31d   : > { %13530 = vmatmul.mubr.bf16.gmra.mxu0 %v16331_v5 }
 0x31e   : > { %13533 = vmatprep.mubr.bf16.mxu0 %v16351_v51  ;;  %v16789_v57 = vadd.f32 %v13432_v29, %v12272_v55  ;;  %v16791_v47 = vpop.f32.mrf.mxu0  ;;  %v4222_v29 = vrot.slane %v3950_v49, 4 }
 0x320   : > { %v12273_v10 = vpop.f32.mrf.mxu1  ;;  %v16798_v5 = vpop.f32.mrf.mxu0 }
 0x322   : > { %v12274_v35 = vpop.f32.mrf.mxu1  ;;  %v4945_v61 = vpop.f32.mrf.mxu0 }
 0x323   : > { %5864 = vmatmul.mubr.bf16.gmra.mxu1 %v16471_v63  ;;  %v12275_v51 = vadd.f32 %v12274_v35, %v12273_v10  ;;  %v18816_v63 = vshll.u32 %v16793_v50, 16 }
 0x324   : > { %5871 = vmatprep.mubr.bf16.mxu1 %v16447_v39  ;;  %v12276_v60 = vpop.f32.mrf.mxu1  ;;  %v13933_v39 = vld [vmem:[%s14258_s12 + $0x530] sm:$0xff]  }
 0x325   : > { %13534 = vmatmul.mubr.bf16.gmra.mxu0 %v16399_v1  ;;  %v16804_v58 = vadd.f32 %v12275_v51, %v4926_v37  ;;  %13551 = vmatprep.subr.bf16.mxu1 %v13933_v39 }
 0x326   : > { %13537 = vmatprep.mubr.bf16.mxu0 %v16421_v22  ;;  %v12277_v9 = vpop.f32.mrf.mxu1  ;;  %v16810_v3 = vpop.f32.mrf.mxu0  ;;  %v4223_v22 = vrot.slane %v18816_v63, 5  ;;  %13552 = vmatpush3.bf16.msra.mxu1 %v13933_v39 }
 0x327   : > { %v12278_v45 = vadd.f32 %v12277_v9, %v12276_v60 }
 0x328   : > { %v12279_v1 = vpop.f32.mrf.mxu1  ;;  %v16822_v28 = vpop.f32.mrf.mxu0  ;;  %v4224_v32 = vor.u32 %v4223_v22, %v4222_v29 }
 0x329   : > { %v16814_v34 = vadd.f32 %v12278_v45, %v4929_v24  ;;  %v4232_v24 = vshll.u32 %v3983_v54, 16 }
 0x32a   : > { %v12280_v11 = vpop.f32.mrf.mxu1  ;;  %v16827_v30 = vpop.f32.mrf.mxu0  ;;  %v4225_v10 = vrot.slane %v4224_v32, 4  ;;  %v19085_v32 = vld [vmem:[#allocation21_spill] sm:$0xff] }
 0x32b   : > { %5872 = vmatmul.mubr.bf16.gmra.mxu1 %v16514_v2  ;;  %v12281_v37 = vadd.f32 %v12280_v11, %v12279_v1  ;;  %v4234_v35 = vrot.slane %v4232_v24, 5 }
 0x32c   : > { %5879 = vmatprep.mubr.bf16.mxu1 %v16518_v41  ;;  %v12282_v44 = vpop.f32.mrf.mxu1  ;;  %v16833_v2 = vpop.f32.mrf.mxu0  ;;  %v4227_v39 = vsel %vm14324_vm8, %v4225_v10, %v4226_v36 }
 0x32d   : > { %13538 = vmatmul.mubr.bf16.gmra.mxu0 %v19077_v21  ;;  %v16831_v53 = vadd.f32 %v16771_v8, %v12281_v37  ;;  %19078 = vst [vmem:[#allocation22_spill] sm:$0xff] %v16833_v2  ;;  %v4230_v21 = vrot.slane %v4229_v31, 4  ;;  %v19080_v8 = vld [vmem:[#allocation18_spill] sm:$0xff]  ;;  %v13934_v31 = vld [vmem:[%s14258_s12 + $0x528] sm:$0xff]  }
 0x32e   : > { %13541 = vmatprep.mubr.bf16.mxu0 %v16490_v25  ;;  %v12283_v43 = vpop.f32.mrf.mxu1  ;;  %v19079_v25 = vld [vmem:[#allocation12_spill] sm:$0xff]  ;;  %13553 = vmatprep.subr.bf16.mxu1 %v13934_v31 }
 0x32f   : > { %v12284_v55 = vadd.f32 %v12283_v43, %v12282_v44  ;;  %v4235_v1 = vsel %vm14324_vm8, %v4230_v21, %v4234_v35  ;;  %v19083_v44 = vld [vmem:[#allocation11_spill] sm:$0xff]  ;;  %13554 = vmatpush3.bf16.msra.mxu1 %v13934_v31 }
 0x330   : > { %v16838_v51 = vpop.f32.mrf.mxu0  ;;  %v10945_v54 = vcombine.low %v4227_v39, %v4235_v1  ;;  %v13936_v35 = vld [vmem:[%s14258_s12 + $0x4b8] sm:$0xff]  }
 0x331   : > { %v16836_v41 = vadd.f32 %v16778_v16, %v12284_v55  ;;  %v19087_v39 = vld [vmem:[#allocation19_spill] sm:$0xff] }
 0x332   : > { %v16843_v9 = vpop.f32.mrf.mxu0 }
 0x333   : > { %v12285_v60 = vpop.f32.mrf.mxu1  ;;  %5880 = vmatmul.mubr.bf16.gmra.mxu1 %v19079_v25 }
 0x334   : > { %5887 = vmatprep.mubr.bf16.mxu1 %v19080_v8  ;;  %v16850_v29 = vpop.f32.mrf.mxu0 }
 0x335   : > { %13542 = vmatmul.mubr.bf16.gmra.mxu0 %v16528_v62  ;;  %v12286_v45 = vpop.f32.mrf.mxu1 }
 0x336   : > { %13545 = vmatprep.mubr.bf16.mxu0 %v16724_v4  ;;  %v12287_v16 = vadd.f32 %v12286_v45, %v12285_v60  ;;  %v16855_v62 = vpop.f32.mrf.mxu0 }
 0x337   : > { %v12288_v22 = vpop.f32.mrf.mxu1  ;;  %19082 = vst [vmem:[#allocation15_spill] sm:$0xff] %v16855_v62 }
 0x338   : > { %v16853_v14 = vadd.f32 %v12287_v16, %v16791_v47 }
 0x339   : > { %v12289_v11 = vpop.f32.mrf.mxu1 }
 0x33a   : > { %19081 = vst [vmem:[#allocation20_spill] sm:$0xff] %v16853_v14  ;;  %v12290_v37 = vadd.f32 %v12289_v11, %v12288_v22  ;;  %v19089_v22 = vld [vmem:[#allocation35_spill] sm:$0xff]  ;;  %v13938_v11 = vld [vmem:[%s14258_s12 + $0x4b0] sm:$0xff]  }
 0x33b   : > { %v12291_v4 = vpop.f32.mrf.mxu1  ;;  %5888 = vmatmul.mubr.bf16.gmra.mxu1 %v19083_v44 }
 0x33c   : > { %v16858_v36 = vadd.f32 %v12290_v37, %v4945_v61  ;;  %5895 = vmatprep.mubr.bf16.mxu1 %v19085_v32  ;;  %v16862_v24 = vpop.f32.mrf.mxu0  ;;  %v13935_v61 = vld [vmem:[%s14258_s12 + $0x4f8] sm:$0xff]  }
 0x33d   : > { %v12292_v43 = vpop.f32.mrf.mxu1  ;;  %13546 = vmatmul.mubr.bf16.gmra.mxu0 %v10945_v54  ;;  %12629 = vmatprep.subr.bf16.mxu0 %v13935_v61  ;;  %v13939_v61 = vld [vmem:[%s14258_s12 + $0x4e8] sm:$0xff]  }
 0x33e   : > { %19084 = vst [vmem:[#allocation23_spill] sm:$0xff] %v16858_v36  ;;  %v12293_v47 = vadd.f32 %v12292_v43, %v12291_v4  ;;  %v16864_v55 = vpop.f32.mrf.mxu0  ;;  %12630 = vmatpush3.bf16.msra.mxu0 %v13936_v35  ;;  %v13940_v35 = vld [vmem:[%s14258_s12 + $0x4a8] sm:$0xff]  }
 0x33f   : > { %v12294_v10 = vpop.f32.mrf.mxu1 }
 0x340   : > { %v16867_v21 = vadd.f32 %v16787_v26, %v12293_v47  ;;  %v16871_v60 = vpop.f32.mrf.mxu0  ;;  %v13937_v26 = vld [vmem:[%s14258_s12 + $0x4f0] sm:$0xff]  }
 0x341   : > { %v12295_v25 = vpop.f32.mrf.mxu1  ;;  %12631 = vmatprep.subr.bf16.mxu0 %v13937_v26 }
 0x342   : > { %v12296_v8 = vadd.f32 %v12295_v25, %v12294_v10  ;;  %v16873_v45 = vpop.f32.mrf.mxu0  ;;  %12632 = vmatpush3.bf16.msra.mxu0 %v13938_v11 }
 0x343   : > { %19086 = vst [vmem:[#allocation25_spill] sm:$0xff] %v16873_v45  ;;  %v12297_v16 = vpop.f32.mrf.mxu1  ;;  %5896 = vmatmul.mubr.bf16.gmra.mxu1 %v19087_v39  ;;  %v19093_v39 = vld [vmem:[#allocation6_spill] sm:$0xff]  ;;  %12633 = vmatprep.subr.bf16.mxu0 %v13939_v61 }
 0x344   : > { %v16877_v1 = vadd.f32 %v16798_v5, %v12296_v8  ;;  %5903 = vmatprep.mubr.bf16.mxu1 %v19089_v22  ;;  %v12373_v54 = vpop.f32.mrf.mxu0  ;;  %v13941_v22 = vld [vmem:[%s14258_s12 + $0x520] sm:$0xff]  }
 0x345   : > { %v12298_v37 = vpop.f32.mrf.mxu1  ;;  %13555 = vmatprep.subr.bf16.mxu1 %v13941_v22 }
 0x346   : > { %19088 = vst [vmem:[#allocation24_spill] sm:$0xff] %v16877_v1  ;;  %v12299_v4 = vadd.f32 %v12298_v37, %v12297_v16  ;;  %v12374_v44 = vpop.f32.mrf.mxu0  ;;  %v19092_v16 = vld [vmem:[#allocation4_spill] sm:$0xff]  ;;  %12634 = vmatpush3.bf16.msra.mxu0 %v13940_v35  ;;  %13556 = vmatpush3.bf16.msra.mxu1 %v13941_v22 }
 0x347   : > { %v12300_v32 = vpop.f32.mrf.mxu1  ;;  %v16882_v31 = vadd.f32 %v12374_v44, %v12373_v54 }
 0x348   : > { %v16885_v43 = vadd.f32 %v12299_v4, %v16822_v28  ;;  %v16887_v5 = vpop.f32.mrf.mxu0 }
 0x349   : > { %v12301_v47 = vpop.f32.mrf.mxu1 }
 0x34a   : > { %19090 = vst [vmem:[#allocation28_spill] sm:$0xff] %v16885_v43  ;;  %v16889_v10 = vadd.f32 %v12301_v47, %v12300_v32  ;;  %v16893_v25 = vpop.f32.mrf.mxu0  ;;  %v6331_v43 = vld [vmem:[#allocation2 + $0xc] sm:$0xf] }
 0x34b   : > { %v12303_v8 = vpop.f32.mrf.mxu1  ;;  %5904 = vmatmul.mubr.bf16.gmra.mxu1 %v19092_v16  ;;  %v13942_v16 = vld [vmem:[%s14258_s12 + $0x4e0] sm:$0xff]   ;;  %v6398_v1 = vshrl.u32 %v6331_v43, 16 }
 0x34c   : > { %19091 = vst [vmem:[#allocation26_spill] sm:$0xff] %v16889_v10  ;;  %5911 = vmatprep.mubr.bf16.mxu1 %v19093_v39  ;;  %v12379_v28 = vpop.f32.mrf.mxu0  ;;  %v13943_v39 = vld [vmem:[%s14258_s12 + $0x4a0] sm:$0xff]   ;;  %12635 = vmatprep.subr.bf16.mxu0 %v13942_v16 }
 0x34d   : > { %v12304_v26 = vpop.f32.mrf.mxu1  ;;  %12636 = vmatpush3.bf16.msra.mxu0 %v13943_v39  ;;  %v3952_v39 = vrot.slane %v3950_v49, 7 }
 0x34e   : > { %v12305_v11 = vadd.f32 %v12304_v26, %v12303_v8  ;;  %v12380_v54 = vpop.f32.mrf.mxu0 }
 0x34f   : > { %v12306_v37 = vpop.f32.mrf.mxu1  ;;  %v16898_v4 = vadd.f32 %v12380_v54, %v12379_v28  ;;  %v3957_v45 = vrot.slane %v3952_v39, 4 }
 0x350   : > { %v16901_v44 = vadd.f32 %v16810_v3, %v12305_v11  ;;  %v16903_v32 = vpop.f32.mrf.mxu0  ;;  %v13944_v3 = vld [vmem:[%s14258_s12 + $0x4d8] sm:$0xff]  }
 0x351   : > { %v12307_v47 = vpop.f32.mrf.mxu1  ;;  %v13945_v11 = vld [vmem:[%s14258_s12 + $0x498] sm:$0xff]   ;;  %12637 = vmatprep.subr.bf16.mxu0 %v13944_v3  ;;  %v3961_v3 = vrot.slane %v3959_v0, 7  ;;  %v13949_v0 = vld [vmem:[%s14258_s12 + $0x488] sm:$0xff]  }
 0x352   : > { %19094 = vst [vmem:[#allocation29_spill] sm:$0xff] %v16901_v44  ;;  %v12308_v61 = vadd.f32 %v12307_v47, %v12306_v37  ;;  %v16907_v35 = vpop.f32.mrf.mxu0  ;;  %v3567_v37 = vld [vmem:[#allocation3 + $0x19c] sm:$0x8]  ;;  %v13946_v47 = vld [vmem:[%s14258_s12 + $0x4d0] sm:$0xff]   ;;  %12638 = vmatpush3.bf16.msra.mxu0 %v13945_v11  ;;  %v10927_v11 = vcombine.low %v16793_v50, %v16796_v13  ;;  %v6330_v44 = vld [vmem:[#allocation2 + $0x8] sm:$0xf] }
 0x353   : > { %v12309_v8 = vpop.f32.mrf.mxu1  ;;  %5912 = vmatmul.mubr.bf16.gmra.mxu1 %v16640_v40  ;;  %v3945_v16 = vshrl.u32 %v3567_v37, 16  ;;  %12639 = vmatprep.subr.bf16.mxu0 %v13946_v47  ;;  %v13953_v47 = vld [vmem:[%s14258_s12 + $0x510] sm:$0xff]   ;;  %v6389_v2 = vshrl.u32 %v6330_v44, 16  ;;  %v6392_v36 = vshll.u32 %v6330_v44, 16 }
 0x354   : > { %v16911_v22 = vadd.f32 %v16827_v30, %v12308_v61  ;;  %5919 = vmatprep.mubr.bf16.mxu1 %v16644_v48  ;;  %v12385_v28 = vpop.f32.mrf.mxu0 }
 0x355   : > { %v12310_v26 = vpop.f32.mrf.mxu1  ;;  %v10891_v37 = vrot.slane %v3945_v16, 11 }
 0x356   : > { %19095 = vst [vmem:[#allocation27_spill] sm:$0xff] %v16911_v22  ;;  %v12311_v54 = vadd.f32 %v12310_v26, %v12309_v8  ;;  %v12386_v7 = vpop.f32.mrf.mxu0  ;;  %v13947_v8 = vld [vmem:[%s14258_s12 + $0x490] sm:$0xff]   ;;  %v13950_v26 = vld [vmem:[%s14258_s12 + $0x518] sm:$0xff]   ;;  %v19099_v22 = vshll.u32 %v16793_v50, 16 }
 0x357   : > { %v16917_v63 = vpop.f32.mrf.mxu1  ;;  %v16919_v40 = vadd.f32 %v12386_v7, %v12385_v28  ;;  %v13948_v28 = vld [vmem:[%s14258_s12 + $0x4c8] sm:$0xff]   ;;  %12640 = vmatpush3.bf16.msra.mxu0 %v13947_v8  ;;  %13557 = vmatprep.subr.bf16.mxu1 %v13950_v26 }
 0x358   : > { %19096 = vst [vmem:[#allocation38_spill] sm:$0xff] %v16917_v63  ;;  %v16922_v48 = vadd.f32 %v12311_v54, %v16843_v9  ;;  %v16924_v30 = vpop.f32.mrf.mxu0  ;;  %12641 = vmatprep.subr.bf16.mxu0 %v13948_v28  ;;  %v6329_v63 = vld [vmem:[#allocation2 + $0x4] sm:$0x8]  ;;  %13558 = vmatpush3.bf16.msra.mxu1 %v13950_v26  ;;  %v6400_v26 = vrot.slane %v6398_v1, 7 }
 0x359   : > { %v16926_v61 = vpop.f32.mrf.mxu1  ;;  %v6384_v8 = vshrl.u32 %v6329_v63, 16  ;;  %13559 = vmatprep.subr.bf16.mxu1 %v13953_v47  ;;  %v13952_v28 = vld [vmem:[%s14258_s12 + $0x480] sm:$0xff]  }
 0x35a   : > { %19097 = vst [vmem:[#allocation31_spill] sm:$0xff] %v16922_v48  ;;  %19098 = vst [vmem:[#allocation37_spill] sm:$0xff] %v16926_v61  ;;  %v16933_v7 = vpop.f32.mrf.mxu0  ;;  %v13951_v48 = vld [vmem:[%s14258_s12 + $0x4c0] sm:$0xff]   ;;  %v3955_v61 = vor.u32 %v19099_v22, %v3952_v39  ;;  %v11232_v22 = vcombine.low %v6330_v44, %v6331_v43 }
 0x35b   : > { %v12315_v9 = vpop.f32.mrf.mxu1  ;;  %5920 = vmatmul.mubr.bf16.gmra.mxu1 %v16658_v17  ;;  %v19100_v17 = vshll.u32 %v16796_v13, 16  ;;  %v6401_v13 = vshll.u32 %v6331_v43, 16  ;;  %12642 = vmatpush3.bf16.msra.mxu0 %v13949_v0  ;;  %v6797_v0 = vrot.slane %v6389_v2, 4 }
 0x35c   : > { %5927 = vmatprep.mubr.bf16.mxu1 %v16736_v19  ;;  %v12391_v54 = vpop.f32.mrf.mxu0  ;;  %12643 = vmatprep.subr.bf16.mxu0 %v13951_v48  ;;  %v3956_v48 = vsel %vm14289_vm7, %v10891_v37, %v3955_v61  ;;  %v6779_v37 = vld [vmem:[#allocation2 + $0x10] sm:$0x1] }
 0x35d   : > { %v12316_v49 = vpop.f32.mrf.mxu1  ;;  %v3964_v19 = vor.u32 %v19100_v17, %v3961_v3  ;;  %v6391_v17 = vrot.slane %v6389_v2, 7  ;;  %7528 = vmatprep.mubr.bf16.mxu0 %v11232_v22  ;;  %v6403_v44 = vor.u32 %v6401_v13, %v6400_v26  ;;  %13560 = vmatpush3.bf16.msra.mxu1 %v13953_v47 }
 0x35e   : > { %v12317_v62 = vadd.f32 %v12316_v49, %v12315_v9  ;;  %v12392_v10 = vpop.f32.mrf.mxu0  ;;  %v11196_v49 = vrot.slane %v6384_v8, 11 }
 0x35f   : > { %v12318_v16 = vpop.f32.mrf.mxu1  ;;  %v16948_v9 = vadd.f32 %v12392_v10, %v12391_v54  ;;  %v6396_v43 = vrot.slane %v6391_v17, 4  ;;  %12644 = vmatpush3.bf16.msra.mxu0 %v13952_v28  ;;  %v6801_v28 = vrot.slane %v6401_v13, 5 }
 0x360   : > { %v16951_v50 = vadd.f32 %v16838_v51, %v12317_v62  ;;  %v16953_v39 = vpop.f32.mrf.mxu0  ;;  %v3965_v51 = vsel %vm14289_vm7, %v3957_v45, %v3964_v19  ;;  %v6394_v62 = vor.u32 %v6392_v36, %v6391_v17  ;;  %v13956_v17 = vld [vmem:[%s14258_s12 + $0x508] sm:$0xff]  }
 0x361   : > { %v12319_v3 = vpop.f32.mrf.mxu1  ;;  %v6404_v19 = vsel %vm14289_vm7, %v6396_v43, %v6403_v44  ;;  %v10909_v2 = vcombine.low %v3956_v48, %v3965_v51  ;;  %13561 = vmatprep.subr.bf16.mxu1 %v13956_v17 }
 0x362   : > { %v12320_v63 = vadd.f32 %v12319_v3, %v12318_v16  ;;  %v16956_v14 = vpop.f32.mrf.mxu0  ;;  %v6798_v16 = vrot.slane %v6392_v36, 5  ;;  %v6395_v45 = vsel %vm14289_vm7, %v11196_v49, %v6394_v62  ;;  %v6803_v3 = vrot.slane %v6398_v1, 4  ;;  %13562 = vmatpush3.bf16.msra.mxu1 %v13956_v17  ;;  %v16993_v17 = vld [vmem:[%s15375_s21 + $0x1] ss:$0 sm:$0xff] }
 0x363   : > { %v12321_v10 = vpop.f32.mrf.mxu1  ;;  %5928 = vmatmul.mubr.bf16.gmra.mxu1 %v16746_v15 }
 0x364   : > { %v16962_v54 = vadd.f32 %v16850_v29, %v12320_v63  ;;  %5935 = vmatprep.mubr.bf16.mxu1 %v10927_v11  ;;  %v12397_v8 = vpop.f32.mrf.mxu0  ;;  %v11214_v29 = vcombine.low %v6395_v45, %v6404_v19  ;;  %v13957_v11 = vld [vmem:[%s14258_s12 + $0x500] sm:$0xff]   ;;  %v6799_v47 = vor.u32 %v6798_v16, %v6797_v0  ;;  %v6804_v43 = vor.u32 %v6803_v3, %v6801_v28 }
 0x365   : > { %v12322_v15 = vpop.f32.mrf.mxu1  ;;  %13563 = vmatprep.subr.bf16.mxu1 %v13957_v11 }
 0x366   : > { %v12323_v22 = vadd.f32 %v12322_v15, %v12321_v10  ;;  %v12398_v26 = vpop.f32.mrf.mxu0  ;;  %7529 = vmatmul.mubr.bf16.vlgmr.msra.gmra.mxu0 %v11214_v29  ;;  %v6807_v10 = vshll.u32 %v6779_v37, 16  ;;  %v6800_v62 = vrot.slane %v6799_v47, 4  ;;  %v6805_v0 = vrot.slane %v6804_v43, 4  ;;  %13564 = vmatpush3.bf16.msra.mxu1 %v13957_v11 }
 0x367   : > { %v16972_v63 = vpop.f32.mrf.mxu1  ;;  %v16974_v36 = vadd.f32 %v12398_v26, %v12397_v8  ;;  %v5013_v11 = vadd.f32 %v16993_v17, %v16719_v56  ;;  %v5014_v56 = vadd.f32 %v16993_v17, %v16726_v52 }
 0x368   : > { %v16977_v61 = vadd.f32 %v12323_v22, %v16864_v55  ;;  %v16979_v49 = vpop.f32.mrf.mxu0  ;;  %v6809_v55 = vrot.slane %v6807_v10, 5  ;;  %v6802_v48 = vsel %vm14324_vm8, %v6800_v62, %v6801_v28 }
 0x369   : > { %v16981_v1 = vpop.f32.mrf.mxu1 }
 0x36a   : > { %v16983_v51 = vpop.f32.mrf.mxu0  ;;  %v6810_v15 = vsel %vm14324_vm8, %v6805_v0, %v6809_v55  ;;  %v12384_v55 = vadd.f32 %v16907_v35, %v16903_v32  ;;  %v5012_v35 = vadd.f32 %v16993_v17, %v16729_v33  ;;  %v12396_v33 = vadd.f32 %v16956_v14, %v16953_v39 }
 0x36b   : > { %v12327_v44 = vpop.f32.mrf.mxu1  ;;  %5936 = vmatmul.mubr.bf16.gmra.mxu1 %v10909_v2  ;;  %v11250_v22 = vcombine.low %v6802_v48, %v6810_v15  ;;  %v5016_v14 = vadd.f32 %v16993_v17, %v16754_v23 }
 0x36c   : > { %v12403_v13 = vpop.f32.mrf.mxu0 }
 0x36d   : > { %v12328_v16 = vpop.f32.mrf.mxu1  ;;  %13565 = vmatprep.mubr.bf16.mxu1 %v11250_v22 }
 0x36e   : > { %v12329_v8 = vadd.f32 %v12328_v16, %v12327_v44  ;;  %v12404_v45 = vpop.f32.mrf.mxu0 }
 0x36f   : > { %v12330_v19 = vpop.f32.mrf.mxu1  ;;  %v12405_v3 = vadd.f32 %v12404_v45, %v12403_v13 }
 0x370   : > { %v16990_v29 = vadd.f32 %v16862_v24, %v12329_v8  ;;  %v12406_v26 = vpop.f32.mrf.mxu0  ;;  %v5011_v24 = vadd.f32 %v16993_v17, %v16722_v12 }
 0x371   : > { %v12331_v2 = vpop.f32.mrf.mxu1 }
 0x372   : > { %v12332_v37 = vadd.f32 %v12331_v2, %v12330_v19  ;;  %v12407_v47 = vpop.f32.mrf.mxu0 }
 0x373   : > { %v13471_v28 = vpop.f32.mrf.mxu1 }
 0x374   : > { %v16998_v10 = vadd.f32 %v16871_v60, %v12332_v37  ;;  %v5440_v62 = vadd.f32 %v13471_v28, %v16898_v4  ;;  %v12378_v4 = vadd.f32 %v16893_v25, %v16887_v5  ;;  %v5017_v5 = vadd.f32 %v16993_v17, %v16756_v20 }
 0x375   : > { %v12409_v43 = vpop.f32.mrf.mxu0  ;;  %v5431_v44 = vpop.f32.mrf.mxu1  ;;  %v5015_v28 = vadd.f32 %v16993_v17, %v16749_v42  ;;  %v12390_v20 = vadd.f32 %v16933_v7, %v16924_v30 }
 0x376   : > { %v17005_v48 = vadd.f32 %v5440_v62, %v5013_v11  ;;  %v5432_v0 = vadd.f32 %v16882_v31, %v5431_v44  ;;  %v5018_v44 = vadd.f32 %v16993_v17, %v16759_v46  ;;  %v5021_v46 = vadd.f32 %v16993_v17, %v16783_v18 }
 0x377   : > { %v12410_v13 = vpop.f32.mrf.mxu0  ;;  %v13472_v60 = vpop.f32.mrf.mxu1 }
 0x378   : > { %v17012_v16 = vadd.f32 %v12410_v13, %v12409_v43  ;;  %v17014_v8 = vadd.f32 %v5432_v0, %v5011_v24  ;;  %v5443_v12 = vadd.f32 %v13472_v60, %v12384_v55 }
 0x379   : > { %v17016_v15 = vpop.f32.mrf.mxu0  ;;  %v5434_v32 = vpop.f32.mrf.mxu1 }
 0x37a   : > { %v17020_v31 = vadd.f32 %v5443_v12, %v5014_v56  ;;  %v5435_v45 = vadd.f32 %v12378_v4, %v5434_v32  ;;  %v12408_v32 = vadd.f32 %v12407_v47, %v12406_v26 }
 0x37b   : > { %v12413_v52 = vpop.f32.mrf.mxu0  ;;  %v13475_v19 = vpop.f32.mrf.mxu1 }
 0x37c   : > { %v17022_v22 = vadd.f32 %v5435_v45, %v5012_v35  ;;  %v5456_v25 = vadd.f32 %v13475_v19, %v16948_v9  ;;  %v5019_v45 = vadd.f32 %v16993_v17, %v16768_v6  ;;  %v5020_v6 = vadd.f32 %v16993_v17, %v16773_v38 }
 0x37d   : > { %v12415_v2 = vpop.f32.mrf.mxu0  ;;  %v5447_v37 = vpop.f32.mrf.mxu1 }
 0x37e   : > { %v17031_v11 = vadd.f32 %v5456_v25, %v5017_v5  ;;  %v5448_v62 = vadd.f32 %v16919_v40, %v5447_v37  ;;  %v5022_v5 = vadd.f32 %v16993_v17, %v16789_v57  ;;  %v5025_v57 = vadd.f32 %v16993_v17, %v16831_v53 }
 0x37f   : > { %v12416_v43 = vpop.f32.mrf.mxu0  ;;  %v13476_v24 = vpop.f32.mrf.mxu1 }
 0x380   : > { %v12417_v9 = vadd.f32 %v12416_v43, %v12415_v2  ;;  %v17038_v55 = vadd.f32 %v5448_v62, %v5015_v28  ;;  %v5459_v0 = vadd.f32 %v13476_v24, %v12396_v33  ;;  %v12402_v2 = vadd.f32 %v16983_v51, %v16979_v49 }
 0x381   : > { %v12418_v42 = vpop.f32.mrf.mxu0  ;;  %v5450_v56 = vpop.f32.mrf.mxu1 }
 0x382   : > { %v17042_v39 = vadd.f32 %v5459_v0, %v5018_v44  ;;  %v5451_v40 = vadd.f32 %v12390_v20, %v5450_v56  ;;  %v5023_v0 = vadd.f32 %v16993_v17, %v16804_v58  ;;  %v5024_v58 = vadd.f32 %v16993_v17, %v16814_v34 }
 0x383   : > { %v12419_v13 = vpop.f32.mrf.mxu0  ;;  %v13479_v60 = vpop.f32.mrf.mxu1 }
 0x384   : > { %v17044_v4 = vadd.f32 %v5451_v40, %v5016_v14  ;;  %v5472_v30 = vadd.f32 %v13479_v60, %v12405_v3  ;;  %v12420_v24 = vadd.f32 %v12419_v13, %v12418_v42  ;;  %v5026_v14 = vadd.f32 %v16993_v17, %v16836_v41 }
 0x385   : > { %v12421_v7 = vpop.f32.mrf.mxu0  ;;  %v5463_v12 = vpop.f32.mrf.mxu1  ;;  %v12414_v60 = vadd.f32 %v12413_v52, %v17016_v15  ;;  %v5029_v41 = vadd.f32 %v16993_v17, %v16867_v21 }
 0x386   : > { %v17048_v35 = vadd.f32 %v5472_v30, %v5021_v46  ;;  %v5464_v23 = vadd.f32 %v16974_v36, %v5463_v12 }
 0x387   : > { %v12422_v19 = vpop.f32.mrf.mxu0  ;;  %v13480_v25 = vpop.f32.mrf.mxu1 }
 0x388   : > { %v12423_v18 = vadd.f32 %v12422_v19, %v12421_v7  ;;  %v17057_v3 = vadd.f32 %v5464_v23, %v5019_v45  ;;  %v5475_v37 = vadd.f32 %v13480_v25, %v12408_v32 }
 0x389   : > { %v12424_v26 = vpop.f32.mrf.mxu0  ;;  %v5466_v47 = vpop.f32.mrf.mxu1 }
 0x38a   : > { %v17059_v28 = vadd.f32 %v5475_v37, %v5022_v5  ;;  %v5467_v36 = vadd.f32 %v12402_v2, %v5466_v47  ;;  %v19102_v5 = vld [vmem:[#allocation20_spill] sm:$0xff] }
 0x38b   : > { %v12425_v33 = vpop.f32.mrf.mxu0  ;;  %v13483_v62 = vpop.f32.mrf.mxu1  ;;  %v5027_v25 = vadd.f32 %v16993_v17, %v19102_v5  ;;  %v19103_v37 = vld [vmem:[#allocation24_spill] sm:$0xff]  ;;  %v19110_v5 = vld [vmem:[#allocation29_spill] sm:$0xff] }
 0x38c   : > { %v17063_v43 = vadd.f32 %v5467_v36, %v5020_v6  ;;  %v5488_v49 = vadd.f32 %v13483_v62, %v12417_v9  ;;  %v5030_v47 = vadd.f32 %v16993_v17, %v19103_v37  ;;  %v12426_v36 = vadd.f32 %v12425_v33, %v12424_v26 }
 0x38d   : > { %v12427_v51 = vpop.f32.mrf.mxu0  ;;  %v5479_v44 = vpop.f32.mrf.mxu1 }
 0x38e   : > { %v17067_v20 = vadd.f32 %v5488_v49, %v5025_v57  ;;  %v5480_v56 = vadd.f32 %v17012_v16, %v5479_v44 }
 0x38f   : > { %v12428_v38 = vpop.f32.mrf.mxu0  ;;  %v13484_v40 = vpop.f32.mrf.mxu1 }
 0x390   : > { %v12429_v46 = vadd.f32 %v12428_v38, %v12427_v51  ;;  %v17075_v53 = vadd.f32 %v5480_v56, %v5023_v0  ;;  %v5491_v9 = vadd.f32 %v13484_v40, %v12420_v24  ;;  %v19105_v24 = vld [vmem:[#allocation23_spill] sm:$0xff] }
 0x391   : > { %v12430_v30 = vpop.f32.mrf.mxu0  ;;  %v5482_v42 = vpop.f32.mrf.mxu1  ;;  %v5028_v0 = vadd.f32 %v16993_v17, %v19105_v24  ;;  %v13964_v38 = vld [vmem:[%s14258_s12 + $0x5f8] sm:$0xff]   ;;  %v19113_v24 = vld [vmem:[#allocation38_spill] sm:$0xff] }
 0x392   : > { %v17077_v13 = vadd.f32 %v5491_v9, %v5026_v14  ;;  %v5483_v7 = vadd.f32 %v12414_v60, %v5482_v42  ;;  %13597 = vmatprep.subr.bf16.mxu0 %v13964_v38  ;;  %v19106_v60 = vld [vmem:[#allocation22_spill] sm:$0xff] }
 0x393   : > { %v12431_v16 = vpop.f32.mrf.mxu0  ;;  %v13487_v12 = vpop.f32.mrf.mxu1  ;;  %13598 = vmatpush3.bf16.msra.mxu0 %v13964_v38  ;;  %v19115_v38 = vld [vmem:[#allocation27_spill] sm:$0xff] }
 0x394   : > { %v17081_v32 = vadd.f32 %v5483_v7, %v5024_v58  ;;  %v5504_v15 = vadd.f32 %v13487_v12, %v12429_v46  ;;  %v12432_v23 = vadd.f32 %v12431_v16, %v12430_v30  ;;  %v19107_v46 = vld [vmem:[#allocation26_spill] sm:$0xff]  ;;  %v19108_v30 = vld [vmem:[#allocation28_spill] sm:$0xff] }
 0x395   : > { %v12433_v52 = vpop.f32.mrf.mxu0  ;;  %v5495_v45 = vpop.f32.mrf.mxu1  ;;  %v4962_v9 = vadd.f32 %v19107_v46, %v19106_v60  ;;  %v5031_v42 = vadd.f32 %v16993_v17, %v19108_v30 }
 0x396   : > { %v17085_v19 = vadd.f32 %v5504_v15, %v5029_v41  ;;  %v5496_v2 = vadd.f32 %v12423_v18, %v5495_v45 }
 0x397   : > { %v12434_v34 = vpop.f32.mrf.mxu0  ;;  %v13488_v6 = vpop.f32.mrf.mxu1 }
 0x398   : > { %19101 = vst [vmem:[#allocation14_spill] sm:$0xff] %v17085_v19  ;;  %v12435_v62 = vadd.f32 %v12434_v34, %v12433_v52  ;;  %v17091_v57 = vadd.f32 %v5496_v2, %v5027_v25  ;;  %v5507_v21 = vadd.f32 %v13488_v6, %v12432_v23  ;;  %v13966_v52 = vld [vmem:[%s14258_s12 + $0x5b8] sm:$0xff]   ;;  %v5033_v25 = vadd.f32 %v16993_v17, %v19110_v5 }
 0x399   : > { %v12436_v49 = vpop.f32.mrf.mxu0  ;;  %v5498_v51 = vpop.f32.mrf.mxu1  ;;  %v5032_v34 = vadd.f32 %v16993_v17, %v4962_v9  ;;  %12765 = vmatprep.subr.bf16.mxu1 %v13966_v52  ;;  %v13971_v52 = vld [vmem:[%s14258_s12 + $0x5f0] sm:$0xff]  }
 0x39a   : > { %v17093_v44 = vadd.f32 %v5507_v21, %v5030_v47  ;;  %v5499_v56 = vadd.f32 %v12426_v36, %v5498_v51  ;;  %13599 = vmatprep.subr.bf16.mxu0 %v13971_v52 }
 0x39b   : > { %v12437_v18 = vpop.f32.mrf.mxu0  ;;  %v13491_v14 = vpop.f32.mrf.mxu1  ;;  %13600 = vmatpush3.bf16.msra.mxu0 %v13971_v52 }
 0x39c   : > { %19104 = vst [vmem:[#allocation33_spill] sm:$0xff] %v17093_v44  ;;  %v17098_v40 = vadd.f32 %v5499_v56, %v5028_v0  ;;  %v12438_v12 = vadd.f32 %v12437_v18, %v12436_v49  ;;  %v19114_v0 = vld [vmem:[#allocation37_spill] sm:$0xff]  ;;  %v5034_v18 = vadd.f32 %v16993_v17, %v19115_v38  ;;  %v6353_v44 = vld [vmem:[#allocation2 + $0xc4] sm:$0x8] }
 0x39d   : > { %v12439_v26 = vpop.f32.mrf.mxu0  ;;  %v5511_v33 = vpop.f32.mrf.mxu1  ;;  %v12314_v56 = vadd.f32 %v19114_v0, %v19113_v24 }
 0x39e   : > { %v5512_v58 = vadd.f32 %v12435_v62, %v5511_v33 }
 0x39f   : > { %v12440_v7 = vpop.f32.mrf.mxu0  ;;  %v13492_v16 = vpop.f32.mrf.mxu1 }
 0x3a0   : > { %v12441_v41 = vadd.f32 %v12440_v7, %v12439_v26  ;;  %v17104_v15 = vadd.f32 %v5512_v58, %v5031_v42  ;;  %v19117_v42 = vld [vmem:[#allocation15_spill] sm:$0xff] }
 0x3a1   : > { %v12442_v45 = vpop.f32.mrf.mxu0  ;;  %v5514_v23 = vpop.f32.mrf.mxu1  ;;  %v4978_v58 = vadd.f32 %v12314_v56, %v19117_v42  ;;  %v19118_v7 = vld [vmem:[#allocation31_spill] sm:$0xff]  ;;  %v5037_v56 = vadd.f32 %v16993_v17, %v16951_v50  ;;  %v5038_v42 = vadd.f32 %v16993_v17, %v16962_v54 }
 0x3a2   : > { %19109 = vst [vmem:[#allocation30_spill] sm:$0xff] %v17104_v15  ;;  %v5520_v2 = vadd.f32 %v13491_v14, %v12441_v41  ;;  %v5515_v37 = vadd.f32 %v12438_v12, %v5514_v23  ;;  %v5035_v12 = vadd.f32 %v16993_v17, %v19118_v7 }
 0x3a3   : > { %v12443_v47 = vpop.f32.mrf.mxu0  ;;  %v13495_v6 = vpop.f32.mrf.mxu1 }
 0x3a4   : > { %v12444_v36 = vadd.f32 %v12443_v47, %v12442_v45  ;;  %v17110_v62 = vadd.f32 %v5520_v2, %v5033_v25  ;;  %v17112_v21 = vadd.f32 %v5515_v37, %v5032_v34  ;;  %v5036_v34 = vadd.f32 %v16993_v17, %v4978_v58 }
 0x3a5   : > { %v12445_v49 = vpop.f32.mrf.mxu0  ;;  %v5527_v51 = vpop.f32.mrf.mxu1  ;;  %v12326_v58 = vadd.f32 %v16981_v1, %v16972_v63  ;;  %v6781_v63 = vld [vmem:[#allocation2 + $0x40] sm:$0x1]  ;;  %v6335_v1 = vld [vmem:[#allocation2 + $0x34] sm:$0x8] }
 0x3a6   : > { %19111 = vst [vmem:[#allocation34_spill] sm:$0xff] %v17110_v62  ;;  %19112 = vst [vmem:[#allocation36_spill] sm:$0xff] %v17112_v21  ;;  %v5523_v14 = vadd.f32 %v13492_v16, %v12444_v36 }
 0x3a7   : > { %v12446_v26 = vpop.f32.mrf.mxu0  ;;  %v13496_v33 = vpop.f32.mrf.mxu1 }
 0x3a8   : > { %v12447_v60 = vadd.f32 %v12446_v26, %v12445_v49  ;;  %v17118_v46 = vadd.f32 %v5523_v14, %v5034_v18 }
 0x3a9   : > { %v12448_v9 = vpop.f32.mrf.mxu0  ;;  %v5530_v30 = vpop.f32.mrf.mxu1 }
 0x3aa   : > { %19116 = vst [vmem:[#allocation17_spill] sm:$0xff] %v17118_v46  ;;  %v5528_v41 = vadd.f32 %v12447_v60, %v5527_v51  ;;  %v6786_v46 = vld [vmem:[#allocation2 + $0xb8] sm:$0x1] }
 0x3ab   : > { %v12449_v45 = vpop.f32.mrf.mxu0  ;;  %v17124_v23 = vpop.f32.mrf.mxu1 }
 0x3ac   : > { %v12450_v5 = vadd.f32 %v12449_v45, %v12448_v9  ;;  %v17126_v25 = vadd.f32 %v5528_v41, %v5035_v12 }
 0x3ad   : > { %v12451_v16 = vpop.f32.mrf.mxu0  ;;  %v5543_v2 = vpop.f32.mrf.mxu1 }
 0x3ae   : > { %19119 = vst [vmem:[#allocation5_spill] sm:$0xff] %v17126_v25  ;;  %v5531_v37 = vadd.f32 %v12450_v5, %v5530_v30  ;;  %v6780_v5 = vld [vmem:[#allocation2 + $0x28] sm:$0x1] }
 0x3af   : > { %v12452_v47 = vpop.f32.mrf.mxu0  ;;  %v17129_v36 = vpop.f32.mrf.mxu1 }
 0x3b0   : > { %v12453_v49 = vadd.f32 %v12452_v47, %v12451_v16  ;;  %v17131_v24 = vadd.f32 %v5531_v37, %v5036_v34  ;;  %v5039_v16 = vadd.f32 %v16993_v17, %v16977_v61  ;;  %v19123_v34 = vld [vmem:[#allocation25_spill] sm:$0xff]  ;;  %v6332_v47 = vld [vmem:[#allocation2 + $0x1c] sm:$0x8]  ;;  %v6428_v61 = vshrl.u32 %v6335_v1, 16 }
 0x3b1   : > { %v12454_v51 = vpop.f32.mrf.mxu0  ;;  %v5546_v0 = vpop.f32.mrf.mxu1  ;;  %v4994_v54 = vadd.f32 %v12326_v58, %v19123_v34  ;;  %v5041_v1 = vadd.f32 %v16993_v17, %v16990_v29 }
 0x3b2   : > { %19120 = vst [vmem:[#allocation7_spill] sm:$0xff] %v17131_v24  ;;  %v5536_v38 = vadd.f32 %v13495_v6, %v12453_v49 }
 0x3b3   : > { %v12455_v18 = vpop.f32.mrf.mxu0  ;;  %v17135_v14 = vpop.f32.mrf.mxu1 }
 0x3b4   : > { %v17137_v26 = vadd.f32 %v5536_v38, %v5037_v56  ;;  %v12456_v60 = vadd.f32 %v12455_v18, %v12454_v51  ;;  %v13978_v51 = vld [vmem:[%s14258_s12 + $0x5e8] sm:$0xff]   ;;  %v6782_v18 = vld [vmem:[#allocation2 + $0x58] sm:$0x1] }
 0x3b5   : > { %v12457_v9 = vpop.f32.mrf.mxu0  ;;  %v17139_v30 = vpop.f32.mrf.mxu1  ;;  %13601 = vmatprep.subr.bf16.mxu0 %v13978_v51 }
 0x3b6   : > { %19121 = vst [vmem:[#allocation9_spill] sm:$0xff] %v17137_v26  ;;  %v5539_v7 = vadd.f32 %v13496_v33, %v12456_v60  ;;  %v6338_v60 = vld [vmem:[#allocation2 + $0x4c] sm:$0x8]  ;;  %13602 = vmatpush3.bf16.msra.mxu0 %v13978_v51  ;;  %v6849_v26 = vshll.u32 %v6782_v18, 16  ;;  %v6344_v18 = vld [vmem:[#allocation2 + $0x7c] sm:$0x8] }
 0x3b7   : > { %v12458_v12 = vpop.f32.mrf.mxu0  ;;  %v17145_v50 = vpop.f32.mrf.mxu1  ;;  %v6450_v24 = vshrl.u32 %v6338_v60, 16  ;;  %v6785_v60 = vld [vmem:[#allocation2 + $0xa0] sm:$0x1]  ;;  %v6494_v21 = vshrl.u32 %v6344_v18, 16 }
 0x3b8   : > { %v17147_v6 = vadd.f32 %v5539_v7, %v5038_v42  ;;  %v12459_v41 = vadd.f32 %v12458_v12, %v12457_v9  ;;  %v6821_v7 = vshll.u32 %v6780_v5, 16  ;;  %v6406_v12 = vshrl.u32 %v6332_v47, 16 }
 0x3b9   : > { %v12460_v52 = vpop.f32.mrf.mxu0  ;;  %v17149_v45 = vpop.f32.mrf.mxu1  ;;  %v6891_v15 = vshll.u32 %v6785_v60, 16 }
 0x3ba   : > { %19122 = vst [vmem:[#allocation32_spill] sm:$0xff] %v17147_v6  ;;  %v5544_v37 = vadd.f32 %v12459_v41, %v5543_v2  ;;  %v6835_v6 = vshll.u32 %v6781_v63, 16  ;;  %v5040_v2 = vadd.f32 %v16993_v17, %v4994_v54  ;;  %v17160_v5 = vrot.slane %v6821_v7, 5 }
 0x3bb   : > { %v12461_v33 = vpop.f32.mrf.mxu0  ;;  %v12515_v49 = vpop.f32.mrf.mxu1  ;;  %v17162_v47 = vrot.slane %v6406_v12, 11  ;;  %v17166_v54 = vrot.slane %v6428_v61, 11  ;;  %v17171_v7 = vrot.slane %v6849_v26, 5  ;;  %v17173_v12 = vrot.slane %v6450_v24, 11 }
 0x3bc   : > { %v17155_v56 = vadd.f32 %v5544_v37, %v5039_v16  ;;  %v12462_v38 = vadd.f32 %v12461_v33, %v12460_v52  ;;  %v6783_v37 = vld [vmem:[#allocation2 + $0x70] sm:$0x1]  ;;  %v6341_v33 = vld [vmem:[#allocation2 + $0x64] sm:$0x8]  ;;  %v17164_v63 = vrot.slane %v6835_v6, 5  ;;  %v5042_v61 = vadd.f32 %v16993_v17, %v16998_v10 }
 0x3bd   : > { %v12463_v9 = vpop.f32.mrf.mxu0  ;;  %v12516_v42 = vpop.f32.mrf.mxu1  ;;  %v6863_v6 = vshll.u32 %v6783_v37, 16  ;;  %v12511_v24 = vadd.f32 %v17139_v30, %v17135_v14  ;;  %v6788_v10 = vld [vmem:[#allocation2 + $0xe8] sm:$0x1] }
 0x3be   : > { %19124 = vst [vmem:[#allocation39_spill] sm:$0xff] %v17155_v56  ;;  %v5547_v58 = vadd.f32 %v12462_v38, %v5546_v0  ;;  %v6784_v0 = vld [vmem:[#allocation2 + $0x88] sm:$0x1]  ;;  %v12517_v38 = vadd.f32 %v12516_v42, %v12515_v49  ;;  %v6787_v49 = vld [vmem:[#allocation2 + $0xd0] sm:$0x1] }
 0x3bf   : > { %v12464_v41 = vpop.f32.mrf.mxu0  ;;  %v12518_v34 = vpop.f32.mrf.mxu1  ;;  %v6877_v62 = vshll.u32 %v6784_v0, 16  ;;  %v6919_v19 = vshll.u32 %v6787_v49, 16 }
 0x3c0   : > { %v17158_v16 = vadd.f32 %v5547_v58, %v5040_v2  ;;  %v12465_v52 = vadd.f32 %v12464_v41, %v12463_v9  ;;  %v6347_v9 = vld [vmem:[#allocation2 + $0x94] sm:$0x8]  ;;  %v6472_v41 = vshrl.u32 %v6341_v33, 16 }
 0x3c1   : > { %v12466_v56 = vpop.f32.mrf.mxu0  ;;  %v12519_v25 = vpop.f32.mrf.mxu1  ;;  %v6516_v26 = vshrl.u32 %v6347_v9, 16  ;;  %v6560_v9 = vshrl.u32 %v6353_v44, 16 }
 0x3c2   : > { %19125 = vst [vmem:[#allocation10_spill] sm:$0xff] %v17158_v16  ;;  %v5552_v51 = vadd.f32 %v17124_v23, %v12465_v52  ;;  %v6350_v23 = vld [vmem:[#allocation2 + $0xac] sm:$0x8]  ;;  %v12520_v17 = vadd.f32 %v12519_v25, %v12518_v34  ;;  %v17186_v60 = vrot.slane %v6472_v41, 11  ;;  %v17190_v25 = vrot.slane %v6494_v21, 11 }
 0x3c3   : > { %v12467_v2 = vpop.f32.mrf.mxu0  ;;  %v12521_v58 = vpop.f32.mrf.mxu1  ;;  %v17192_v34 = vrot.slane %v6891_v15, 5  ;;  %v6356_v41 = vld [vmem:[#allocation2 + $0xdc] sm:$0x8]  ;;  %v17205_v15 = vrot.slane %v6919_v19, 5 }
 0x3c4   : > { %v17177_v16 = vadd.f32 %v5552_v51, %v5041_v1  ;;  %v12468_v29 = vadd.f32 %v12467_v2, %v12466_v56  ;;  %v17182_v51 = vrot.slane %v6863_v6, 5  ;;  %v6905_v2 = vshll.u32 %v6786_v46, 16 }
 0x3c5   : > { %v13519_v42 = vpop.f32.mrf.mxu0  ;;  %v12522_v52 = vpop.f32.mrf.mxu1  ;;  %v12514_v46 = vadd.f32 %v17149_v45, %v17145_v50  ;;  %19130 = vst [vmem:[#allocation18_spill] sm:$0xff] %v17205_v15 }
 0x3c6   : > { %19126 = vst [vmem:[#allocation16_spill] sm:$0xff] %v17177_v16  ;;  %v5555_v37 = vadd.f32 %v17129_v36, %v12468_v29  ;;  %v5987_v33 = vadd.f32 %v13519_v42, %v12517_v38  ;;  %v6538_v16 = vshrl.u32 %v6350_v23, 16  ;;  %v17188_v36 = vrot.slane %v6877_v62, 5  ;;  %v13985_v23 = vld [vmem:[%s14258_s12 + $0x5e0] sm:$0xff]  }
 0x3c7   : > { %v5978_v1 = vpop.f32.mrf.mxu0  ;;  %v12524_v56 = vpop.f32.mrf.mxu1  ;;  %v6933_v38 = vshll.u32 %v6788_v10, 16  ;;  %v17197_v29 = vrot.slane %v6516_v26, 11  ;;  %v17201_v42 = vrot.slane %v6905_v2, 5  ;;  %v12523_v45 = vadd.f32 %v12522_v52, %v12521_v58  ;;  %v6789_v26 = vld [vmem:[#allocation2 + $0x100] sm:$0x1]  ;;  %13603 = vmatprep.subr.bf16.mxu0 %v13985_v23 }
 0x3c8   : > { %v17184_v0 = vadd.f32 %v5555_v37, %v5042_v61  ;;  %v5979_v18 = vadd.f32 %v12511_v24, %v5978_v1  ;;  %v6107_v6 = vadd.f32 %v5987_v33, %v17005_v48  ;;  %v17203_v21 = vrot.slane %v6538_v16, 11  ;;  %v6359_v37 = vld [vmem:[#allocation2 + $0xf4] sm:$0x8]  ;;  %v6790_v1 = vld [vmem:[#allocation2 + $0x118] sm:$0x1]  ;;  %13604 = vmatpush3.bf16.msra.mxu0 %v13985_v23 }
 0x3c9   : > { %v13520_v14 = vpop.f32.mrf.mxu0  ;;  %v12525_v30 = vpop.f32.mrf.mxu1  ;;  %19128 = vst [vmem:[#allocation13_spill] sm:$0xff] %v17201_v42  ;;  %v17208_v48 = vrot.slane %v6560_v9, 11  ;;  %v6582_v10 = vshrl.u32 %v6356_v41, 16  ;;  %v6362_v16 = vld [vmem:[#allocation2 + $0x10c] sm:$0x8] }
 0x3ca   : > { %19127 = vst [vmem:[#allocation8_spill] sm:$0xff] %v17184_v0  ;;  %v5990_v61 = vadd.f32 %v13520_v14, %v12520_v17  ;;  %v6105_v44 = vadd.f32 %v5979_v18, %v17014_v8  ;;  %19129 = vst [vmem:[#allocation12_spill] sm:$0xff] %v17203_v21  ;;  %v17210_v8 = vrot.slane %v6933_v38, 5  ;;  %v6139_v19 = vmax.f32 %v6107_v6, 0.0  ;;  %v6791_v58 = vld [vmem:[#allocation2 + $0x130] sm:$0x1] }
 0x3cb   : > { %v5981_v49 = vpop.f32.mrf.mxu0  ;;  %v12527_v62 = vpop.f32.mrf.mxu1  ;;  %19131 = vst [vmem:[#allocation11_spill] sm:$0xff] %v17208_v48  ;;  %v6365_v52 = vld [vmem:[#allocation2 + $0x124] sm:$0x8]  ;;  %v6604_v0 = vshrl.u32 %v6359_v37, 16  ;;  %v6792_v38 = vld [vmem:[#allocation2 + $0x148] sm:$0x1] }
 0x3cc   : > { %v6108_v24 = vadd.f32 %v5990_v61, %v17020_v31  ;;  %v5982_v50 = vadd.f32 %v12514_v46, %v5981_v49  ;;  %19132 = vst [vmem:[#allocation21_spill] sm:$0xff] %v17210_v8  ;;  %v6137_v9 = vmax.f32 %v6105_v44, 0.0  ;;  %v12526_v46 = vadd.f32 %v12525_v30, %v12524_v56  ;;  %v13989_v8 = vld [vmem:[%s14258_s12 + $0x5d8] sm:$0xff]   ;;  %v6371_v6 = vld [vmem:[#allocation2 + $0x154] sm:$0x8] }
 0x3cd   : > { %v13523_v33 = vpop.f32.mrf.mxu0  ;;  %v12528_v17 = vpop.f32.mrf.mxu1  ;;  %v6947_v49 = vshll.u32 %v6789_v26, 16  ;;  %v6368_v23 = vld [vmem:[#allocation2 + $0x13c] sm:$0x8]  ;;  %13605 = vmatprep.subr.bf16.mxu0 %v13989_v8  ;;  %v17214_v44 = vrot.slane %v6582_v10, 11  ;;  %v6989_v26 = vshll.u32 %v6792_v38, 16 }
 0x3ce   : > { %v6140_v2 = vmax.f32 %v6108_v24, 0.0  ;;  %v6106_v31 = vadd.f32 %v5982_v50, %v17022_v22  ;;  %v12529_v18 = vadd.f32 %v12528_v17, %v12527_v62  ;;  %v6961_v22 = vshll.u32 %v6790_v1, 16  ;;  %13606 = vmatpush3.bf16.msra.mxu0 %v13989_v8 }
 0x3cf   : > { %v5994_v14 = vpop.f32.mrf.mxu0  ;;  %v12530_v61 = vpop.f32.mrf.mxu1  ;;  %v6626_v62 = vshrl.u32 %v6362_v16, 16  ;;  %v6975_v50 = vshll.u32 %v6791_v58, 16  ;;  %v6648_v17 = vshrl.u32 %v6365_v52, 16  ;;  %v6692_v1 = vshrl.u32 %v6371_v6, 16 }
 0x3d0   : > { %v11709_v41 = vpack.c.bf16 %v6140_v2, %v6139_v19  ;;  %v6138_v15 = vmax.f32 %v6106_v31, 0.0  ;;  %v5995_v48 = vadd.f32 %v12523_v45, %v5994_v14  ;;  %v6003_v42 = vadd.f32 %v13523_v33, %v12529_v18 }
 0x3d1   : > { %v13524_v24 = vpop.f32.mrf.mxu0  ;;  %v12531_v21 = vpop.f32.mrf.mxu1  ;;  %v17217_v19 = vrot.slane %v6947_v49, 5  ;;  %v6670_v2 = vshrl.u32 %v6368_v23, 16  ;;  %v17228_v10 = vrot.slane %v6626_v62, 11  ;;  %v17230_v58 = vrot.slane %v6975_v50, 5  ;;  %v13994_v49 = vld [vmem:[%s14258_s12 + $0x5c8] sm:$0xff]  }
 0x3d2   : > { %11798 = vst [vmem:[#allocation2 + $0x38] sm:$0xff] %v11709_v41   ;;  %v11704_v56 = vpack.c.bf16 %v6138_v15, %v6137_v9  ;;  %v12532_v30 = vadd.f32 %v12531_v21, %v12530_v61  ;;  %v6109_v37 = vadd.f32 %v5995_v48, %v17038_v55  ;;  %v6111_v31 = vadd.f32 %v6003_v42, %v17031_v11  ;;  %v17222_v15 = vld [vmem:[#allocation2 + $0x160] sm:$0x1]  ;;  %v13993_v9 = vld [vmem:[%s14258_s12 + $0x5d0] sm:$0xff]   ;;  %v17241_v61 = vld [vmem:[#allocation2 + $0x16c] sm:$0x8] }
 0x3d3   : > { %v5997_v45 = vpop.f32.mrf.mxu0  ;;  %v12533_v33 = vpop.f32.mrf.mxu1  ;;  %v17220_v21 = vrot.slane %v6604_v0, 11  ;;  %19133 = vst [vmem:[#allocation19_spill] sm:$0xff] %v17222_v15  ;;  %v17226_v48 = vrot.slane %v6961_v22, 5  ;;  %v17232_v52 = vrot.slane %v6648_v17, 11  ;;  %v17237_v14 = vrot.slane %v6989_v26, 5  ;;  %19136 = vst [vmem:[#allocation6_spill] sm:$0xff] %v17241_v61  ;;  %13607 = vmatprep.subr.bf16.mxu0 %v13993_v9 }
 0x3d4   : > { %11797 = vst [vmem:[#allocation2 + $0x20] sm:$0xff] %v11704_v56   ;;  %v5998_v16 = vadd.f32 %v12526_v46, %v5997_v45  ;;  %v6006_v18 = vadd.f32 %v13524_v24, %v12532_v30  ;;  %v17239_v46 = vld [vmem:[#allocation2 + $0x178] sm:$0x1]  ;;  %v6141_v38 = vmax.f32 %v6109_v37, 0.0  ;;  %v17244_v6 = vrot.slane %v6670_v2, 11  ;;  %13608 = vmatpush3.bf16.msra.mxu0 %v13993_v9  ;;  %v13996_v45 = vld [vmem:[%s14258_s12 + $0x5c0] sm:$0xff]  }
 0x3d5   : > { %v17224_v8 = vpop.f32.mrf.mxu0  ;;  %v12534_v55 = vpop.f32.mrf.mxu1  ;;  %19134 = vst [vmem:[#allocation35_spill] sm:$0xff] %v17237_v14  ;;  %19135 = vst [vmem:[#allocation4_spill] sm:$0xff] %v17239_v46  ;;  %v17247_v22 = vrot.slane %v6692_v1, 11  ;;  %13609 = vmatprep.subr.bf16.mxu0 %v13994_v49 }
 0x3d6   : > { %v6110_v11 = vadd.f32 %v5998_v16, %v17044_v4  ;;  %v6112_v42 = vadd.f32 %v6006_v18, %v17042_v39  ;;  %v12535_v0 = vadd.f32 %v12534_v55, %v12533_v33  ;;  %19137 = vst [vmem:[#allocation20_spill] sm:$0xff] %v17244_v6  ;;  %v6143_v39 = vmax.f32 %v6111_v31, 0.0 }
 0x3d7   : > { %v6010_v41 = vpop.f32.mrf.mxu0  ;;  %v12536_v23 = vpop.f32.mrf.mxu1  ;;  %19138 = vst [vmem:[#allocation24_spill] sm:$0xff] %v17247_v22 }
 0x3d8   : > { %v6142_v4 = vmax.f32 %v6110_v11, 0.0  ;;  %v6144_v62 = vmax.f32 %v6112_v42, 0.0  ;;  %v6011_v50 = vadd.f32 %v12535_v0, %v6010_v41  ;;  %13610 = vmatpush3.bf16.msra.mxu0 %v13994_v49 }
 0x3d9   : > { %v17249_v17 = vpop.f32.mrf.mxu0  ;;  %v12537_v56 = vpop.f32.mrf.mxu1  ;;  %v17251_v30 = vld [vmem:[#allocation2 + $0x38] sm:$0xf]  ;;  %v17253_v26 = vld [vmem:[#allocation2 + $0x3c] sm:$0xf]  ;;  %13611 = vmatprep.subr.bf16.mxu0 %v13996_v45 }
 0x3da   : > { %v11714_v33 = vpack.c.bf16 %v6142_v4, %v6141_v38  ;;  %v11719_v2 = vpack.c.bf16 %v6144_v62, %v6143_v39  ;;  %v6113_v1 = vadd.f32 %v6011_v50, %v17057_v3  ;;  %v12538_v16 = vadd.f32 %v12537_v56, %v12536_v23 }
 0x3db   : > { %v6333_v31 = vld [vmem:[#allocation2 + $0x20] sm:$0xf]  ;;  %v6334_v18 = vld [vmem:[#allocation2 + $0x24] sm:$0xf]  ;;  %v12539_v55 = vpop.f32.mrf.mxu1  ;;  %v6433_v9 = vshrl.u32 %v17251_v30, 16  ;;  %v6436_v11 = vshll.u32 %v17251_v30, 16  ;;  %v17262_v42 = vcombine.low %v17251_v30, %v17253_v26  ;;  %v6013_v0 = vpop.f32.mrf.mxu0 }
 0x3dc   : > { %11799 = vst [vmem:[#allocation2 + $0x50] sm:$0xff] %v11714_v33   ;;  %11800 = vst [vmem:[#allocation2 + $0x68] sm:$0xff] %v11719_v2   ;;  %v6145_v38 = vmax.f32 %v6113_v1, 0.0  ;;  %v6411_v41 = vshrl.u32 %v6333_v31, 16  ;;  %v6414_v4 = vshll.u32 %v6333_v31, 16  ;;  %v6420_v3 = vshrl.u32 %v6334_v18, 16  ;;  %13612 = vmatpush3.bf16.msra.mxu0 %v13996_v45 }
 0x3dd   : > { %v6423_v23 = vshll.u32 %v6334_v18, 16  ;;  %v17264_v39 = vcombine.low %v6333_v31, %v6334_v18  ;;  %v6014_v62 = vadd.f32 %v12538_v16, %v6013_v0  ;;  %v12540_v50 = vpop.f32.mrf.mxu1  ;;  %v17266_v56 = vrot.slane %v6433_v9, 7 }
 0x3de   : > { %v6413_v37 = vrot.slane %v6411_v41, 7  ;;  %v6422_v24 = vrot.slane %v6420_v3, 7  ;;  %v6811_v30 = vrot.slane %v6411_v41, 4  ;;  %v6812_v61 = vrot.slane %v6414_v4, 5 }
 0x3df   : > { %v6815_v33 = vrot.slane %v6423_v23, 5  ;;  %v6817_v2 = vrot.slane %v6420_v3, 4  ;;  %7536 = vmatprep.mubr.bf16.mxu0 %v17264_v39  ;;  %v6114_v1 = vadd.f32 %v6014_v62, %v17063_v43  ;;  %v12541_v46 = vadd.f32 %v12540_v50, %v12539_v55  ;;  %v12542_v49 = vpop.f32.mrf.mxu1 }
 0x3e0   : > { %v6416_v31 = vor.u32 %v6414_v4, %v6413_v37  ;;  %v6418_v18 = vrot.slane %v6413_v37, 4  ;;  %v6425_v16 = vor.u32 %v6423_v23, %v6422_v24  ;;  %v6813_v0 = vor.u32 %v6812_v61, %v6811_v30  ;;  %v13967_v30 = vld [vmem:[%s14258_s12 + $0x578] sm:$0xff]  }
 0x3e1   : > { %v6818_v22 = vor.u32 %v6817_v2, %v6815_v33  ;;  %v6146_v15 = vmax.f32 %v6114_v1, 0.0  ;;  %v6019_v14 = vadd.f32 %v17224_v8, %v12541_v46  ;;  %v6438_v41 = vor.u32 %v6436_v11, %v17266_v56  ;;  %v12543_v6 = vpop.f32.mrf.mxu1  ;;  %v17282_v46 = vpop.f32.mrf.mxu0 }
 0x3e2   : > { %v6814_v3 = vrot.slane %v6813_v0, 4  ;;  %v6417_v43 = vsel %vm14289_vm7, %v17162_v47, %v6416_v31  ;;  %v6426_v55 = vsel %vm14289_vm7, %v6418_v18, %v6425_v16  ;;  %v6440_v37 = vrot.slane %v17266_v56, 4  ;;  %v13969_v31 = vld [vmem:[%s14258_s12 + $0x5b0] sm:$0xff]  }
 0x3e3   : > { %v6819_v24 = vrot.slane %v6818_v22, 4  ;;  %v11724_v61 = vpack.c.bf16 %v6146_v15, %v6145_v38  ;;  %v6115_v45 = vadd.f32 %v6019_v14, %v17048_v35  ;;  %v17280_v4 = vcombine.low %v6417_v43, %v6426_v55  ;;  %v12545_v8 = vpop.f32.mrf.mxu1  ;;  %v6339_v56 = vld [vmem:[#allocation2 + $0x50] sm:$0xf] }
 0x3e4   : > { %v6816_v23 = vsel %vm14324_vm8, %v6814_v3, %v6815_v33  ;;  %v6442_v47 = vshrl.u32 %v17253_v26, 16  ;;  %v6445_v62 = vshll.u32 %v17253_v26, 16  ;;  %v6825_v50 = vrot.slane %v6433_v9, 4  ;;  %v6340_v9 = vld [vmem:[#allocation2 + $0x54] sm:$0xf] }
 0x3e5   : > { %v6824_v15 = vsel %vm14324_vm8, %v6819_v24, %v17160_v5  ;;  %11801 = vst [vmem:[#allocation2 + $0x80] sm:$0xff] %v11724_v61   ;;  %v6147_v35 = vmax.f32 %v6115_v45, 0.0  ;;  %7537 = vmatmul.mubr.bf16.gmra.mxu0 %v17280_v4  ;;  %v6826_v14 = vrot.slane %v6436_v11, 5  ;;  %v12544_v22 = vadd.f32 %v12543_v6, %v12542_v49  ;;  %v12546_v38 = vpop.f32.mrf.mxu1  ;;  %v6026_v49 = vpop.f32.mrf.mxu0 }
 0x3e6   : > { %v17293_v33 = vcombine.low %v6816_v23, %v6824_v15  ;;  %v6444_v2 = vrot.slane %v6442_v47, 7  ;;  %v6831_v1 = vrot.slane %v6442_v47, 4  ;;  %7544 = vmatprep.mubr.bf16.mxu0 %v17262_v42  ;;  %v6829_v26 = vrot.slane %v6445_v62, 5 }
 0x3e7   : > { %v6827_v18 = vor.u32 %v6826_v14, %v6825_v50  ;;  %v6022_v5 = vadd.f32 %v17249_v17, %v12544_v22  ;;  %v12547_v16 = vadd.f32 %v12546_v38, %v12545_v8  ;;  %v6439_v6 = vsel %vm14289_vm7, %v17166_v54, %v6438_v41  ;;  %v12548_v11 = vpop.f32.mrf.mxu1  ;;  %v13970_v8 = vld [vmem:[%s14258_s12 + $0x570] sm:$0xff]   ;;  %v13973_v50 = vld [vmem:[%s14258_s12 + $0x5a8] sm:$0xff]  }
 0x3e8   : > { %v6447_v0 = vor.u32 %v6445_v62, %v6444_v2  ;;  %13566 = vmatmul.mubr.bf16.vlgmr.msra.gmra.mxu1 %v17293_v33  ;;  %v6832_v3 = vor.u32 %v6831_v1, %v6829_v26  ;;  %v6455_v43 = vshrl.u32 %v6339_v56, 16  ;;  %v6458_v55 = vshll.u32 %v6339_v56, 16 }
 0x3e9   : > { %v6828_v24 = vrot.slane %v6827_v18, 4  ;;  %v6116_v61 = vadd.f32 %v6022_v5, %v17059_v28  ;;  %v6027_v45 = vadd.f32 %v12547_v16, %v6026_v49  ;;  %v6464_v17 = vshrl.u32 %v6340_v9, 16  ;;  %v12549_v23 = vpop.f32.mrf.mxu1  ;;  %12766 = vmatpush3.bf16.msra.mxu1 %v13967_v30  ;;  %v17314_v30 = vpop.f32.mrf.mxu0  ;;  %v13974_v49 = vld [vmem:[%s14258_s12 + $0x568] sm:$0xff]  }
 0x3ea   : > { %v6833_v47 = vrot.slane %v6832_v3, 4  ;;  %v6448_v54 = vsel %vm14289_vm7, %v6440_v37, %v6447_v0  ;;  %v6457_v41 = vrot.slane %v6455_v43, 7  ;;  %v6467_v62 = vshll.u32 %v6340_v9, 16  ;;  %12767 = vmatprep.subr.bf16.mxu1 %v13969_v31 }
 0x3eb   : > { %v6830_v15 = vsel %vm14324_vm8, %v6828_v24, %v6829_v26  ;;  %v6148_v14 = vmax.f32 %v6116_v61, 0.0  ;;  %v17310_v22 = vadd.f32 %v6027_v45, %v17075_v53  ;;  %v17312_v28 = vcombine.low %v6439_v6, %v6448_v54  ;;  %v12551_v38 = vpop.f32.mrf.mxu1  ;;  %v6342_v6 = vld [vmem:[#allocation2 + $0x68] sm:$0xf]  ;;  %v13976_v61 = vld [vmem:[%s14258_s12 + $0x5a0] sm:$0xff]  }
 0x3ec   : > { %v6838_v37 = vsel %vm14324_vm8, %v6833_v47, %v17164_v63  ;;  %v6460_v2 = vor.u32 %v6458_v55, %v6457_v41  ;;  %v6462_v1 = vrot.slane %v6457_v41, 4  ;;  %v6466_v31 = vrot.slane %v6464_v17, 7  ;;  %v6029_v41 = vpop.f32.mrf.mxu0 }
 0x3ed   : > { %v17319_v18 = vcombine.low %v6830_v15, %v6838_v37  ;;  %v11729_v26 = vpack.c.bf16 %v6148_v14, %v6147_v35  ;;  %v6149_v53 = vmax.f32 %v17310_v22, 0.0  ;;  %7545 = vmatmul.mubr.bf16.gmra.mxu0 %v17312_v28  ;;  %v6839_v5 = vrot.slane %v6455_v43, 4  ;;  %v12552_v16 = vpop.f32.mrf.mxu1  ;;  %12768 = vmatpush3.bf16.msra.mxu1 %v13970_v8  ;;  %v6343_v8 = vld [vmem:[#allocation2 + $0x6c] sm:$0xf] }
 0x3ee   : > { %v6469_v0 = vor.u32 %v6467_v62, %v6466_v31  ;;  %v6840_v3 = vrot.slane %v6458_v55, 5  ;;  %v6843_v24 = vrot.slane %v6467_v62, 5  ;;  %v6845_v63 = vrot.slane %v6464_v17, 4  ;;  %12769 = vmatprep.subr.bf16.mxu1 %v13973_v50  ;;  %v13980_v31 = vld [vmem:[%s14258_s12 + $0x598] sm:$0xff]  }
 0x3ef   : > { %13569 = vmatprep.mubr.bf16.mxu1 %v17319_v18  ;;  %11802 = vst [vmem:[#allocation2 + $0x98] sm:$0xff] %v11729_v26   ;;  %v17326_v45 = vcombine.low %v6339_v56, %v6340_v9  ;;  %v12550_v35 = vadd.f32 %v12549_v23, %v12548_v11  ;;  %v12553_v47 = vadd.f32 %v12552_v16, %v12551_v38  ;;  %v12554_v54 = vpop.f32.mrf.mxu1  ;;  %v6477_v50 = vshrl.u32 %v6342_v6, 16 }
 0x3f0   : > { %v6461_v43 = vsel %vm14289_vm7, %v17173_v12, %v6460_v2  ;;  %v6841_v55 = vor.u32 %v6840_v3, %v6839_v5  ;;  %v6846_v62 = vor.u32 %v6845_v63, %v6843_v24  ;;  %v6470_v17 = vsel %vm14289_vm7, %v6462_v1, %v6469_v0  ;;  %v13977_v12 = vld [vmem:[%s14258_s12 + $0x560] sm:$0xff]   ;;  %v17343_v0 = vpop.f32.mrf.mxu0 }
 0x3f1   : > { %7552 = vmatprep.mubr.bf16.mxu0 %v17326_v45  ;;  %v6030_v56 = vadd.f32 %v12550_v35, %v6029_v41  ;;  %v6035_v9 = vadd.f32 %v17282_v46, %v12553_v47  ;;  %v17335_v11 = vcombine.low %v6461_v43, %v6470_v17  ;;  %v6480_v23 = vshll.u32 %v6342_v6, 16  ;;  %v12555_v15 = vpop.f32.mrf.mxu1  ;;  %12770 = vmatpush3.bf16.msra.mxu1 %v13974_v49  ;;  %v17354_v41 = vld [vmem:[#allocation2 + $0x80] sm:$0xf] }
 0x3f2   : > { %v6842_v14 = vrot.slane %v6841_v55, 4  ;;  %v6847_v38 = vrot.slane %v6846_v62, 4  ;;  %v6479_v37 = vrot.slane %v6477_v50, 7  ;;  %v6486_v2 = vshrl.u32 %v6343_v8, 16  ;;  %12771 = vmatprep.subr.bf16.mxu1 %v13976_v61 }
 0x3f3   : > { %v6118_v1 = vadd.f32 %v6030_v56, %v17081_v32  ;;  %v17341_v26 = vadd.f32 %v6035_v9, %v17067_v20  ;;  %v6489_v5 = vshll.u32 %v6343_v8, 16  ;;  %v6853_v46 = vrot.slane %v6477_v50, 4  ;;  %v12557_v16 = vpop.f32.mrf.mxu1  ;;  %v13983_v50 = vld [vmem:[%s14258_s12 + $0x590] sm:$0xff]  }
 0x3f4   : > { %v6844_v49 = vsel %vm14324_vm8, %v6842_v14, %v6843_v24  ;;  %v6852_v3 = vsel %vm14324_vm8, %v6847_v38, %v17171_v7  ;;  %v6482_v63 = vor.u32 %v6480_v23, %v6479_v37  ;;  %v6484_v61 = vrot.slane %v6479_v37, 4  ;;  %v13981_v24 = vld [vmem:[%s14258_s12 + $0x558] sm:$0xff]  }
 0x3f5   : > { %v17350_v32 = vcombine.low %v6844_v49, %v6852_v3  ;;  %v6150_v20 = vmax.f32 %v6118_v1, 0.0  ;;  %v6151_v35 = vmax.f32 %v17341_v26, 0.0  ;;  %7553 = vmatmul.mubr.bf16.gmra.mxu0 %v17335_v11  ;;  %v6488_v47 = vrot.slane %v6486_v2, 7  ;;  %v12558_v43 = vpop.f32.mrf.mxu1  ;;  %12772 = vmatpush3.bf16.msra.mxu1 %v13977_v12  ;;  %v6042_v1 = vpop.f32.mrf.mxu0  ;;  %v13987_v3 = vld [vmem:[%s14258_s12 + $0x588] sm:$0xff]  }
 0x3f6   : > { %v6854_v55 = vrot.slane %v6480_v23, 5  ;;  %v6859_v62 = vrot.slane %v6486_v2, 4  ;;  %v17357_v17 = vcombine.low %v6342_v6, %v6343_v8  ;;  %v6857_v7 = vrot.slane %v6489_v5, 5  ;;  %12773 = vmatprep.subr.bf16.mxu1 %v13980_v31  ;;  %v6346_v8 = vld [vmem:[#allocation2 + $0x84] sm:$0xf] }
 0x3f7   : > { %13570 = vmatmul.mubr.bf16.gmra.mxu1 %v17350_v32  ;;  %v11734_v56 = vpack.c.bf16 %v6150_v20, %v6149_v53  ;;  %v6491_v9 = vor.u32 %v6489_v5, %v6488_v47  ;;  %v12556_v14 = vadd.f32 %v12555_v15, %v12554_v54  ;;  %v12559_v38 = vadd.f32 %v12558_v43, %v12557_v16  ;;  %v12560_v37 = vpop.f32.mrf.mxu1  ;;  %v13984_v5 = vld [vmem:[%s14258_s12 + $0x550] sm:$0xff]   ;;  %v17380_v43 = vpop.f32.mrf.mxu0 }
 0x3f8   : > { %7560 = vmatprep.mubr.bf16.mxu0 %v17357_v17  ;;  %v6855_v23 = vor.u32 %v6854_v55, %v6853_v46  ;;  %v6860_v12 = vor.u32 %v6859_v62, %v6857_v7  ;;  %v6483_v6 = vsel %vm14289_vm7, %v17186_v60, %v6482_v63  ;;  %v6499_v2 = vshrl.u32 %v17354_v41, 16 }
 0x3f9   : > { %11803 = vst [vmem:[#allocation2 + $0xb0] sm:$0xff] %v11734_v56   ;;  %v6038_v22 = vadd.f32 %v17314_v30, %v12556_v14  ;;  %v6043_v53 = vadd.f32 %v12559_v38, %v6042_v1  ;;  %v6492_v54 = vsel %vm14289_vm7, %v6484_v61, %v6491_v9  ;;  %v6502_v15 = vshll.u32 %v17354_v41, 16  ;;  %v12561_v31 = vpop.f32.mrf.mxu1  ;;  %12774 = vmatpush3.bf16.msra.mxu1 %v13981_v24  ;;  %v17391_v38 = vld [vmem:[#allocation2 + $0x98] sm:$0xf] }
 0x3fa   : > { %v6856_v46 = vrot.slane %v6855_v23, 4  ;;  %v6861_v16 = vrot.slane %v6860_v12, 4  ;;  %v17373_v49 = vcombine.low %v6483_v6, %v6492_v54  ;;  %v6501_v60 = vrot.slane %v6499_v2, 7  ;;  %12775 = vmatprep.subr.bf16.mxu1 %v13983_v50  ;;  %v13991_v6 = vld [vmem:[%s14258_s12 + $0x580] sm:$0xff]  }
 0x3fb   : > { %v6120_v63 = vadd.f32 %v6038_v22, %v17077_v13  ;;  %v17378_v30 = vadd.f32 %v6043_v53, %v17091_v57  ;;  %v6508_v20 = vshrl.u32 %v6346_v8, 16  ;;  %v6511_v61 = vshll.u32 %v6346_v8, 16  ;;  %v12563_v47 = vpop.f32.mrf.mxu1  ;;  %v13999_v22 = vld [vmem:[%s14258_s12 + $0x678] sm:$0xff]  }
 0x3fc   : > { %v6858_v24 = vsel %vm14324_vm8, %v6856_v46, %v6857_v7  ;;  %v6866_v55 = vsel %vm14324_vm8, %v6861_v16, %v17182_v51  ;;  %v6504_v62 = vor.u32 %v6502_v15, %v6501_v60  ;;  %v6506_v50 = vrot.slane %v6501_v60, 4  ;;  %v13988_v7 = vld [vmem:[%s14258_s12 + $0x548] sm:$0xff]   ;;  %12901 = vmatprep.subr.bf16.mxu0 %v13999_v22 }
 0x3fd   : > { %v17387_v13 = vcombine.low %v6858_v24, %v6866_v55  ;;  %v6152_v57 = vmax.f32 %v6120_v63, 0.0  ;;  %v6153_v56 = vmax.f32 %v17378_v30, 0.0  ;;  %7561 = vmatmul.mubr.bf16.gmra.mxu0 %v17373_v49  ;;  %v6510_v9 = vrot.slane %v6508_v20, 7  ;;  %v12564_v14 = vpop.f32.mrf.mxu1  ;;  %12776 = vmatpush3.bf16.msra.mxu1 %v13984_v5  ;;  %v6045_v5 = vpop.f32.mrf.mxu0  ;;  %v17415_v55 = vld [vmem:[%s14258_s12 + $0x6b8] sm:$0xff]  }
 0x3fe   : > { %v6867_v1 = vrot.slane %v6499_v2, 4  ;;  %v6868_v23 = vrot.slane %v6502_v15, 5  ;;  %v6871_v51 = vrot.slane %v6511_v61, 5  ;;  %v6873_v12 = vrot.slane %v6508_v20, 4  ;;  %12777 = vmatprep.subr.bf16.mxu1 %v13987_v3  ;;  %v6349_v20 = vld [vmem:[#allocation2 + $0x9c] sm:$0xf] }
 0x3ff   : > { %13573 = vmatprep.mubr.bf16.mxu1 %v17387_v13  ;;  %v11739_v53 = vpack.c.bf16 %v6152_v57, %v6151_v35  ;;  %v6513_v54 = vor.u32 %v6511_v61, %v6510_v9  ;;  %v17400_v46 = vcombine.low %v17354_v41, %v6346_v8  ;;  %v12562_v16 = vadd.f32 %v12561_v31, %v12560_v37  ;;  %v12566_v60 = vpop.f32.mrf.mxu1  ;;  %v13992_v31 = vld [vmem:[%s14258_s12 + $0x540] sm:$0xff]   ;;  %v17424_v22 = vpop.f32.mrf.mxu0 }
 0x400   : > { %v6869_v2 = vor.u32 %v6868_v23, %v6867_v1  ;;  %v6874_v15 = vor.u32 %v6873_v12, %v6871_v51  ;;  %v12565_v63 = vadd.f32 %v12564_v14, %v12563_v47  ;;  %v6505_v3 = vsel %vm14289_vm7, %v17190_v25, %v6504_v62  ;;  %v19139_v23 = vld [vmem:[#allocation14_spill] sm:$0xff] }
 0x401   : > { %11804 = vst [vmem:[#allocation2 + $0xc8] sm:$0xff] %v11739_v53   ;;  %7568 = vmatprep.mubr.bf16.mxu0 %v17400_v46  ;;  %v6046_v26 = vadd.f32 %v12562_v16, %v6045_v5  ;;  %v6514_v35 = vsel %vm14289_vm7, %v6506_v50, %v6513_v54  ;;  %v6521_v41 = vshrl.u32 %v17391_v38, 16  ;;  %v6524_v37 = vshll.u32 %v17391_v38, 16  ;;  %v12567_v8 = vpop.f32.mrf.mxu1  ;;  %12778 = vmatpush3.bf16.msra.mxu1 %v13988_v7 }
 0x402   : > { %v6870_v61 = vrot.slane %v6869_v2, 4  ;;  %v6875_v47 = vrot.slane %v6874_v15, 4  ;;  %v6051_v25 = vadd.f32 %v17343_v0, %v12565_v63  ;;  %v17412_v24 = vcombine.low %v6505_v3, %v6514_v35  ;;  %12779 = vmatprep.subr.bf16.mxu1 %v13991_v6  ;;  %v6351_v63 = vld [vmem:[#allocation2 + $0xb0] sm:$0xf] }
 0x403   : > { %v6122_v62 = vadd.f32 %v6046_v26, %v17098_v40  ;;  %v6523_v57 = vrot.slane %v6521_v41, 7  ;;  %v6530_v50 = vshrl.u32 %v6349_v20, 16  ;;  %v6533_v9 = vshll.u32 %v6349_v20, 16  ;;  %v12569_v14 = vpop.f32.mrf.mxu1 }
 0x404   : > { %v6872_v1 = vsel %vm14324_vm8, %v6870_v61, %v6871_v51  ;;  %v6880_v7 = vsel %vm14324_vm8, %v6875_v47, %v17188_v36  ;;  %v6123_v0 = vadd.f32 %v6051_v25, %v19139_v23  ;;  %v6881_v12 = vrot.slane %v6521_v41, 4  ;;  %v6352_v41 = vld [vmem:[#allocation2 + $0xb4] sm:$0xf] }
 0x405   : > { %v17426_v6 = vcombine.low %v6872_v1, %v6880_v7  ;;  %v6154_v53 = vmax.f32 %v6122_v62, 0.0  ;;  %7569 = vmatmul.mubr.bf16.gmra.mxu0 %v17412_v24  ;;  %v6526_v40 = vor.u32 %v6524_v37, %v6523_v57  ;;  %v6528_v54 = vrot.slane %v6523_v57, 4  ;;  %v12570_v16 = vpop.f32.mrf.mxu1  ;;  %12780 = vmatpush3.bf16.msra.mxu1 %v13992_v31  ;;  %v6058_v62 = vpop.f32.mrf.mxu0  ;;  %v19140_v1 = vld [vmem:[#allocation33_spill] sm:$0xff] }
 0x406   : > { %v6155_v5 = vmax.f32 %v6123_v0, 0.0  ;;  %v6532_v51 = vrot.slane %v6530_v50, 7  ;;  %v6882_v2 = vrot.slane %v6524_v37, 5  ;;  %v6887_v15 = vrot.slane %v6530_v50, 4  ;;  %13645 = vmatprep.subr.bf16.mxu1 %v17415_v55 }
 0x407   : > { %13574 = vmatmul.mubr.bf16.gmra.mxu1 %v17426_v6  ;;  %v11744_v36 = vpack.c.bf16 %v6154_v53, %v6153_v56  ;;  %v17434_v3 = vcombine.low %v17391_v38, %v6349_v20  ;;  %v6885_v26 = vrot.slane %v6533_v9, 5  ;;  %v12568_v35 = vadd.f32 %v12567_v8, %v12566_v60  ;;  %v12572_v61 = vpop.f32.mrf.mxu1 }
 0x408   : > { %v6535_v31 = vor.u32 %v6533_v9, %v6532_v51  ;;  %v6883_v47 = vor.u32 %v6882_v2, %v6881_v12  ;;  %v12571_v25 = vadd.f32 %v12570_v16, %v12569_v14  ;;  %v6527_v37 = vsel %vm14289_vm7, %v17197_v29, %v6526_v40  ;;  %v17451_v51 = vpop.f32.mrf.mxu0 }
 0x409   : > { %11805 = vst [vmem:[#allocation2 + $0xe0] sm:$0xff] %v11744_v36   ;;  %7576 = vmatprep.mubr.bf16.mxu0 %v17434_v3  ;;  %v6888_v30 = vor.u32 %v6887_v15, %v6885_v26  ;;  %v6054_v56 = vadd.f32 %v17380_v43, %v12568_v35  ;;  %v6543_v38 = vshrl.u32 %v6351_v63, 16  ;;  %v6546_v20 = vshll.u32 %v6351_v63, 16  ;;  %v12573_v57 = vpop.f32.mrf.mxu1  ;;  %v19141_v43 = vld [vmem:[#allocation30_spill] sm:$0xff] }
 0x40a   : > { %v6884_v60 = vrot.slane %v6883_v47, 4  ;;  %v6059_v8 = vadd.f32 %v12571_v25, %v6058_v62  ;;  %v6536_v50 = vsel %vm14289_vm7, %v6528_v54, %v6535_v31  ;;  %v6552_v9 = vshrl.u32 %v6352_v41, 16 }
 0x40b   : > { %v6889_v14 = vrot.slane %v6888_v30, 4  ;;  %v6124_v7 = vadd.f32 %v6054_v56, %v19140_v1  ;;  %v17444_v29 = vcombine.low %v6527_v37, %v6536_v50  ;;  %v6545_v23 = vrot.slane %v6543_v38, 7  ;;  %v12575_v0 = vpop.f32.mrf.mxu1  ;;  %v6354_v37 = vld [vmem:[#allocation2 + $0xc8] sm:$0xf]  ;;  %v19142_v1 = vld [vmem:[#allocation12_spill] sm:$0xff] }
 0x40c   : > { %v6886_v12 = vsel %vm14324_vm8, %v6884_v60, %v6885_v26  ;;  %v17449_v53 = vadd.f32 %v6059_v8, %v19141_v43  ;;  %v6554_v40 = vrot.slane %v6552_v9, 7  ;;  %v6555_v16 = vshll.u32 %v6352_v41, 16 }
 0x40d   : > { %v6894_v54 = vsel %vm14324_vm8, %v6889_v14, %v17192_v34  ;;  %v6156_v2 = vmax.f32 %v6124_v7, 0.0  ;;  %7577 = vmatmul.mubr.bf16.gmra.mxu0 %v17444_v29  ;;  %v6548_v15 = vor.u32 %v6546_v20, %v6545_v23  ;;  %v6550_v36 = vrot.slane %v6545_v23, 4  ;;  %v12576_v35 = vpop.f32.mrf.mxu1  ;;  %v6355_v23 = vld [vmem:[#allocation2 + $0xcc] sm:$0xf] }
 0x40e   : > { %v17457_v31 = vcombine.low %v6886_v12, %v6894_v54  ;;  %v6157_v26 = vmax.f32 %v17449_v53, 0.0  ;;  %v6557_v47 = vor.u32 %v6555_v16, %v6554_v40  ;;  %v6895_v25 = vrot.slane %v6543_v38, 4  ;;  %v6061_v12 = vpop.f32.mrf.mxu0 }
 0x40f   : > { %v11749_v62 = vpack.c.bf16 %v6156_v2, %v6155_v5  ;;  %v6896_v30 = vrot.slane %v6546_v20, 5  ;;  %v6899_v56 = vrot.slane %v6555_v16, 5  ;;  %v6901_v60 = vrot.slane %v6552_v9, 4  ;;  %v12578_v8 = vpop.f32.mrf.mxu1  ;;  %v19144_v2 = vld [vmem:[#allocation36_spill] sm:$0xff] }
 0x410   : > { %13577 = vmatprep.mubr.bf16.mxu1 %v17457_v31  ;;  %v17461_v34 = vcombine.low %v6351_v63, %v6352_v41  ;;  %v12574_v50 = vadd.f32 %v12573_v57, %v12572_v61  ;;  %v12577_v14 = vadd.f32 %v12576_v35, %v12575_v0  ;;  %v6549_v7 = vsel %vm14289_vm7, %v19142_v1, %v6548_v15  ;;  %v19145_v35 = vld [vmem:[#allocation34_spill] sm:$0xff] }
 0x411   : > { %11806 = vst [vmem:[#allocation2 + $0xf8] sm:$0xff] %v11749_v62   ;;  %v6897_v38 = vor.u32 %v6896_v30, %v6895_v25  ;;  %v6902_v43 = vor.u32 %v6901_v60, %v6899_v56  ;;  %v6558_v5 = vsel %vm14289_vm7, %v6550_v36, %v6557_v47  ;;  %v6565_v20 = vshrl.u32 %v6354_v37, 16  ;;  %v12579_v9 = vpop.f32.mrf.mxu1  ;;  %v17476_v62 = vpop.f32.mrf.mxu0  ;;  %v19146_v30 = vld [vmem:[#allocation13_spill] sm:$0xff] }
 0x412   : > { %7584 = vmatprep.mubr.bf16.mxu0 %v17461_v34  ;;  %v6062_v63 = vadd.f32 %v12574_v50, %v6061_v12  ;;  %v6067_v41 = vadd.f32 %v17424_v22, %v12577_v14  ;;  %v17470_v61 = vcombine.low %v6549_v7, %v6558_v5  ;;  %v6568_v57 = vshll.u32 %v6354_v37, 16  ;;  %v6357_v5 = vld [vmem:[#allocation2 + $0xe0] sm:$0xf] }
 0x413   : > { %v6898_v0 = vrot.slane %v6897_v38, 4  ;;  %v6903_v53 = vrot.slane %v6902_v43, 4  ;;  %v6567_v40 = vrot.slane %v6565_v20, 7  ;;  %v6574_v16 = vshrl.u32 %v6355_v23, 16  ;;  %v12581_v54 = vpop.f32.mrf.mxu1 }
 0x414   : > { %19143 = vst [vmem:[#allocation23_spill] sm:$0xff] %v17470_v61  ;;  %v6126_v15 = vadd.f32 %v6062_v63, %v19144_v2  ;;  %v17474_v25 = vadd.f32 %v6067_v41, %v19145_v35  ;;  %v6577_v36 = vshll.u32 %v6355_v23, 16  ;;  %v6909_v47 = vrot.slane %v6565_v20, 4 }
 0x415   : > { %v6900_v22 = vsel %vm14324_vm8, %v6898_v0, %v6899_v56  ;;  %v6908_v60 = vsel %vm14324_vm8, %v6903_v53, %v19146_v30  ;;  %7585 = vmatmul.mubr.bf16.gmra.mxu0 %v17470_v61  ;;  %v6570_v50 = vor.u32 %v6568_v57, %v6567_v40  ;;  %v6572_v14 = vrot.slane %v6567_v40, 4  ;;  %v12582_v1 = vpop.f32.mrf.mxu1  ;;  %v6074_v30 = vpop.f32.mrf.mxu0 }
 0x416   : > { %v17484_v7 = vcombine.low %v6900_v22, %v6908_v60  ;;  %v6158_v12 = vmax.f32 %v6126_v15, 0.0  ;;  %v6159_v38 = vmax.f32 %v17474_v25, 0.0  ;;  %v6576_v43 = vrot.slane %v6574_v16, 7  ;;  %v19148_v25 = vld [vmem:[#allocation11_spill] sm:$0xff] }
 0x417   : > { %v6910_v20 = vrot.slane %v6568_v57, 5  ;;  %v6915_v63 = vrot.slane %v6574_v16, 4  ;;  %v17487_v41 = vcombine.low %v6354_v37, %v6355_v23  ;;  %v6913_v56 = vrot.slane %v6577_v36, 5  ;;  %v12584_v0 = vpop.f32.mrf.mxu1  ;;  %v6358_v16 = vld [vmem:[#allocation2 + $0xe4] sm:$0xf] }
 0x418   : > { %13578 = vmatmul.mubr.bf16.gmra.mxu1 %v17484_v7  ;;  %v11754_v53 = vpack.c.bf16 %v6158_v12, %v6157_v26  ;;  %v6579_v2 = vor.u32 %v6577_v36, %v6576_v43  ;;  %v12580_v35 = vadd.f32 %v12579_v9, %v12578_v8  ;;  %v12583_v40 = vadd.f32 %v12582_v1, %v12581_v54  ;;  %v19150_v12 = vld [vmem:[#allocation17_spill] sm:$0xff] }
 0x419   : > { %19147 = vst [vmem:[#allocation22_spill] sm:$0xff] %v17487_v41  ;;  %7592 = vmatprep.mubr.bf16.mxu0 %v17487_v41  ;;  %v6911_v15 = vor.u32 %v6910_v20, %v6909_v47  ;;  %v6916_v22 = vor.u32 %v6915_v63, %v6913_v56  ;;  %v6571_v57 = vsel %vm14289_vm7, %v19148_v25, %v6570_v50  ;;  %v6587_v37 = vshrl.u32 %v6357_v5, 16  ;;  %v12585_v23 = vpop.f32.mrf.mxu1  ;;  %v19151_v50 = vld [vmem:[#allocation5_spill] sm:$0xff]  ;;  %v17503_v25 = vpop.f32.mrf.mxu0 }
 0x41a   : > { %11807 = vst [vmem:[#allocation2 + $0x110] sm:$0xff] %v11754_v53   ;;  %v6070_v60 = vadd.f32 %v17451_v51, %v12580_v35  ;;  %v6075_v61 = vadd.f32 %v12583_v40, %v6074_v30  ;;  %v6580_v26 = vsel %vm14289_vm7, %v6572_v14, %v6579_v2  ;;  %v6590_v8 = vshll.u32 %v6357_v5, 16  ;;  %v19152_v14 = vld [vmem:[#allocation18_spill] sm:$0xff] }
 0x41b   : > { %v6912_v9 = vrot.slane %v6911_v15, 4  ;;  %v6917_v54 = vrot.slane %v6916_v22, 4  ;;  %v17497_v36 = vcombine.low %v6571_v57, %v6580_v26  ;;  %v6589_v47 = vrot.slane %v6587_v37, 7  ;;  %v12587_v1 = vpop.f32.mrf.mxu1  ;;  %v6077_v41 = vpop.f32.mrf.mxu0 }
 0x41c   : > { %v6128_v43 = vadd.f32 %v6070_v60, %v19150_v12  ;;  %v17501_v20 = vadd.f32 %v6075_v61, %v19151_v50  ;;  %v6596_v63 = vshrl.u32 %v6358_v16, 16  ;;  %v6599_v53 = vshll.u32 %v6358_v16, 16 }
 0x41d   : > { %19149 = vst [vmem:[#allocation26_spill] sm:$0xff] %v17497_v36  ;;  %v6914_v51 = vsel %vm14324_vm8, %v6912_v9, %v6913_v56  ;;  %v6922_v2 = vsel %vm14324_vm8, %v6917_v54, %v19152_v14  ;;  %7593 = vmatmul.mubr.bf16.gmra.mxu0 %v17497_v36  ;;  %v6592_v35 = vor.u32 %v6590_v8, %v6589_v47  ;;  %v6594_v40 = vrot.slane %v6589_v47, 4  ;;  %v12588_v30 = vpop.f32.mrf.mxu1  ;;  %v6360_v56 = vld [vmem:[#allocation2 + $0xf8] sm:$0xf] }
 0x41e   : > { %v17511_v15 = vcombine.low %v6914_v51, %v6922_v2  ;;  %v6160_v61 = vmax.f32 %v6128_v43, 0.0  ;;  %v6161_v22 = vmax.f32 %v17501_v20, 0.0  ;;  %v6598_v57 = vrot.slane %v6596_v63, 7 }
 0x41f   : > { %v6923_v60 = vrot.slane %v6587_v37, 4  ;;  %v6924_v26 = vrot.slane %v6590_v8, 5  ;;  %v6927_v12 = vrot.slane %v6599_v53, 5  ;;  %v6929_v50 = vrot.slane %v6596_v63, 4  ;;  %v12590_v9 = vpop.f32.mrf.mxu1  ;;  %v6361_v8 = vld [vmem:[#allocation2 + $0xfc] sm:$0xf] }
 0x420   : > { %13581 = vmatprep.mubr.bf16.mxu1 %v17511_v15  ;;  %v11759_v54 = vpack.c.bf16 %v6160_v61, %v6159_v38  ;;  %v6601_v14 = vor.u32 %v6599_v53, %v6598_v57  ;;  %v17515_v36 = vcombine.low %v6357_v5, %v6358_v16  ;;  %v12586_v47 = vadd.f32 %v12585_v23, %v12584_v0  ;;  %v19154_v61 = vld [vmem:[#allocation7_spill] sm:$0xff] }
 0x421   : > { %v6925_v51 = vor.u32 %v6924_v26, %v6923_v60  ;;  %v6930_v2 = vor.u32 %v6929_v50, %v6927_v12  ;;  %v12589_v43 = vadd.f32 %v12588_v30, %v12587_v1  ;;  %v6593_v37 = vsel %vm14289_vm7, %v17214_v44, %v6592_v35  ;;  %v12591_v20 = vpop.f32.mrf.mxu1  ;;  %v19155_v26 = vld [vmem:[#allocation21_spill] sm:$0xff] }
 0x422   : > { %19153 = vst [vmem:[#allocation28_spill] sm:$0xff] %v17515_v36  ;;  %11808 = vst [vmem:[#allocation2 + $0x128] sm:$0xff] %v11759_v54   ;;  %7600 = vmatprep.mubr.bf16.mxu0 %v17515_v36  ;;  %v6078_v63 = vadd.f32 %v12586_v47, %v6077_v41  ;;  %v6602_v38 = vsel %vm14289_vm7, %v6594_v40, %v6601_v14  ;;  %v6609_v5 = vshrl.u32 %v6360_v56, 16  ;;  %v6612_v16 = vshll.u32 %v6360_v56, 16  ;;  %v19156_v50 = vld [vmem:[#allocation9_spill] sm:$0xff] }
 0x423   : > { %v6926_v0 = vrot.slane %v6925_v51, 4  ;;  %v6931_v23 = vrot.slane %v6930_v2, 4  ;;  %v6083_v53 = vadd.f32 %v17476_v62, %v12589_v43  ;;  %v17524_v1 = vcombine.low %v6593_v37, %v6602_v38  ;;  %v12593_v30 = vpop.f32.mrf.mxu1  ;;  %v17536_v37 = vpop.f32.mrf.mxu0 }
 0x424   : > { %v6130_v44 = vadd.f32 %v6078_v63, %v19154_v61  ;;  %v6611_v35 = vrot.slane %v6609_v5, 7  ;;  %v6618_v57 = vshrl.u32 %v6361_v8, 16  ;;  %v6621_v60 = vshll.u32 %v6361_v8, 16  ;;  %v6363_v61 = vld [vmem:[#allocation2 + $0x110] sm:$0xf] }
 0x425   : > { %v6928_v41 = vsel %vm14324_vm8, %v6926_v0, %v6927_v12  ;;  %v6936_v40 = vsel %vm14324_vm8, %v6931_v23, %v19155_v26  ;;  %v6131_v54 = vadd.f32 %v6083_v53, %v19156_v50  ;;  %7601 = vmatmul.mubr.bf16.gmra.mxu0 %v17524_v1  ;;  %v6937_v62 = vrot.slane %v6609_v5, 4  ;;  %v12594_v14 = vpop.f32.mrf.mxu1 }
 0x426   : > { %v17534_v47 = vcombine.low %v6928_v41, %v6936_v40  ;;  %v6162_v51 = vmax.f32 %v6130_v44, 0.0  ;;  %v6614_v2 = vor.u32 %v6612_v16, %v6611_v35  ;;  %v6616_v43 = vrot.slane %v6611_v35, 4  ;;  %v6364_v41 = vld [vmem:[#allocation2 + $0x114] sm:$0xf] }
 0x427   : > { %v6163_v63 = vmax.f32 %v6131_v54, 0.0  ;;  %v6620_v38 = vrot.slane %v6618_v57, 7  ;;  %v6938_v12 = vrot.slane %v6612_v16, 5  ;;  %v6943_v0 = vrot.slane %v6618_v57, 4  ;;  %v12596_v36 = vpop.f32.mrf.mxu1 }
 0x428   : > { %13582 = vmatmul.mubr.bf16.gmra.mxu1 %v17534_v47  ;;  %v11764_v23 = vpack.c.bf16 %v6162_v51, %v6161_v22  ;;  %v17539_v53 = vcombine.low %v6360_v56, %v6361_v8  ;;  %v6941_v5 = vrot.slane %v6621_v60, 5  ;;  %v12592_v26 = vadd.f32 %v12591_v20, %v12590_v9  ;;  %v6090_v22 = vpop.f32.mrf.mxu0 }
 0x429   : > { %v6623_v40 = vor.u32 %v6621_v60, %v6620_v38  ;;  %v6939_v44 = vor.u32 %v6938_v12, %v6937_v62  ;;  %v12595_v50 = vadd.f32 %v12594_v14, %v12593_v30  ;;  %v6615_v35 = vsel %vm14289_vm7, %v17220_v21, %v6614_v2  ;;  %v12597_v54 = vpop.f32.mrf.mxu1  ;;  %v19158_v14 = vld [vmem:[#allocation32_spill] sm:$0xff] }
 0x42a   : > { %19157 = vst [vmem:[#allocation29_spill] sm:$0xff] %v17539_v53  ;;  %11809 = vst [vmem:[#allocation2 + $0x140] sm:$0xff] %v11764_v23   ;;  %7608 = vmatprep.mubr.bf16.mxu0 %v17539_v53  ;;  %v6944_v16 = vor.u32 %v6943_v0, %v6941_v5  ;;  %v6086_v57 = vadd.f32 %v17503_v25, %v12592_v26  ;;  %v6631_v56 = vshrl.u32 %v6363_v61, 16  ;;  %v6634_v8 = vshll.u32 %v6363_v61, 16  ;;  %v19159_v25 = vld [vmem:[#allocation39_spill] sm:$0xff] }
 0x42b   : > { %v6940_v51 = vrot.slane %v6939_v44, 4  ;;  %v6091_v9 = vadd.f32 %v12595_v50, %v6090_v22  ;;  %v6624_v20 = vsel %vm14289_vm7, %v6616_v43, %v6623_v40  ;;  %v6640_v30 = vshrl.u32 %v6364_v41, 16  ;;  %v12599_v60 = vpop.f32.mrf.mxu1  ;;  %v17559_v44 = vpop.f32.mrf.mxu0 }
 0x42c   : > { %v6945_v62 = vrot.slane %v6944_v16, 4  ;;  %v6132_v21 = vadd.f32 %v6086_v57, %v19158_v14  ;;  %v17549_v2 = vcombine.low %v6615_v35, %v6624_v20  ;;  %v6633_v38 = vrot.slane %v6631_v56, 7 }
 0x42d   : > { %v6942_v12 = vsel %vm14324_vm8, %v6940_v51, %v6941_v5  ;;  %v17554_v0 = vadd.f32 %v6091_v9, %v19159_v25  ;;  %v6642_v23 = vrot.slane %v6640_v30, 7  ;;  %v6643_v26 = vshll.u32 %v6364_v41, 16  ;;  %v12600_v16 = vpop.f32.mrf.mxu1  ;;  %v6366_v9 = vld [vmem:[#allocation2 + $0x128] sm:$0xf] }
 0x42e   : > { %v6950_v43 = vsel %vm14324_vm8, %v6945_v62, %v17217_v19  ;;  %v6164_v40 = vmax.f32 %v6132_v21, 0.0  ;;  %7609 = vmatmul.mubr.bf16.gmra.mxu0 %v17549_v2  ;;  %v6636_v50 = vor.u32 %v6634_v8, %v6633_v38  ;;  %v6638_v35 = vrot.slane %v6633_v38, 4 }
 0x42f   : > { %v17562_v57 = vcombine.low %v6942_v12, %v6950_v43  ;;  %v6165_v5 = vmax.f32 %v17554_v0, 0.0  ;;  %v6645_v22 = vor.u32 %v6643_v26, %v6642_v23  ;;  %v6951_v51 = vrot.slane %v6631_v56, 4  ;;  %v6367_v12 = vld [vmem:[#allocation2 + $0x12c] sm:$0xf]  ;;  %v6093_v0 = vpop.f32.mrf.mxu0 }
 0x430   : > { %v11769_v20 = vpack.c.bf16 %v6164_v40, %v6163_v63  ;;  %v6952_v14 = vrot.slane %v6634_v8, 5  ;;  %v6955_v25 = vrot.slane %v6643_v26, 5  ;;  %v6957_v53 = vrot.slane %v6640_v30, 4  ;;  %v12602_v30 = vpop.f32.mrf.mxu1  ;;  %v19160_v40 = vld [vmem:[#allocation10_spill] sm:$0xff] }
 0x431   : > { %13585 = vmatprep.mubr.bf16.mxu1 %v17562_v57  ;;  %v17566_v19 = vcombine.low %v6363_v61, %v6364_v41  ;;  %v12598_v62 = vadd.f32 %v12597_v54, %v12596_v36  ;;  %v12601_v21 = vadd.f32 %v12600_v16, %v12599_v60  ;;  %v6637_v38 = vsel %vm14289_vm7, %v17228_v10, %v6636_v50 }
 0x432   : > { %11810 = vst [vmem:[#allocation2 + $0x158] sm:$0xff] %v11769_v20   ;;  %v6953_v23 = vor.u32 %v6952_v14, %v6951_v51  ;;  %v6958_v56 = vor.u32 %v6957_v53, %v6955_v25  ;;  %v6646_v63 = vsel %vm14289_vm7, %v6638_v35, %v6645_v22  ;;  %v6653_v8 = vshrl.u32 %v6366_v9, 16  ;;  %v19161_v53 = vld [vmem:[#allocation16_spill] sm:$0xff] }
 0x433   : > { %7616 = vmatprep.mubr.bf16.mxu0 %v17566_v19  ;;  %v6094_v61 = vadd.f32 %v12598_v62, %v6093_v0  ;;  %v6099_v36 = vadd.f32 %v17536_v37, %v12601_v21  ;;  %v17575_v41 = vcombine.low %v6637_v38, %v6646_v63  ;;  %v6656_v54 = vshll.u32 %v6366_v9, 16  ;;  %v12603_v62 = vpop.f32.mrf.mxu1 }
 0x434   : > { %v6954_v60 = vrot.slane %v6953_v23, 4  ;;  %v6959_v10 = vrot.slane %v6958_v56, 4  ;;  %v6655_v26 = vrot.slane %v6653_v8, 7  ;;  %v6662_v43 = vshrl.u32 %v6367_v12, 16  ;;  %v6369_v56 = vld [vmem:[#allocation2 + $0x140] sm:$0xf] }
 0x435   : > { %v6134_v50 = vadd.f32 %v6094_v61, %v19160_v40  ;;  %v6135_v16 = vadd.f32 %v6099_v36, %v19161_v53  ;;  %v6665_v51 = vshll.u32 %v6367_v12, 16  ;;  %v6965_v35 = vrot.slane %v6653_v8, 4  ;;  %v6370_v36 = vld [vmem:[#allocation2 + $0x144] sm:$0xf] }
 0x436   : > { %v6956_v22 = vsel %vm14324_vm8, %v6954_v60, %v6955_v25  ;;  %v6964_v37 = vsel %vm14324_vm8, %v6959_v10, %v17226_v48  ;;  %7617 = vmatmul.mubr.bf16.gmra.mxu0 %v17575_v41  ;;  %v6658_v20 = vor.u32 %v6656_v54, %v6655_v26  ;;  %v6660_v14 = vrot.slane %v6655_v26, 4 }
 0x437   : > { %v17585_v21 = vcombine.low %v6956_v22, %v6964_v37  ;;  %v6166_v38 = vmax.f32 %v6134_v50, 0.0  ;;  %v6167_v0 = vmax.f32 %v6135_v16, 0.0  ;;  %v6664_v23 = vrot.slane %v6662_v43, 7 }
 0x438   : > { %v6966_v63 = vrot.slane %v6656_v54, 5  ;;  %v6971_v8 = vrot.slane %v6662_v43, 4  ;;  %v17587_v61 = vcombine.low %v6366_v9, %v6367_v12  ;;  %v6969_v25 = vrot.slane %v6665_v51, 5 }
 0x439   : > { %13586 = vmatmul.mubr.bf16.gmra.mxu1 %v17585_v21  ;;  %v11774_v48 = vpack.c.bf16 %v6166_v38, %v6165_v5  ;;  %v6667_v60 = vor.u32 %v6665_v51, %v6664_v23  ;;  %v12604_v10 = vadd.f32 %v12603_v62, %v12602_v30  ;;  %v6659_v26 = vsel %vm14289_vm7, %v17232_v52, %v6658_v20  ;;  %v19163_v52 = vld [vmem:[#allocation8_spill] sm:$0xff] }
 0x43a   : > { %7624 = vmatprep.mubr.bf16.mxu0 %v17587_v61  ;;  %v6967_v40 = vor.u32 %v6966_v63, %v6965_v35  ;;  %v6972_v50 = vor.u32 %v6971_v8, %v6969_v25  ;;  %v6675_v53 = vshrl.u32 %v6369_v56, 16  ;;  %v6678_v54 = vshll.u32 %v6369_v56, 16  ;;  %v6372_v63 = vld [vmem:[#allocation2 + $0x158] sm:$0xf] }
 0x43b   : > { %11811 = vst [vmem:[#allocation2 + $0x170] sm:$0xff] %v11774_v48   ;;  %v6102_v9 = vadd.f32 %v17559_v44, %v12604_v10  ;;  %v6668_v12 = vsel %vm14289_vm7, %v6660_v14, %v6667_v60  ;;  %v6684_v43 = vshrl.u32 %v6370_v36, 16  ;;  %v6687_v5 = vshll.u32 %v6370_v36, 16 }
 0x43c   : > { %v6968_v16 = vrot.slane %v6967_v40, 4  ;;  %v6973_v30 = vrot.slane %v6972_v50, 4  ;;  %v17597_v51 = vcombine.low %v6659_v26, %v6668_v12  ;;  %v6677_v22 = vrot.slane %v6675_v53, 7  ;;  %v6373_v26 = vld [vmem:[#allocation2 + $0x15c] sm:$0xf] }
 0x43d   : > { %v6136_v37 = vadd.f32 %v6102_v9, %v19163_v52  ;;  %v6686_v20 = vrot.slane %v6684_v43, 7  ;;  %v6979_v35 = vrot.slane %v6675_v53, 4  ;;  %v6980_v62 = vrot.slane %v6678_v54, 5 }
 0x43e   : > { %19162 = vst [vmem:[#allocation38_spill] sm:$0xff] %v17597_v51  ;;  %v6970_v38 = vsel %vm14324_vm8, %v6968_v16, %v6969_v25  ;;  %v6978_v44 = vsel %vm14324_vm8, %v6973_v30, %v17230_v58  ;;  %7625 = vmatmul.mubr.bf16.gmra.mxu0 %v17597_v51  ;;  %v6680_v14 = vor.u32 %v6678_v54, %v6677_v22  ;;  %v6682_v23 = vrot.slane %v6677_v22, 4  ;;  %v19165_v25 = vld [vmem:[#allocation20_spill] sm:$0xff] }
 0x43f   : > { %v17606_v8 = vcombine.low %v6970_v38, %v6978_v44  ;;  %v6168_v48 = vmax.f32 %v6136_v37, 0.0  ;;  %v6689_v60 = vor.u32 %v6687_v5, %v6686_v20  ;;  %v6981_v10 = vor.u32 %v6980_v62, %v6979_v35 }
 0x440   : > { %v6983_v40 = vrot.slane %v6687_v5, 5  ;;  %v6985_v50 = vrot.slane %v6684_v43, 4  ;;  %v17608_v53 = vcombine.low %v6369_v56, %v6370_v36  ;;  %v6681_v9 = vsel %vm14289_vm7, %v19165_v25, %v6680_v14 }
 0x441   : > { %13589 = vmatprep.mubr.bf16.mxu1 %v17606_v8  ;;  %v11779_v58 = vpack.c.bf16 %v6168_v48, %v6167_v0  ;;  %v6982_v54 = vrot.slane %v6981_v10, 4  ;;  %v6690_v12 = vsel %vm14289_vm7, %v6682_v23, %v6689_v60  ;;  %v6697_v16 = vshrl.u32 %v6372_v63, 16  ;;  %v19168_v10 = vld [vmem:[#allocation35_spill] sm:$0xff] }
 0x442   : > { %19164 = vst [vmem:[#allocation37_spill] sm:$0xff] %v17608_v53  ;;  %v6986_v30 = vor.u32 %v6985_v50, %v6983_v40  ;;  %7632 = vmatprep.mubr.bf16.mxu0 %v17608_v53  ;;  %v17617_v22 = vcombine.low %v6681_v9, %v6690_v12  ;;  %v6700_v43 = vshll.u32 %v6372_v63, 16  ;;  %v6706_v56 = vshrl.u32 %v6373_v26, 16  ;;  %v6375_v0 = vld [vmem:[#allocation2 + $0x170] sm:$0xf]  ;;  %v19169_v12 = vld [vmem:[#allocation19_spill] sm:$0xff] }
 0x443   : > { %11812 = vst [vmem:[#allocation2 + $0x188] sm:$0xff] %v11779_v58   ;;  %v6984_v36 = vsel %vm14324_vm8, %v6982_v54, %v6983_v40  ;;  %v6699_v5 = vrot.slane %v6697_v16, 7  ;;  %v6709_v52 = vshll.u32 %v6373_v26, 16  ;;  %v6993_v37 = vrot.slane %v6697_v16, 4  ;;  %v6376_v60 = vld [vmem:[#allocation2 + $0x174] sm:$0xf] }
 0x444   : > { %19166 = vst [vmem:[#allocation27_spill] sm:$0xff] %v17617_v22  ;;  %v6987_v20 = vrot.slane %v6986_v30, 4  ;;  %v6708_v35 = vrot.slane %v6706_v56, 7  ;;  %v6994_v62 = vrot.slane %v6700_v43, 5  ;;  %v6999_v38 = vrot.slane %v6706_v56, 4 }
 0x445   : > { %v6702_v44 = vor.u32 %v6700_v43, %v6699_v5  ;;  %v6704_v14 = vrot.slane %v6699_v5, 4  ;;  %v17621_v23 = vcombine.low %v6372_v63, %v6373_v26  ;;  %v6997_v48 = vrot.slane %v6709_v52, 5  ;;  %v19171_v43 = vld [vmem:[#allocation24_spill] sm:$0xff] }
 0x446   : > { %v6992_v50 = vsel %vm14324_vm8, %v6987_v20, %v19168_v10  ;;  %7633 = vmatmul.mubr.bf16.gmra.mxu0 %v17617_v22  ;;  %v6711_v40 = vor.u32 %v6709_v52, %v6708_v35  ;;  %v6995_v25 = vor.u32 %v6994_v62, %v6993_v37  ;;  %v6719_v9 = vshrl.u32 %v6375_v0, 16  ;;  %v19172_v10 = vld [vmem:[#allocation4_spill] sm:$0xff] }
 0x447   : > { %19167 = vst [vmem:[#allocation15_spill] sm:$0xff] %v17621_v23  ;;  %v17627_v58 = vcombine.low %v6984_v36, %v6992_v50  ;;  %7640 = vmatprep.mubr.bf16.mxu0 %v17621_v23  ;;  %v7000_v54 = vor.u32 %v6999_v38, %v6997_v48  ;;  %v19170_v16 = vshll.u32 %v19169_v12, 16  ;;  %v6722_v26 = vshll.u32 %v6375_v0, 16  ;;  %v19174_v12 = vld [vmem:[#allocation6_spill] sm:$0xff] }
 0x448   : > { %v6996_v30 = vrot.slane %v6995_v25, 4  ;;  %v6703_v56 = vsel %vm14289_vm7, %v19171_v43, %v6702_v44  ;;  %v6721_v5 = vrot.slane %v6719_v9, 7  ;;  %v6728_v20 = vshrl.u32 %v6376_v60, 16 }
 0x449   : > { %v7005_v63 = vrot.slane %v19170_v16, 5  ;;  %13590 = vmatmul.mubr.bf16.gmra.mxu1 %v17627_v58  ;;  %v7001_v52 = vrot.slane %v7000_v54, 4  ;;  %v6712_v36 = vsel %vm14289_vm7, %v6704_v14, %v6711_v40  ;;  %v6731_v37 = vshll.u32 %v6376_v60, 16 }
 0x44a   : > { %v7007_v35 = vrot.slane %v6719_v9, 4  ;;  %v6998_v62 = vsel %vm14324_vm8, %v6996_v30, %v6997_v48  ;;  %v6730_v38 = vrot.slane %v6728_v20, 7  ;;  %v19173_v50 = vshll.u32 %v19172_v10, 16  ;;  %v17650_v48 = vld [vmem:[#allocation2 + $0x188] sm:$0xf]  ;;  %v12645_v10 = vpop.f32.mrf.mxu0 }
 0x44b   : > { %v19175_v16 = vshrl.u32 %v19174_v12, 16  ;;  %v7006_v43 = vsel %vm14324_vm8, %v7001_v52, %v7005_v63  ;;  %v7008_v23 = vrot.slane %v6722_v26, 5  ;;  %v7011_v54 = vrot.slane %v6731_v37, 5  ;;  %v17652_v30 = vld [vmem:[#allocation2 + $0x18c] sm:$0xf] }
 0x44c   : > { %v7019_v25 = vrot.slane %v19173_v50, 5  ;;  %v7013_v22 = vrot.slane %v6728_v20, 4  ;;  %v17646_v53 = vcombine.low %v6998_v62, %v7006_v43  ;;  %v17648_v14 = vcombine.low %v6703_v56, %v6712_v36  ;;  %v12646_v52 = vpop.f32.mrf.mxu0 }
 0x44d   : > { %v11211_v44 = vrot.slane %v19175_v16, 11  ;;  %v6724_v40 = vor.u32 %v6722_v26, %v6721_v5  ;;  %v6726_v9 = vrot.slane %v6721_v5, 4  ;;  %v6733_v50 = vor.u32 %v6731_v37, %v6730_v38 }
 0x44e   : > { %v7009_v12 = vor.u32 %v7008_v23, %v7007_v35  ;;  %v7014_v16 = vor.u32 %v7013_v22, %v7011_v54  ;;  %v17654_v51 = vcombine.low %v6375_v0, %v6376_v60  ;;  %13593 = vmatprep.mubr.bf16.mxu1 %v17646_v53  ;;  %7641 = vmatmul.mubr.bf16.gmra.mxu0 %v17648_v14  ;;  %v6741_v26 = vshrl.u32 %v17650_v48, 16  ;;  %v6377_v23 = vld [vmem:[#allocation2 + $0x184] sm:$0x8] }
 0x44f   : > { %v6750_v5 = vshrl.u32 %v17652_v30, 16  ;;  %v6725_v20 = vsel %vm14289_vm7, %v11211_v44, %v6724_v40  ;;  %v6734_v60 = vsel %vm14289_vm7, %v6726_v9, %v6733_v50  ;;  %v17669_v36 = vadd.f32 %v12646_v52, %v12645_v10  ;;  %v14002_v52 = vld [vmem:[%s14258_s12 + $0x630] sm:$0xff]  }
 0x450   : > { %7648 = vmatprep.mubr.bf16.mxu0 %v17654_v51  ;;  %v7010_v63 = vrot.slane %v7009_v12, 4  ;;  %v7015_v56 = vrot.slane %v7014_v16, 4  ;;  %v6744_v35 = vshll.u32 %v17650_v48, 16  ;;  %v17676_v62 = vcombine.low %v17650_v48, %v17652_v30 }
 0x451   : > { %v6753_v38 = vshll.u32 %v17652_v30, 16  ;;  %v6736_v44 = vshrl.u32 %v6377_v23, 16  ;;  %v6752_v43 = vrot.slane %v6750_v5, 7  ;;  %v14003_v23 = vld [vmem:[%s14258_s12 + $0x668] sm:$0xff]  }
 0x452   : > { %v7012_v22 = vsel %vm14324_vm8, %v7010_v63, %v7011_v54  ;;  %v7020_v0 = vsel %vm14324_vm8, %v7015_v56, %v7019_v25  ;;  %v6743_v25 = vrot.slane %v6741_v26, 7  ;;  %v17684_v54 = vcombine.low %v6725_v20, %v6734_v60  ;;  %v13997_v63 = vld [vmem:[%s14258_s12 + $0x6b0] sm:$0xff]   ;;  %v14000_v56 = vld [vmem:[%s14258_s12 + $0x638] sm:$0xff]   ;;  %v14007_v60 = vld [vmem:[%s14258_s12 + $0x620] sm:$0xff]  }
 0x453   : > { %v17671_v37 = vcombine.low %v7012_v22, %v7020_v0  ;;  %v11212_v40 = vrot.slane %v6736_v44, 11  ;;  %v6755_v50 = vor.u32 %v6753_v38, %v6752_v43  ;;  %v14001_v20 = vld [vmem:[%s14258_s12 + $0x670] sm:$0xff]   ;;  %v14004_v22 = vld [vmem:[%s14258_s12 + $0x628] sm:$0xff]   ;;  %v14014_v0 = vld [vmem:[%s14258_s12 + $0x698] sm:$0xff]  }
 0x454   : > { %v6746_v9 = vor.u32 %v6744_v35, %v6743_v25  ;;  %v6748_v10 = vrot.slane %v6743_v25, 4  ;;  %v14008_v44 = vld [vmem:[%s14258_s12 + $0x658] sm:$0xff]   ;;  %v14017_v25 = vld [vmem:[%s14258_s12 + $0x690] sm:$0xff]  }
 0x455   : > { %13594 = vmatmul.mubr.bf16.gmra.mxu1 %v17671_v37  ;;  %v14009_v43 = vld [vmem:[%s14258_s12 + $0x618] sm:$0xff]  }
 0x456   : > { %8081 = vmatprep.mubr.bf16.mxu1 %v17264_v39  ;;  %7649 = vmatmul.mubr.bf16.gmra.mxu0 %v17684_v54  ;;  %v6747_v12 = vsel %vm14289_vm7, %v11212_v40, %v6746_v9  ;;  %v6756_v39 = vsel %vm14289_vm7, %v6748_v10, %v6755_v50  ;;  %v14010_v40 = vld [vmem:[%s14258_s12 + $0x650] sm:$0xff]   ;;  %v14018_v9 = vld [vmem:[%s14258_s12 + $0x688] sm:$0xff]  }
 0x457   : > { %13613 = vmatprep.mubr.bf16.mxu0 %v17293_v33  ;;  %v17697_v16 = vcombine.low %v6747_v12, %v6756_v39  ;;  %v13998_v33 = vld [vmem:[%s14258_s12 + $0x6a8] sm:$0xff]   ;;  %v14011_v10 = vld [vmem:[%s14258_s12 + $0x610] sm:$0xff]   ;;  %v14019_v12 = vld [vmem:[%s14258_s12 + $0x680] sm:$0xff]  }
 0x458   : > { %v14012_v50 = vld [vmem:[%s14258_s12 + $0x648] sm:$0xff]  }
 0x459   : > { %v14013_v39 = vld [vmem:[%s14258_s12 + $0x608] sm:$0xff]  }
 0x45d   : > { %8082 = vmatmul.mubr.bf16.vlgmr.msra.gmra.mxu1 %v17280_v4  ;;  %v14005_v4 = vld [vmem:[%s14258_s12 + $0x6a0] sm:$0xff]  }
 0x45e   : > { %8089 = vmatprep.mubr.bf16.mxu1 %v17262_v42  ;;  %13646 = vmatpush3.bf16.msra.mxu1 %v17415_v55  ;;  %v14006_v55 = vld [vmem:[%s14258_s12 + $0x660] sm:$0xff]  }
 0x45f   : > { %13614 = vmatmul.mubr.bf16.vlgmr.msra.gmra.mxu0 %v17319_v18  ;;  %13647 = vmatprep.subr.bf16.mxu1 %v13997_v63 }
 0x460   : > { %13617 = vmatprep.mubr.bf16.mxu0 %v17350_v32  ;;  %12902 = vmatpush3.bf16.msra.mxu0 %v14000_v56  ;;  %v14016_v56 = vld [vmem:[%s14258_s12 + $0x600] sm:$0xff]  }
 0x461   : > { %12903 = vmatprep.subr.bf16.mxu0 %v14001_v20  ;;  %v7021_v20 = vrot.slane %v6741_v26, 4  ;;  %v19177_v26 = vld [vmem:[#allocation22_spill] sm:$0xff] }
 0x462   : > { %13648 = vmatpush3.bf16.msra.mxu1 %v13997_v63  ;;  %v14015_v63 = vld [vmem:[%s14258_s12 + $0x640] sm:$0xff]  }
 0x463   : > { %13649 = vmatprep.subr.bf16.mxu1 %v13998_v33 }
 0x464   : > { %12904 = vmatpush3.bf16.msra.mxu0 %v14002_v52  ;;  %v7025_v52 = vrot.slane %v6753_v38, 5  ;;  %v19178_v38 = vld [vmem:[#allocation26_spill] sm:$0xff] }
 0x465   : > { %8090 = vmatmul.mubr.bf16.gmra.mxu1 %v17312_v28  ;;  %12905 = vmatprep.subr.bf16.mxu0 %v14003_v23  ;;  %v7027_v23 = vrot.slane %v6750_v5, 4 }
 0x466   : > { %8097 = vmatprep.mubr.bf16.mxu1 %v17326_v45  ;;  %13650 = vmatpush3.bf16.msra.mxu1 %v13998_v33  ;;  %v7022_v33 = vrot.slane %v6744_v35, 5 }
 0x467   : > { %13618 = vmatmul.mubr.bf16.gmra.mxu0 %v17387_v13  ;;  %13651 = vmatprep.subr.bf16.mxu1 %v14005_v4 }
 0x468   : > { %13621 = vmatprep.mubr.bf16.mxu0 %v17426_v6  ;;  %12906 = vmatpush3.bf16.msra.mxu0 %v14004_v22  ;;  %v7023_v22 = vor.u32 %v7022_v33, %v7021_v20 }
 0x469   : > { %12907 = vmatprep.subr.bf16.mxu0 %v14006_v55  ;;  %v7028_v55 = vor.u32 %v7027_v23, %v7025_v52  ;;  %v14022_v23 = vld [vmem:[%s17794_s10 + $0xe8] ss:$16 sps:$4 sm:$0xff]  }
 0x46a   : > { %13652 = vmatpush3.bf16.msra.mxu1 %v14005_v4  ;;  %v6795_v4 = vld [vmem:[#allocation2 + $0x190] sm:$0x1]  ;;  %v7024_v48 = vrot.slane %v7023_v22, 4  ;;  %v14024_v22 = vld [vmem:[%s17794_s10 + $0xec] ss:$16 sps:$4 sm:$0xff]  }
 0x46b   : > { %13653 = vmatprep.subr.bf16.mxu1 %v14014_v0  ;;  %v7029_v35 = vrot.slane %v7028_v55, 4 }
 0x46c   : > { %12908 = vmatpush3.bf16.msra.mxu0 %v14007_v60  ;;  %v19176_v60 = vld [vmem:[#allocation23_spill] sm:$0xff]  ;;  %v7026_v30 = vsel %vm14324_vm8, %v7024_v48, %v7025_v52 }
 0x46d   : > { %8098 = vmatmul.mubr.bf16.gmra.mxu1 %v17335_v11  ;;  %12909 = vmatprep.subr.bf16.mxu0 %v14008_v44 }
 0x46e   : > { %8105 = vmatprep.mubr.bf16.mxu1 %v17357_v17  ;;  %13654 = vmatpush3.bf16.msra.mxu1 %v14014_v0  ;;  %v7031_v0 = vshll.u32 %v6795_v4, 16 }
 0x46f   : > { %13622 = vmatmul.mubr.bf16.gmra.mxu0 %v17457_v31  ;;  %13655 = vmatprep.subr.bf16.mxu1 %v14017_v25 }
 0x470   : > { %13625 = vmatprep.mubr.bf16.mxu0 %v17484_v7  ;;  %12910 = vmatpush3.bf16.msra.mxu0 %v14009_v43  ;;  %v7033_v44 = vrot.slane %v7031_v0, 5  ;;  %v19179_v43 = vld [vmem:[#allocation28_spill] sm:$0xff] }
 0x471   : > { %12911 = vmatprep.subr.bf16.mxu0 %v14010_v40  ;;  %v19180_v40 = vld [vmem:[#allocation29_spill] sm:$0xff] }
 0x472   : > { %13656 = vmatpush3.bf16.msra.mxu1 %v14017_v25  ;;  %v7034_v5 = vsel %vm14324_vm8, %v7029_v35, %v7033_v44  ;;  %v19182_v44 = vld [vmem:[#allocation37_spill] sm:$0xff] }
 0x473   : > { %13657 = vmatprep.subr.bf16.mxu1 %v14018_v9  ;;  %v17763_v25 = vcombine.low %v7026_v30, %v7034_v5 }
 0x474   : > { %12912 = vmatpush3.bf16.msra.mxu0 %v14011_v10 }
 0x475   : > { %8106 = vmatmul.mubr.bf16.gmra.mxu1 %v17373_v49  ;;  %12913 = vmatprep.subr.bf16.mxu0 %v14012_v50 }
 0x476   : > { %8113 = vmatprep.mubr.bf16.mxu1 %v17400_v46  ;;  %13658 = vmatpush3.bf16.msra.mxu1 %v14018_v9  ;;  %v17770_v9 = vpop.f32.mrf.mxu0 }
 0x477   : > { %13626 = vmatmul.mubr.bf16.gmra.mxu0 %v17511_v15  ;;  %13659 = vmatprep.subr.bf16.mxu1 %v14019_v12 }
 0x478   : > { %13629 = vmatprep.mubr.bf16.mxu0 %v17534_v47  ;;  %12914 = vmatpush3.bf16.msra.mxu0 %v14013_v39  ;;  %v17774_v10 = vpop.f32.mrf.mxu0 }
 0x479   : > { %12915 = vmatprep.subr.bf16.mxu0 %v14015_v63 }
 0x47a   : > { %13660 = vmatpush3.bf16.msra.mxu1 %v14019_v12 }
 0x47c   : > { %12916 = vmatpush3.bf16.msra.mxu0 %v14016_v56 }
 0x47d   : > { %8114 = vmatmul.mubr.bf16.gmra.mxu1 %v17412_v24  ;;  %9535 = vmatprep.subr.bf16.mxu0 %v14024_v22 }
 0x47e   : > { %8121 = vmatprep.mubr.bf16.mxu1 %v17434_v3 }
 0x47f   : > { %13630 = vmatmul.mubr.bf16.gmra.mxu0 %v17562_v57 }
 0x480   : > { %13633 = vmatprep.mubr.bf16.mxu0 %v17585_v21 }
 0x485   : > { %8122 = vmatmul.mubr.bf16.gmra.mxu1 %v17444_v29 }
 0x486   : > { %8129 = vmatprep.mubr.bf16.mxu1 %v17461_v34 }
 0x487   : > { %13634 = vmatmul.mubr.bf16.gmra.mxu0 %v17606_v8 }
 0x488   : > { %13637 = vmatprep.mubr.bf16.mxu0 %v17627_v58 }
 0x48d   : > { %8130 = vmatmul.mubr.bf16.gmra.mxu1 %v19176_v60 }
 0x48e   : > { %8137 = vmatprep.mubr.bf16.mxu1 %v19177_v26 }
 0x48f   : > { %13638 = vmatmul.mubr.bf16.gmra.mxu0 %v17646_v53 }
 0x490   : > { %13641 = vmatprep.mubr.bf16.mxu0 %v17671_v37 }
 0x495   : > { %8138 = vmatmul.mubr.bf16.gmra.mxu1 %v19178_v38 }
 0x496   : > { %8145 = vmatprep.mubr.bf16.mxu1 %v19179_v43 }
 0x497   : > { %13642 = vmatmul.mubr.bf16.gmra.mxu0 %v17763_v25 }
 0x498   : > { %8628 = vmatprep.mubr.bf16.mxu0 %v17262_v42 }
 0x49d   : > { %8146 = vmatmul.mubr.bf16.gmra.mxu1 %v17524_v1 }
 0x49e   : > { %8153 = vmatprep.mubr.bf16.mxu1 %v19180_v40 }
 0x49f   : > { %8629 = vmatmul.mubr.bf16.vlgmr.msra.gmra.mxu0 %v17312_v28 }
 0x4a0   : > { %8636 = vmatprep.mubr.bf16.mxu0 %v17326_v45  ;;  %9536 = vmatpush1.bf16.msra.mxu0 %v14022_v23 }
 0x4a5   : > { %8154 = vmatmul.mubr.bf16.gmra.mxu1 %v17549_v2  ;;  %v12651_v50 = vpop.f32.mrf.mxu0 }
 0x4a6   : > { %8161 = vmatprep.mubr.bf16.mxu1 %v17566_v19 }
 0x4a7   : > { %8637 = vmatmul.mubr.bf16.gmra.mxu0 %v17335_v11  ;;  %v12652_v42 = vpop.f32.mrf.mxu0 }
 0x4a8   : > { %8644 = vmatprep.mubr.bf16.mxu0 %v17357_v17  ;;  %v12653_v12 = vadd.f32 %v12652_v42, %v12651_v50  ;;  %v13567_v39 = vpop.f32.mrf.mxu1 }
 0x4a9   : > { %v12654_v63 = vpop.f32.mrf.mxu0 }
 0x4aa   : > { %v17780_v56 = vadd.f32 %v13567_v39, %v12653_v12  ;;  %v7691_v28 = vpop.f32.mrf.mxu1 }
 0x4ab   : > { %v17783_v45 = vadd.f32 %v17669_v36, %v7691_v28  ;;  %v12655_v20 = vpop.f32.mrf.mxu0 }
 0x4ac   : > { %v12656_v33 = vadd.f32 %v12655_v20, %v12654_v63  ;;  %v13568_v52 = vpop.f32.mrf.mxu1 }
 0x4ad   : > { %8162 = vmatmul.mubr.bf16.gmra.mxu1 %v17575_v41  ;;  %v12657_v11 = vpop.f32.mrf.mxu0 }
 0x4ae   : > { %8169 = vmatprep.mubr.bf16.mxu1 %v17587_v61  ;;  %v17788_v17 = vadd.f32 %v13568_v52, %v12656_v33  ;;  %v17799_v0 = vpop.f32.mrf.mxu1  ;;  %v19184_v52 = vld [vmem:[#allocation15_spill] sm:$0xff] }
 0x4af   : > { %8645 = vmatmul.mubr.bf16.gmra.mxu0 %v17373_v49  ;;  %v12658_v36 = vpop.f32.mrf.mxu0  ;;  %v19181_v49 = vld [vmem:[#allocation38_spill] sm:$0xff] }
 0x4b0   : > { %8652 = vmatprep.mubr.bf16.mxu0 %v17400_v46  ;;  %v12659_v4 = vadd.f32 %v12658_v36, %v12657_v11  ;;  %v14025_v11 = vld [vmem:[%s17794_s10 + $0xc8] ss:$16 sps:$4 sm:$0xff]   ;;  %v14027_v36 = vld [vmem:[%s17794_s10 + $0xcc] ss:$16 sps:$4 sm:$0xff]  }
 0x4b1   : > { %v12660_v55 = vpop.f32.mrf.mxu0  ;;  %9537 = vmatprep.subr.bf16.mxu0 %v14027_v36 }
 0x4b2   : > { %9538 = vmatpush1.bf16.msra.mxu0 %v14025_v11 }
 0x4b3   : > { %v12661_v48 = vpop.f32.mrf.mxu0 }
 0x4b4   : > { %v17802_v35 = vadd.f32 %v12661_v48, %v12660_v55 }
 0x4b5   : > { %8170 = vmatmul.mubr.bf16.gmra.mxu1 %v19181_v49  ;;  %v12663_v30 = vpop.f32.mrf.mxu0 }
 0x4b6   : > { %8177 = vmatprep.mubr.bf16.mxu1 %v19182_v44 }
 0x4b7   : > { %8653 = vmatmul.mubr.bf16.gmra.mxu0 %v17412_v24  ;;  %v13571_v46 = vpop.f32.mrf.mxu1  ;;  %v12664_v5 = vpop.f32.mrf.mxu0  ;;  %v19183_v24 = vld [vmem:[#allocation27_spill] sm:$0xff] }
 0x4b8   : > { %8660 = vmatprep.mubr.bf16.mxu0 %v17434_v3  ;;  %v12665_v50 = vadd.f32 %v12664_v5, %v12663_v30 }
 0x4b9   : > { %v7707_v42 = vpop.f32.mrf.mxu1  ;;  %v12666_v12 = vpop.f32.mrf.mxu0 }
 0x4ba   : > { %v17812_v39 = vadd.f32 %v12659_v4, %v7707_v42  ;;  %v17814_v63 = vadd.f32 %v13571_v46, %v12665_v50 }
 0x4bb   : > { %v12667_v28 = vpop.f32.mrf.mxu0  ;;  %v13572_v33 = vpop.f32.mrf.mxu1 }
 0x4bc   : > { %v12668_v20 = vadd.f32 %v12667_v28, %v12666_v12 }
 0x4bd   : > { %8178 = vmatmul.mubr.bf16.gmra.mxu1 %v19183_v24  ;;  %v12669_v3 = vpop.f32.mrf.mxu0  ;;  %v17825_v46 = vpop.f32.mrf.mxu1 }
 0x4be   : > { %8185 = vmatprep.mubr.bf16.mxu1 %v19184_v52  ;;  %v17820_v23 = vadd.f32 %v13572_v33, %v12668_v20 }
 0x4bf   : > { %8661 = vmatmul.mubr.bf16.gmra.mxu0 %v17444_v29  ;;  %v12670_v4 = vpop.f32.mrf.mxu0 }
 0x4c0   : > { %8668 = vmatprep.mubr.bf16.mxu0 %v17461_v34  ;;  %v12671_v22 = vadd.f32 %v12670_v4, %v12669_v3  ;;  %v14028_v4 = vld [vmem:[%s17794_s10 + $0xa8] ss:$16 sps:$4 sm:$0xff]  }
 0x4c1   : > { %v12672_v55 = vpop.f32.mrf.mxu0 }
 0x4c3   : > { %v12673_v48 = vpop.f32.mrf.mxu0 }
 0x4c4   : > { %v12674_v30 = vadd.f32 %v12673_v48, %v12672_v55  ;;  %v14030_v55 = vld [vmem:[%s17794_s10 + $0xac] ss:$16 sps:$4 sm:$0xff]  }
 0x4c5   : > { %8186 = vmatmul.mubr.bf16.gmra.mxu1 %v17648_v14  ;;  %v12675_v5 = vpop.f32.mrf.mxu0  ;;  %9539 = vmatprep.subr.bf16.mxu0 %v14030_v55  ;;  %v14033_v55 = vld [vmem:[%s17794_s10 + $0x8c] ss:$16 sps:$4 sm:$0xff]  }
 0x4c6   : > { %8193 = vmatprep.mubr.bf16.mxu1 %v17654_v51  ;;  %9540 = vmatpush1.bf16.msra.mxu0 %v14028_v4  ;;  %v14031_v4 = vld [vmem:[%s17794_s10 + $0x88] ss:$16 sps:$4 sm:$0xff]  }
 0x4c7   : > { %8669 = vmatmul.mubr.bf16.gmra.mxu0 %v19176_v60  ;;  %v13575_v29 = vpop.f32.mrf.mxu1  ;;  %v12676_v34 = vpop.f32.mrf.mxu0  ;;  %9541 = vmatprep.subr.bf16.mxu0 %v14033_v55 }
 0x4c8   : > { %8676 = vmatprep.mubr.bf16.mxu0 %v19177_v26  ;;  %v12677_v50 = vadd.f32 %v12676_v34, %v12675_v5 }
 0x4c9   : > { %v7723_v42 = vpop.f32.mrf.mxu1  ;;  %v12678_v12 = vpop.f32.mrf.mxu0 }
 0x4ca   : > { %v17830_v28 = vadd.f32 %v12671_v22, %v7723_v42  ;;  %v17832_v20 = vadd.f32 %v13575_v29, %v12677_v50  ;;  %9542 = vmatpush1.bf16.msra.mxu0 %v14031_v4  ;;  %v14039_v4 = vld [vmem:[%s17794_s10 + $0x6c] ss:$16 sps:$4 sm:$0xff]  }
 0x4cb   : > { %v13576_v33 = vpop.f32.mrf.mxu1  ;;  %v12679_v3 = vpop.f32.mrf.mxu0  ;;  %9543 = vmatprep.subr.bf16.mxu0 %v14039_v4 }
 0x4cc   : > { %v12680_v11 = vadd.f32 %v12679_v3, %v12678_v12 }
 0x4cd   : > { %8194 = vmatmul.mubr.bf16.gmra.mxu1 %v17684_v54  ;;  %v7726_v36 = vpop.f32.mrf.mxu1  ;;  %v12681_v60 = vpop.f32.mrf.mxu0 }
 0x4ce   : > { %8201 = vmatprep.mubr.bf16.mxu1 %v17676_v62  ;;  %v17838_v26 = vadd.f32 %v12674_v30, %v7726_v36  ;;  %v17840_v48 = vadd.f32 %v13576_v33, %v12680_v11 }
 0x4cf   : > { %8677 = vmatmul.mubr.bf16.gmra.mxu0 %v19178_v38  ;;  %v12682_v22 = vpop.f32.mrf.mxu0 }
 0x4d0   : > { %8684 = vmatprep.mubr.bf16.mxu0 %v19179_v43  ;;  %v12683_v5 = vadd.f32 %v12682_v22, %v12681_v60 }
 0x4d1   : > { %v12684_v29 = vpop.f32.mrf.mxu0 }
 0x4d3   : > { %v12685_v34 = vpop.f32.mrf.mxu0 }
 0x4d4   : > { %v12686_v50 = vadd.f32 %v12685_v34, %v12684_v29 }
 0x4d5   : > { %8202 = vmatmul.mubr.bf16.gmra.mxu1 %v17697_v16  ;;  %v12687_v42 = vpop.f32.mrf.mxu0 }
 0x4d6   : > { %13661 = vmatprep.mubr.bf16.mxu1 %v17319_v18 }
 0x4d7   : > { %8685 = vmatmul.mubr.bf16.gmra.mxu0 %v17524_v1  ;;  %v12688_v38 = vpop.f32.mrf.mxu0 }
 0x4d8   : > { %8692 = vmatprep.mubr.bf16.mxu0 %v19180_v40  ;;  %v13579_v43 = vpop.f32.mrf.mxu1  ;;  %v12689_v30 = vadd.f32 %v12688_v38, %v12687_v42 }
 0x4d9   : > { %v12690_v12 = vpop.f32.mrf.mxu0 }
 0x4da   : > { %v7739_v33 = vpop.f32.mrf.mxu1  ;;  %v17848_v3 = vadd.f32 %v13579_v43, %v12689_v30 }
 0x4db   : > { %v17850_v11 = vadd.f32 %v12683_v5, %v7739_v33  ;;  %v12691_v36 = vpop.f32.mrf.mxu0 }
 0x4dc   : > { %v13580_v60 = vpop.f32.mrf.mxu1  ;;  %v12692_v18 = vadd.f32 %v12691_v36, %v12690_v12 }
 0x4dd   : > { %13662 = vmatmul.mubr.bf16.vlgmr.msra.gmra.mxu1 %v17350_v32  ;;  %v12693_v1 = vpop.f32.mrf.mxu0 }
 0x4de   : > { %13665 = vmatprep.mubr.bf16.mxu1 %v17387_v13  ;;  %v7742_v40 = vpop.f32.mrf.mxu1  ;;  %v17856_v22 = vadd.f32 %v13580_v60, %v12692_v18  ;;  %v14036_v60 = vld [vmem:[%s17794_s10 + $0xe4] ss:$16 sps:$4 sm:$0xff]  }
 0x4df   : > { %8693 = vmatmul.mubr.bf16.gmra.mxu0 %v17549_v2  ;;  %v17859_v29 = vadd.f32 %v12686_v50, %v7742_v40  ;;  %v12694_v5 = vpop.f32.mrf.mxu0  ;;  %9106 = vmatprep.subr.bf16.mxu1 %v14036_v60  ;;  %v14043_v60 = vld [vmem:[%s17794_s10 + $0xa0] ss:$16 sps:$4 sm:$0xff]  }
 0x4e0   : > { %8700 = vmatprep.mubr.bf16.mxu0 %v17566_v19  ;;  %v12695_v34 = vadd.f32 %v12694_v5, %v12693_v1 }
 0x4e1   : > { %v12696_v32 = vpop.f32.mrf.mxu0 }
 0x4e3   : > { %v12697_v42 = vpop.f32.mrf.mxu0 }
 0x4e4   : > { %v17863_v13 = vadd.f32 %v12697_v42, %v12696_v32  ;;  %v14042_v32 = vld [vmem:[%s17794_s10 + $0xc4] ss:$16 sps:$4 sm:$0xff]  }
 0x4e5   : > { %13666 = vmatmul.mubr.bf16.gmra.mxu1 %v17426_v6  ;;  %v12699_v38 = vpop.f32.mrf.mxu0 }
 0x4e6   : > { %13669 = vmatprep.mubr.bf16.mxu1 %v17457_v31 }
 0x4e7   : > { %8701 = vmatmul.mubr.bf16.gmra.mxu0 %v17575_v41  ;;  %v12700_v2 = vpop.f32.mrf.mxu0  ;;  %v14034_v41 = vld [vmem:[%s17794_s10 + $0xe0] ss:$16 sps:$4 sm:$0xff]  }
 0x4e8   : > { %8708 = vmatprep.mubr.bf16.mxu0 %v17587_v61  ;;  %v13583_v19 = vpop.f32.mrf.mxu1  ;;  %v12701_v50 = vadd.f32 %v12700_v2, %v12699_v38  ;;  %v14037_v61 = vld [vmem:[%s17794_s10 + $0x68] ss:$16 sps:$4 sm:$0xff]   ;;  %9107 = vmatpush1.bf16.msra.mxu1 %v14034_v41  ;;  %v17892_v38 = vld [vmem:[#allocation2 + $0x1a0] sm:$0xf]  ;;  %v17894_v2 = vld [vmem:[#allocation2 + $0x1a4] sm:$0xf] }
 0x4e9   : > { %v12702_v43 = vpop.f32.mrf.mxu0  ;;  %9544 = vmatpush1.bf16.msra.mxu0 %v14037_v61  ;;  %9108 = vmatprep.subr.bf16.mxu1 %v14042_v32  ;;  %v14045_v61 = vld [vmem:[%s17794_s10 + $0xa4] ss:$16 sps:$4 sm:$0xff]  }
 0x4ea   : > { %v7755_v30 = vpop.f32.mrf.mxu1  ;;  %v17868_v12 = vadd.f32 %v13583_v19, %v12701_v50 }
 0x4eb   : > { %v17870_v6 = vadd.f32 %v12695_v34, %v7755_v30  ;;  %v12703_v33 = vpop.f32.mrf.mxu0  ;;  %v14040_v34 = vld [vmem:[%s17794_s10 + $0xc0] ss:$16 sps:$4 sm:$0xff]  }
 0x4ec   : > { %v12704_v31 = vadd.f32 %v12703_v33, %v12702_v43  ;;  %v13584_v36 = vpop.f32.mrf.mxu1  ;;  %9109 = vmatpush1.bf16.msra.mxu1 %v14040_v34  ;;  %v6766_v33 = vshll.u32 %v17892_v38, 16 }
 0x4ed   : > { %13670 = vmatmul.mubr.bf16.gmra.mxu1 %v17484_v7  ;;  %9110 = vmatprep.subr.bf16.mxu1 %v14045_v61 }
 0x4ee   : > { %13673 = vmatprep.mubr.bf16.mxu1 %v17511_v15  ;;  %v17877_v18 = vadd.f32 %v13584_v36, %v12704_v31  ;;  %v12705_v1 = vpop.f32.mrf.mxu0  ;;  %v6772_v31 = vshrl.u32 %v17894_v2, 16  ;;  %v6775_v36 = vshll.u32 %v17894_v2, 16  ;;  %v7036_v34 = vrot.slane %v6766_v33, 5 }
 0x4ef   : > { %8709 = vmatmul.mubr.bf16.gmra.mxu0 %v19181_v49 }
 0x4f0   : > { %8716 = vmatprep.mubr.bf16.mxu0 %v19182_v44  ;;  %v12706_v55 = vpop.f32.mrf.mxu0  ;;  %v17889_v44 = vpop.f32.mrf.mxu1  ;;  %9111 = vmatpush1.bf16.msra.mxu1 %v14043_v60  ;;  %v7039_v32 = vrot.slane %v6775_v36, 5 }
 0x4f1   : > { %v12707_v7 = vadd.f32 %v12706_v55, %v12705_v1  ;;  %v14046_v1 = vld [vmem:[%s17794_s10 + $0x48] ss:$16 sps:$4 sm:$0xff]  }
 0x4f2   : > { %v12708_v15 = vpop.f32.mrf.mxu0 }
 0x4f4   : > { %v12709_v40 = vpop.f32.mrf.mxu0 }
 0x4f5   : > { %13674 = vmatmul.mubr.bf16.gmra.mxu1 %v17534_v47  ;;  %v17884_v5 = vadd.f32 %v12709_v40, %v12708_v15 }
 0x4f6   : > { %13677 = vmatprep.mubr.bf16.mxu1 %v17562_v57  ;;  %v12711_v49 = vpop.f32.mrf.mxu0 }
 0x4f7   : > { %8717 = vmatmul.mubr.bf16.gmra.mxu0 %v19183_v24  ;;  %v6763_v24 = vshrl.u32 %v17892_v38, 16 }
 0x4f8   : > { %8724 = vmatprep.mubr.bf16.mxu0 %v19184_v52  ;;  %v12712_v42 = vpop.f32.mrf.mxu0 }
 0x4f9   : > { %v13587_v47 = vpop.f32.mrf.mxu1  ;;  %v12713_v57 = vadd.f32 %v12712_v42, %v12711_v49  ;;  %v7035_v40 = vrot.slane %v6763_v24, 4  ;;  %v7041_v49 = vrot.slane %v6772_v31, 4  ;;  %v6765_v61 = vrot.slane %v6763_v24, 7 }
 0x4fa   : > { %v12714_v19 = vpop.f32.mrf.mxu0 }
 0x4fb   : > { %v7771_v50 = vpop.f32.mrf.mxu1  ;;  %v17896_v43 = vadd.f32 %v13587_v47, %v12713_v57  ;;  %v7037_v57 = vor.u32 %v7036_v34, %v7035_v40  ;;  %v6768_v24 = vor.u32 %v6766_v33, %v6765_v61  ;;  %v14052_v33 = vld [vmem:[%s17794_s10 + $0x60] ss:$16 sps:$4 sm:$0xff]  }
 0x4fc   : > { %v17899_v52 = vadd.f32 %v12707_v7, %v7771_v50  ;;  %v12715_v30 = vpop.f32.mrf.mxu0  ;;  %v14048_v7 = vld [vmem:[%s17794_s10 + $0x4c] ss:$16 sps:$4 sm:$0xff]  }
 0x4fd   : > { %13678 = vmatmul.mubr.bf16.gmra.mxu1 %v17585_v21  ;;  %v12716_v41 = vadd.f32 %v12715_v30, %v12714_v19  ;;  %v13588_v4 = vpop.f32.mrf.mxu1  ;;  %9545 = vmatprep.subr.bf16.mxu0 %v14048_v7  ;;  %v7042_v19 = vor.u32 %v7041_v49, %v7039_v32  ;;  %v14049_v30 = vld [vmem:[%s17794_s10 + $0x80] ss:$16 sps:$4 sm:$0xff]  }
 0x4fe   : > { %13681 = vmatprep.mubr.bf16.mxu1 %v17606_v8  ;;  %v12717_v55 = vpop.f32.mrf.mxu0  ;;  %9546 = vmatpush1.bf16.msra.mxu0 %v14046_v1 }
 0x4ff   : > { %8725 = vmatmul.mubr.bf16.gmra.mxu0 %v17648_v14  ;;  %v17911_v15 = vadd.f32 %v13588_v4, %v12716_v41  ;;  %v6796_v14 = vld [vmem:[#allocation2 + $0x1a8] sm:$0x1]  ;;  %v14051_v41 = vld [vmem:[%s17794_s10 + $0x84] ss:$16 sps:$4 sm:$0xff]   ;;  %v17923_v1 = vpop.f32.mrf.mxu1  ;;  %v7043_v40 = vrot.slane %v7042_v19, 4 }
 0x500   : > { %8732 = vmatprep.mubr.bf16.mxu0 %v17654_v51  ;;  %v12718_v21 = vpop.f32.mrf.mxu0  ;;  %v6380_v51 = vld [vmem:[#allocation2 + $0x19c] sm:$0x8]  ;;  %v7045_v50 = vshll.u32 %v6796_v14, 16  ;;  %9112 = vmatprep.subr.bf16.mxu1 %v14051_v41 }
 0x501   : > { %v12719_v8 = vadd.f32 %v12718_v21, %v12717_v55  ;;  %v6758_v4 = vshrl.u32 %v6380_v51, 16  ;;  %9113 = vmatpush1.bf16.msra.mxu1 %v14049_v30  ;;  %v7038_v21 = vrot.slane %v7037_v57, 4  ;;  %v6770_v51 = vrot.slane %v6765_v61, 4 }
 0x502   : > { %v17914_v42 = vpop.f32.mrf.mxu0  ;;  %v7047_v34 = vrot.slane %v7045_v50, 5  ;;  %v14054_v50 = vld [vmem:[%s17794_s10 + $0x64] ss:$16 sps:$4 sm:$0xff]  }
 0x503   : > { %9114 = vmatprep.subr.bf16.mxu1 %v14054_v50 }
 0x504   : > { %v17917_v47 = vpop.f32.mrf.mxu0 }
 0x505   : > { %13682 = vmatmul.mubr.bf16.gmra.mxu1 %v17627_v58  ;;  %v6774_v58 = vrot.slane %v6772_v31, 7  ;;  %v11213_v31 = vrot.slane %v6758_v4, 11 }
 0x506   : > { %13685 = vmatprep.mubr.bf16.mxu1 %v17646_v53  ;;  %v12723_v60 = vpop.f32.mrf.mxu0  ;;  %9115 = vmatpush1.bf16.msra.mxu1 %v14052_v33  ;;  %v12650_v33 = vadd.f32 %v17774_v10, %v17770_v9 }
 0x507   : > { %8733 = vmatmul.mubr.bf16.gmra.mxu0 %v17684_v54  ;;  %v11249_v54 = vcombine.low %v17892_v38, %v17894_v2  ;;  %v6777_v30 = vor.u32 %v6775_v36, %v6774_v58  ;;  %v7040_v38 = vsel %vm14324_vm8, %v7038_v21, %v7039_v32  ;;  %v7048_v2 = vsel %vm14324_vm8, %v7043_v40, %v7047_v34  ;;  %v14057_v36 = vld [vmem:[%s17794_s10 + $0x2c] ss:$16 sps:$4 sm:$0xff]   ;;  %v14058_v40 = vld [vmem:[%s17794_s10 + $0x40] ss:$16 sps:$4 sm:$0xff]  }
 0x508   : > { %8740 = vmatprep.mubr.bf16.mxu0 %v17676_v62  ;;  %v12724_v55 = vpop.f32.mrf.mxu0  ;;  %v11267_v32 = vcombine.low %v7040_v38, %v7048_v2  ;;  %9547 = vmatprep.subr.bf16.mxu0 %v14057_v36  ;;  %v19185_v34 = vmov 0  }
 0x509   : > { %v13591_v7 = vpop.f32.mrf.mxu1  ;;  %v12725_v53 = vadd.f32 %v12724_v55, %v12723_v60  ;;  %v14055_v60 = vld [vmem:[%s17794_s10 + $0x28] ss:$16 sps:$4 sm:$0xff]   ;;  %v6778_v59 = vsel %vm14289_vm7, %v6770_v51, %v6777_v30  ;;  %9116 = vmatprep.subr.bf16.mxu1 %v14060_v27  ;;  %v7695_v27 = vadd.f32 %v12650_v33, %v17799_v0 }
 0x50a   : > { %v12726_v49 = vpop.f32.mrf.mxu0  ;;  %9548 = vmatpush1.bf16.msra.mxu0 %v14055_v60  ;;  %9117 = vmatpush1.bf16.msra.mxu1 %v14058_v40  ;;  %v17968_v60 = vld [vmem:[%s15375_s21 + $0x2] ss:$0 sm:$0xff] }
 0x50b   : > { %v7787_v14 = vpop.f32.mrf.mxu1  ;;  %v17928_v62 = vadd.f32 %v13591_v7, %v12725_v53  ;;  %v7824_v40 = vadd.f32 %v17968_v60, %v17783_v45 }
 0x50c   : > { %v17930_v41 = vadd.f32 %v12719_v8, %v7787_v14  ;;  %v12727_v57 = vpop.f32.mrf.mxu0 }
 0x50d   : > { %13686 = vmatmul.mubr.bf16.gmra.mxu1 %v17671_v37  ;;  %v12728_v19 = vadd.f32 %v12727_v57, %v12726_v49  ;;  %v13592_v4 = vpop.f32.mrf.mxu1  ;;  %v6769_v37 = vsel %vm14289_vm7, %v11213_v31, %v6768_v24 }
 0x50e   : > { %13689 = vmatprep.mubr.bf16.mxu1 %v17763_v25  ;;  %v12729_v61 = vpop.f32.mrf.mxu0  ;;  %v11231_v7 = vcombine.low %v6769_v37, %v6778_v59  ;;  %v14061_v59 = vld [vmem:[%s17794_s10 + $0x20] ss:$16 sps:$4 sm:$0xff]  }
 0x50f   : > { %8741 = vmatmul.mubr.bf16.gmra.mxu0 %v17697_v16  ;;  %v17943_v8 = vadd.f32 %v13592_v4, %v12728_v19  ;;  %v17949_v16 = vpop.f32.mrf.mxu1 }
 0x510   : > { %8748 = vmatprep.mubr.bf16.mxu0 %v11249_v54  ;;  %v12730_v25 = vpop.f32.mrf.mxu0 }
 0x511   : > { %v12731_v58 = vadd.f32 %v12730_v25, %v12729_v61  ;;  %v14063_v25 = vld [vmem:[%s17794_s10 + $0x24] ss:$16 sps:$4 sm:$0xff]  }
 0x512   : > { %v17951_v55 = vpop.f32.mrf.mxu0  ;;  %9118 = vmatprep.subr.bf16.mxu1 %v14063_v25  ;;  %v14067_v25 = vld [vmem:[%s17794_s10] ss:$16 sps:$4 sm:$0xff]  }
 0x513   : > { %9119 = vmatpush1.bf16.msra.mxu1 %v14061_v59 }
 0x514   : > { %v17953_v21 = vpop.f32.mrf.mxu0 }
 0x515   : > { %v13595_v53 = vpop.f32.mrf.mxu1  ;;  %13690 = vmatmul.mubr.bf16.gmra.mxu1 %v11267_v32  ;;  %v14064_v32 = vld [vmem:[%s17794_s10 + $0x8] ss:$16 sps:$4 sm:$0xff]  }
 0x516   : > { %9138 = vmatprep.mubr.bf16.mxu1 %v19185_v34  ;;  %v12735_v54 = vpop.f32.mrf.mxu0 }
 0x517   : > { %v7803_v49 = vpop.f32.mrf.mxu1  ;;  %8749 = vmatmul.mubr.bf16.gmra.mxu0 %v11231_v7 }
 0x518   : > { %v17958_v24 = vadd.f32 %v12731_v58, %v7803_v49  ;;  %9567 = vmatprep.mubr.bf16.mxu0 %v19185_v34  ;;  %v12736_v31 = vpop.f32.mrf.mxu0 }
 0x519   : > { %v13596_v14 = vpop.f32.mrf.mxu1  ;;  %v12737_v51 = vadd.f32 %v12736_v31, %v12735_v54 }
 0x51a   : > { %v12738_v57 = vpop.f32.mrf.mxu0 }
 0x51b   : > { %v17961_v30 = vpop.f32.mrf.mxu1  ;;  %v17963_v19 = vadd.f32 %v13595_v53, %v12737_v51  ;;  %v14066_v53 = vld [vmem:[%s17794_s10 + $0xc] ss:$16 sps:$4 sm:$0xff]  }
 0x51c   : > { %v12739_v2 = vpop.f32.mrf.mxu0  ;;  %9549 = vmatprep.subr.bf16.mxu0 %v14066_v53 }
 0x51d   : > { %v12781_v38 = vpop.f32.mrf.mxu1  ;;  %v12740_v50 = vadd.f32 %v12739_v2, %v12738_v57  ;;  %9550 = vmatpush1.bf16.msra.mxu0 %v14064_v32  ;;  %v7825_v57 = vadd.f32 %v17968_v60, %v7695_v27 }
 0x51f   : > { %v12782_v4 = vpop.f32.mrf.mxu1  ;;  %v13615_v61 = vpop.f32.mrf.mxu0  ;;  %v17970_v37 = vadd.f32 %v13596_v14, %v12740_v50 }
 0x520   : > { %v12783_v36 = vadd.f32 %v12782_v4, %v12781_v38 }
 0x521   : > { %v12784_v58 = vpop.f32.mrf.mxu1  ;;  %v8244_v7 = vpop.f32.mrf.mxu0 }
 0x522   : > { %v8245_v9 = vadd.f32 %v12783_v36, %v8244_v7  ;;  %v7826_v36 = vadd.f32 %v17968_v60, %v17780_v56 }
 0x523   : > { %v12785_v10 = vpop.f32.mrf.mxu1  ;;  %v13616_v49 = vpop.f32.mrf.mxu0 }
 0x524   : > { %v12786_v54 = vadd.f32 %v12785_v10, %v12784_v58  ;;  %v17979_v14 = vadd.f32 %v8245_v9, %v7824_v40  ;;  %v14069_v58 = vld [vmem:[%s17794_s10 + $0x4] ss:$16 sps:$4 sm:$0xff]   ;;  %v7827_v10 = vadd.f32 %v17968_v60, %v17788_v17 }
 0x525   : > { %v12787_v31 = vpop.f32.mrf.mxu1  ;;  %v8247_v51 = vpop.f32.mrf.mxu0  ;;  %9120 = vmatprep.subr.bf16.mxu1 %v14069_v58 }
 0x526   : > { %v8248_v38 = vadd.f32 %v12786_v54, %v8247_v51  ;;  %9121 = vmatpush1.bf16.msra.mxu1 %v14067_v25 }
 0x527   : > { %v12788_v45 = vpop.f32.mrf.mxu1  ;;  %v13619_v2 = vpop.f32.mrf.mxu0 }
 0x528   : > { %v12789_v0 = vadd.f32 %v12788_v45, %v12787_v31  ;;  %v17982_v33 = vadd.f32 %v8248_v38, %v7825_v57  ;;  %v7828_v45 = vadd.f32 %v17968_v60, %v17812_v39 }
 0x529   : > { %v12790_v50 = vpop.f32.mrf.mxu1  ;;  %v8260_v4 = vpop.f32.mrf.mxu0 }
 0x52a   : > { %v8253_v59 = vadd.f32 %v13615_v61, %v12789_v0  ;;  %v7711_v0 = vadd.f32 %v17802_v35, %v17825_v46  ;;  %v7830_v35 = vadd.f32 %v17968_v60, %v17814_v63 }
 0x52b   : > { %v12791_v7 = vpop.f32.mrf.mxu1  ;;  %v13620_v32 = vpop.f32.mrf.mxu0 }
 0x52c   : > { %v12792_v53 = vadd.f32 %v12791_v7, %v12790_v50  ;;  %v17988_v40 = vadd.f32 %v8253_v59, %v7826_v36  ;;  %v7829_v7 = vadd.f32 %v17968_v60, %v7711_v0 }
 0x52d   : > { %v12793_v27 = vpop.f32.mrf.mxu1  ;;  %v8263_v9 = vpop.f32.mrf.mxu0 }
 0x52e   : > { %v8256_v54 = vadd.f32 %v13616_v49, %v12792_v53 }
 0x52f   : > { %v12794_v31 = vpop.f32.mrf.mxu1  ;;  %v13623_v51 = vpop.f32.mrf.mxu0 }
 0x530   : > { %v12795_v57 = vadd.f32 %v12794_v31, %v12793_v27  ;;  %v17992_v56 = vadd.f32 %v8256_v54, %v7827_v10 }
 0x531   : > { %v12796_v61 = vpop.f32.mrf.mxu1  ;;  %v8276_v38 = vpop.f32.mrf.mxu0 }
 0x532   : > { %v8261_v50 = vadd.f32 %v12795_v57, %v8260_v4 }
 0x533   : > { %v12797_v36 = vpop.f32.mrf.mxu1  ;;  %v13624_v59 = vpop.f32.mrf.mxu0 }
 0x534   : > { %v12798_v25 = vadd.f32 %v12797_v36, %v12796_v61  ;;  %v17998_v58 = vadd.f32 %v8261_v50, %v7828_v45  ;;  %v7831_v50 = vadd.f32 %v17968_v60, %v17820_v23 }
 0x535   : > { %v12799_v17 = vpop.f32.mrf.mxu1  ;;  %v8279_v49 = vpop.f32.mrf.mxu0 }
 0x536   : > { %v8264_v53 = vadd.f32 %v12798_v25, %v8263_v9 }
 0x537   : > { %v12800_v27 = vpop.f32.mrf.mxu1  ;;  %v18001_v10 = vpop.f32.mrf.mxu0 }
 0x538   : > { %v12801_v54 = vadd.f32 %v12800_v27, %v12799_v17  ;;  %v18003_v31 = vadd.f32 %v8264_v53, %v7829_v7  ;;  %v7832_v27 = vadd.f32 %v17968_v60, %v17830_v28 }
 0x539   : > { %v12802_v39 = vpop.f32.mrf.mxu1  ;;  %v8292_v34 = vpop.f32.mrf.mxu0 }
 0x53a   : > { %19186 = vst [vmem:[#allocation31_spill] sm:$0xff] %v18003_v31  ;;  %v8269_v46 = vadd.f32 %v13619_v2, %v12801_v54 }
 0x53b   : > { %v12803_v4 = vpop.f32.mrf.mxu1  ;;  %v18007_v57 = vpop.f32.mrf.mxu0 }
 0x53c   : > { %v12804_v61 = vadd.f32 %v12803_v4, %v12802_v39  ;;  %v18009_v45 = vadd.f32 %v8269_v46, %v7830_v35 }
 0x53d   : > { %v12805_v0 = vpop.f32.mrf.mxu1  ;;  %v8295_v9 = vpop.f32.mrf.mxu0 }
 0x53e   : > { %v8272_v36 = vadd.f32 %v13620_v32, %v12804_v61  ;;  %v7833_v61 = vadd.f32 %v17968_v60, %v17838_v26 }
 0x53f   : > { %v12806_v25 = vpop.f32.mrf.mxu1  ;;  %v18013_v17 = vpop.f32.mrf.mxu0 }
 0x540   : > { %v12807_v7 = vadd.f32 %v12806_v25, %v12805_v0  ;;  %v18015_v53 = vadd.f32 %v8272_v36, %v7831_v50 }
 0x541   : > { %v12808_v63 = vpop.f32.mrf.mxu1  ;;  %v18017_v2 = vpop.f32.mrf.mxu0 }
 0x542   : > { %v8277_v54 = vadd.f32 %v12807_v7, %v8276_v38  ;;  %v7834_v7 = vadd.f32 %v17968_v60, %v17832_v20 }
 0x543   : > { %v12809_v39 = vpop.f32.mrf.mxu1  ;;  %v18021_v35 = vpop.f32.mrf.mxu0 }
 0x544   : > { %v12810_v46 = vadd.f32 %v12809_v39, %v12808_v63  ;;  %v18023_v4 = vadd.f32 %v8277_v54, %v7832_v27 }
 0x545   : > { %v12811_v23 = vpop.f32.mrf.mxu1  ;;  %v18025_v32 = vpop.f32.mrf.mxu0 }
 0x546   : > { %19187 = vst [vmem:[#allocation25_spill] sm:$0xff] %v18023_v4  ;;  %v8280_v0 = vadd.f32 %v12810_v46, %v8279_v49  ;;  %v7835_v46 = vadd.f32 %v17968_v60, %v17840_v48 }
 0x547   : > { %v12812_v50 = vpop.f32.mrf.mxu1  ;;  %v18029_v36 = vpop.f32.mrf.mxu0 }
 0x548   : > { %v12813_v25 = vadd.f32 %v12812_v50, %v12811_v23  ;;  %v18031_v31 = vadd.f32 %v8280_v0, %v7833_v61 }
 0x549   : > { %v12814_v28 = vpop.f32.mrf.mxu1  ;;  %v18033_v38 = vpop.f32.mrf.mxu0 }
 0x54a   : > { %19188 = vst [vmem:[#allocation14_spill] sm:$0xff] %v18031_v31  ;;  %v8285_v63 = vadd.f32 %v13623_v51, %v12813_v25  ;;  %v7836_v25 = vadd.f32 %v17968_v60, %v17850_v11 }
 0x54b   : > { %v12815_v27 = vpop.f32.mrf.mxu1  ;;  %v18037_v54 = vpop.f32.mrf.mxu0 }
 0x54c   : > { %v12816_v39 = vadd.f32 %v12815_v27, %v12814_v28  ;;  %v18039_v4 = vadd.f32 %v8285_v63, %v7834_v7 }
 0x54d   : > { %v12817_v26 = vpop.f32.mrf.mxu1  ;;  %v18041_v49 = vpop.f32.mrf.mxu0 }
 0x54e   : > { %19189 = vst [vmem:[#allocation33_spill] sm:$0xff] %v18039_v4  ;;  %v8288_v23 = vadd.f32 %v13624_v59, %v12816_v39  ;;  %v7837_v39 = vadd.f32 %v17968_v60, %v17859_v29 }
 0x54f   : > { %v12818_v61 = vpop.f32.mrf.mxu1  ;;  %v18045_v0 = vpop.f32.mrf.mxu0 }
 0x550   : > { %v12819_v50 = vadd.f32 %v12818_v61, %v12817_v26  ;;  %v18047_v31 = vadd.f32 %v8288_v23, %v7835_v46 }
 0x551   : > { %v12820_v20 = vpop.f32.mrf.mxu1  ;;  %v18049_v51 = vpop.f32.mrf.mxu0 }
 0x552   : > { %19190 = vst [vmem:[#allocation30_spill] sm:$0xff] %v18047_v31  ;;  %v8293_v28 = vadd.f32 %v12819_v50, %v8292_v34  ;;  %v7838_v50 = vadd.f32 %v17968_v60, %v17848_v3 }
 0x553   : > { %v12821_v7 = vpop.f32.mrf.mxu1  ;;  %v18053_v63 = vpop.f32.mrf.mxu0 }
 0x554   : > { %v12822_v27 = vadd.f32 %v12821_v7, %v12820_v20  ;;  %v18055_v4 = vadd.f32 %v8293_v28, %v7836_v25 }
 0x555   : > { %v12823_v48 = vpop.f32.mrf.mxu1  ;;  %v18057_v59 = vpop.f32.mrf.mxu0 }
 0x556   : > { %19191 = vst [vmem:[#allocation12_spill] sm:$0xff] %v18055_v4  ;;  %v8296_v26 = vadd.f32 %v12822_v27, %v8295_v9 }
 0x557   : > { %v12824_v46 = vpop.f32.mrf.mxu1  ;;  %v18061_v23 = vpop.f32.mrf.mxu0 }
 0x558   : > { %v12825_v61 = vadd.f32 %v12824_v46, %v12823_v48  ;;  %v18063_v31 = vadd.f32 %v8296_v26, %v7837_v39  ;;  %v7839_v48 = vadd.f32 %v17968_v60, %v17856_v22 }
 0x559   : > { %v12826_v11 = vpop.f32.mrf.mxu1  ;;  %v18065_v34 = vpop.f32.mrf.mxu0 }
 0x55a   : > { %19192 = vst [vmem:[#allocation36_spill] sm:$0xff] %v18063_v31  ;;  %v8301_v20 = vadd.f32 %v18001_v10, %v12825_v61 }
 0x55b   : > { %v12827_v25 = vpop.f32.mrf.mxu1  ;;  %v18070_v28 = vpop.f32.mrf.mxu0 }
 0x55c   : > { %v12828_v7 = vadd.f32 %v12827_v25, %v12826_v11  ;;  %v18072_v29 = vadd.f32 %v8301_v20, %v7838_v50  ;;  %v7840_v11 = vadd.f32 %v17968_v60, %v17870_v6  ;;  %v7759_v50 = vadd.f32 %v17863_v13, %v17889_v44 }
 0x55d   : > { %v12829_v9 = vpop.f32.mrf.mxu1  ;;  %v18074_v27 = vpop.f32.mrf.mxu0 }
 0x55e   : > { %v8304_v39 = vadd.f32 %v18007_v57, %v12828_v7 }
 0x55f   : > { %v12830_v26 = vpop.f32.mrf.mxu1  ;;  %v18079_v46 = vpop.f32.mrf.mxu0 }
 0x560   : > { %v12831_v3 = vadd.f32 %v12830_v26, %v12829_v9  ;;  %v18081_v31 = vadd.f32 %v8304_v39, %v7839_v48  ;;  %v7841_v39 = vadd.f32 %v17968_v60, %v7759_v50 }
 0x561   : > { %v12832_v10 = vpop.f32.mrf.mxu1  ;;  %v18083_v61 = vpop.f32.mrf.mxu0 }
 0x562   : > { %19193 = vst [vmem:[#allocation34_spill] sm:$0xff] %v18081_v31  ;;  %v8309_v20 = vadd.f32 %v12831_v3, %v18017_v2  ;;  %v7842_v3 = vadd.f32 %v17968_v60, %v17868_v12 }
 0x563   : > { %v12833_v22 = vpop.f32.mrf.mxu1  ;;  %v18090_v25 = vpop.f32.mrf.mxu0 }
 0x564   : > { %v12834_v57 = vadd.f32 %v12833_v22, %v12832_v10  ;;  %v18092_v7 = vadd.f32 %v8309_v20, %v7840_v11 }
 0x565   : > { %v12835_v9 = vpop.f32.mrf.mxu1  ;;  %v18094_v48 = vpop.f32.mrf.mxu0 }
 0x566   : > { %v8312_v26 = vadd.f32 %v12834_v57, %v18025_v32 }
 0x567   : > { %v12836_v31 = vpop.f32.mrf.mxu1  ;;  %v18098_v6 = vpop.f32.mrf.mxu0 }
 0x568   : > { %v12837_v4 = vadd.f32 %v12836_v31, %v12835_v9  ;;  %v18100_v13 = vadd.f32 %v8312_v26, %v7841_v39  ;;  %v7843_v31 = vadd.f32 %v17968_v60, %v17877_v18 }
 0x569   : > { %v12838_v44 = vpop.f32.mrf.mxu1  ;;  %v18102_v2 = vpop.f32.mrf.mxu0 }
 0x56a   : > { %19194 = vst [vmem:[#allocation13_spill] sm:$0xff] %v18100_v13  ;;  %v8317_v10 = vadd.f32 %v18013_v17, %v12837_v4 }
 0x56b   : > { %v12839_v11 = vpop.f32.mrf.mxu1  ;;  %v18107_v20 = vpop.f32.mrf.mxu0 }
 0x56c   : > { %v12840_v50 = vadd.f32 %v12839_v11, %v12838_v44  ;;  %v18109_v22 = vadd.f32 %v8317_v10, %v7842_v3  ;;  %v7844_v3 = vadd.f32 %v17968_v60, %v17899_v52  ;;  %v7775_v10 = vadd.f32 %v17884_v5, %v17923_v1 }
 0x56d   : > { %v12841_v32 = vpop.f32.mrf.mxu1  ;;  %v18111_v57 = vpop.f32.mrf.mxu0 }
 0x56e   : > { %v8320_v9 = vadd.f32 %v18021_v35, %v12840_v50 }
 0x56f   : > { %v12842_v39 = vpop.f32.mrf.mxu1  ;;  %v18116_v12 = vpop.f32.mrf.mxu0 }
 0x570   : > { %v12843_v17 = vadd.f32 %v12842_v39, %v12841_v32  ;;  %v18118_v4 = vadd.f32 %v8320_v9, %v7843_v31  ;;  %v14070_v32 = vld [vmem:[%s17810_s13 + $0xf8] sm:$0xff]  }
 0x571   : > { %v12844_v26 = vpop.f32.mrf.mxu1  ;;  %v18120_v44 = vpop.f32.mrf.mxu0  ;;  %v14071_v31 = vld [vmem:[%s17810_s13 + $0x78] sm:$0xff]   ;;  %13037 = vmatprep.subr.bf16.mxu1 %v14070_v32 }
 0x572   : > { %19195 = vst [vmem:[#allocation11_spill] sm:$0xff] %v18118_v4  ;;  %v8325_v18 = vadd.f32 %v12843_v17, %v18033_v38  ;;  %v7845_v4 = vadd.f32 %v17968_v60, %v7775_v10  ;;  %13149 = vmatprep.subr.bf16.mxu0 %v14071_v31 }
 0x573   : > { %v12845_v11 = vpop.f32.mrf.mxu1  ;;  %v18127_v13 = vpop.f32.mrf.mxu0 }
 0x574   : > { %v12846_v35 = vadd.f32 %v12845_v11, %v12844_v26  ;;  %v18129_v50 = vadd.f32 %v8325_v18, %v7844_v3  ;;  %v7846_v18 = vadd.f32 %v17968_v60, %v17896_v43 }
 0x575   : > { %v12847_v9 = vpop.f32.mrf.mxu1  ;;  %v18133_v39 = vpop.f32.mrf.mxu0 }
 0x576   : > { %19196 = vst [vmem:[#allocation17_spill] sm:$0xff] %v18129_v50  ;;  %v8328_v52 = vadd.f32 %v12846_v35, %v18041_v49 }
 0x577   : > { %v12848_v5 = vpop.f32.mrf.mxu1  ;;  %v18137_v1 = vpop.f32.mrf.mxu0 }
 0x578   : > { %v12849_v38 = vadd.f32 %v12848_v5, %v12847_v9  ;;  %v18139_v17 = vadd.f32 %v8328_v52, %v7845_v4  ;;  %v7847_v4 = vadd.f32 %v17968_v60, %v17911_v15  ;;  %v12722_v9 = vadd.f32 %v17917_v47, %v17914_v42 }
 0x579   : > { %v12850_v26 = vpop.f32.mrf.mxu1  ;;  %v18141_v3 = vpop.f32.mrf.mxu0 }
 0x57a   : > { %19197 = vst [vmem:[#allocation5_spill] sm:$0xff] %v18139_v17  ;;  %v8333_v11 = vadd.f32 %v18029_v36, %v12849_v38 }
 0x57b   : > { %v12851_v50 = vpop.f32.mrf.mxu1  ;;  %v18146_v10 = vpop.f32.mrf.mxu0 }
 0x57c   : > { %v12852_v49 = vadd.f32 %v12851_v50, %v12850_v26  ;;  %v18148_v35 = vadd.f32 %v8333_v11, %v7846_v18  ;;  %v7848_v18 = vadd.f32 %v17968_v60, %v17930_v41  ;;  %v7791_v11 = vadd.f32 %v12722_v9, %v17949_v16 }
 0x57d   : > { %v12853_v32 = vpop.f32.mrf.mxu1  ;;  %v18150_v31 = vpop.f32.mrf.mxu0 }
 0x57e   : > { %v8336_v52 = vadd.f32 %v18037_v54, %v12852_v49 }
 0x57f   : > { %v12854_v43 = vpop.f32.mrf.mxu1  ;;  %v18157_v5 = vpop.f32.mrf.mxu0 }
 0x580   : > { %v12855_v36 = vadd.f32 %v12854_v43, %v12853_v32  ;;  %v18159_v38 = vadd.f32 %v8336_v52, %v7847_v4  ;;  %v7849_v4 = vadd.f32 %v17968_v60, %v7791_v11 }
 0x581   : > { %v12856_v50 = vpop.f32.mrf.mxu1  ;;  %v18161_v26 = vpop.f32.mrf.mxu0 }
 0x582   : > { %19198 = vst [vmem:[#allocation18_spill] sm:$0xff] %v18159_v38  ;;  %v8341_v15 = vadd.f32 %v12855_v36, %v18049_v51 }
 0x583   : > { %v12857_v17 = vpop.f32.mrf.mxu1  ;;  %v18167_v42 = vpop.f32.mrf.mxu0 }
 0x584   : > { %v12858_v47 = vadd.f32 %v12857_v17, %v12856_v50  ;;  %v18169_v54 = vadd.f32 %v8341_v15, %v7848_v18  ;;  %v7850_v17 = vadd.f32 %v17968_v60, %v17928_v62 }
 0x585   : > { %v12859_v49 = vpop.f32.mrf.mxu1  ;;  %v18171_v32 = vpop.f32.mrf.mxu0 }
 0x586   : > { %v8344_v52 = vadd.f32 %v12858_v47, %v18057_v59 }
 0x587   : > { %v12860_v43 = vpop.f32.mrf.mxu1  ;;  %v18175_v38 = vpop.f32.mrf.mxu0 }
 0x588   : > { %v12861_v41 = vadd.f32 %v12860_v43, %v12859_v49  ;;  %v18177_v16 = vadd.f32 %v8344_v52, %v7849_v4  ;;  %v7851_v49 = vadd.f32 %v17968_v60, %v17943_v8  ;;  %v12734_v4 = vadd.f32 %v17953_v21, %v17951_v55 }
 0x589   : > { %v12862_v51 = vpop.f32.mrf.mxu1  ;;  %v18179_v9 = vpop.f32.mrf.mxu0 }
 0x58a   : > { %19199 = vst [vmem:[#allocation7_spill] sm:$0xff] %v18177_v16  ;;  %v8349_v36 = vadd.f32 %v18045_v0, %v12861_v41 }
 0x58b   : > { %v12863_v50 = vpop.f32.mrf.mxu1  ;;  %v18184_v18 = vpop.f32.mrf.mxu0 }
 0x58c   : > { %v12864_v11 = vadd.f32 %v12863_v50, %v12862_v51  ;;  %v18186_v15 = vadd.f32 %v8349_v36, %v7850_v17  ;;  %v7852_v36 = vadd.f32 %v17968_v60, %v17958_v24  ;;  %v7807_v50 = vadd.f32 %v12734_v4, %v17961_v30 }
 0x58d   : > { %v12865_v59 = vpop.f32.mrf.mxu1  ;;  %v18188_v47 = vpop.f32.mrf.mxu0 }
 0x58e   : > { %v8352_v52 = vadd.f32 %v18053_v63, %v12864_v11 }
 0x58f   : > { %v12866_v62 = vpop.f32.mrf.mxu1  ;;  %v18195_v43 = vpop.f32.mrf.mxu0 }
 0x590   : > { %v12867_v0 = vadd.f32 %v12866_v62, %v12865_v59  ;;  %v18197_v41 = vadd.f32 %v8352_v52, %v7851_v49  ;;  %v7853_v49 = vadd.f32 %v17968_v60, %v7807_v50 }
 0x591   : > { %v12868_v51 = vpop.f32.mrf.mxu1  ;;  %v18199_v17 = vpop.f32.mrf.mxu0 }
 0x592   : > { %19200 = vst [vmem:[#allocation21_spill] sm:$0xff] %v18197_v41  ;;  %v8357_v8 = vadd.f32 %v12867_v0, %v18065_v34 }
 0x593   : > { %v12869_v16 = vpop.f32.mrf.mxu1  ;;  %v18205_v55 = vpop.f32.mrf.mxu0 }
 0x594   : > { %v12870_v21 = vadd.f32 %v12869_v16, %v12868_v51  ;;  %v18207_v63 = vadd.f32 %v8357_v8, %v7852_v36  ;;  %v7854_v16 = vadd.f32 %v17968_v60, %v17963_v19  ;;  %v12919_v19 = vadd.f32 %v18083_v61, %v18079_v46 }
 0x595   : > { %v12871_v11 = vpop.f32.mrf.mxu1  ;;  %v18209_v59 = vpop.f32.mrf.mxu0 }
 0x596   : > { %v8360_v52 = vadd.f32 %v12870_v21, %v18074_v27  ;;  %v12925_v27 = vadd.f32 %v18102_v2, %v18098_v6  ;;  %v12928_v6 = vadd.f32 %v18111_v57, %v18107_v20 }
 0x597   : > { %v12872_v62 = vpop.f32.mrf.mxu1  ;;  %v18213_v41 = vpop.f32.mrf.mxu0 }
 0x598   : > { %v12873_v24 = vadd.f32 %v12872_v62, %v12871_v11  ;;  %v18215_v30 = vadd.f32 %v8360_v52, %v7853_v49  ;;  %v7855_v49 = vadd.f32 %v17968_v60, %v17970_v37  ;;  %v12922_v60 = vadd.f32 %v18094_v48, %v18090_v25 }
 0x599   : > { %v12874_v34 = vpop.f32.mrf.mxu1  ;;  %v18217_v4 = vpop.f32.mrf.mxu0 }
 0x59a   : > { %v8365_v0 = vadd.f32 %v18061_v23, %v12873_v24 }
 0x59b   : > { %v12875_v51 = vpop.f32.mrf.mxu1  ;;  %v18222_v36 = vpop.f32.mrf.mxu0 }
 0x59c   : > { %v18226_v50 = vadd.f32 %v8365_v0, %v7854_v16  ;;  %v12876_v8 = vadd.f32 %v12875_v51, %v12874_v34  ;;  %v12937_v51 = vadd.f32 %v18141_v3, %v18137_v1  ;;  %v12940_v1 = vadd.f32 %v18150_v31, %v18146_v10  ;;  %v14072_v31 = vld [vmem:[%s17810_s13 + $0xb8] sm:$0xff]  }
 0x59d   : > { %v13663_v21 = vpop.f32.mrf.mxu1  ;;  %v18228_v11 = vpop.f32.mrf.mxu0 }
 0x59e   : > { %v8368_v23 = vadd.f32 %v18070_v28, %v12876_v8  ;;  %v8800_v52 = vadd.f32 %v13663_v21, %v12925_v27  ;;  %v12931_v8 = vadd.f32 %v18120_v44, %v18116_v12 }
 0x59f   : > { %v8791_v62 = vpop.f32.mrf.mxu1  ;;  %v18235_v24 = vpop.f32.mrf.mxu0 }
 0x5a0   : > { %v18239_v2 = vadd.f32 %v8368_v23, %v7855_v49  ;;  %v8792_v34 = vadd.f32 %v12919_v19, %v8791_v62  ;;  %v8920_v37 = vadd.f32 %v8800_v52, %v17988_v40 }
 0x5a1   : > { %v13664_v16 = vpop.f32.mrf.mxu1  ;;  %v18241_v0 = vpop.f32.mrf.mxu0 }
 0x5a2   : > { %v8803_v46 = vadd.f32 %v13664_v16, %v12928_v6  ;;  %v8918_v20 = vadd.f32 %v8792_v34, %v17979_v14  ;;  %v8952_v25 = vmax.f32 %v8920_v37, 0.0  ;;  %v14073_v16 = vld [vmem:[%s17810_s13 + $0x38] sm:$0xff]  }
 0x5a3   : > { %v8794_v28 = vpop.f32.mrf.mxu1  ;;  %v18246_v61 = vpop.f32.mrf.mxu0 }
 0x5a4   : > { %v8921_v57 = vadd.f32 %v8803_v46, %v17992_v56  ;;  %v8795_v27 = vadd.f32 %v12922_v60, %v8794_v28  ;;  %v8950_v56 = vmax.f32 %v8918_v20, 0.0  ;;  %v12949_v60 = vadd.f32 %v18179_v9, %v18175_v38  ;;  %v14074_v28 = vld [vmem:[%s17810_s13 + $0xf0] sm:$0xff]  }
 0x5a5   : > { %v13667_v21 = vpop.f32.mrf.mxu1  ;;  %v18254_v49 = vpop.f32.mrf.mxu0  ;;  %v19201_v38 = vmov 0  }
 0x5a6   : > { %v8953_v40 = vmax.f32 %v8921_v57, 0.0  ;;  %v8919_v48 = vadd.f32 %v8795_v27, %v17982_v33  ;;  %v8816_v19 = vadd.f32 %v13667_v21, %v12937_v51  ;;  %v12934_v33 = vadd.f32 %v18133_v39, %v18127_v13  ;;  %v14075_v51 = vld [vmem:[%s17810_s13 + $0x70] sm:$0xff]  }
 0x5a7   : > { %v8807_v14 = vpop.f32.mrf.mxu1  ;;  %v18259_v3 = vpop.f32.mrf.mxu0 }
 0x5a8   : > { %v18261_v12 = vpack.c.bf16 %v8953_v40, %v8952_v25  ;;  %v8951_v44 = vmax.f32 %v8919_v48, 0.0  ;;  %v8808_v23 = vadd.f32 %v12931_v8, %v8807_v14  ;;  %v8924_v34 = vadd.f32 %v8816_v19, %v18009_v45  ;;  %v19202_v8 = vld [vmem:[#allocation31_spill] sm:$0xff]  ;;  %v14076_v25 = vld [vmem:[%s17810_s13 + $0xb0] sm:$0xff]   ;;  %v14078_v19 = vld [vmem:[%s17810_s13 + $0xe8] sm:$0xff]  }
 0x5a9   : > { %v13668_v52 = vpop.f32.mrf.mxu1  ;;  %v18263_v62 = vpop.f32.mrf.mxu0  ;;  %v12943_v45 = vadd.f32 %v18161_v26, %v18157_v5  ;;  %v14077_v40 = vld [vmem:[%s17810_s13 + $0x30] sm:$0xff]   ;;  %v12952_v5 = vadd.f32 %v18188_v47, %v18184_v18 }
 0x5aa   : > { %v8982_v6 = vpack.c.bf16 %v8951_v44, %v8950_v56  ;;  %v8819_v10 = vadd.f32 %v13668_v52, %v12940_v1  ;;  %v8922_v20 = vadd.f32 %v8808_v23, %v17998_v58  ;;  %v8956_v58 = vmax.f32 %v8924_v34, 0.0  ;;  %v14079_v1 = vld [vmem:[%s17810_s13 + $0x68] sm:$0xff]  }
 0x5ab   : > { %v8810_v37 = vpop.f32.mrf.mxu1  ;;  %v18272_v46 = vpop.f32.mrf.mxu0  ;;  %v12946_v52 = vadd.f32 %v18171_v32, %v18167_v42  ;;  %v14082_v42 = vld [vmem:[%s17810_s13 + $0xe0] sm:$0xff]  }
 0x5ac   : > { %v8925_v57 = vadd.f32 %v8819_v10, %v18015_v53  ;;  %v8811_v13 = vadd.f32 %v12934_v33, %v8810_v37  ;;  %9139 = vmatmul.mubr.bf16.vlgmr.msra.gmra.mxu1 %v8982_v6  ;;  %9568 = vmatmul.mubr.bf16.vlgmr.msra.gmra.mxu0 %v8982_v6  ;;  %v8954_v14 = vmax.f32 %v8922_v20, 0.0  ;;  %v19203_v6 = vld [vmem:[#allocation33_spill] sm:$0xff]  ;;  %v14083_v32 = vld [vmem:[%s17810_s13 + $0x60] sm:$0xff]  }
 0x5ad   : > { %v13671_v39 = vpop.f32.mrf.mxu1  ;;  %v18280_v27 = vpop.f32.mrf.mxu0  ;;  %9148 = vmatprep.mubr.bf16.mxu1 %v19201_v38  ;;  %9577 = vmatprep.mubr.bf16.mxu0 %v19201_v38 }
 0x5ae   : > { %v8957_v9 = vmax.f32 %v8925_v57, 0.0  ;;  %v8923_v53 = vadd.f32 %v8811_v13, %v19202_v8  ;;  %v8832_v21 = vadd.f32 %v13671_v39, %v12949_v60  ;;  %13038 = vmatpush3.bf16.msra.mxu1 %v14072_v31  ;;  %13150 = vmatpush3.bf16.msra.mxu0 %v14073_v16  ;;  %v14080_v31 = vld [vmem:[%s17810_s13 + $0xa8] sm:$0xff]   ;;  %v12961_v60 = vadd.f32 %v18217_v4, %v18213_v41  ;;  %v19205_v57 = vld [vmem:[#allocation30_spill] sm:$0xff] }
 0x5af   : > { %v8823_v26 = vpop.f32.mrf.mxu1  ;;  %v18289_v48 = vpop.f32.mrf.mxu0  ;;  %13039 = vmatprep.subr.bf16.mxu1 %v14074_v28  ;;  %13151 = vmatprep.subr.bf16.mxu0 %v14075_v51  ;;  %v14081_v16 = vld [vmem:[%s17810_s13 + $0x28] sm:$0xff]   ;;  %v12955_v41 = vadd.f32 %v18199_v17, %v18195_v43  ;;  %v19206_v8 = vld [vmem:[#allocation14_spill] sm:$0xff]  ;;  %v12964_v43 = vadd.f32 %v18228_v11, %v18222_v36 }
 0x5b0   : > { %v18293_v56 = vpack.c.bf16 %v8957_v9, %v8956_v58  ;;  %v8955_v44 = vmax.f32 %v8923_v53, 0.0  ;;  %v8824_v23 = vadd.f32 %v12943_v45, %v8823_v26  ;;  %v8928_v34 = vadd.f32 %v8832_v21, %v19203_v6  ;;  %v19204_v51 = vld [vmem:[#allocation25_spill] sm:$0xff]  ;;  %v14087_v26 = vld [vmem:[%s17810_s13 + $0x58] sm:$0xff]  }
 0x5b1   : > { %v13672_v18 = vpop.f32.mrf.mxu1  ;;  %v18297_v47 = vpop.f32.mrf.mxu0 }
 0x5b2   : > { %v18299_v33 = vpack.c.bf16 %v8955_v44, %v8954_v14  ;;  %v8835_v10 = vadd.f32 %v13672_v18, %v12952_v5  ;;  %13040 = vmatpush3.bf16.msra.mxu1 %v14076_v25  ;;  %13152 = vmatpush3.bf16.msra.mxu0 %v14077_v40  ;;  %v8926_v20 = vadd.f32 %v8824_v23, %v19204_v51  ;;  %v8960_v58 = vmax.f32 %v8928_v34, 0.0  ;;  %v14085_v25 = vld [vmem:[%s17810_s13 + $0x20] sm:$0xff]   ;;  %v14086_v5 = vld [vmem:[%s17810_s13 + $0xd8] sm:$0xff]  }
 0x5b3   : > { %v8826_v37 = vpop.f32.mrf.mxu1  ;;  %v18306_v28 = vpop.f32.mrf.mxu0  ;;  %13041 = vmatprep.subr.bf16.mxu1 %v14078_v19  ;;  %13153 = vmatprep.subr.bf16.mxu0 %v14079_v1  ;;  %v12958_v23 = vadd.f32 %v18209_v59, %v18205_v55  ;;  %v14088_v34 = vld [vmem:[%s17810_s13 + $0x98] sm:$0xff]   ;;  %v14090_v55 = vld [vmem:[%s17810_s13 + $0xd0] sm:$0xff]  }
 0x5b4   : > { %v8929_v13 = vadd.f32 %v8835_v10, %v19205_v57  ;;  %v8827_v45 = vadd.f32 %v12946_v52, %v8826_v37  ;;  %9149 = vmatmul.mubr.bf16.gmra.mxu1 %v18261_v12  ;;  %9578 = vmatmul.mubr.bf16.gmra.mxu0 %v18261_v12  ;;  %v14084_v12 = vld [vmem:[%s17810_s13 + $0xa0] sm:$0xff]   ;;  %v8958_v19 = vmax.f32 %v8926_v20, 0.0  ;;  %v14089_v10 = vld [vmem:[%s17810_s13 + $0x18] sm:$0xff]   ;;  %v14091_v59 = vld [vmem:[%s17810_s13 + $0x50] sm:$0xff]  }
 0x5b5   : > { %v13675_v4 = vpop.f32.mrf.mxu1  ;;  %v18316_v39 = vpop.f32.mrf.mxu0  ;;  %9158 = vmatprep.mubr.bf16.mxu1 %v19201_v38  ;;  %9587 = vmatprep.mubr.bf16.mxu0 %v19201_v38  ;;  %v19207_v37 = vld [vmem:[#allocation12_spill] sm:$0xff] }
 0x5b6   : > { %v8961_v9 = vmax.f32 %v8929_v13, 0.0  ;;  %v8927_v53 = vadd.f32 %v8827_v45, %v19206_v8  ;;  %v8848_v21 = vadd.f32 %v13675_v4, %v12961_v60  ;;  %13042 = vmatpush3.bf16.msra.mxu1 %v14080_v31  ;;  %13154 = vmatpush3.bf16.msra.mxu0 %v14081_v16  ;;  %v12973_v31 = vadd.f32 %v18263_v62, %v18259_v3  ;;  %v19209_v45 = vld [vmem:[#allocation36_spill] sm:$0xff]  ;;  %v14094_v8 = vld [vmem:[%s17810_s13 + $0xc8] sm:$0xff]  }
 0x5b7   : > { %v8839_v17 = vpop.f32.mrf.mxu1  ;;  %v18325_v40 = vpop.f32.mrf.mxu0  ;;  %13043 = vmatprep.subr.bf16.mxu1 %v14082_v42  ;;  %13155 = vmatprep.subr.bf16.mxu0 %v14083_v32  ;;  %v19208_v32 = vld [vmem:[#allocation34_spill] sm:$0xff]  ;;  %v12967_v3 = vadd.f32 %v18241_v0, %v18235_v24  ;;  %v12976_v24 = vadd.f32 %v18280_v27, %v18272_v46 }
 0x5b8   : > { %v18329_v1 = vpack.c.bf16 %v8961_v9, %v8960_v58  ;;  %v8959_v14 = vmax.f32 %v8927_v53, 0.0  ;;  %v8840_v44 = vadd.f32 %v12955_v41, %v8839_v17  ;;  %v8932_v18 = vadd.f32 %v8848_v21, %v18072_v29  ;;  %v14092_v58 = vld [vmem:[%s17810_s13 + $0x90] sm:$0xff]   ;;  %v14095_v53 = vld [vmem:[%s17810_s13 + $0x48] sm:$0xff]  }
 0x5b9   : > { %v13676_v36 = vpop.f32.mrf.mxu1  ;;  %v12984_v11 = vpop.f32.mrf.mxu0  ;;  %v12970_v17 = vadd.f32 %v18254_v49, %v18246_v61  ;;  %v14098_v61 = vld [vmem:[%s17810_s13 + $0xc0] sm:$0xff]  }
 0x5ba   : > { %v18333_v52 = vpack.c.bf16 %v8959_v14, %v8958_v19  ;;  %v8851_v6 = vadd.f32 %v13676_v36, %v12964_v43  ;;  %13044 = vmatpush3.bf16.msra.mxu1 %v14084_v12  ;;  %13156 = vmatpush3.bf16.msra.mxu0 %v14085_v25  ;;  %v8930_v42 = vadd.f32 %v8840_v44, %v19207_v37  ;;  %v8964_v57 = vmax.f32 %v8932_v18, 0.0  ;;  %v14096_v14 = vld [vmem:[%s17810_s13 + $0x88] sm:$0xff]   ;;  %v14099_v49 = vld [vmem:[%s17810_s13 + $0x40] sm:$0xff]  }
 0x5bb   : > { %v8842_v16 = vpop.f32.mrf.mxu1  ;;  %v18340_v60 = vpop.f32.mrf.mxu0  ;;  %13045 = vmatprep.subr.bf16.mxu1 %v14086_v5  ;;  %13157 = vmatprep.subr.bf16.mxu0 %v14087_v26  ;;  %v14097_v44 = vld [vmem:[%s17810_s13 + $0x8] sm:$0xff]  }
 0x5bc   : > { %v8933_v29 = vadd.f32 %v8851_v6, %v19208_v32  ;;  %v8843_v51 = vadd.f32 %v12958_v23, %v8842_v16  ;;  %9159 = vmatmul.mubr.bf16.gmra.mxu1 %v18299_v33  ;;  %9588 = vmatmul.mubr.bf16.gmra.mxu0 %v18299_v33  ;;  %v14093_v33 = vld [vmem:[%s17810_s13 + $0x10] sm:$0xff]   ;;  %v8962_v21 = vmax.f32 %v8930_v42, 0.0  ;;  %v12985_v23 = vadd.f32 %v12984_v11, %v18325_v40  ;;  %v14100_v42 = vld [vmem:[%s17810_s13 + $0x80] sm:$0xff]  }
 0x5bd   : > { %v13679_v62 = vpop.f32.mrf.mxu1  ;;  %v12987_v20 = vpop.f32.mrf.mxu0  ;;  %9168 = vmatprep.mubr.bf16.mxu1 %v19201_v38  ;;  %9597 = vmatprep.mubr.bf16.mxu0 %v19201_v38  ;;  %v12979_v40 = vadd.f32 %v18297_v47, %v18289_v48  ;;  %v14101_v32 = vld [vmem:[%s17810_s13] sm:$0xff]  }
 0x5be   : > { %v8965_v13 = vmax.f32 %v8933_v29, 0.0  ;;  %v8931_v41 = vadd.f32 %v8843_v51, %v19209_v45  ;;  %v8864_v4 = vadd.f32 %v13679_v62, %v12973_v31  ;;  %13046 = vmatpush3.bf16.msra.mxu1 %v14088_v34  ;;  %13158 = vmatpush3.bf16.msra.mxu0 %v14089_v10  ;;  %v19210_v34 = vld [vmem:[#allocation11_spill] sm:$0xff] }
 0x5bf   : > { %v8855_v0 = vpop.f32.mrf.mxu1  ;;  %v18357_v9 = vpop.f32.mrf.mxu0  ;;  %13047 = vmatprep.subr.bf16.mxu1 %v14090_v55  ;;  %13159 = vmatprep.subr.bf16.mxu0 %v14091_v59  ;;  %v19211_v55 = vld [vmem:[#allocation13_spill] sm:$0xff] }
 0x5c0   : > { %v18361_v12 = vpack.c.bf16 %v8965_v13, %v8964_v57  ;;  %v8963_v25 = vmax.f32 %v8931_v41, 0.0  ;;  %v8856_v43 = vadd.f32 %v12967_v3, %v8855_v0  ;;  %v8936_v26 = vadd.f32 %v8864_v4, %v18109_v22 }
 0x5c1   : > { %v13680_v46 = vpop.f32.mrf.mxu1  ;;  %v12990_v27 = vpop.f32.mrf.mxu0  ;;  %v12982_v41 = vadd.f32 %v18316_v39, %v18306_v28 }
 0x5c2   : > { %v18365_v5 = vpack.c.bf16 %v8963_v25, %v8962_v21  ;;  %v8867_v19 = vadd.f32 %v13680_v46, %v12976_v24  ;;  %13048 = vmatpush3.bf16.msra.mxu1 %v14092_v58  ;;  %13160 = vmatpush3.bf16.msra.mxu0 %v14093_v33  ;;  %v8934_v6 = vadd.f32 %v8856_v43, %v18092_v7  ;;  %v8968_v16 = vmax.f32 %v8936_v26, 0.0  ;;  %v19212_v24 = vld [vmem:[#allocation17_spill] sm:$0xff] }
 0x5c3   : > { %v8858_v36 = vpop.f32.mrf.mxu1  ;;  %v18371_v18 = vpop.f32.mrf.mxu0  ;;  %13049 = vmatprep.subr.bf16.mxu1 %v14094_v8  ;;  %13161 = vmatprep.subr.bf16.mxu0 %v14095_v53  ;;  %v19213_v8 = vld [vmem:[#allocation18_spill] sm:$0xff] }
 0x5c4   : > { %v8937_v10 = vadd.f32 %v8867_v19, %v19210_v34  ;;  %v8859_v22 = vadd.f32 %v12970_v17, %v8858_v36  ;;  %9169 = vmatmul.mubr.bf16.gmra.mxu1 %v18293_v56  ;;  %9598 = vmatmul.mubr.bf16.gmra.mxu0 %v18293_v56  ;;  %v12988_v56 = vadd.f32 %v12987_v20, %v18340_v60  ;;  %v8966_v48 = vmax.f32 %v8934_v6, 0.0  ;;  %v19214_v17 = vld [vmem:[#allocation5_spill] sm:$0xff] }
 0x5c5   : > { %v13683_v11 = vpop.f32.mrf.mxu1  ;;  %v12993_v31 = vpop.f32.mrf.mxu0  ;;  %9178 = vmatprep.mubr.bf16.mxu1 %v19201_v38  ;;  %9607 = vmatprep.mubr.bf16.mxu0 %v19201_v38 }
 0x5c6   : > { %v8969_v7 = vmax.f32 %v8937_v10, 0.0  ;;  %v8935_v59 = vadd.f32 %v8859_v22, %v19211_v55  ;;  %v8880_v37 = vadd.f32 %v13683_v11, %v12985_v23  ;;  %13050 = vmatpush3.bf16.msra.mxu1 %v14096_v14  ;;  %13162 = vmatpush3.bf16.msra.mxu0 %v14097_v44 }
 0x5c7   : > { %v8871_v29 = vpop.f32.mrf.mxu1  ;;  %v12995_v51 = vpop.f32.mrf.mxu0  ;;  %13051 = vmatprep.subr.bf16.mxu1 %v14098_v61  ;;  %13163 = vmatprep.subr.bf16.mxu0 %v14099_v49  ;;  %v12994_v49 = vadd.f32 %v12993_v31, %v18371_v18  ;;  %v19216_v31 = vld [vmem:[#allocation7_spill] sm:$0xff] }
 0x5c8   : > { %v18387_v47 = vpack.c.bf16 %v8969_v7, %v8968_v16  ;;  %v8967_v3 = vmax.f32 %v8935_v59, 0.0  ;;  %v8872_v62 = vadd.f32 %v12979_v40, %v8871_v29  ;;  %v8940_v57 = vadd.f32 %v8880_v37, %v18148_v35  ;;  %v19215_v16 = vld [vmem:[#allocation21_spill] sm:$0xff] }
 0x5c9   : > { %v13684_v13 = vpop.f32.mrf.mxu1  ;;  %v12996_v45 = vpop.f32.mrf.mxu0  ;;  %v12991_v35 = vadd.f32 %v12990_v27, %v18357_v9 }
 0x5ca   : > { %v18392_v4 = vpack.c.bf16 %v8967_v3, %v8966_v48  ;;  %v8883_v58 = vadd.f32 %v13684_v13, %v12988_v56  ;;  %13052 = vmatpush3.bf16.msra.mxu1 %v14100_v42  ;;  %13164 = vmatpush3.bf16.msra.mxu0 %v14101_v32  ;;  %v12997_v20 = vadd.f32 %v12996_v45, %v12995_v51  ;;  %v8972_v28 = vmax.f32 %v8940_v57, 0.0 }
 0x5cb   : > { %v8874_v60 = vpop.f32.mrf.mxu1  ;;  %v12998_v33 = vpop.f32.mrf.mxu0  ;;  %v8938_v0 = vadd.f32 %v8872_v62, %v19212_v24 }
 0x5cc   : > { %v8941_v53 = vadd.f32 %v8883_v58, %v19213_v8  ;;  %v8875_v21 = vadd.f32 %v12982_v41, %v8874_v60  ;;  %9179 = vmatmul.mubr.bf16.gmra.mxu1 %v18333_v52  ;;  %9608 = vmatmul.mubr.bf16.gmra.mxu0 %v18333_v52 }
 0x5cd   : > { %v13687_v39 = vpop.f32.mrf.mxu1  ;;  %v12999_v25 = vpop.f32.mrf.mxu0  ;;  %9188 = vmatprep.mubr.bf16.mxu1 %v19201_v38  ;;  %9617 = vmatprep.mubr.bf16.mxu0 %v19201_v38  ;;  %v8970_v23 = vmax.f32 %v8938_v0, 0.0 }
 0x5ce   : > { %v8973_v43 = vmax.f32 %v8941_v53, 0.0  ;;  %v8939_v46 = vadd.f32 %v8875_v21, %v19214_v17  ;;  %v8896_v26 = vadd.f32 %v13687_v39, %v12997_v20  ;;  %v13000_v19 = vadd.f32 %v12999_v25, %v12998_v33 }
 0x5cf   : > { %v8887_v14 = vpop.f32.mrf.mxu1  ;;  %v13001_v44 = vpop.f32.mrf.mxu0 }
 0x5d0   : > { %v18402_v36 = vpack.c.bf16 %v8973_v43, %v8972_v28  ;;  %v8971_v52 = vmax.f32 %v8939_v46, 0.0  ;;  %v8888_v61 = vadd.f32 %v12991_v35, %v8887_v14  ;;  %v8944_v34 = vadd.f32 %v8896_v26, %v18186_v15 }
 0x5d1   : > { %v13688_v9 = vpop.f32.mrf.mxu1  ;;  %v13002_v27 = vpop.f32.mrf.mxu0 }
 0x5d2   : > { %v8992_v6 = vpack.c.bf16 %v8971_v52, %v8970_v23  ;;  %v8899_v10 = vadd.f32 %v13688_v9, %v13000_v19  ;;  %v8942_v22 = vadd.f32 %v8888_v61, %v18169_v54  ;;  %v13003_v59 = vadd.f32 %v13002_v27, %v13001_v44 }
 0x5d3   : > { %v8890_v40 = vpop.f32.mrf.mxu1  ;;  %v13004_v11 = vpop.f32.mrf.mxu0  ;;  %v8976_v15 = vmax.f32 %v8944_v34, 0.0 }
 0x5d4   : > { %v8945_v7 = vadd.f32 %v8899_v10, %v19215_v16  ;;  %v8891_v55 = vadd.f32 %v12994_v49, %v8890_v40  ;;  %9189 = vmatmul.mubr.bf16.gmra.mxu1 %v18329_v1  ;;  %9618 = vmatmul.mubr.bf16.gmra.mxu0 %v18329_v1  ;;  %v8974_v32 = vmax.f32 %v8942_v22, 0.0 }
 0x5d5   : > { %v13691_v37 = vpop.f32.mrf.mxu1  ;;  %v13005_v42 = vpop.f32.mrf.mxu0  ;;  %9198 = vmatprep.mubr.bf16.mxu1 %v19201_v38  ;;  %9627 = vmatprep.mubr.bf16.mxu0 %v19201_v38 }
 0x5d6   : > { %v8977_v18 = vmax.f32 %v8945_v7, 0.0  ;;  %v8943_v54 = vadd.f32 %v8891_v55, %v19216_v31  ;;  %v13006_v62 = vadd.f32 %v13005_v42, %v13004_v11 }
 0x5d7   : > { %v8903_v56 = vpop.f32.mrf.mxu1  ;;  %v13007_v29 = vpop.f32.mrf.mxu0 }
 0x5d8   : > { %v8995_v51 = vpack.c.bf16 %v8977_v18, %v8976_v15  ;;  %v8975_v48 = vmax.f32 %v8943_v54, 0.0  ;;  %v8904_v3 = vadd.f32 %v13003_v59, %v8903_v56 }
 0x5d9   : > { %v13692_v57 = vpop.f32.mrf.mxu1  ;;  %v13008_v1 = vpop.f32.mrf.mxu0 }
 0x5da   : > { %v8994_v13 = vpack.c.bf16 %v8975_v48, %v8974_v32  ;;  %v13009_v45 = vadd.f32 %v13008_v1, %v13007_v29  ;;  %v8946_v60 = vadd.f32 %v8904_v3, %v18207_v63 }
 0x5db   : > { %v8906_v41 = vpop.f32.mrf.mxu1  ;;  %v13010_v58 = vpop.f32.mrf.mxu0 }
 0x5dc   : > { %v8907_v20 = vadd.f32 %v13006_v62, %v8906_v41  ;;  %9199 = vmatmul.mubr.bf16.gmra.mxu1 %v18365_v5  ;;  %9628 = vmatmul.mubr.bf16.gmra.mxu0 %v18365_v5  ;;  %v8912_v33 = vadd.f32 %v13691_v37, %v13009_v45  ;;  %v8978_v53 = vmax.f32 %v8946_v60, 0.0 }
 0x5dd   : > { %v13011_v24 = vpop.f32.mrf.mxu0  ;;  %9208 = vmatprep.mubr.bf16.mxu1 %v19201_v38  ;;  %9637 = vmatprep.mubr.bf16.mxu0 %v19201_v38 }
 0x5de   : > { %v8947_v0 = vadd.f32 %v8907_v20, %v18215_v30  ;;  %v13012_v8 = vadd.f32 %v13011_v24, %v13010_v58  ;;  %v8948_v35 = vadd.f32 %v8912_v33, %v18226_v50  ;;  %v9016_v50 = vlaneseq }
 0x5e0   : > { %v8979_v21 = vmax.f32 %v8947_v0, 0.0  ;;  %v8915_v28 = vadd.f32 %v13692_v57, %v13012_v8  ;;  %v8980_v25 = vmax.f32 %v8948_v35, 0.0 }
 0x5e2   : > { %v8996_v63 = vpack.c.bf16 %v8979_v21, %v8978_v53  ;;  %v8949_v39 = vadd.f32 %v8915_v28, %v18239_v2  ;;  %v9017_v2 = vshrl.u32 %v9016_v50, 7 }
 0x5e4   : > { %v8981_v43 = vmax.f32 %v8949_v39, 0.0  ;;  %9209 = vmatmul.mubr.bf16.gmra.mxu1 %v18361_v12  ;;  %9638 = vmatmul.mubr.bf16.gmra.mxu0 %v18361_v12  ;;  %v9022_v12 = vsub.s32 1, %v9017_v2  ;;  %v9018_v5 = vsub.s32 0, %v9017_v2 }
 0x5e5   : > { %9218 = vmatprep.mubr.bf16.mxu1 %v19201_v38  ;;  %9647 = vmatprep.mubr.bf16.mxu0 %v19201_v38 }
 0x5e6   : > { %v8997_v30 = vpack.c.bf16 %v8981_v43, %v8980_v25 }
 0x5ec   : > { %9219 = vmatmul.mubr.bf16.gmra.mxu1 %v18392_v4  ;;  %9648 = vmatmul.mubr.bf16.gmra.mxu0 %v18392_v4  ;;  %v9443_v4 = vld [vmem:[%s391_s17 + $0x2] sm:$0x3] }
 0x5ed   : > { %9228 = vmatprep.mubr.bf16.mxu1 %v19201_v38  ;;  %9657 = vmatprep.mubr.bf16.mxu0 %v19201_v38  ;;  %v18451_v19 = vrot.slane %v9443_v4, %v9022_v12  ;;  %v18455_v14 = vrot.slane %v9443_v4, %v9018_v5 }
 0x5f4   : > { %9229 = vmatmul.mubr.bf16.gmra.mxu1 %v18387_v47  ;;  %9658 = vmatmul.mubr.bf16.gmra.mxu0 %v18387_v47  ;;  %v9014_v47 = vld [vmem:[%s391_s17] sm:$0x3] }
 0x5f5   : > { %9238 = vmatprep.mubr.bf16.mxu1 %v19201_v38  ;;  %9667 = vmatprep.mubr.bf16.mxu0 %v19201_v38  ;;  %v18449_v26 = vrot.slane %v9014_v47, %v9022_v12 }
 0x5fc   : > { %9239 = vmatmul.mubr.bf16.gmra.mxu1 %v8992_v6  ;;  %9668 = vmatmul.mubr.bf16.gmra.mxu0 %v8992_v6 }
 0x5fd   : > { %9248 = vmatprep.mubr.bf16.mxu1 %v19201_v38  ;;  %9677 = vmatprep.mubr.bf16.mxu0 %v19201_v38 }
 0x604   : > { %9249 = vmatmul.mubr.bf16.gmra.mxu1 %v18402_v36  ;;  %9678 = vmatmul.mubr.bf16.gmra.mxu0 %v18402_v36 }
 0x605   : > { %9258 = vmatprep.mubr.bf16.mxu1 %v19201_v38  ;;  %9687 = vmatprep.mubr.bf16.mxu0 %v19201_v38 }
 0x60c   : > { %9259 = vmatmul.mubr.bf16.gmra.mxu1 %v8994_v13  ;;  %9688 = vmatmul.mubr.bf16.gmra.mxu0 %v8994_v13 }
 0x60d   : > { %9268 = vmatprep.mubr.bf16.mxu1 %v19201_v38  ;;  %9697 = vmatprep.mubr.bf16.mxu0 %v19201_v38 }
 0x614   : > { %9269 = vmatmul.mubr.bf16.gmra.mxu1 %v8995_v51  ;;  %9698 = vmatmul.mubr.bf16.gmra.mxu0 %v8995_v51 }
 0x615   : > { %9278 = vmatprep.mubr.bf16.mxu1 %v19201_v38  ;;  %9707 = vmatprep.mubr.bf16.mxu0 %v19201_v38 }
 0x61c   : > { %9279 = vmatmul.mubr.bf16.gmra.mxu1 %v8996_v63  ;;  %9708 = vmatmul.mubr.bf16.gmra.mxu0 %v8996_v63 }
 0x61d   : > { %9288 = vmatprep.mubr.bf16.mxu1 %v19201_v38  ;;  %9717 = vmatprep.mubr.bf16.mxu0 %v19201_v38  ;;  %v18453_v38 = vrot.slane %v9014_v47, %v9018_v5 }
 0x624   : > { %9289 = vmatmul.mubr.bf16.gmra.mxu1 %v8997_v30  ;;  %9718 = vmatmul.mubr.bf16.gmra.mxu0 %v8997_v30 }
 0x66c   : > { %v9140_v17 = vpop.f32.mrf.mxu1  ;;  %v9569_v46 = vpop.f32.mrf.mxu0 }
 0x66d   : > { %v9141_v6 = vadd.f32 %v9140_v17, %v18453_v38  ;;  %v9570_v34 = vadd.f32 %v9569_v46, %v18455_v14 }
 0x66e   : > { %v9142_v44 = vpop.f32.mrf.mxu1  ;;  %v9571_v23 = vpop.f32.mrf.mxu0 }
 0x66f   : > { %v9143_v61 = vadd.f32 %v9142_v44, %v18449_v26  ;;  %v9572_v9 = vadd.f32 %v9571_v23, %v18451_v19  ;;  %v9299_v31 = vmax.f32 %v9141_v6, 0.0  ;;  %v9728_v54 = vmax.f32 %v9570_v34, 0.0 }
 0x670   : > { %v9144_v36 = vpop.f32.mrf.mxu1  ;;  %v9573_v52 = vpop.f32.mrf.mxu0 }
 0x671   : > { %v9145_v27 = vadd.f32 %v9144_v36, %v18453_v38  ;;  %v9574_v49 = vadd.f32 %v9573_v52, %v18455_v14  ;;  %v9300_v37 = vmax.f32 %v9143_v61, 0.0  ;;  %v9729_v42 = vmax.f32 %v9572_v9, 0.0 }
 0x672   : > { %v9146_v10 = vpop.f32.mrf.mxu1  ;;  %v9575_v22 = vpop.f32.mrf.mxu0 }
 0x673   : > { %v9147_v40 = vadd.f32 %v9146_v10, %v18449_v26  ;;  %v9576_v11 = vadd.f32 %v9575_v22, %v18451_v19  ;;  %v9301_v16 = vmax.f32 %v9145_v27, 0.0  ;;  %v9730_v7 = vmax.f32 %v9574_v49, 0.0 }
 0x674   : > { %v9150_v55 = vpop.f32.mrf.mxu1  ;;  %v9579_v59 = vpop.f32.mrf.mxu0 }
 0x675   : > { %v9302_v15 = vmax.f32 %v9147_v40, 0.0  ;;  %v9731_v18 = vmax.f32 %v9576_v11, 0.0  ;;  %v9363_v48 = vpack.c.bf16 %v9301_v16, %v9299_v31  ;;  %v9792_v3 = vpack.c.bf16 %v9730_v7, %v9728_v54 }
 0x676   : > { %v9152_v32 = vpop.f32.mrf.mxu1  ;;  %v9581_v56 = vpop.f32.mrf.mxu0  ;;  %v9151_v58 = vadd.f32 %v9150_v55, %v18453_v38  ;;  %v9580_v60 = vadd.f32 %v9579_v59, %v18455_v14 }
 0x677   : > { %v9793_v29 = vpack.c.bf16 %v9731_v18, %v9729_v42  ;;  %v9364_v51 = vpack.c.bf16 %v9302_v15, %v9300_v37  ;;  %v9153_v62 = vadd.f32 %v9152_v32, %v18449_v26  ;;  %v9582_v13 = vadd.f32 %v9581_v56, %v18451_v19 }
 0x678   : > { %v9154_v57 = vpop.f32.mrf.mxu1  ;;  %v9583_v1 = vpop.f32.mrf.mxu0  ;;  %v9303_v43 = vmax.f32 %v9151_v58, 0.0  ;;  %v9732_v30 = vmax.f32 %v9580_v60, 0.0 }
 0x679   : > { %v9155_v45 = vadd.f32 %v9154_v57, %v18453_v38  ;;  %v9584_v41 = vadd.f32 %v9583_v1, %v18455_v14  ;;  %9984 = vmatprep.mubr.bf16.mxu1 %v9793_v29  ;;  %10241 = vmatprep.mubr.bf16.mxu0 %v9364_v51  ;;  %v9304_v28 = vmax.f32 %v9153_v62, 0.0  ;;  %v9733_v63 = vmax.f32 %v9582_v13, 0.0 }
 0x67a   : > { %v9156_v20 = vpop.f32.mrf.mxu1  ;;  %v9585_v33 = vpop.f32.mrf.mxu0  ;;  %9985 = vmatmul.mubr.bf16.vlgmr.msra.gmra.mxu1 %v9792_v3  ;;  %10242 = vmatmul.mubr.bf16.vlgmr.msra.gmra.mxu0 %v9363_v48 }
 0x67b   : > { %v9157_v24 = vadd.f32 %v9156_v20, %v18449_v26  ;;  %v9586_v0 = vadd.f32 %v9585_v33, %v18451_v19  ;;  %v9305_v8 = vmax.f32 %v9155_v45, 0.0  ;;  %v9734_v53 = vmax.f32 %v9584_v41, 0.0 }
 0x67c   : > { %v9160_v21 = vpop.f32.mrf.mxu1  ;;  %v9589_v35 = vpop.f32.mrf.mxu0 }
 0x67d   : > { %v9306_v39 = vmax.f32 %v9157_v24, 0.0  ;;  %v9735_v25 = vmax.f32 %v9586_v0, 0.0  ;;  %v9365_v47 = vpack.c.bf16 %v9305_v8, %v9303_v43  ;;  %v9794_v4 = vpack.c.bf16 %v9734_v53, %v9732_v30 }
 0x67e   : > { %v9162_v50 = vpop.f32.mrf.mxu1  ;;  %v9591_v2 = vpop.f32.mrf.mxu0  ;;  %v9161_v61 = vadd.f32 %v9160_v21, %v18453_v38  ;;  %v9590_v9 = vadd.f32 %v9589_v35, %v18455_v14 }
 0x67f   : > { %v9795_v12 = vpack.c.bf16 %v9735_v25, %v9733_v63  ;;  %v9366_v5 = vpack.c.bf16 %v9306_v39, %v9304_v28  ;;  %v9163_v17 = vadd.f32 %v9162_v50, %v18449_v26  ;;  %v9592_v23 = vadd.f32 %v9591_v2, %v18451_v19 }
 0x680   : > { %v9164_v46 = vpop.f32.mrf.mxu1  ;;  %v9593_v44 = vpop.f32.mrf.mxu0  ;;  %v9307_v37 = vmax.f32 %v9161_v61, 0.0  ;;  %v9736_v42 = vmax.f32 %v9590_v9, 0.0 }
 0x681   : > { %v9165_v36 = vadd.f32 %v9164_v46, %v18453_v38  ;;  %v9594_v52 = vadd.f32 %v9593_v44, %v18455_v14  ;;  %9992 = vmatprep.mubr.bf16.mxu1 %v9795_v12  ;;  %10249 = vmatprep.mubr.bf16.mxu0 %v9366_v5  ;;  %v9308_v16 = vmax.f32 %v9163_v17, 0.0  ;;  %v9737_v7 = vmax.f32 %v9592_v23, 0.0 }
 0x682   : > { %v9166_v27 = vpop.f32.mrf.mxu1  ;;  %v9595_v49 = vpop.f32.mrf.mxu0  ;;  %9993 = vmatmul.mubr.bf16.gmra.mxu1 %v9794_v4  ;;  %10250 = vmatmul.mubr.bf16.gmra.mxu0 %v9365_v47 }
 0x683   : > { %v9167_v6 = vadd.f32 %v9166_v27, %v18449_v26  ;;  %v9596_v34 = vadd.f32 %v9595_v49, %v18451_v19  ;;  %v9309_v10 = vmax.f32 %v9165_v36, 0.0  ;;  %v9738_v22 = vmax.f32 %v9594_v52, 0.0 }
 0x684   : > { %v9170_v40 = vpop.f32.mrf.mxu1  ;;  %v9599_v11 = vpop.f32.mrf.mxu0 }
 0x685   : > { %v9310_v55 = vmax.f32 %v9167_v6, 0.0  ;;  %v9739_v59 = vmax.f32 %v9596_v34, 0.0  ;;  %v9367_v32 = vpack.c.bf16 %v9309_v10, %v9307_v37  ;;  %v9796_v56 = vpack.c.bf16 %v9738_v22, %v9736_v42 }
 0x686   : > { %v9172_v15 = vpop.f32.mrf.mxu1  ;;  %v9601_v18 = vpop.f32.mrf.mxu0  ;;  %v9171_v1 = vadd.f32 %v9170_v40, %v18453_v38  ;;  %v9600_v13 = vadd.f32 %v9599_v11, %v18455_v14 }
 0x687   : > { %v9797_v31 = vpack.c.bf16 %v9739_v59, %v9737_v7  ;;  %v9368_v54 = vpack.c.bf16 %v9310_v55, %v9308_v16  ;;  %v9173_v29 = vadd.f32 %v9172_v15, %v18449_v26  ;;  %v9602_v3 = vadd.f32 %v9601_v18, %v18451_v19 }
 0x688   : > { %v9174_v51 = vpop.f32.mrf.mxu1  ;;  %v9603_v48 = vpop.f32.mrf.mxu0  ;;  %v9311_v28 = vmax.f32 %v9171_v1, 0.0  ;;  %v9740_v63 = vmax.f32 %v9600_v13, 0.0 }
 0x689   : > { %v9175_v62 = vadd.f32 %v9174_v51, %v18453_v38  ;;  %v9604_v57 = vadd.f32 %v9603_v48, %v18455_v14  ;;  %10000 = vmatprep.mubr.bf16.mxu1 %v9797_v31  ;;  %10257 = vmatprep.mubr.bf16.mxu0 %v9368_v54  ;;  %v9312_v8 = vmax.f32 %v9173_v29, 0.0  ;;  %v9741_v53 = vmax.f32 %v9602_v3, 0.0 }
 0x68a   : > { %v9176_v45 = vpop.f32.mrf.mxu1  ;;  %v9605_v41 = vpop.f32.mrf.mxu0  ;;  %10001 = vmatmul.mubr.bf16.gmra.mxu1 %v9796_v56  ;;  %10258 = vmatmul.mubr.bf16.gmra.mxu0 %v9367_v32 }
 0x68b   : > { %v9177_v58 = vadd.f32 %v9176_v45, %v18449_v26  ;;  %v9606_v60 = vadd.f32 %v9605_v41, %v18451_v19  ;;  %v9313_v20 = vmax.f32 %v9175_v62, 0.0  ;;  %v9742_v33 = vmax.f32 %v9604_v57, 0.0 }
 0x68c   : > { %v9180_v24 = vpop.f32.mrf.mxu1  ;;  %v9609_v0 = vpop.f32.mrf.mxu0 }
 0x68d   : > { %v9314_v21 = vmax.f32 %v9177_v58, 0.0  ;;  %v9743_v35 = vmax.f32 %v9606_v60, 0.0  ;;  %v9369_v50 = vpack.c.bf16 %v9313_v20, %v9311_v28  ;;  %v9798_v2 = vpack.c.bf16 %v9742_v33, %v9740_v63 }
 0x68e   : > { %v9182_v39 = vpop.f32.mrf.mxu1  ;;  %v9611_v25 = vpop.f32.mrf.mxu0  ;;  %v9181_v44 = vadd.f32 %v9180_v24, %v18453_v38  ;;  %v9610_v23 = vadd.f32 %v9609_v0, %v18455_v14 }
 0x68f   : > { %v9799_v43 = vpack.c.bf16 %v9743_v35, %v9741_v53  ;;  %v9370_v30 = vpack.c.bf16 %v9314_v21, %v9312_v8  ;;  %v9183_v12 = vadd.f32 %v9182_v39, %v18449_v26  ;;  %v9612_v4 = vadd.f32 %v9611_v25, %v18451_v19 }
 0x690   : > { %v9184_v5 = vpop.f32.mrf.mxu1  ;;  %v9613_v47 = vpop.f32.mrf.mxu0  ;;  %v9315_v16 = vmax.f32 %v9181_v44, 0.0  ;;  %v9744_v7 = vmax.f32 %v9610_v23, 0.0 }
 0x691   : > { %v9185_v17 = vadd.f32 %v9184_v5, %v18453_v38  ;;  %v9614_v46 = vadd.f32 %v9613_v47, %v18455_v14  ;;  %10008 = vmatprep.mubr.bf16.mxu1 %v9799_v43  ;;  %10265 = vmatprep.mubr.bf16.mxu0 %v9370_v30  ;;  %v9316_v10 = vmax.f32 %v9183_v12, 0.0  ;;  %v9745_v22 = vmax.f32 %v9612_v4, 0.0 }
 0x692   : > { %v9186_v36 = vpop.f32.mrf.mxu1  ;;  %v9615_v52 = vpop.f32.mrf.mxu0  ;;  %10009 = vmatmul.mubr.bf16.gmra.mxu1 %v9798_v2  ;;  %10266 = vmatmul.mubr.bf16.gmra.mxu0 %v9369_v50 }
 0x693   : > { %v9187_v61 = vadd.f32 %v9186_v36, %v18449_v26  ;;  %v9616_v9 = vadd.f32 %v9615_v52, %v18451_v19  ;;  %v9317_v27 = vmax.f32 %v9185_v17, 0.0  ;;  %v9746_v49 = vmax.f32 %v9614_v46, 0.0 }
 0x694   : > { %v9190_v6 = vpop.f32.mrf.mxu1  ;;  %v9619_v34 = vpop.f32.mrf.mxu0 }
 0x695   : > { %v9318_v40 = vmax.f32 %v9187_v61, 0.0  ;;  %v9747_v11 = vmax.f32 %v9616_v9, 0.0  ;;  %v9371_v15 = vpack.c.bf16 %v9317_v27, %v9315_v16  ;;  %v9800_v18 = vpack.c.bf16 %v9746_v49, %v9744_v7 }
 0x696   : > { %v9192_v55 = vpop.f32.mrf.mxu1  ;;  %v9621_v59 = vpop.f32.mrf.mxu0  ;;  %v9191_v48 = vadd.f32 %v9190_v6, %v18453_v38  ;;  %v9620_v3 = vadd.f32 %v9619_v34, %v18455_v14 }
 0x697   : > { %v9372_v37 = vpack.c.bf16 %v9318_v40, %v9316_v10  ;;  %v9801_v42 = vpack.c.bf16 %v9747_v11, %v9745_v22  ;;  %v9193_v31 = vadd.f32 %v9192_v55, %v18449_v26  ;;  %v9622_v56 = vadd.f32 %v9621_v59, %v18451_v19 }
 0x698   : > { %v9194_v54 = vpop.f32.mrf.mxu1  ;;  %v9623_v32 = vpop.f32.mrf.mxu0  ;;  %v9319_v8 = vmax.f32 %v9191_v48, 0.0  ;;  %v9748_v53 = vmax.f32 %v9620_v3, 0.0 }
 0x699   : > { %v9195_v29 = vadd.f32 %v9194_v54, %v18453_v38  ;;  %v9624_v51 = vadd.f32 %v9623_v32, %v18455_v14  ;;  %10016 = vmatprep.mubr.bf16.mxu1 %v9801_v42  ;;  %10273 = vmatprep.mubr.bf16.mxu0 %v9372_v37  ;;  %v9320_v20 = vmax.f32 %v9193_v31, 0.0  ;;  %v9749_v33 = vmax.f32 %v9622_v56, 0.0 }
 0x69a   : > { %v9196_v62 = vpop.f32.mrf.mxu1  ;;  %v9625_v57 = vpop.f32.mrf.mxu0  ;;  %10017 = vmatmul.mubr.bf16.gmra.mxu1 %v9800_v18  ;;  %10274 = vmatmul.mubr.bf16.gmra.mxu0 %v9371_v15 }
 0x69b   : > { %v9197_v1 = vadd.f32 %v9196_v62, %v18449_v26  ;;  %v9626_v13 = vadd.f32 %v9625_v57, %v18451_v19  ;;  %v9321_v45 = vmax.f32 %v9195_v29, 0.0  ;;  %v9750_v41 = vmax.f32 %v9624_v51, 0.0 }
 0x69c   : > { %v9200_v58 = vpop.f32.mrf.mxu1  ;;  %v9629_v60 = vpop.f32.mrf.mxu0 }
 0x69d   : > { %v9322_v24 = vmax.f32 %v9197_v1, 0.0  ;;  %v9751_v0 = vmax.f32 %v9626_v13, 0.0  ;;  %v9373_v39 = vpack.c.bf16 %v9321_v45, %v9319_v8  ;;  %v9802_v25 = vpack.c.bf16 %v9750_v41, %v9748_v53 }
 0x69e   : > { %v9202_v21 = vpop.f32.mrf.mxu1  ;;  %v9631_v35 = vpop.f32.mrf.mxu0  ;;  %v9201_v47 = vadd.f32 %v9200_v58, %v18453_v38  ;;  %v9630_v4 = vadd.f32 %v9629_v60, %v18455_v14 }
 0x69f   : > { %v9374_v28 = vpack.c.bf16 %v9322_v24, %v9320_v20  ;;  %v9803_v63 = vpack.c.bf16 %v9751_v0, %v9749_v33  ;;  %v9203_v43 = vadd.f32 %v9202_v21, %v18449_v26  ;;  %v9632_v2 = vadd.f32 %v9631_v35, %v18451_v19 }
 0x6a0   : > { %v9204_v30 = vpop.f32.mrf.mxu1  ;;  %v9633_v50 = vpop.f32.mrf.mxu0  ;;  %v9323_v10 = vmax.f32 %v9201_v47, 0.0  ;;  %v9752_v22 = vmax.f32 %v9630_v4, 0.0 }
 0x6a1   : > { %v9205_v12 = vadd.f32 %v9204_v30, %v18453_v38  ;;  %v9634_v5 = vadd.f32 %v9633_v50, %v18455_v14  ;;  %10024 = vmatprep.mubr.bf16.mxu1 %v9803_v63  ;;  %10281 = vmatprep.mubr.bf16.mxu0 %v9374_v28  ;;  %v9324_v27 = vmax.f32 %v9203_v43, 0.0  ;;  %v9753_v49 = vmax.f32 %v9632_v2, 0.0 }
 0x6a2   : > { %v9206_v17 = vpop.f32.mrf.mxu1  ;;  %v9635_v46 = vpop.f32.mrf.mxu0  ;;  %10025 = vmatmul.mubr.bf16.gmra.mxu1 %v9802_v25  ;;  %10282 = vmatmul.mubr.bf16.gmra.mxu0 %v9373_v39 }
 0x6a3   : > { %v9207_v44 = vadd.f32 %v9206_v17, %v18449_v26  ;;  %v9636_v23 = vadd.f32 %v9635_v46, %v18451_v19  ;;  %v9325_v36 = vmax.f32 %v9205_v12, 0.0  ;;  %v9754_v52 = vmax.f32 %v9634_v5, 0.0 }
 0x6a4   : > { %v9210_v61 = vpop.f32.mrf.mxu1  ;;  %v9639_v9 = vpop.f32.mrf.mxu0 }
 0x6a5   : > { %v9326_v6 = vmax.f32 %v9207_v44, 0.0  ;;  %v9755_v34 = vmax.f32 %v9636_v23, 0.0  ;;  %v9375_v55 = vpack.c.bf16 %v9325_v36, %v9323_v10  ;;  %v9804_v59 = vpack.c.bf16 %v9754_v52, %v9752_v22 }
 0x6a6   : > { %v9212_v40 = vpop.f32.mrf.mxu1  ;;  %v9641_v11 = vpop.f32.mrf.mxu0  ;;  %v9211_v32 = vadd.f32 %v9210_v61, %v18453_v38  ;;  %v9640_v56 = vadd.f32 %v9639_v9, %v18455_v14 }
 0x6a7   : > { %v9376_v16 = vpack.c.bf16 %v9326_v6, %v9324_v27  ;;  %v9805_v7 = vpack.c.bf16 %v9755_v34, %v9753_v49  ;;  %v9213_v37 = vadd.f32 %v9212_v40, %v18449_v26  ;;  %v9642_v18 = vadd.f32 %v9641_v11, %v18451_v19 }
 0x6a8   : > { %v9214_v42 = vpop.f32.mrf.mxu1  ;;  %v9643_v15 = vpop.f32.mrf.mxu0  ;;  %v9327_v20 = vmax.f32 %v9211_v32, 0.0  ;;  %v9756_v33 = vmax.f32 %v9640_v56, 0.0 }
 0x6a9   : > { %v9215_v31 = vadd.f32 %v9214_v42, %v18453_v38  ;;  %v9644_v54 = vadd.f32 %v9643_v15, %v18455_v14  ;;  %10032 = vmatprep.mubr.bf16.mxu1 %v9805_v7  ;;  %10289 = vmatprep.mubr.bf16.mxu0 %v9376_v16  ;;  %v9328_v45 = vmax.f32 %v9213_v37, 0.0  ;;  %v9757_v41 = vmax.f32 %v9642_v18, 0.0 }
 0x6aa   : > { %v9216_v29 = vpop.f32.mrf.mxu1  ;;  %v9645_v51 = vpop.f32.mrf.mxu0  ;;  %10033 = vmatmul.mubr.bf16.gmra.mxu1 %v9804_v59  ;;  %10290 = vmatmul.mubr.bf16.gmra.mxu0 %v9375_v55 }
 0x6ab   : > { %v9217_v48 = vadd.f32 %v9216_v29, %v18449_v26  ;;  %v9646_v3 = vadd.f32 %v9645_v51, %v18451_v19  ;;  %v9329_v62 = vmax.f32 %v9215_v31, 0.0  ;;  %v9758_v57 = vmax.f32 %v9644_v54, 0.0 }
 0x6ac   : > { %v9220_v1 = vpop.f32.mrf.mxu1  ;;  %v9649_v13 = vpop.f32.mrf.mxu0 }
 0x6ad   : > { %v9330_v58 = vmax.f32 %v9217_v48, 0.0  ;;  %v9759_v60 = vmax.f32 %v9646_v3, 0.0  ;;  %v9377_v21 = vpack.c.bf16 %v9329_v62, %v9327_v20  ;;  %v9806_v35 = vpack.c.bf16 %v9758_v57, %v9756_v33 }
 0x6ae   : > { %v9222_v24 = vpop.f32.mrf.mxu1  ;;  %v9651_v0 = vpop.f32.mrf.mxu0  ;;  %v9221_v50 = vadd.f32 %v9220_v1, %v18453_v38  ;;  %v9650_v2 = vadd.f32 %v9649_v13, %v18455_v14 }
 0x6af   : > { %v9378_v8 = vpack.c.bf16 %v9330_v58, %v9328_v45  ;;  %v9807_v53 = vpack.c.bf16 %v9759_v60, %v9757_v41  ;;  %v9223_v28 = vadd.f32 %v9222_v24, %v18449_v26  ;;  %v9652_v25 = vadd.f32 %v9651_v0, %v18451_v19 }
 0x6b0   : > { %v9224_v63 = vpop.f32.mrf.mxu1  ;;  %v9653_v39 = vpop.f32.mrf.mxu0  ;;  %v9331_v27 = vmax.f32 %v9221_v50, 0.0  ;;  %v9760_v49 = vmax.f32 %v9650_v2, 0.0 }
 0x6b1   : > { %v9225_v43 = vadd.f32 %v9224_v63, %v18453_v38  ;;  %v9654_v30 = vadd.f32 %v9653_v39, %v18455_v14  ;;  %10040 = vmatprep.mubr.bf16.mxu1 %v9807_v53  ;;  %10297 = vmatprep.mubr.bf16.mxu0 %v9378_v8  ;;  %v9332_v36 = vmax.f32 %v9223_v28, 0.0  ;;  %v9761_v52 = vmax.f32 %v9652_v25, 0.0 }
 0x6b2   : > { %v9226_v12 = vpop.f32.mrf.mxu1  ;;  %v9655_v5 = vpop.f32.mrf.mxu0  ;;  %10041 = vmatmul.mubr.bf16.gmra.mxu1 %v9806_v35  ;;  %10298 = vmatmul.mubr.bf16.gmra.mxu0 %v9377_v21 }
 0x6b3   : > { %v9227_v47 = vadd.f32 %v9226_v12, %v18449_v26  ;;  %v9656_v4 = vadd.f32 %v9655_v5, %v18451_v19  ;;  %v9333_v17 = vmax.f32 %v9225_v43, 0.0  ;;  %v9762_v46 = vmax.f32 %v9654_v30, 0.0 }
 0x6b4   : > { %v9230_v44 = vpop.f32.mrf.mxu1  ;;  %v9659_v23 = vpop.f32.mrf.mxu0 }
 0x6b5   : > { %v9334_v61 = vmax.f32 %v9227_v47, 0.0  ;;  %v9763_v9 = vmax.f32 %v9656_v4, 0.0  ;;  %v9379_v40 = vpack.c.bf16 %v9333_v17, %v9331_v27  ;;  %v9808_v11 = vpack.c.bf16 %v9762_v46, %v9760_v49 }
 0x6b6   : > { %v9232_v6 = vpop.f32.mrf.mxu1  ;;  %v9661_v34 = vpop.f32.mrf.mxu0  ;;  %v9231_v15 = vadd.f32 %v9230_v44, %v18453_v38  ;;  %v9660_v18 = vadd.f32 %v9659_v23, %v18455_v14 }
 0x6b7   : > { %v9380_v10 = vpack.c.bf16 %v9334_v61, %v9332_v36  ;;  %v9809_v22 = vpack.c.bf16 %v9763_v9, %v9761_v52  ;;  %v9233_v16 = vadd.f32 %v9232_v6, %v18449_v26  ;;  %v9662_v59 = vadd.f32 %v9661_v34, %v18451_v19 }
 0x6b8   : > { %v9234_v7 = vpop.f32.mrf.mxu1  ;;  %v9663_v55 = vpop.f32.mrf.mxu0  ;;  %v9335_v45 = vmax.f32 %v9231_v15, 0.0  ;;  %v9764_v41 = vmax.f32 %v9660_v18, 0.0 }
 0x6b9   : > { %v9235_v37 = vadd.f32 %v9234_v7, %v18453_v38  ;;  %v9664_v42 = vadd.f32 %v9663_v55, %v18455_v14  ;;  %10048 = vmatprep.mubr.bf16.mxu1 %v9809_v22  ;;  %10305 = vmatprep.mubr.bf16.mxu0 %v9380_v10  ;;  %v9336_v62 = vmax.f32 %v9233_v16, 0.0  ;;  %v9765_v57 = vmax.f32 %v9662_v59, 0.0 }
 0x6ba   : > { %v9236_v31 = vpop.f32.mrf.mxu1  ;;  %v9665_v54 = vpop.f32.mrf.mxu0  ;;  %10049 = vmatmul.mubr.bf16.gmra.mxu1 %v9808_v11  ;;  %10306 = vmatmul.mubr.bf16.gmra.mxu0 %v9379_v40 }
 0x6bb   : > { %v9237_v32 = vadd.f32 %v9236_v31, %v18449_v26  ;;  %v9666_v56 = vadd.f32 %v9665_v54, %v18451_v19  ;;  %v9337_v29 = vmax.f32 %v9235_v37, 0.0  ;;  %v9766_v51 = vmax.f32 %v9664_v42, 0.0 }
 0x6bc   : > { %v9240_v48 = vpop.f32.mrf.mxu1  ;;  %v9669_v3 = vpop.f32.mrf.mxu0 }
 0x6bd   : > { %v9338_v1 = vmax.f32 %v9237_v32, 0.0  ;;  %v9767_v13 = vmax.f32 %v9666_v56, 0.0  ;;  %v9381_v24 = vpack.c.bf16 %v9337_v29, %v9335_v45  ;;  %v9810_v0 = vpack.c.bf16 %v9766_v51, %v9764_v41 }
 0x6be   : > { %v9242_v58 = vpop.f32.mrf.mxu1  ;;  %v9671_v60 = vpop.f32.mrf.mxu0  ;;  %v9241_v39 = vadd.f32 %v9240_v48, %v18453_v38  ;;  %v9670_v25 = vadd.f32 %v9669_v3, %v18455_v14 }
 0x6bf   : > { %v9382_v20 = vpack.c.bf16 %v9338_v1, %v9336_v62  ;;  %v9811_v33 = vpack.c.bf16 %v9767_v13, %v9765_v57  ;;  %v9243_v8 = vadd.f32 %v9242_v58, %v18449_v26  ;;  %v9672_v35 = vadd.f32 %v9671_v60, %v18451_v19 }
 0x6c0   : > { %v9244_v53 = vpop.f32.mrf.mxu1  ;;  %v9673_v21 = vpop.f32.mrf.mxu0  ;;  %v9339_v36 = vmax.f32 %v9241_v39, 0.0  ;;  %v9768_v52 = vmax.f32 %v9670_v25, 0.0 }
 0x6c1   : > { %v9245_v28 = vadd.f32 %v9244_v53, %v18453_v38  ;;  %v9674_v63 = vadd.f32 %v9673_v21, %v18455_v14  ;;  %10056 = vmatprep.mubr.bf16.mxu1 %v9811_v33  ;;  %10313 = vmatprep.mubr.bf16.mxu0 %v9382_v20  ;;  %v9340_v17 = vmax.f32 %v9243_v8, 0.0  ;;  %v9769_v46 = vmax.f32 %v9672_v35, 0.0 }
 0x6c2   : > { %v9246_v43 = vpop.f32.mrf.mxu1  ;;  %v9675_v30 = vpop.f32.mrf.mxu0  ;;  %10057 = vmatmul.mubr.bf16.gmra.mxu1 %v9810_v0  ;;  %10314 = vmatmul.mubr.bf16.gmra.mxu0 %v9381_v24 }
 0x6c3   : > { %v9247_v50 = vadd.f32 %v9246_v43, %v18449_v26  ;;  %v9676_v2 = vadd.f32 %v9675_v30, %v18451_v19  ;;  %v9341_v12 = vmax.f32 %v9245_v28, 0.0  ;;  %v9770_v5 = vmax.f32 %v9674_v63, 0.0 }
 0x6c4   : > { %v9250_v47 = vpop.f32.mrf.mxu1  ;;  %v9679_v4 = vpop.f32.mrf.mxu0 }
 0x6c5   : > { %v9342_v44 = vmax.f32 %v9247_v50, 0.0  ;;  %v9771_v23 = vmax.f32 %v9676_v2, 0.0  ;;  %v9383_v6 = vpack.c.bf16 %v9341_v12, %v9339_v36  ;;  %v9812_v34 = vpack.c.bf16 %v9770_v5, %v9768_v52 }
 0x6c6   : > { %v9252_v61 = vpop.f32.mrf.mxu1  ;;  %v9681_v9 = vpop.f32.mrf.mxu0  ;;  %v9251_v55 = vadd.f32 %v9250_v47, %v18453_v38  ;;  %v9680_v59 = vadd.f32 %v9679_v4, %v18455_v14 }
 0x6c7   : > { %v9384_v27 = vpack.c.bf16 %v9342_v44, %v9340_v17  ;;  %v9813_v49 = vpack.c.bf16 %v9771_v23, %v9769_v46  ;;  %v9253_v10 = vadd.f32 %v9252_v61, %v18449_v26  ;;  %v9682_v11 = vadd.f32 %v9681_v9, %v18451_v19 }
 0x6c8   : > { %v9254_v22 = vpop.f32.mrf.mxu1  ;;  %v9683_v40 = vpop.f32.mrf.mxu0  ;;  %v9343_v62 = vmax.f32 %v9251_v55, 0.0  ;;  %v9772_v57 = vmax.f32 %v9680_v59, 0.0 }
 0x6c9   : > { %v9255_v16 = vadd.f32 %v9254_v22, %v18453_v38  ;;  %v9684_v7 = vadd.f32 %v9683_v40, %v18455_v14  ;;  %10064 = vmatprep.mubr.bf16.mxu1 %v9813_v49  ;;  %10321 = vmatprep.mubr.bf16.mxu0 %v9384_v27  ;;  %v9344_v29 = vmax.f32 %v9253_v10, 0.0  ;;  %v9773_v51 = vmax.f32 %v9682_v11, 0.0 }
 0x6ca   : > { %v9256_v37 = vpop.f32.mrf.mxu1  ;;  %v9685_v42 = vpop.f32.mrf.mxu0  ;;  %10065 = vmatmul.mubr.bf16.gmra.mxu1 %v9812_v34  ;;  %10322 = vmatmul.mubr.bf16.gmra.mxu0 %v9383_v6 }
 0x6cb   : > { %v9257_v15 = vadd.f32 %v9256_v37, %v18449_v26  ;;  %v9686_v18 = vadd.f32 %v9685_v42, %v18451_v19  ;;  %v9345_v31 = vmax.f32 %v9255_v16, 0.0  ;;  %v9774_v54 = vmax.f32 %v9684_v7, 0.0 }
 0x6cc   : > { %v9260_v32 = vpop.f32.mrf.mxu1  ;;  %v9689_v56 = vpop.f32.mrf.mxu0 }
 0x6cd   : > { %v9346_v48 = vmax.f32 %v9257_v15, 0.0  ;;  %v9775_v3 = vmax.f32 %v9686_v18, 0.0  ;;  %v9385_v58 = vpack.c.bf16 %v9345_v31, %v9343_v62  ;;  %v9814_v60 = vpack.c.bf16 %v9774_v54, %v9772_v57 }
 0x6ce   : > { %v9262_v1 = vpop.f32.mrf.mxu1  ;;  %v9691_v13 = vpop.f32.mrf.mxu0  ;;  %v9261_v21 = vadd.f32 %v9260_v32, %v18453_v38  ;;  %v9690_v35 = vadd.f32 %v9689_v56, %v18455_v14 }
 0x6cf   : > { %v9386_v45 = vpack.c.bf16 %v9346_v48, %v9344_v29  ;;  %v9815_v41 = vpack.c.bf16 %v9775_v3, %v9773_v51  ;;  %v9263_v20 = vadd.f32 %v9262_v1, %v18449_v26  ;;  %v9692_v0 = vadd.f32 %v9691_v13, %v18451_v19 }
 0x6d0   : > { %v9264_v33 = vpop.f32.mrf.mxu1  ;;  %v9693_v24 = vpop.f32.mrf.mxu0  ;;  %v9347_v17 = vmax.f32 %v9261_v21, 0.0  ;;  %v9776_v46 = vmax.f32 %v9690_v35, 0.0 }
 0x6d1   : > { %v9265_v8 = vadd.f32 %v9264_v33, %v18453_v38  ;;  %v9694_v53 = vadd.f32 %v9693_v24, %v18455_v14  ;;  %10072 = vmatprep.mubr.bf16.mxu1 %v9815_v41  ;;  %10329 = vmatprep.mubr.bf16.mxu0 %v9386_v45  ;;  %v9348_v12 = vmax.f32 %v9263_v20, 0.0  ;;  %v9777_v5 = vmax.f32 %v9692_v0, 0.0 }
 0x6d2   : > { %v9266_v28 = vpop.f32.mrf.mxu1  ;;  %v9695_v63 = vpop.f32.mrf.mxu0  ;;  %10073 = vmatmul.mubr.bf16.gmra.mxu1 %v9814_v60  ;;  %10330 = vmatmul.mubr.bf16.gmra.mxu0 %v9385_v58 }
 0x6d3   : > { %v9267_v39 = vadd.f32 %v9266_v28, %v18449_v26  ;;  %v9696_v25 = vadd.f32 %v9695_v63, %v18451_v19  ;;  %v9349_v43 = vmax.f32 %v9265_v8, 0.0  ;;  %v9778_v30 = vmax.f32 %v9694_v53, 0.0 }
 0x6d4   : > { %v9270_v50 = vpop.f32.mrf.mxu1  ;;  %v9699_v2 = vpop.f32.mrf.mxu0 }
 0x6d5   : > { %v9350_v47 = vmax.f32 %v9267_v39, 0.0  ;;  %v9779_v4 = vmax.f32 %v9696_v25, 0.0  ;;  %v9387_v61 = vpack.c.bf16 %v9349_v43, %v9347_v17  ;;  %v9816_v9 = vpack.c.bf16 %v9778_v30, %v9776_v46 }
 0x6d6   : > { %v9272_v44 = vpop.f32.mrf.mxu1  ;;  %v9701_v23 = vpop.f32.mrf.mxu0  ;;  %v9271_v40 = vadd.f32 %v9270_v50, %v18453_v38  ;;  %v9700_v11 = vadd.f32 %v9699_v2, %v18455_v14 }
 0x6d7   : > { %v9388_v36 = vpack.c.bf16 %v9350_v47, %v9348_v12  ;;  %v9817_v52 = vpack.c.bf16 %v9779_v4, %v9777_v5  ;;  %v9273_v27 = vadd.f32 %v9272_v44, %v18449_v26  ;;  %v9702_v34 = vadd.f32 %v9701_v23, %v18451_v19 }
 0x6d8   : > { %v9274_v49 = vpop.f32.mrf.mxu1  ;;  %v9703_v6 = vpop.f32.mrf.mxu0  ;;  %v9351_v29 = vmax.f32 %v9271_v40, 0.0  ;;  %v9780_v51 = vmax.f32 %v9700_v11, 0.0 }
 0x6d9   : > { %v9275_v10 = vadd.f32 %v9274_v49, %v18453_v38  ;;  %v9704_v22 = vadd.f32 %v9703_v6, %v18455_v14  ;;  %10080 = vmatprep.mubr.bf16.mxu1 %v9817_v52  ;;  %10337 = vmatprep.mubr.bf16.mxu0 %v9388_v36  ;;  %v9352_v31 = vmax.f32 %v9273_v27, 0.0  ;;  %v9781_v54 = vmax.f32 %v9702_v34, 0.0 }
 0x6da   : > { %v9276_v16 = vpop.f32.mrf.mxu1  ;;  %v9705_v7 = vpop.f32.mrf.mxu0  ;;  %10081 = vmatmul.mubr.bf16.gmra.mxu1 %v9816_v9  ;;  %10338 = vmatmul.mubr.bf16.gmra.mxu0 %v9387_v61 }
 0x6db   : > { %v9277_v55 = vadd.f32 %v9276_v16, %v18449_v26  ;;  %v9706_v59 = vadd.f32 %v9705_v7, %v18451_v19  ;;  %v9353_v37 = vmax.f32 %v9275_v10, 0.0  ;;  %v9782_v42 = vmax.f32 %v9704_v22, 0.0 }
 0x6dc   : > { %v9280_v15 = vpop.f32.mrf.mxu1  ;;  %v9709_v18 = vpop.f32.mrf.mxu0 }
 0x6dd   : > { %v9354_v32 = vmax.f32 %v9277_v55, 0.0  ;;  %v9783_v56 = vmax.f32 %v9706_v59, 0.0  ;;  %v9389_v1 = vpack.c.bf16 %v9353_v37, %v9351_v29  ;;  %v9818_v13 = vpack.c.bf16 %v9782_v42, %v9780_v51 }
 0x6de   : > { %v9282_v48 = vpop.f32.mrf.mxu1  ;;  %v9711_v3 = vpop.f32.mrf.mxu0  ;;  %v9281_v24 = vadd.f32 %v9280_v15, %v18453_v38  ;;  %v9710_v0 = vadd.f32 %v9709_v18, %v18455_v14 }
 0x6df   : > { %v9390_v62 = vpack.c.bf16 %v9354_v32, %v9352_v31  ;;  %v9819_v57 = vpack.c.bf16 %v9783_v56, %v9781_v54  ;;  %v9283_v45 = vadd.f32 %v9282_v48, %v18449_v26  ;;  %v9712_v60 = vadd.f32 %v9711_v3, %v18451_v19  ;;  %v18591_v48 = vld [vmem:[%s399_s22] ss:$0 sm:$0xff] }
 0x6e0   : > { %v9284_v41 = vpop.f32.mrf.mxu1  ;;  %v9713_v58 = vpop.f32.mrf.mxu0  ;;  %v9355_v12 = vmax.f32 %v9281_v24, 0.0  ;;  %v9784_v5 = vmax.f32 %v9710_v0, 0.0 }
 0x6e1   : > { %v9285_v20 = vadd.f32 %v9284_v41, %v18453_v38  ;;  %v9714_v33 = vadd.f32 %v9713_v58, %v18455_v14  ;;  %10088 = vmatprep.mubr.bf16.mxu1 %v9819_v57  ;;  %10345 = vmatprep.mubr.bf16.mxu0 %v9390_v62  ;;  %v9356_v43 = vmax.f32 %v9283_v45, 0.0  ;;  %v9785_v30 = vmax.f32 %v9712_v60, 0.0 }
 0x6e2   : > { %v9286_v8 = vpop.f32.mrf.mxu1  ;;  %v9715_v53 = vpop.f32.mrf.mxu0  ;;  %10089 = vmatmul.mubr.bf16.gmra.mxu1 %v9818_v13  ;;  %10346 = vmatmul.mubr.bf16.gmra.mxu0 %v9389_v1 }
 0x6e3   : > { %v9287_v21 = vadd.f32 %v9286_v8, %v18449_v26  ;;  %v9716_v35 = vadd.f32 %v9715_v53, %v18451_v19  ;;  %v9357_v28 = vmax.f32 %v9285_v20, 0.0  ;;  %v9786_v63 = vmax.f32 %v9714_v33, 0.0 }
 0x6e4   : > { %v9290_v39 = vpop.f32.mrf.mxu1  ;;  %v9719_v25 = vpop.f32.mrf.mxu0 }
 0x6e5   : > { %v9358_v50 = vmax.f32 %v9287_v21, 0.0  ;;  %v9787_v2 = vmax.f32 %v9716_v35, 0.0  ;;  %v9391_v44 = vpack.c.bf16 %v9357_v28, %v9355_v12  ;;  %v9820_v23 = vpack.c.bf16 %v9786_v63, %v9784_v5 }
 0x6e6   : > { %v9292_v47 = vpop.f32.mrf.mxu1  ;;  %v9721_v4 = vpop.f32.mrf.mxu0  ;;  %v9291_v6 = vadd.f32 %v9290_v39, %v18453_v38  ;;  %v9720_v34 = vadd.f32 %v9719_v25, %v18455_v14 }
 0x6e7   : > { %v9392_v17 = vpack.c.bf16 %v9358_v50, %v9356_v43  ;;  %v9821_v46 = vpack.c.bf16 %v9787_v2, %v9785_v30  ;;  %v9293_v36 = vadd.f32 %v9292_v47, %v18449_v26  ;;  %v9722_v9 = vadd.f32 %v9721_v4, %v18451_v19 }
 0x6e8   : > { %v9294_v52 = vpop.f32.mrf.mxu1  ;;  %v9723_v61 = vpop.f32.mrf.mxu0  ;;  %v9359_v15 = vmax.f32 %v9291_v6, 0.0 }
 0x6e9   : > { %v9295_v27 = vadd.f32 %v9294_v52, %v18453_v38  ;;  %v9724_v49 = vadd.f32 %v9723_v61, %v18455_v14  ;;  %10096 = vmatprep.mubr.bf16.mxu1 %v9821_v46  ;;  %10353 = vmatprep.mubr.bf16.mxu0 %v9392_v17  ;;  %v9360_v55 = vmax.f32 %v9293_v36, 0.0  ;;  %v9789_v59 = vmax.f32 %v9722_v9, 0.0 }
 0x6ea   : > { %v9296_v10 = vpop.f32.mrf.mxu1  ;;  %v9725_v22 = vpop.f32.mrf.mxu0  ;;  %10097 = vmatmul.mubr.bf16.gmra.mxu1 %v9820_v23  ;;  %10354 = vmatmul.mubr.bf16.gmra.mxu0 %v9391_v44  ;;  %v9788_v38 = vmax.f32 %v9720_v34, 0.0 }
 0x6eb   : > { %v9297_v40 = vadd.f32 %v9296_v10, %v18449_v26  ;;  %v9726_v11 = vadd.f32 %v9725_v22, %v18451_v19  ;;  %v9361_v16 = vmax.f32 %v9295_v27, 0.0  ;;  %v9790_v7 = vmax.f32 %v9724_v49, 0.0 }
 0x6ed   : > { %v9362_v37 = vmax.f32 %v9297_v40, 0.0  ;;  %v9791_v42 = vmax.f32 %v9726_v11, 0.0  ;;  %v9393_v31 = vpack.c.bf16 %v9361_v16, %v9359_v15  ;;  %v9822_v54 = vpack.c.bf16 %v9790_v7, %v9788_v38 }
 0x6ef   : > { %v9394_v14 = vpack.c.bf16 %v9362_v37, %v9360_v55  ;;  %v9823_v18 = vpack.c.bf16 %v9791_v42, %v9789_v59 }
 0x6f1   : > { %10104 = vmatprep.mubr.bf16.mxu1 %v9823_v18  ;;  %10361 = vmatprep.mubr.bf16.mxu0 %v9394_v14 }
 0x6f2   : > { %10105 = vmatmul.mubr.bf16.gmra.mxu1 %v9822_v54  ;;  %10362 = vmatmul.mubr.bf16.gmra.mxu0 %v9393_v31 }
 0x73a   : > { %v13053_v26 = vpop.f32.mrf.mxu1  ;;  %v13165_v19 = vpop.f32.mrf.mxu0 }
 0x73c   : > { %v13054_v32 = vpop.f32.mrf.mxu1  ;;  %v13166_v56 = vpop.f32.mrf.mxu0 }
 0x73d   : > { %v13055_v29 = vadd.f32 %v13054_v32, %v13053_v26  ;;  %v13167_v51 = vadd.f32 %v13166_v56, %v13165_v19 }
 0x73e   : > { %v13056_v3 = vpop.f32.mrf.mxu1  ;;  %v13168_v62 = vpop.f32.mrf.mxu0 }
 0x73f   : > { %v10244_v57 = vadd.f32 %v13167_v51, %v13055_v29 }
 0x740   : > { %v13057_v1 = vpop.f32.mrf.mxu1  ;;  %v13169_v13 = vpop.f32.mrf.mxu0 }
 0x741   : > { %v10377_v45 = vadd.f32 %v18591_v48, %v10244_v57  ;;  %v13058_v41 = vadd.f32 %v13057_v1, %v13056_v3  ;;  %v13170_v58 = vadd.f32 %v13169_v13, %v13168_v62 }
 0x742   : > { %v13059_v60 = vpop.f32.mrf.mxu1  ;;  %v13171_v20 = vpop.f32.mrf.mxu0 }
 0x743   : > { %10409 = vst [vmem:[%s18596_s9] sm:$0xff] %v10377_v45  ;;  %v10247_v33 = vadd.f32 %v13170_v58, %v13058_v41 }
 0x744   : > { %v13060_v24 = vpop.f32.mrf.mxu1  ;;  %v13172_v0 = vpop.f32.mrf.mxu0 }
 0x745   : > { %v10378_v8 = vadd.f32 %v18591_v48, %v10247_v33  ;;  %v13061_v53 = vadd.f32 %v13060_v24, %v13059_v60  ;;  %v13173_v21 = vadd.f32 %v13172_v0, %v13171_v20 }
 0x746   : > { %v13062_v35 = vpop.f32.mrf.mxu1  ;;  %v13174_v28 = vpop.f32.mrf.mxu0 }
 0x747   : > { %10410 = vst [vmem:[%s18596_s9 + $0x8] sm:$0xff] %v10378_v8  ;;  %v10252_v63 = vadd.f32 %v13173_v21, %v13061_v53 }
 0x748   : > { %v13063_v39 = vpop.f32.mrf.mxu1  ;;  %v13175_v25 = vpop.f32.mrf.mxu0 }
 0x749   : > { %v10379_v43 = vadd.f32 %v18591_v48, %v10252_v63  ;;  %v13064_v30 = vadd.f32 %v13063_v39, %v13062_v35  ;;  %v13176_v50 = vadd.f32 %v13175_v25, %v13174_v28 }
 0x74a   : > { %v13065_v2 = vpop.f32.mrf.mxu1  ;;  %v13177_v12 = vpop.f32.mrf.mxu0 }
 0x74b   : > { %10411 = vst [vmem:[%s18596_s9 + $0x10] sm:$0xff] %v10379_v43  ;;  %v10255_v5 = vadd.f32 %v13176_v50, %v13064_v30 }
 0x74c   : > { %v13066_v47 = vpop.f32.mrf.mxu1  ;;  %v13178_v4 = vpop.f32.mrf.mxu0 }
 0x74d   : > { %v10380_v17 = vadd.f32 %v18591_v48, %v10255_v5  ;;  %v13067_v46 = vadd.f32 %v13066_v47, %v13065_v2  ;;  %v13179_v44 = vadd.f32 %v13178_v4, %v13177_v12 }
 0x74e   : > { %v13068_v23 = vpop.f32.mrf.mxu1  ;;  %v13180_v36 = vpop.f32.mrf.mxu0 }
 0x74f   : > { %10412 = vst [vmem:[%s18596_s9 + $0x18] sm:$0xff] %v10380_v17  ;;  %v10260_v52 = vadd.f32 %v13179_v44, %v13067_v46 }
 0x750   : > { %v13069_v61 = vpop.f32.mrf.mxu1  ;;  %v13181_v9 = vpop.f32.mrf.mxu0 }
 0x751   : > { %v10381_v27 = vadd.f32 %v18591_v48, %v10260_v52  ;;  %v13070_v49 = vadd.f32 %v13069_v61, %v13068_v23  ;;  %v13182_v6 = vadd.f32 %v13181_v9, %v13180_v36 }
 0x752   : > { %v13071_v34 = vpop.f32.mrf.mxu1  ;;  %v13183_v10 = vpop.f32.mrf.mxu0 }
 0x753   : > { %10413 = vst [vmem:[%s18596_s9 + $0x20] sm:$0xff] %v10381_v27  ;;  %v10263_v22 = vadd.f32 %v13182_v6, %v13070_v49 }
 0x754   : > { %v13072_v40 = vpop.f32.mrf.mxu1  ;;  %v13184_v11 = vpop.f32.mrf.mxu0 }
 0x755   : > { %v10382_v16 = vadd.f32 %v18591_v48, %v10263_v22  ;;  %v13073_v7 = vadd.f32 %v13072_v40, %v13071_v34  ;;  %v13185_v55 = vadd.f32 %v13184_v11, %v13183_v10 }
 0x756   : > { %v13074_v59 = vpop.f32.mrf.mxu1  ;;  %v13186_v37 = vpop.f32.mrf.mxu0 }
 0x757   : > { %10414 = vst [vmem:[%s18596_s9 + $0x28] sm:$0xff] %v10382_v16  ;;  %v10268_v42 = vadd.f32 %v13185_v55, %v13073_v7 }
 0x758   : > { %v13075_v15 = vpop.f32.mrf.mxu1  ;;  %v13187_v38 = vpop.f32.mrf.mxu0 }
 0x759   : > { %v10383_v14 = vadd.f32 %v18591_v48, %v10268_v42  ;;  %v13076_v18 = vadd.f32 %v13075_v15, %v13074_v59  ;;  %v13188_v31 = vadd.f32 %v13187_v38, %v13186_v37 }
 0x75a   : > { %v13077_v54 = vpop.f32.mrf.mxu1  ;;  %v13189_v26 = vpop.f32.mrf.mxu0 }
 0x75b   : > { %10415 = vst [vmem:[%s18596_s9 + $0x30] sm:$0xff] %v10383_v14  ;;  %v10271_v19 = vadd.f32 %v13188_v31, %v13076_v18 }
 0x75c   : > { %v13078_v32 = vpop.f32.mrf.mxu1  ;;  %v13190_v56 = vpop.f32.mrf.mxu0 }
 0x75d   : > { %v10384_v29 = vadd.f32 %v18591_v48, %v10271_v19  ;;  %v13079_v51 = vadd.f32 %v13078_v32, %v13077_v54  ;;  %v13191_v3 = vadd.f32 %v13190_v56, %v13189_v26 }
 0x75e   : > { %v13080_v62 = vpop.f32.mrf.mxu1  ;;  %v13192_v57 = vpop.f32.mrf.mxu0 }
 0x75f   : > { %10416 = vst [vmem:[%s18596_s9 + $0x38] sm:$0xff] %v10384_v29  ;;  %v10276_v1 = vadd.f32 %v13191_v3, %v13079_v51 }
 0x760   : > { %v13081_v13 = vpop.f32.mrf.mxu1  ;;  %v13193_v45 = vpop.f32.mrf.mxu0 }
 0x761   : > { %v10385_v41 = vadd.f32 %v18591_v48, %v10276_v1  ;;  %v13082_v58 = vadd.f32 %v13081_v13, %v13080_v62  ;;  %v13194_v60 = vadd.f32 %v13193_v45, %v13192_v57 }
 0x762   : > { %v13083_v20 = vpop.f32.mrf.mxu1  ;;  %v13195_v33 = vpop.f32.mrf.mxu0 }
 0x763   : > { %10417 = vst [vmem:[%s18596_s9 + $0x40] sm:$0xff] %v10385_v41  ;;  %v10279_v24 = vadd.f32 %v13194_v60, %v13082_v58 }
 0x764   : > { %v13084_v0 = vpop.f32.mrf.mxu1  ;;  %v13196_v8 = vpop.f32.mrf.mxu0 }
 0x765   : > { %v10386_v53 = vadd.f32 %v18591_v48, %v10279_v24  ;;  %v13085_v21 = vadd.f32 %v13084_v0, %v13083_v20  ;;  %v13197_v35 = vadd.f32 %v13196_v8, %v13195_v33 }
 0x766   : > { %v13086_v28 = vpop.f32.mrf.mxu1  ;;  %v13198_v63 = vpop.f32.mrf.mxu0 }
 0x767   : > { %10418 = vst [vmem:[%s18596_s9 + $0x48] sm:$0xff] %v10386_v53  ;;  %v10284_v39 = vadd.f32 %v13197_v35, %v13085_v21 }
 0x768   : > { %v13087_v25 = vpop.f32.mrf.mxu1  ;;  %v13199_v43 = vpop.f32.mrf.mxu0 }
 0x769   : > { %v10387_v30 = vadd.f32 %v18591_v48, %v10284_v39  ;;  %v13088_v50 = vadd.f32 %v13087_v25, %v13086_v28  ;;  %v13200_v2 = vadd.f32 %v13199_v43, %v13198_v63 }
 0x76a   : > { %v13089_v12 = vpop.f32.mrf.mxu1  ;;  %v13201_v5 = vpop.f32.mrf.mxu0 }
 0x76b   : > { %10419 = vst [vmem:[%s18596_s9 + $0x50] sm:$0xff] %v10387_v30  ;;  %v10287_v47 = vadd.f32 %v13200_v2, %v13088_v50 }
 0x76c   : > { %v13090_v4 = vpop.f32.mrf.mxu1  ;;  %v13202_v17 = vpop.f32.mrf.mxu0 }
 0x76d   : > { %v10388_v46 = vadd.f32 %v18591_v48, %v10287_v47  ;;  %v13091_v44 = vadd.f32 %v13090_v4, %v13089_v12  ;;  %v13203_v23 = vadd.f32 %v13202_v17, %v13201_v5 }
 0x76e   : > { %v13092_v36 = vpop.f32.mrf.mxu1  ;;  %v13204_v52 = vpop.f32.mrf.mxu0 }
 0x76f   : > { %10420 = vst [vmem:[%s18596_s9 + $0x58] sm:$0xff] %v10388_v46  ;;  %v10292_v61 = vadd.f32 %v13203_v23, %v13091_v44 }
 0x770   : > { %v13093_v9 = vpop.f32.mrf.mxu1  ;;  %v13205_v27 = vpop.f32.mrf.mxu0 }
 0x771   : > { %v10389_v49 = vadd.f32 %v18591_v48, %v10292_v61  ;;  %v13094_v6 = vadd.f32 %v13093_v9, %v13092_v36  ;;  %v13206_v34 = vadd.f32 %v13205_v27, %v13204_v52 }
 0x772   : > { %v13095_v10 = vpop.f32.mrf.mxu1  ;;  %v13207_v22 = vpop.f32.mrf.mxu0 }
 0x773   : > { %10421 = vst [vmem:[%s18596_s9 + $0x60] sm:$0xff] %v10389_v49  ;;  %v10295_v40 = vadd.f32 %v13206_v34, %v13094_v6 }
 0x774   : > { %v13096_v11 = vpop.f32.mrf.mxu1  ;;  %v13208_v16 = vpop.f32.mrf.mxu0 }
 0x775   : > { %v10390_v7 = vadd.f32 %v18591_v48, %v10295_v40  ;;  %v13097_v55 = vadd.f32 %v13096_v11, %v13095_v10  ;;  %v13209_v59 = vadd.f32 %v13208_v16, %v13207_v22 }
 0x776   : > { %v13098_v37 = vpop.f32.mrf.mxu1  ;;  %v13210_v42 = vpop.f32.mrf.mxu0 }
 0x777   : > { %10422 = vst [vmem:[%s18596_s9 + $0x68] sm:$0xff] %v10390_v7  ;;  %v10300_v15 = vadd.f32 %v13209_v59, %v13097_v55 }
 0x778   : > { %v13099_v38 = vpop.f32.mrf.mxu1  ;;  %v13211_v14 = vpop.f32.mrf.mxu0 }
 0x779   : > { %v10391_v18 = vadd.f32 %v18591_v48, %v10300_v15  ;;  %v13100_v31 = vadd.f32 %v13099_v38, %v13098_v37  ;;  %v13212_v54 = vadd.f32 %v13211_v14, %v13210_v42 }
 0x77a   : > { %v13101_v26 = vpop.f32.mrf.mxu1  ;;  %v13213_v19 = vpop.f32.mrf.mxu0 }
 0x77b   : > { %10423 = vst [vmem:[%s18596_s9 + $0x70] sm:$0xff] %v10391_v18  ;;  %v10303_v32 = vadd.f32 %v13212_v54, %v13100_v31 }
 0x77c   : > { %v13102_v56 = vpop.f32.mrf.mxu1  ;;  %v13214_v29 = vpop.f32.mrf.mxu0 }
 0x77d   : > { %v10392_v51 = vadd.f32 %v18591_v48, %v10303_v32  ;;  %v13103_v3 = vadd.f32 %v13102_v56, %v13101_v26  ;;  %v13215_v62 = vadd.f32 %v13214_v29, %v13213_v19 }
 0x77e   : > { %v13104_v57 = vpop.f32.mrf.mxu1  ;;  %v13216_v1 = vpop.f32.mrf.mxu0 }
 0x77f   : > { %10424 = vst [vmem:[%s18596_s9 + $0x78] sm:$0xff] %v10392_v51  ;;  %v10308_v13 = vadd.f32 %v13215_v62, %v13103_v3 }
 0x780   : > { %v13105_v45 = vpop.f32.mrf.mxu1  ;;  %v13217_v41 = vpop.f32.mrf.mxu0 }
 0x781   : > { %v10393_v58 = vadd.f32 %v18591_v48, %v10308_v13  ;;  %v13106_v60 = vadd.f32 %v13105_v45, %v13104_v57  ;;  %v13218_v20 = vadd.f32 %v13217_v41, %v13216_v1 }
 0x782   : > { %v13107_v33 = vpop.f32.mrf.mxu1  ;;  %v13219_v24 = vpop.f32.mrf.mxu0 }
 0x783   : > { %10425 = vst [vmem:[%s18596_s9 + $0x80] sm:$0xff] %v10393_v58  ;;  %v10311_v0 = vadd.f32 %v13218_v20, %v13106_v60 }
 0x784   : > { %v13108_v8 = vpop.f32.mrf.mxu1  ;;  %v13220_v53 = vpop.f32.mrf.mxu0 }
 0x785   : > { %v10394_v21 = vadd.f32 %v18591_v48, %v10311_v0  ;;  %v13109_v35 = vadd.f32 %v13108_v8, %v13107_v33  ;;  %v13221_v28 = vadd.f32 %v13220_v53, %v13219_v24 }
 0x786   : > { %v13110_v63 = vpop.f32.mrf.mxu1  ;;  %v13222_v39 = vpop.f32.mrf.mxu0 }
 0x787   : > { %10426 = vst [vmem:[%s18596_s9 + $0x88] sm:$0xff] %v10394_v21  ;;  %v10316_v25 = vadd.f32 %v13221_v28, %v13109_v35 }
 0x788   : > { %v13111_v43 = vpop.f32.mrf.mxu1  ;;  %v13223_v30 = vpop.f32.mrf.mxu0 }
 0x789   : > { %v10395_v50 = vadd.f32 %v18591_v48, %v10316_v25  ;;  %v13112_v2 = vadd.f32 %v13111_v43, %v13110_v63  ;;  %v13224_v12 = vadd.f32 %v13223_v30, %v13222_v39 }
 0x78a   : > { %v13113_v5 = vpop.f32.mrf.mxu1  ;;  %v13225_v47 = vpop.f32.mrf.mxu0 }
 0x78b   : > { %10427 = vst [vmem:[%s18596_s9 + $0x90] sm:$0xff] %v10395_v50  ;;  %v10319_v4 = vadd.f32 %v13224_v12, %v13112_v2 }
 0x78c   : > { %v13114_v17 = vpop.f32.mrf.mxu1  ;;  %v13226_v46 = vpop.f32.mrf.mxu0 }
 0x78d   : > { %v10396_v44 = vadd.f32 %v18591_v48, %v10319_v4  ;;  %v13115_v23 = vadd.f32 %v13114_v17, %v13113_v5  ;;  %v13227_v36 = vadd.f32 %v13226_v46, %v13225_v47 }
 0x78e   : > { %v13116_v52 = vpop.f32.mrf.mxu1  ;;  %v13228_v61 = vpop.f32.mrf.mxu0 }
 0x78f   : > { %10428 = vst [vmem:[%s18596_s9 + $0x98] sm:$0xff] %v10396_v44  ;;  %v10324_v9 = vadd.f32 %v13227_v36, %v13115_v23 }
 0x790   : > { %v13117_v27 = vpop.f32.mrf.mxu1  ;;  %v13229_v49 = vpop.f32.mrf.mxu0 }
 0x791   : > { %v10397_v6 = vadd.f32 %v18591_v48, %v10324_v9  ;;  %v13118_v34 = vadd.f32 %v13117_v27, %v13116_v52  ;;  %v13230_v10 = vadd.f32 %v13229_v49, %v13228_v61 }
 0x792   : > { %v13119_v22 = vpop.f32.mrf.mxu1  ;;  %v13231_v40 = vpop.f32.mrf.mxu0 }
 0x793   : > { %10429 = vst [vmem:[%s18596_s9 + $0xa0] sm:$0xff] %v10397_v6  ;;  %v10327_v11 = vadd.f32 %v13230_v10, %v13118_v34 }
 0x794   : > { %v13120_v16 = vpop.f32.mrf.mxu1  ;;  %v13232_v7 = vpop.f32.mrf.mxu0 }
 0x795   : > { %v10398_v55 = vadd.f32 %v18591_v48, %v10327_v11  ;;  %v13121_v59 = vadd.f32 %v13120_v16, %v13119_v22  ;;  %v13233_v37 = vadd.f32 %v13232_v7, %v13231_v40 }
 0x796   : > { %v13122_v42 = vpop.f32.mrf.mxu1  ;;  %v13234_v15 = vpop.f32.mrf.mxu0 }
 0x797   : > { %10430 = vst [vmem:[%s18596_s9 + $0xa8] sm:$0xff] %v10398_v55  ;;  %v10332_v38 = vadd.f32 %v13233_v37, %v13121_v59 }
 0x798   : > { %v13123_v14 = vpop.f32.mrf.mxu1  ;;  %v13235_v18 = vpop.f32.mrf.mxu0 }
 0x799   : > { %v10399_v31 = vadd.f32 %v18591_v48, %v10332_v38  ;;  %v13124_v54 = vadd.f32 %v13123_v14, %v13122_v42  ;;  %v13236_v26 = vadd.f32 %v13235_v18, %v13234_v15 }
 0x79a   : > { %v13125_v19 = vpop.f32.mrf.mxu1  ;;  %v13237_v32 = vpop.f32.mrf.mxu0 }
 0x79b   : > { %10431 = vst [vmem:[%s18596_s9 + $0xb0] sm:$0xff] %v10399_v31  ;;  %v10335_v56 = vadd.f32 %v13236_v26, %v13124_v54 }
 0x79c   : > { %v13126_v29 = vpop.f32.mrf.mxu1  ;;  %v13238_v51 = vpop.f32.mrf.mxu0 }
 0x79d   : > { %v10400_v3 = vadd.f32 %v18591_v48, %v10335_v56  ;;  %v13127_v62 = vadd.f32 %v13126_v29, %v13125_v19  ;;  %v13239_v57 = vadd.f32 %v13238_v51, %v13237_v32 }
 0x79e   : > { %v13128_v1 = vpop.f32.mrf.mxu1  ;;  %v13240_v13 = vpop.f32.mrf.mxu0 }
 0x79f   : > { %10432 = vst [vmem:[%s18596_s9 + $0xb8] sm:$0xff] %v10400_v3  ;;  %v10340_v45 = vadd.f32 %v13239_v57, %v13127_v62 }
 0x7a0   : > { %v13129_v41 = vpop.f32.mrf.mxu1  ;;  %v13241_v58 = vpop.f32.mrf.mxu0 }
 0x7a1   : > { %v10401_v60 = vadd.f32 %v18591_v48, %v10340_v45  ;;  %v13130_v20 = vadd.f32 %v13129_v41, %v13128_v1  ;;  %v13242_v33 = vadd.f32 %v13241_v58, %v13240_v13 }
 0x7a2   : > { %v13131_v24 = vpop.f32.mrf.mxu1  ;;  %v13243_v0 = vpop.f32.mrf.mxu0 }
 0x7a3   : > { %10433 = vst [vmem:[%s18596_s9 + $0xc0] sm:$0xff] %v10401_v60  ;;  %v10343_v8 = vadd.f32 %v13242_v33, %v13130_v20 }
 0x7a4   : > { %v13132_v53 = vpop.f32.mrf.mxu1  ;;  %v13244_v21 = vpop.f32.mrf.mxu0 }
 0x7a5   : > { %v10402_v35 = vadd.f32 %v18591_v48, %v10343_v8  ;;  %v13133_v28 = vadd.f32 %v13132_v53, %v13131_v24  ;;  %v13245_v63 = vadd.f32 %v13244_v21, %v13243_v0 }
 0x7a6   : > { %v13134_v39 = vpop.f32.mrf.mxu1  ;;  %v13246_v25 = vpop.f32.mrf.mxu0 }
 0x7a7   : > { %10434 = vst [vmem:[%s18596_s9 + $0xc8] sm:$0xff] %v10402_v35  ;;  %v10348_v43 = vadd.f32 %v13245_v63, %v13133_v28 }
 0x7a8   : > { %v13135_v30 = vpop.f32.mrf.mxu1  ;;  %v13247_v50 = vpop.f32.mrf.mxu0 }
 0x7a9   : > { %v10403_v2 = vadd.f32 %v18591_v48, %v10348_v43  ;;  %v13136_v12 = vadd.f32 %v13135_v30, %v13134_v39  ;;  %v13248_v5 = vadd.f32 %v13247_v50, %v13246_v25 }
 0x7aa   : > { %v13137_v47 = vpop.f32.mrf.mxu1  ;;  %v13249_v4 = vpop.f32.mrf.mxu0 }
 0x7ab   : > { %10435 = vst [vmem:[%s18596_s9 + $0xd0] sm:$0xff] %v10403_v2  ;;  %v10351_v17 = vadd.f32 %v13248_v5, %v13136_v12 }
 0x7ac   : > { %v13138_v46 = vpop.f32.mrf.mxu1  ;;  %v13250_v44 = vpop.f32.mrf.mxu0 }
 0x7ad   : > { %v10404_v23 = vadd.f32 %v18591_v48, %v10351_v17  ;;  %v13139_v36 = vadd.f32 %v13138_v46, %v13137_v47  ;;  %v13251_v52 = vadd.f32 %v13250_v44, %v13249_v4 }
 0x7ae   : > { %v13140_v61 = vpop.f32.mrf.mxu1  ;;  %v13252_v9 = vpop.f32.mrf.mxu0 }
 0x7af   : > { %10436 = vst [vmem:[%s18596_s9 + $0xd8] sm:$0xff] %v10404_v23  ;;  %v10356_v27 = vadd.f32 %v13251_v52, %v13139_v36 }
 0x7b0   : > { %v13141_v49 = vpop.f32.mrf.mxu1  ;;  %v13253_v6 = vpop.f32.mrf.mxu0 }
 0x7b1   : > { %v10405_v34 = vadd.f32 %v18591_v48, %v10356_v27  ;;  %v13142_v10 = vadd.f32 %v13141_v49, %v13140_v61  ;;  %v13254_v22 = vadd.f32 %v13253_v6, %v13252_v9 }
 0x7b2   : > { %v13143_v40 = vpop.f32.mrf.mxu1  ;;  %v13255_v11 = vpop.f32.mrf.mxu0 }
 0x7b3   : > { %10437 = vst [vmem:[%s18596_s9 + $0xe0] sm:$0xff] %v10405_v34  ;;  %v10359_v16 = vadd.f32 %v13254_v22, %v13142_v10 }
 0x7b4   : > { %v13144_v7 = vpop.f32.mrf.mxu1  ;;  %v13256_v55 = vpop.f32.mrf.mxu0 }
 0x7b5   : > { %v10406_v59 = vadd.f32 %v18591_v48, %v10359_v16  ;;  %v13145_v37 = vadd.f32 %v13144_v7, %v13143_v40  ;;  %v13257_v42 = vadd.f32 %v13256_v55, %v13255_v11 }
 0x7b6   : > { %v13146_v15 = vpop.f32.mrf.mxu1  ;;  %v13258_v38 = vpop.f32.mrf.mxu0 }
 0x7b7   : > { %10438 = vst [vmem:[%s18596_s9 + $0xe8] sm:$0xff] %v10406_v59  ;;  %v10364_v14 = vadd.f32 %v13257_v42, %v13145_v37 }
 0x7b8   : > { %v13147_v18 = vpop.f32.mrf.mxu1  ;;  %v13259_v31 = vpop.f32.mrf.mxu0 }
 0x7b9   : > { %v10407_v54 = vadd.f32 %v18591_v48, %v10364_v14  ;;  %v13148_v26 = vadd.f32 %v13147_v18, %v13146_v15  ;;  %v13260_v19 = vadd.f32 %v13259_v31, %v13258_v38 }
 0x7bb   : > { %10439 = vst [vmem:[%s18596_s9 + $0xf0] sm:$0xff] %v10407_v54  ;;  %v10367_v32 = vadd.f32 %v13260_v19, %v13148_v26 }
 0x7bd   : > { %v10408_v56 = vadd.f32 %v18591_v48, %v10367_v32 }
 0x7bf   : > { %10440 = vst [vmem:[%s18596_s9 + $0xf8] sm:$0xff] %v10408_v56 }
 0x7c0 PF: > { %s17_s28 = sadd.s32 1, %s14140_s28   ;;  %s19217_s24 = smov %s14132_s26 }
 0x7c1   : > { %p14_p8 = scmp.ge.s32.totalorder %s17_s28, 6   ;;  %s19218_s25 = smov %s14136_s27 }
 0x7c2   : > { %s19219_s26 = smov %s19222_s29  ;;  %s19220_s27 = smov %s19226_s30 }
 0x7c3   :  { %16 = sbr.rel (!%p14_p8) target bundleno = 3 (0x3), region = 110 }

</bundles_post_ra>
